<compile_context>
chip_gen: v6e
topology: v6e:2x2x1
jax: 0.10.0
libtpu: 0.0.40
codegen_flags: <defaults>
</compile_context>

<pallas_src>
import functools

import numpy as np

import jax
import jax.numpy as jnp
from jax.experimental import pallas as pl
from jax.experimental.pallas import tpu as pltpu


# ------------------------------ Pallas kernels ----------------------------- #
def _conv1_kernel(w_ref, b_ref, x_ref, o_ref):
    # o = relu(W @ colT + b), lane-dense output (oc, tile_m)
    y = jnp.dot(w_ref[...], x_ref[...], preferred_element_type=jnp.float32)
    o_ref[...] = jnp.maximum(y + b_ref[...], 0.0).astype(o_ref.dtype)


def _conv1_call(w_flat, b2d, colT, tile_m):
    """relu(W @ colT + b).  w_flat:(oc,K) bf16, b2d:(oc,1) f32, colT:(K,M_pad) bf16."""
    oc, K = w_flat.shape
    m_pad = colT.shape[1]
    assert m_pad % tile_m == 0
    cost = pl.CostEstimate(
        flops=2 * oc * K * m_pad,
        transcendentals=0,
        bytes_accessed=(colT.size * colT.dtype.itemsize
                        + w_flat.size * w_flat.dtype.itemsize
                        + b2d.size * 4 + oc * m_pad * 2),
    )
    return pl.pallas_call(
        _conv1_kernel,
        out_shape=jax.ShapeDtypeStruct((oc, m_pad), jnp.bfloat16),
        grid=(m_pad // tile_m,),
        in_specs=[
            pl.BlockSpec((oc, K), lambda i: (0, 0)),
            pl.BlockSpec((oc, 1), lambda i: (0, 0)),
            pl.BlockSpec((K, tile_m), lambda i: (0, i)),
        ],
        out_specs=pl.BlockSpec((oc, tile_m), lambda i: (0, i)),
        compiler_params=pltpu.CompilerParams(dimension_semantics=("parallel",)),
        cost_estimate=cost,
    )(w_flat, b2d, colT)


def _tail_kernel(y1_ref, pos_ref, d2_ref, b2_ref, d3_ref, b3_ref,
                 d4_ref, b4_ref, w1p_ref, w1d_ref, c1_ref, w2_ref, c2_ref,
                 o_ref):
    """conv2 + conv3 + conv4 + fc1(+ReLU) + fc2, everything resident in VMEM.

    conv2/3/4 are dense matmuls against precomputed im2col-embedded matrices,
    so the only data reorganisation needed is static slicing of the lane-dense
    conv1 output (3, b*sp:(b+1)*sp) per channel / batch.
    """
    f32 = jnp.float32
    B = pos_ref.shape[0]
    nch = y1_ref.shape[0]               # 3
    sp = d2_ref.shape[0] // nch         # conv2 input spatial size per channel

    for b in range(B):                  # B == 2, static unroll; rows stay (1, N)
        # ---- conv2 (dense): y2 = relu(sum_c y1[c, b-block] @ D2[c-block]) ----
        acc = b2_ref[...]                                        # (1, n2) f32
        for c in range(nch):
            xcb = y1_ref[c:c + 1, b * sp:(b + 1) * sp]           # (1, sp) bf16
            acc = acc + jnp.dot(xcb, d2_ref[c * sp:(c + 1) * sp, :],
                                preferred_element_type=f32)
        h2 = jnp.maximum(acc, 0.0).astype(jnp.bfloat16)          # (1, 507)

        # ---- conv3 / conv4 (dense) ----
        h3 = jnp.maximum(jnp.dot(h2, d3_ref[...], preferred_element_type=f32)
                         + b3_ref[...], 0.0).astype(jnp.bfloat16)   # (1, 108)
        h4 = jnp.maximum(jnp.dot(h3, d4_ref[...], preferred_element_type=f32)
                         + b4_ref[...], 0.0).astype(jnp.bfloat16)   # (1, 27)

        # ---- fc1 (split weights avoid an in-kernel lane concat) + fc2 ----
        pos_b = pos_ref[b:b + 1, :].astype(jnp.bfloat16)            # (1, 54)
        g1 = jnp.maximum(
            jnp.dot(pos_b, w1p_ref[...], preferred_element_type=f32)
            + jnp.dot(h4, w1d_ref[...], preferred_element_type=f32)
            + c1_ref[...], 0.0).astype(jnp.bfloat16)                # (1, 81)
        o_ref[b:b + 1, :] = (jnp.dot(g1, w2_ref[...], preferred_element_type=f32)
                             + c2_ref[...])


def _tail_call(y1, pos2d, prep):
    B = pos2d.shape[0]
    d_out = prep["fc2_wT"].shape[1]
    args = (y1, pos2d,
            prep["conv2_d"], prep["conv2_b"],
            prep["conv3_d"], prep["conv3_b"],
            prep["conv4_d"], prep["conv4_b"],
            prep["fc1_wT_pos"], prep["fc1_wT_dc"], prep["fc1_b"],
            prep["fc2_wT"], prep["fc2_b"])
    mat_flops = (prep["conv2_d"].size + prep["conv3_d"].size + prep["conv4_d"].size
                 + prep["fc1_wT_pos"].size + prep["fc1_wT_dc"].size + prep["fc2_wT"].size)
    cost = pl.CostEstimate(
        flops=2 * B * int(mat_flops),
        transcendentals=0,
        bytes_accessed=int(sum(a.size * a.dtype.itemsize for a in args)) + B * d_out * 4,
    )
    return pl.pallas_call(
        _tail_kernel,
        out_shape=jax.ShapeDtypeStruct((B, d_out), jnp.float32),
        grid=(1,),
        in_specs=[pl.BlockSpec(a.shape, lambda i: (0, 0)) for a in args],
        out_specs=pl.BlockSpec((B, d_out), lambda i: (0, 0)),
        cost_estimate=cost,
    )(*args)


# ------------------------------- helpers ------------------------------------ #
def _round_up(x, n):
    return ((x + n - 1) // n) * n


def _pick_conv1_tile_m():
    """Per-generation conv1 M tile: one tile per TensorCore."""
    try:
        kind = jax.devices()[0].device_kind.lower()
    except Exception:
        return None
    if "v7" in kind or "7x" in kind:   # 2 TensorCores -> 2 x 1024 tiles
        return 1024
    return None                        # v5e / v6e: single ~1920-wide block


def _dense_conv_matrix(w, ih, iw, stride):
    """Fold conv (no padding) into a dense matrix D:(ic*ih*iw, oc*oh*ow).

    Row layout (c, h, w), column layout (o, p, q):  x_flat @ D == conv(x)_flat.
    """
    oc, ic, kh, kw = w.shape
    oh = (ih - kh) // stride + 1
    ow = (iw - kw) // stride + 1
    d = np.zeros((ic, ih, iw, oc, oh, ow), np.float32)
    for i in range(kh):
        for j in range(kw):
            for p in range(oh):
                for q in range(ow):
                    d[:, stride * p + i, stride * q + j, :, p, q] = w[:, :, i, j].T
    return d.reshape(ic * ih * iw, oc * oh * ow), oh, ow


# --------------------------- Parameters / prep ------------------------------ #
def init_params(key, kernel_size, kernel_num, dim):
    ks2 = kernel_size ** 2
    d_in = 3 * (kernel_num + 1) * ks2
    d_out = 3 * kernel_num * ks2
    keys = jax.random.split(key, 12)

    def w(k, shape, fan_in):
        return jax.random.normal(k, shape, jnp.float32) * (1.0 / jnp.sqrt(fan_in))

    return {
        "conv1_w": w(keys[0], (3, 16 * dim, 6, 6), 16 * dim * 36),
        "conv1_b": w(keys[1], (3,), 16 * dim * 36),
        "conv2_w": w(keys[2], (3, 3, 6, 6), 3 * 36),
        "conv2_b": w(keys[3], (3,), 3 * 36),
        "conv3_w": w(keys[4], (3, 3, 3, 3), 27),
        "conv3_b": w(keys[5], (3,), 27),
        "conv4_w": w(keys[6], (3, 3, 4, 4), 48),
        "conv4_b": w(keys[7], (3,), 48),
        "fc1_w": w(keys[8], (d_in, d_in), d_in),     # PyTorch Linear layout (out, in)
        "fc1_b": w(keys[9], (d_in,), d_in),
        "fc2_w": w(keys[10], (d_out, d_in), d_in),
        "fc2_b": w(keys[11], (d_out,), d_in),
    }


def prepare_params(params, *, input_hw=64):
    """One-time inference prep.

    conv1 -> (oc, K) bf16 with K ordered (kh, kw, C) to match the im2col layout.
    conv2/3/4 -> dense im2col-embedded bf16 matrices + per-column f32 biases.
    fc1 -> transposed, bf16, row-split into [poskernel rows | down_condition rows].
    """
    prep = {}
    w1 = np.asarray(params["conv1_w"], np.float32)
    prep["conv1_wf"] = jnp.asarray(
        w1.transpose(0, 2, 3, 1).reshape(w1.shape[0], -1), jnp.bfloat16)
    prep["conv1_b"] = jnp.asarray(
        np.asarray(params["conv1_b"], np.float32).reshape(-1, 1))

    hw = (input_hw - 6) // 2 + 1               # conv1 output spatial (30)
    for name, stride in (("conv2", 2), ("conv3", 2), ("conv4", 1)):
        w = np.asarray(params[name + "_w"], np.float32)
        d, oh, _ = _dense_conv_matrix(w, hw, hw, stride)
        prep[name + "_d"] = jnp.asarray(d, jnp.bfloat16)
        b = np.asarray(params[name + "_b"], np.float32)
        prep[name + "_b"] = jnp.asarray(np.repeat(b, oh * oh).reshape(1, -1))
        hw = oh

    n_down = prep["conv4_b"].shape[1]          # 27
    fc1_wT = np.asarray(params["fc1_w"], np.float32).T          # (in, out)
    n_pos = fc1_wT.shape[0] - n_down                            # 54
    prep["fc1_wT_pos"] = jnp.asarray(fc1_wT[:n_pos], jnp.bfloat16)
    prep["fc1_wT_dc"] = jnp.asarray(fc1_wT[n_pos:], jnp.bfloat16)
    prep["fc1_b"] = jnp.asarray(
        np.asarray(params["fc1_b"], np.float32).reshape(1, -1))
    prep["fc2_wT"] = jnp.asarray(
        np.asarray(params["fc2_w"], np.float32).T, jnp.bfloat16)
    prep["fc2_b"] = jnp.asarray(
        np.asarray(params["fc2_b"], np.float32).reshape(1, -1))
    return prep


# -------------------------------- forward ----------------------------------- #
@functools.partial(jax.jit,
                   static_argnames=("kernel_size", "kernel_num", "conv1_tile_m"))
def _forward_impl(prepared, poskernel, condition_map, *,
                  kernel_size, kernel_num, conv1_tile_m):
    B, C, H, W = condition_map.shape
    k, s = 6, 2
    oh = (H - k) // s + 1
    ow = (W - k) // s + 1
    m = B * oh * ow

    tile = conv1_tile_m if conv1_tile_m is not None else _round_up(m, 128)
    m_pad = _round_up(m, tile)

    # conv1 im2col built directly in its final (K, M) bf16 layout:
    #   K = (kh, kw, C),  M = (b, oh, ow)
    xc = condition_map.astype(jnp.bfloat16).transpose(1, 0, 2, 3)   # (C, B, H, W)
    taps = [xc[:, :, i:i + s * (oh - 1) + 1:s, j:j + s * (ow - 1) + 1:s]
            for i in range(k) for j in range(k)]                    # each (C,B,oh,ow)
    colT = jnp.stack(taps, axis=0).reshape(k * k * C, m)
    if m_pad > m:
        colT = jnp.pad(colT, ((0, 0), (0, m_pad - m)))

    y1 = _conv1_call(prepared["conv1_wf"], prepared["conv1_b"], colT, tile)  # (3, m_pad) bf16

    pos2d = poskernel.reshape(B, -1).astype(jnp.float32)            # (B, 54)
    out = _tail_call(y1, pos2d, prepared)                           # (B, 54) f32
    return out.reshape(B, 3 * kernel_num, kernel_size, kernel_size)


def ak_learner_forward(prepared, poskernel, condition_map, *, kernel_size, kernel_num):
    return _forward_impl(prepared, poskernel, condition_map,
                         kernel_size=kernel_size, kernel_num=kernel_num,
                         conv1_tile_m=_pick_conv1_tile_m())


if __name__ == "__main__":
    kernel_size, kernel_num, dim = 3, 2, 1
    B = 2
    key = jax.random.PRNGKey(0)
    kp, k1, k2 = jax.random.split(key, 3)
    params = init_params(kp, kernel_size, kernel_num, dim)
    prepared = prepare_params(params, input_hw=64)

    poskernel = jax.random.normal(
        k1, (B, 3 * kernel_num, kernel_size, kernel_size), jnp.float32)
    # 64x64 condition map -> conv spatial chain 64 -> 30 -> 13 -> 6 -> 3 == kernel_size
    condition_map = jax.random.normal(k2, (B, 16 * dim, 64, 64), jnp.float32)

    out = ak_learner_forward(prepared, poskernel, condition_map,
                             kernel_size=kernel_size, kernel_num=kernel_num)
    out = jax.block_until_ready(out)
    assert out.shape == (B, 3 * kernel_num, kernel_size, kernel_size)
    assert out.dtype == jnp.float32
    print("KERNEL_OK")
</pallas_src>

<mosaic_0001>
module attributes {stable_mosaic.version = 11 : i64} {
  func.func @_conv1_kernel(%arg0: i32, %arg1: memref<3x576xbf16, #tpu.memory_space<vmem>>, %arg2: memref<3x1xf32, #tpu.memory_space<vmem>>, %arg3: memref<576x1920xbf16, #tpu.memory_space<vmem>>, %arg4: memref<3x1920xbf16, #tpu.memory_space<vmem>>) attributes {dimension_semantics = [#tpu.dimension_semantics<parallel>], iteration_bounds = array<i64: 1>, scalar_prefetch = 0 : i64, scratch_operands = 0 : i64, tpu.core_type = #tpu.core_type<tc>, window_params = [{pipeline_mode = #tpu.pipeline_mode<synchronous>, transform_indices = @transform_0, window_bounds = array<i64: 3, 576>}, {pipeline_mode = #tpu.pipeline_mode<synchronous>, transform_indices = @transform_1, window_bounds = array<i64: 3, 1>}, {transform_indices = @transform_2, window_bounds = array<i64: 576, 1920>}, {transform_indices = @transform_3, window_bounds = array<i64: 3, 1920>}]} {
    %c0 = arith.constant 0 : index
    %c0_0 = arith.constant 0 : index
    %0 = vector.load %arg1[%c0, %c0_0] : memref<3x576xbf16, #tpu.memory_space<vmem>>, vector<3x576xbf16>
    %c0_1 = arith.constant 0 : index
    %c0_2 = arith.constant 0 : index
    %1 = vector.load %arg3[%c0_1, %c0_2] : memref<576x1920xbf16, #tpu.memory_space<vmem>>, vector<576x1920xbf16>
    %cst = arith.constant dense<0.000000e+00> : vector<3x1920xf32>
    %2 = tpu.matmul %0, %1, %cst {dimension_numbers = #tpu.dot_dimension_numbers<[1], [0], [0], [1], [0, 0, 1, 1], [], []>} : vector<3x576xbf16>, vector<576x1920xbf16>, vector<3x1920xf32> -> vector<3x1920xf32>
    %c0_3 = arith.constant 0 : index
    %c0_4 = arith.constant 0 : index
    %3 = vector.load %arg2[%c0_3, %c0_4] : memref<3x1xf32, #tpu.memory_space<vmem>>, vector<3x1xf32>
    %4 = vector.broadcast %3 : vector<3x1xf32> to vector<3x1920xf32>
    %5 = arith.addf %2, %4 : vector<3x1920xf32>
    %cst_5 = arith.constant 0.000000e+00 : f32
    %6 = vector.broadcast %cst_5 : f32 to vector<3x1920xf32>
    %7 = arith.maximumf %5, %6 : vector<3x1920xf32>
    %8 = arith.truncf %7 : vector<3x1920xf32> to vector<3x1920xbf16>
    %c0_6 = arith.constant 0 : index
    %c0_7 = arith.constant 0 : index
    %9 = vector.load %arg4[%c0_6, %c0_7] : memref<3x1920xbf16, #tpu.memory_space<vmem>>, vector<3x1920xbf16>
    tpu.vector_store %arg4[%c0_6, %c0_7], %8 {strides = array<i32>} : memref<3x1920xbf16, #tpu.memory_space<vmem>>, vector<3x1920xbf16>,
    return
  }
  func.func @transform_0(%arg0: i32) -> (i32, i32) {
    %c0_i32 = arith.constant 0 : i32
    %c0_i32_0 = arith.constant 0 : i32
    %c0_i32_1 = arith.constant 0 : i32
    return %c0_i32, %c0_i32_0 : i32, i32
  }
  func.func @transform_1(%arg0: i32) -> (i32, i32) {
    %c0_i32 = arith.constant 0 : i32
    %c0_i32_0 = arith.constant 0 : i32
    %c0_i32_1 = arith.constant 0 : i32
    return %c0_i32, %c0_i32_0 : i32, i32
  }
  func.func @transform_2(%arg0: i32) -> (i32, i32) {
    %c0_i32 = arith.constant 0 : i32
    %c0_i32_0 = arith.constant 0 : i32
    return %c0_i32, %arg0 : i32, i32
  }
  func.func @transform_3(%arg0: i32) -> (i32, i32) {
    %c0_i32 = arith.constant 0 : i32
    %c0_i32_0 = arith.constant 0 : i32
    return %c0_i32, %arg0 : i32, i32
  }
}

module attributes {stable_mosaic.version = 11 : i64} {
  func.func @_tail_kernel(%arg0: i32, %arg1: memref<3x1920xbf16, #tpu.memory_space<vmem>>, %arg2: memref<2x54xf32, #tpu.memory_space<vmem>>, %arg3: memref<2700x507xbf16, #tpu.memory_space<vmem>>, %arg4: memref<1x507xf32, #tpu.memory_space<vmem>>, %arg5: memref<507x108xbf16, #tpu.memory_space<vmem>>, %arg6: memref<1x108xf32, #tpu.memory_space<vmem>>, %arg7: memref<108x27xbf16, #tpu.memory_space<vmem>>, %arg8: memref<1x27xf32, #tpu.memory_space<vmem>>, %arg9: memref<54x81xbf16, #tpu.memory_space<vmem>>, %arg10: memref<27x81xbf16, #tpu.memory_space<vmem>>, %arg11: memref<1x81xf32, #tpu.memory_space<vmem>>, %arg12: memref<81x54xbf16, #tpu.memory_space<vmem>>, %arg13: memref<1x54xf32, #tpu.memory_space<vmem>>, %arg14: memref<2x54xf32, #tpu.memory_space<vmem>>) attributes {dimension_semantics = [#tpu.dimension_semantics<arbitrary>], iteration_bounds = array<i64: 1>, scalar_prefetch = 0 : i64, scratch_operands = 0 : i64, tpu.core_type = #tpu.core_type<tc>, window_params = [{pipeline_mode = #tpu.pipeline_mode<synchronous>, transform_indices = @transform_0, window_bounds = array<i64: 3, 1920>}, {pipeline_mode = #tpu.pipeline_mode<synchronous>, transform_indices = @transform_1, window_bounds = array<i64: 2, 54>}, {pipeline_mode = #tpu.pipeline_mode<synchronous>, transform_indices = @transform_2, window_bounds = array<i64: 2700, 507>}, {pipeline_mode = #tpu.pipeline_mode<synchronous>, transform_indices = @transform_3, window_bounds = array<i64: 1, 507>}, {pipeline_mode = #tpu.pipeline_mode<synchronous>, transform_indices = @transform_4, window_bounds = array<i64: 507, 108>}, {pipeline_mode = #tpu.pipeline_mode<synchronous>, transform_indices = @transform_5, window_bounds = array<i64: 1, 108>}, {pipeline_mode = #tpu.pipeline_mode<synchronous>, transform_indices = @transform_6, window_bounds = array<i64: 108, 27>}, {pipeline_mode = #tpu.pipeline_mode<synchronous>, transform_indices = @transform_7, window_bounds = array<i64: 1, 27>}, {pipeline_mode = #tpu.pipeline_mode<synchronous>, transform_indices = @transform_8, window_bounds = array<i64: 54, 81>}, {pipeline_mode = #tpu.pipeline_mode<synchronous>, transform_indices = @transform_9, window_bounds = array<i64: 27, 81>}, {pipeline_mode = #tpu.pipeline_mode<synchronous>, transform_indices = @transform_10, window_bounds = array<i64: 1, 81>}, {pipeline_mode = #tpu.pipeline_mode<synchronous>, transform_indices = @transform_11, window_bounds = array<i64: 81, 54>}, {pipeline_mode = #tpu.pipeline_mode<synchronous>, transform_indices = @transform_12, window_bounds = array<i64: 1, 54>}, {pipeline_mode = #tpu.pipeline_mode<synchronous>, transform_indices = @transform_13, window_bounds = array<i64: 2, 54>}]} {
    %c0 = arith.constant 0 : index
    %c0_0 = arith.constant 0 : index
    %0 = vector.load %arg4[%c0, %c0_0] : memref<1x507xf32, #tpu.memory_space<vmem>>, vector<1x507xf32>
    %c0_1 = arith.constant 0 : index
    %c0_2 = arith.constant 0 : index
    %1 = vector.load %arg1[%c0_1, %c0_2] : memref<3x1920xbf16, #tpu.memory_space<vmem>>, vector<1x900xbf16>
    %c0_3 = arith.constant 0 : index
    %c0_4 = arith.constant 0 : index
    %2 = vector.load %arg3[%c0_3, %c0_4] : memref<2700x507xbf16, #tpu.memory_space<vmem>>, vector<900x507xbf16>
    %cst = arith.constant dense<0.000000e+00> : vector<1x507xf32>
    %3 = tpu.matmul %1, %2, %cst {dimension_numbers = #tpu.dot_dimension_numbers<[1], [0], [0], [1], [0, 0, 1, 1], [], []>} : vector<1x900xbf16>, vector<900x507xbf16>, vector<1x507xf32> -> vector<1x507xf32>
    %4 = arith.addf %0, %3 : vector<1x507xf32>
    %c1 = arith.constant 1 : index
    %c0_5 = arith.constant 0 : index
    %5 = vector.load %arg1[%c1, %c0_5] : memref<3x1920xbf16, #tpu.memory_space<vmem>>, vector<1x900xbf16>
    %c900 = arith.constant 900 : index
    %c0_6 = arith.constant 0 : index
    %6 = vector.load %arg3[%c900, %c0_6] : memref<2700x507xbf16, #tpu.memory_space<vmem>>, vector<900x507xbf16>
    %cst_7 = arith.constant dense<0.000000e+00> : vector<1x507xf32>
    %7 = tpu.matmul %5, %6, %cst_7 {dimension_numbers = #tpu.dot_dimension_numbers<[1], [0], [0], [1], [0, 0, 1, 1], [], []>} : vector<1x900xbf16>, vector<900x507xbf16>, vector<1x507xf32> -> vector<1x507xf32>
    %8 = arith.addf %4, %7 : vector<1x507xf32>
    %c2 = arith.constant 2 : index
    %c0_8 = arith.constant 0 : index
    %9 = vector.load %arg1[%c2, %c0_8] : memref<3x1920xbf16, #tpu.memory_space<vmem>>, vector<1x900xbf16>
    %c1800 = arith.constant 1800 : index
    %c0_9 = arith.constant 0 : index
    %10 = vector.load %arg3[%c1800, %c0_9] : memref<2700x507xbf16, #tpu.memory_space<vmem>>, vector<900x507xbf16>
    %cst_10 = arith.constant dense<0.000000e+00> : vector<1x507xf32>
    %11 = tpu.matmul %9, %10, %cst_10 {dimension_numbers = #tpu.dot_dimension_numbers<[1], [0], [0], [1], [0, 0, 1, 1], [], []>} : vector<1x900xbf16>, vector<900x507xbf16>, vector<1x507xf32> -> vector<1x507xf32>
    %12 = arith.addf %8, %11 : vector<1x507xf32>
    %cst_11 = arith.constant 0.000000e+00 : f32
    %13 = vector.broadcast %cst_11 : f32 to vector<1x507xf32>
    %14 = arith.maximumf %12, %13 : vector<1x507xf32>
    %15 = arith.truncf %14 : vector<1x507xf32> to vector<1x507xbf16>
    %c0_12 = arith.constant 0 : index
    %c0_13 = arith.constant 0 : index
    %16 = vector.load %arg5[%c0_12, %c0_13] : memref<507x108xbf16, #tpu.memory_space<vmem>>, vector<507x108xbf16>
    %cst_14 = arith.constant dense<0.000000e+00> : vector<1x108xf32>
    %17 = tpu.matmul %15, %16, %cst_14 {dimension_numbers = #tpu.dot_dimension_numbers<[1], [0], [0], [1], [0, 0, 1, 1], [], []>} : vector<1x507xbf16>, vector<507x108xbf16>, vector<1x108xf32> -> vector<1x108xf32>
    %c0_15 = arith.constant 0 : index
    %c0_16 = arith.constant 0 : index
    %18 = vector.load %arg6[%c0_15, %c0_16] : memref<1x108xf32, #tpu.memory_space<vmem>>, vector<1x108xf32>
    %19 = arith.addf %17, %18 : vector<1x108xf32>
    %cst_17 = arith.constant 0.000000e+00 : f32
    %20 = vector.broadcast %cst_17 : f32 to vector<1x108xf32>
    %21 = arith.maximumf %19, %20 : vector<1x108xf32>
    %22 = arith.truncf %21 : vector<1x108xf32> to vector<1x108xbf16>
    %c0_18 = arith.constant 0 : index
    %c0_19 = arith.constant 0 : index
    %23 = vector.load %arg7[%c0_18, %c0_19] : memref<108x27xbf16, #tpu.memory_space<vmem>>, vector<108x27xbf16>
    %cst_20 = arith.constant dense<0.000000e+00> : vector<1x27xf32>
    %24 = tpu.matmul %22, %23, %cst_20 {dimension_numbers = #tpu.dot_dimension_numbers<[1], [0], [0], [1], [0, 0, 1, 1], [], []>} : vector<1x108xbf16>, vector<108x27xbf16>, vector<1x27xf32> -> vector<1x27xf32>
    %c0_21 = arith.constant 0 : index
    %c0_22 = arith.constant 0 : index
    %25 = vector.load %arg8[%c0_21, %c0_22] : memref<1x27xf32, #tpu.memory_space<vmem>>, vector<1x27xf32>
    %26 = arith.addf %24, %25 : vector<1x27xf32>
    %cst_23 = arith.constant 0.000000e+00 : f32
    %27 = vector.broadcast %cst_23 : f32 to vector<1x27xf32>
    %28 = arith.maximumf %26, %27 : vector<1x27xf32>
    %29 = arith.truncf %28 : vector<1x27xf32> to vector<1x27xbf16>
    %c0_24 = arith.constant 0 : index
    %c0_25 = arith.constant 0 : index
    %30 = vector.load %arg2[%c0_24, %c0_25] : memref<2x54xf32, #tpu.memory_space<vmem>>, vector<1x54xf32>
    %31 = arith.truncf %30 : vector<1x54xf32> to vector<1x54xbf16>
    %c0_26 = arith.constant 0 : index
    %c0_27 = arith.constant 0 : index
    %32 = vector.load %arg9[%c0_26, %c0_27] : memref<54x81xbf16, #tpu.memory_space<vmem>>, vector<54x81xbf16>
    %cst_28 = arith.constant dense<0.000000e+00> : vector<1x81xf32>
    %33 = tpu.matmul %31, %32, %cst_28 {dimension_numbers = #tpu.dot_dimension_numbers<[1], [0], [0], [1], [0, 0, 1, 1], [], []>} : vector<1x54xbf16>, vector<54x81xbf16>, vector<1x81xf32> -> vector<1x81xf32>
    %c0_29 = arith.constant 0 : index
    %c0_30 = arith.constant 0 : index
    %34 = vector.load %arg10[%c0_29, %c0_30] : memref<27x81xbf16, #tpu.memory_space<vmem>>, vector<27x81xbf16>
    %cst_31 = arith.constant dense<0.000000e+00> : vector<1x81xf32>
    %35 = tpu.matmul %29, %34, %cst_31 {dimension_numbers = #tpu.dot_dimension_numbers<[1], [0], [0], [1], [0, 0, 1, 1], [], []>} : vector<1x27xbf16>, vector<27x81xbf16>, vector<1x81xf32> -> vector<1x81xf32>
    %36 = arith.addf %33, %35 : vector<1x81xf32>
    %c0_32 = arith.constant 0 : index
    %c0_33 = arith.constant 0 : index
    %37 = vector.load %arg11[%c0_32, %c0_33] : memref<1x81xf32, #tpu.memory_space<vmem>>, vector<1x81xf32>
    %38 = arith.addf %36, %37 : vector<1x81xf32>
    %cst_34 = arith.constant 0.000000e+00 : f32
    %39 = vector.broadcast %cst_34 : f32 to vector<1x81xf32>
    %40 = arith.maximumf %38, %39 : vector<1x81xf32>
    %41 = arith.truncf %40 : vector<1x81xf32> to vector<1x81xbf16>
    %c0_35 = arith.constant 0 : index
    %c0_36 = arith.constant 0 : index
    %42 = vector.load %arg12[%c0_35, %c0_36] : memref<81x54xbf16, #tpu.memory_space<vmem>>, vector<81x54xbf16>
    %cst_37 = arith.constant dense<0.000000e+00> : vector<1x54xf32>
    %43 = tpu.matmul %41, %42, %cst_37 {dimension_numbers = #tpu.dot_dimension_numbers<[1], [0], [0], [1], [0, 0, 1, 1], [], []>} : vector<1x81xbf16>, vector<81x54xbf16>, vector<1x54xf32> -> vector<1x54xf32>
    %c0_38 = arith.constant 0 : index
    %c0_39 = arith.constant 0 : index
    %44 = vector.load %arg13[%c0_38, %c0_39] : memref<1x54xf32, #tpu.memory_space<vmem>>, vector<1x54xf32>
    %45 = arith.addf %43, %44 : vector<1x54xf32>
    %c0_40 = arith.constant 0 : index
    %c0_41 = arith.constant 0 : index
    %46 = vector.load %arg14[%c0_40, %c0_41] : memref<2x54xf32, #tpu.memory_space<vmem>>, vector<1x54xf32>
    tpu.vector_store %arg14[%c0_40, %c0_41], %45 {strides = array<i32>} : memref<2x54xf32, #tpu.memory_space<vmem>>, vector<1x54xf32>,
    %c0_42 = arith.constant 0 : index
    %c0_43 = arith.constant 0 : index
    %47 = vector.load %arg4[%c0_42, %c0_43] : memref<1x507xf32, #tpu.memory_space<vmem>>, vector<1x507xf32>
    %c0_44 = arith.constant 0 : index
    %c900_45 = arith.constant 900 : index
    %48 = vector.load %arg1[%c0_44, %c900_45] : memref<3x1920xbf16, #tpu.memory_space<vmem>>, vector<1x900xbf16>
    %c0_46 = arith.constant 0 : index
    %c0_47 = arith.constant 0 : index
    %49 = vector.load %arg3[%c0_46, %c0_47] : memref<2700x507xbf16, #tpu.memory_space<vmem>>, vector<900x507xbf16>
    %cst_48 = arith.constant dense<0.000000e+00> : vector<1x507xf32>
    %50 = tpu.matmul %48, %49, %cst_48 {dimension_numbers = #tpu.dot_dimension_numbers<[1], [0], [0], [1], [0, 0, 1, 1], [], []>} : vector<1x900xbf16>, vector<900x507xbf16>, vector<1x507xf32> -> vector<1x507xf32>
    %51 = arith.addf %47, %50 : vector<1x507xf32>
    %c1_49 = arith.constant 1 : index
    %c900_50 = arith.constant 900 : index
    %52 = vector.load %arg1[%c1_49, %c900_50] : memref<3x1920xbf16, #tpu.memory_space<vmem>>, vector<1x900xbf16>
    %c900_51 = arith.constant 900 : index
    %c0_52 = arith.constant 0 : index
    %53 = vector.load %arg3[%c900_51, %c0_52] : memref<2700x507xbf16, #tpu.memory_space<vmem>>, vector<900x507xbf16>
    %cst_53 = arith.constant dense<0.000000e+00> : vector<1x507xf32>
    %54 = tpu.matmul %52, %53, %cst_53 {dimension_numbers = #tpu.dot_dimension_numbers<[1], [0], [0], [1], [0, 0, 1, 1], [], []>} : vector<1x900xbf16>, vector<900x507xbf16>, vector<1x507xf32> -> vector<1x507xf32>
    %55 = arith.addf %51, %54 : vector<1x507xf32>
    %c2_54 = arith.constant 2 : index
    %c900_55 = arith.constant 900 : index
    %56 = vector.load %arg1[%c2_54, %c900_55] : memref<3x1920xbf16, #tpu.memory_space<vmem>>, vector<1x900xbf16>
    %c1800_56 = arith.constant 1800 : index
    %c0_57 = arith.constant 0 : index
    %57 = vector.load %arg3[%c1800_56, %c0_57] : memref<2700x507xbf16, #tpu.memory_space<vmem>>, vector<900x507xbf16>
    %cst_58 = arith.constant dense<0.000000e+00> : vector<1x507xf32>
    %58 = tpu.matmul %56, %57, %cst_58 {dimension_numbers = #tpu.dot_dimension_numbers<[1], [0], [0], [1], [0, 0, 1, 1], [], []>} : vector<1x900xbf16>, vector<900x507xbf16>, vector<1x507xf32> -> vector<1x507xf32>
    %59 = arith.addf %55, %58 : vector<1x507xf32>
    %cst_59 = arith.constant 0.000000e+00 : f32
    %60 = vector.broadcast %cst_59 : f32 to vector<1x507xf32>
    %61 = arith.maximumf %59, %60 : vector<1x507xf32>
    %62 = arith.truncf %61 : vector<1x507xf32> to vector<1x507xbf16>
    %c0_60 = arith.constant 0 : index
    %c0_61 = arith.constant 0 : index
    %63 = vector.load %arg5[%c0_60, %c0_61] : memref<507x108xbf16, #tpu.memory_space<vmem>>, vector<507x108xbf16>
    %cst_62 = arith.constant dense<0.000000e+00> : vector<1x108xf32>
    %64 = tpu.matmul %62, %63, %cst_62 {dimension_numbers = #tpu.dot_dimension_numbers<[1], [0], [0], [1], [0, 0, 1, 1], [], []>} : vector<1x507xbf16>, vector<507x108xbf16>, vector<1x108xf32> -> vector<1x108xf32>
    %c0_63 = arith.constant 0 : index
    %c0_64 = arith.constant 0 : index
    %65 = vector.load %arg6[%c0_63, %c0_64] : memref<1x108xf32, #tpu.memory_space<vmem>>, vector<1x108xf32>
    %66 = arith.addf %64, %65 : vector<1x108xf32>
    %cst_65 = arith.constant 0.000000e+00 : f32
    %67 = vector.broadcast %cst_65 : f32 to vector<1x108xf32>
    %68 = arith.maximumf %66, %67 : vector<1x108xf32>
    %69 = arith.truncf %68 : vector<1x108xf32> to vector<1x108xbf16>
    %c0_66 = arith.constant 0 : index
    %c0_67 = arith.constant 0 : index
    %70 = vector.load %arg7[%c0_66, %c0_67] : memref<108x27xbf16, #tpu.memory_space<vmem>>, vector<108x27xbf16>
    %cst_68 = arith.constant dense<0.000000e+00> : vector<1x27xf32>
    %71 = tpu.matmul %69, %70, %cst_68 {dimension_numbers = #tpu.dot_dimension_numbers<[1], [0], [0], [1], [0, 0, 1, 1], [], []>} : vector<1x108xbf16>, vector<108x27xbf16>, vector<1x27xf32> -> vector<1x27xf32>
    %c0_69 = arith.constant 0 : index
    %c0_70 = arith.constant 0 : index
    %72 = vector.load %arg8[%c0_69, %c0_70] : memref<1x27xf32, #tpu.memory_space<vmem>>, vector<1x27xf32>
    %73 = arith.addf %71, %72 : vector<1x27xf32>
    %cst_71 = arith.constant 0.000000e+00 : f32
    %74 = vector.broadcast %cst_71 : f32 to vector<1x27xf32>
    %75 = arith.maximumf %73, %74 : vector<1x27xf32>
    %76 = arith.truncf %75 : vector<1x27xf32> to vector<1x27xbf16>
    %c1_72 = arith.constant 1 : index
    %c0_73 = arith.constant 0 : index
    %77 = vector.load %arg2[%c1_72, %c0_73] : memref<2x54xf32, #tpu.memory_space<vmem>>, vector<1x54xf32>
    %78 = arith.truncf %77 : vector<1x54xf32> to vector<1x54xbf16>
    %c0_74 = arith.constant 0 : index
    %c0_75 = arith.constant 0 : index
    %79 = vector.load %arg9[%c0_74, %c0_75] : memref<54x81xbf16, #tpu.memory_space<vmem>>, vector<54x81xbf16>
    %cst_76 = arith.constant dense<0.000000e+00> : vector<1x81xf32>
    %80 = tpu.matmul %78, %79, %cst_76 {dimension_numbers = #tpu.dot_dimension_numbers<[1], [0], [0], [1], [0, 0, 1, 1], [], []>} : vector<1x54xbf16>, vector<54x81xbf16>, vector<1x81xf32> -> vector<1x81xf32>
    %c0_77 = arith.constant 0 : index
    %c0_78 = arith.constant 0 : index
    %81 = vector.load %arg10[%c0_77, %c0_78] : memref<27x81xbf16, #tpu.memory_space<vmem>>, vector<27x81xbf16>
    %cst_79 = arith.constant dense<0.000000e+00> : vector<1x81xf32>
    %82 = tpu.matmul %76, %81, %cst_79 {dimension_numbers = #tpu.dot_dimension_numbers<[1], [0], [0], [1], [0, 0, 1, 1], [], []>} : vector<1x27xbf16>, vector<27x81xbf16>, vector<1x81xf32> -> vector<1x81xf32>
    %83 = arith.addf %80, %82 : vector<1x81xf32>
    %c0_80 = arith.constant 0 : index
    %c0_81 = arith.constant 0 : index
    %84 = vector.load %arg11[%c0_80, %c0_81] : memref<1x81xf32, #tpu.memory_space<vmem>>, vector<1x81xf32>
    %85 = arith.addf %83, %84 : vector<1x81xf32>
    %cst_82 = arith.constant 0.000000e+00 : f32
    %86 = vector.broadcast %cst_82 : f32 to vector<1x81xf32>
    %87 = arith.maximumf %85, %86 : vector<1x81xf32>
    %88 = arith.truncf %87 : vector<1x81xf32> to vector<1x81xbf16>
    %c0_83 = arith.constant 0 : index
    %c0_84 = arith.constant 0 : index
    %89 = vector.load %arg12[%c0_83, %c0_84] : memref<81x54xbf16, #tpu.memory_space<vmem>>, vector<81x54xbf16>
    %cst_85 = arith.constant dense<0.000000e+00> : vector<1x54xf32>
    %90 = tpu.matmul %88, %89, %cst_85 {dimension_numbers = #tpu.dot_dimension_numbers<[1], [0], [0], [1], [0, 0, 1, 1], [], []>} : vector<1x81xbf16>, vector<81x54xbf16>, vector<1x54xf32> -> vector<1x54xf32>
    %c0_86 = arith.constant 0 : index
    %c0_87 = arith.constant 0 : index
    %91 = vector.load %arg13[%c0_86, %c0_87] : memref<1x54xf32, #tpu.memory_space<vmem>>, vector<1x54xf32>
    %92 = arith.addf %90, %91 : vector<1x54xf32>
    %c1_88 = arith.constant 1 : index
    %c0_89 = arith.constant 0 : index
    %93 = vector.load %arg14[%c1_88, %c0_89] : memref<2x54xf32, #tpu.memory_space<vmem>>, vector<1x54xf32>
    tpu.vector_store %arg14[%c1_88, %c0_89], %92 {strides = array<i32>} : memref<2x54xf32, #tpu.memory_space<vmem>>, vector<1x54xf32>,
    return
  }
  func.func @transform_0(%arg0: i32) -> (i32, i32) {
    %c0_i32 = arith.constant 0 : i32
    %c0_i32_0 = arith.constant 0 : i32
    %c0_i32_1 = arith.constant 0 : i32
    return %c0_i32, %c0_i32_0 : i32, i32
  }
  func.func @transform_1(%arg0: i32) -> (i32, i32) {
    %c0_i32 = arith.constant 0 : i32
    %c0_i32_0 = arith.constant 0 : i32
    %c0_i32_1 = arith.constant 0 : i32
    return %c0_i32, %c0_i32_0 : i32, i32
  }
  func.func @transform_2(%arg0: i32) -> (i32, i32) {
    %c0_i32 = arith.constant 0 : i32
    %c0_i32_0 = arith.constant 0 : i32
    %c0_i32_1 = arith.constant 0 : i32
    return %c0_i32, %c0_i32_0 : i32, i32
  }
  func.func @transform_3(%arg0: i32) -> (i32, i32) {
    %c0_i32 = arith.constant 0 : i32
    %c0_i32_0 = arith.constant 0 : i32
    %c0_i32_1 = arith.constant 0 : i32
    return %c0_i32, %c0_i32_0 : i32, i32
  }
  func.func @transform_4(%arg0: i32) -> (i32, i32) {
    %c0_i32 = arith.constant 0 : i32
    %c0_i32_0 = arith.constant 0 : i32
    %c0_i32_1 = arith.constant 0 : i32
    return %c0_i32, %c0_i32_0 : i32, i32
  }
  func.func @transform_5(%arg0: i32) -> (i32, i32) {
    %c0_i32 = arith.constant 0 : i32
    %c0_i32_0 = arith.constant 0 : i32
    %c0_i32_1 = arith.constant 0 : i32
    return %c0_i32, %c0_i32_0 : i32, i32
  }
  func.func @transform_6(%arg0: i32) -> (i32, i32) {
    %c0_i32 = arith.constant 0 : i32
    %c0_i32_0 = arith.constant 0 : i32
    %c0_i32_1 = arith.constant 0 : i32
    return %c0_i32, %c0_i32_0 : i32, i32
  }
  func.func @transform_7(%arg0: i32) -> (i32, i32) {
    %c0_i32 = arith.constant 0 : i32
    %c0_i32_0 = arith.constant 0 : i32
    %c0_i32_1 = arith.constant 0 : i32
    return %c0_i32, %c0_i32_0 : i32, i32
  }
  func.func @transform_8(%arg0: i32) -> (i32, i32) {
    %c0_i32 = arith.constant 0 : i32
    %c0_i32_0 = arith.constant 0 : i32
    %c0_i32_1 = arith.constant 0 : i32
    return %c0_i32, %c0_i32_0 : i32, i32
  }
  func.func @transform_9(%arg0: i32) -> (i32, i32) {
    %c0_i32 = arith.constant 0 : i32
    %c0_i32_0 = arith.constant 0 : i32
    %c0_i32_1 = arith.constant 0 : i32
    return %c0_i32, %c0_i32_0 : i32, i32
  }
  func.func @transform_10(%arg0: i32) -> (i32, i32) {
    %c0_i32 = arith.constant 0 : i32
    %c0_i32_0 = arith.constant 0 : i32
    %c0_i32_1 = arith.constant 0 : i32
    return %c0_i32, %c0_i32_0 : i32, i32
  }
  func.func @transform_11(%arg0: i32) -> (i32, i32) {
    %c0_i32 = arith.constant 0 : i32
    %c0_i32_0 = arith.constant 0 : i32
    %c0_i32_1 = arith.constant 0 : i32
    return %c0_i32, %c0_i32_0 : i32, i32
  }
  func.func @transform_12(%arg0: i32) -> (i32, i32) {
    %c0_i32 = arith.constant 0 : i32
    %c0_i32_0 = arith.constant 0 : i32
    %c0_i32_1 = arith.constant 0 : i32
    return %c0_i32, %c0_i32_0 : i32, i32
  }
  func.func @transform_13(%arg0: i32) -> (i32, i32) {
    %c0_i32 = arith.constant 0 : i32
    %c0_i32_0 = arith.constant 0 : i32
    %c0_i32_1 = arith.constant 0 : i32
    return %c0_i32, %c0_i32_0 : i32, i32
  }
}

</mosaic_0001>

<bundles_post_ra>
// kernel: _forward_impl.2
= control target key start
LH: loop header
LB: loop body
LE: loop exit
PB: predicated region body
PF: predicated region fallthrough
CT: control target
= control target key end

     0   :  { %v5914_v1 = vmov 0   ;;  %v5915_v37 = vmov 1983009808   ;;  %v605_v39 = vlaneseq  ;;  %vm3365_vm0 = vcmask 523264   ;;  %s7746_s2 = inlined_call_operand.vmem [shape: bf16[576,1920], index: 2, kind: input, shape index: {}]   ;;  %s7747_s0 = inlined_call_operand.vmem [shape: bf16[3,576], index: 0, kind: input, shape index: {}]   ;;  %s7748_s1 = inlined_call_operand.vmem [shape: f32[3,1], index: 1, kind: input, shape index: {}]   ;;  %s7749_s3 = inlined_call_operand.vmem [shape: bf16[3,1920], index: 3, kind: output, shape index: {}]  }
   0x1   :  { %v5119_v0 = vld [vmem:[%s7746_s2 + $0x34c] ss:$60 sps:$4 sm:$0xff]   ;;  %5118 = vset.pattern.permute.xlu0 %v5914_v1  ;;  %v5125_v5 = vld [vmem:[%s7746_s2 + $0x2d4] ss:$60 sps:$4 sm:$0xff]   ;;  %v5131_v9 = vld [vmem:[%s7746_s2 + $0x25c] ss:$60 sps:$4 sm:$0xff]   ;;  %v603_v38 = vunpack.c.l.s4 %v5915_v37 }
   0x2   :  { %v5121_v2 = vld [vmem:[%s7746_s2 + $0xacc] ss:$60 sps:$4 sm:$0xff]   ;;  %3369 = vmatprep.subr.bf16.mxu0 %v5119_v0  ;;  %v5127_v6 = vld [vmem:[%s7746_s2 + $0xa54] ss:$60 sps:$4 sm:$0xff]   ;;  %v5133_v10 = vld [vmem:[%s7746_s2 + $0x9dc] ss:$60 sps:$4 sm:$0xff]  }
   0x3   :  { %v5123_v3 = vld [vmem:[%s7746_s2 + $0x348] ss:$60 sps:$4 sm:$0xff]   ;;  %3410 = vmatprep.subr.bf16.mxu1 %v5121_v2  ;;  %v5129_v7 = vld [vmem:[%s7746_s2 + $0x2d0] ss:$60 sps:$4 sm:$0xff]   ;;  %v5135_v11 = vld [vmem:[%s7746_s2 + $0x258] ss:$60 sps:$4 sm:$0xff]   ;;  %v604_v43 = vunpack.c.0.s8 %v603_v38 }
   0x4   :  { %v5124_v4 = vld [vmem:[%s7746_s2 + $0xac8] ss:$60 sps:$4 sm:$0xff]   ;;  %3370 = vmatpush1.bf16.msra.mxu0 %v5123_v3  ;;  %v5130_v8 = vld [vmem:[%s7746_s2 + $0xa50] ss:$60 sps:$4 sm:$0xff]   ;;  %v5136_v12 = vld [vmem:[%s7746_s2 + $0x9d8] ss:$60 sps:$4 sm:$0xff]  }
   0x5   :  { %3411 = vmatpush1.bf16.msra.mxu1 %v5124_v4  ;;  %3371 = vmatprep.subr.bf16.mxu0 %v5125_v5  ;;  %v5137_v13 = vld [vmem:[%s7746_s2 + $0x1e4] ss:$60 sps:$4 sm:$0xff]   ;;  %v5143_v17 = vld [vmem:[%s7746_s2 + $0x16c] ss:$60 sps:$4 sm:$0xff]   ;;  %v5149_v21 = vld [vmem:[%s7746_s2 + $0xf4] ss:$60 sps:$4 sm:$0xff]  }
   0x6   :  { %3412 = vmatprep.subr.bf16.mxu1 %v5127_v6  ;;  %v5139_v14 = vld [vmem:[%s7746_s2 + $0x964] ss:$60 sps:$4 sm:$0xff]   ;;  %v5145_v18 = vld [vmem:[%s7746_s2 + $0x8ec] ss:$60 sps:$4 sm:$0xff]   ;;  %v5151_v22 = vld [vmem:[%s7746_s2 + $0x874] ss:$60 sps:$4 sm:$0xff]  }
   0x7   :  { %v5141_v15 = vld [vmem:[%s7746_s2 + $0x1e0] ss:$60 sps:$4 sm:$0xff]   ;;  %v5147_v19 = vld [vmem:[%s7746_s2 + $0x168] ss:$60 sps:$4 sm:$0xff]   ;;  %v5153_v23 = vld [vmem:[%s7746_s2 + $0xf0] ss:$60 sps:$4 sm:$0xff]  }
   0x8   :  { %3372 = vmatpush1.bf16.msra.mxu0 %v5129_v7  ;;  %v5142_v16 = vld [vmem:[%s7746_s2 + $0x960] ss:$60 sps:$4 sm:$0xff]   ;;  %v5148_v20 = vld [vmem:[%s7746_s2 + $0x8e8] ss:$60 sps:$4 sm:$0xff]   ;;  %v5154_v24 = vld [vmem:[%s7746_s2 + $0x870] ss:$60 sps:$4 sm:$0xff]  }
   0x9   :  { %3413 = vmatpush1.bf16.msra.mxu1 %v5130_v8  ;;  %3373 = vmatprep.subr.bf16.mxu0 %v5131_v9  ;;  %v5155_v25 = vld [vmem:[%s7746_s2 + $0x7c] ss:$60 sps:$4 sm:$0xff]   ;;  %v5161_v29 = vld [vmem:[%s7746_s2 + $0x4] ss:$60 sps:$4 sm:$0xff]   ;;  %v5167_v33 = vld [vmem:[%s7746_s2 + $0x70c] ss:$60 sps:$4 sm:$0xff]  }
   0xa   :  { %3414 = vmatprep.subr.bf16.mxu1 %v5133_v10  ;;  %v5157_v26 = vld [vmem:[%s7746_s2 + $0x7fc] ss:$60 sps:$4 sm:$0xff]   ;;  %v5163_v30 = vld [vmem:[%s7746_s2 + $0x784] ss:$60 sps:$4 sm:$0xff]   ;;  %v5169_v34 = vld [vmem:[%s7746_s2 + $0xe8c] ss:$60 sps:$4 sm:$0xff]  }
   0xb   :  { %v5159_v27 = vld [vmem:[%s7746_s2 + $0x78] ss:$60 sps:$4 sm:$0xff]   ;;  %v5165_v31 = vld [vmem:[%s7746_s2] ss:$60 sps:$4 sm:$0xff]   ;;  %v5171_v35 = vld [vmem:[%s7746_s2 + $0x708] ss:$60 sps:$4 sm:$0xff]  }
   0xc   :  { %3374 = vmatpush1.bf16.msra.mxu0 %v5135_v11  ;;  %v5160_v28 = vld [vmem:[%s7746_s2 + $0x7f8] ss:$60 sps:$4 sm:$0xff]   ;;  %v5166_v32 = vld [vmem:[%s7746_s2 + $0x780] ss:$60 sps:$4 sm:$0xff]   ;;  %v5172_v36 = vld [vmem:[%s7746_s2 + $0xe88] ss:$60 sps:$4 sm:$0xff]  }
   0xd   :  { %3415 = vmatpush1.bf16.msra.mxu1 %v5136_v12  ;;  %3375 = vmatprep.subr.bf16.mxu0 %v5137_v13  ;;  %v5173_v40 = vld [vmem:[%s7746_s2 + $0x694] ss:$60 sps:$4 sm:$0xff]   ;;  %v606_v44 = vshrl.u32 %v605_v39, 7  ;;  %v5179_v46 = vld [vmem:[%s7746_s2 + $0x61c] ss:$60 sps:$4 sm:$0xff]   ;;  %v15_v53 = vld [vmem:[%s7747_s0] sm:$0xff] }
   0xe   :  { %3416 = vmatprep.subr.bf16.mxu1 %v5139_v14  ;;  %v5175_v41 = vld [vmem:[%s7746_s2 + $0xe14] ss:$60 sps:$4 sm:$0xff]   ;;  %v5181_v47 = vld [vmem:[%s7746_s2 + $0xd9c] ss:$60 sps:$4 sm:$0xff]   ;;  %v5185_v51 = vld [vmem:[%s7746_s2 + $0x5a4] ss:$60 sps:$4 sm:$0xff]   ;;  %v601_v56 = vcombine.high %v15_v53, %v15_v53 }
   0xf   :  { %v5177_v42 = vld [vmem:[%s7746_s2 + $0x690] ss:$60 sps:$4 sm:$0xff]   ;;  %v5183_v48 = vld [vmem:[%s7746_s2 + $0x618] ss:$60 sps:$4 sm:$0xff]   ;;  %v6071_v50 = vsub.s32 %v604_v43, %v606_v44  ;;  %v5187_v52 = vld [vmem:[%s7746_s2 + $0xd24] ss:$60 sps:$4 sm:$0xff]  }
  0x10   :  { %3376 = vmatpush1.bf16.msra.mxu0 %v5141_v15  ;;  %v5178_v45 = vld [vmem:[%s7746_s2 + $0xe10] ss:$60 sps:$4 sm:$0xff]   ;;  %v5184_v49 = vld [vmem:[%s7746_s2 + $0xd98] ss:$60 sps:$4 sm:$0xff]   ;;  %v5189_v54 = vld [vmem:[%s7746_s2 + $0x5a0] ss:$60 sps:$4 sm:$0xff]  }
  0x11   :  { %3417 = vmatpush1.bf16.msra.mxu1 %v5142_v16  ;;  %3377 = vmatprep.subr.bf16.mxu0 %v5143_v17  ;;  %v6086_v55 = vrot.slane %v15_v53, %v6071_v50  ;;  %v5190_v57 = vld [vmem:[%s7746_s2 + $0xd20] ss:$60 sps:$4 sm:$0xff]   ;;  %v5191_v58 = vld [vmem:[%s7746_s2 + $0x52c] ss:$60 sps:$4 sm:$0xff]   ;;  %v6102_v61 = vrot.slane %v601_v56, %v6071_v50  ;;  %v5197_v2 = vld [vmem:[%s7746_s2 + $0x4b4] ss:$60 sps:$4 sm:$0xff]  }
  0x12   :  { %3418 = vmatprep.subr.bf16.mxu1 %v5145_v18  ;;  %v5193_v59 = vld [vmem:[%s7746_s2 + $0xcac] ss:$60 sps:$4 sm:$0xff]   ;;  %v5199_v3 = vld [vmem:[%s7746_s2 + $0xc34] ss:$60 sps:$4 sm:$0xff]   ;;  %v5203_v6 = vld [vmem:[%s7746_s2 + $0x43c] ss:$60 sps:$4 sm:$0xff]  }
  0x13   :  { %v6099_v60 = vcombine.high %v6086_v55, %v6086_v55  ;;  %v5195_v62 = vld [vmem:[%s7746_s2 + $0x528] ss:$60 sps:$4 sm:$0xff]   ;;  %v6110_v63 = vcombine.high %v6102_v61, %v6102_v61  ;;  %v5201_v4 = vld [vmem:[%s7746_s2 + $0x4b0] ss:$60 sps:$4 sm:$0xff]   ;;  %v5205_v7 = vld [vmem:[%s7746_s2 + $0xbbc] ss:$60 sps:$4 sm:$0xff]  }
  0x14   :  { %3378 = vmatpush1.bf16.msra.mxu0 %v5147_v19  ;;  %v5196_v0 = vld [vmem:[%s7746_s2 + $0xca8] ss:$60 sps:$4 sm:$0xff]   ;;  %v5202_v5 = vld [vmem:[%s7746_s2 + $0xc30] ss:$60 sps:$4 sm:$0xff]   ;;  %v5207_v8 = vld [vmem:[%s7746_s2 + $0x438] ss:$60 sps:$4 sm:$0xff]  }
  0x15   :  { %3419 = vmatpush1.bf16.msra.mxu1 %v5148_v20  ;;  %3379 = vmatprep.subr.bf16.mxu0 %v5149_v21  ;;  %v5208_v9 = vld [vmem:[%s7746_s2 + $0xbb8] ss:$60 sps:$4 sm:$0xff]   ;;  %v5209_v10 = vld [vmem:[%s7746_s2 + $0x3c4] ss:$60 sps:$4 sm:$0xff]   ;;  %v5218_v14 = vld [vmem:[%s7746_s2 + $0x106c] ss:$60 sps:$4 sm:$0xff]  }
  0x16   :  { %3420 = vmatprep.subr.bf16.mxu1 %v5151_v22  ;;  %3401 = vmatprep.mubr.bf16.mxu0 %v6099_v60  ;;  %v5211_v11 = vld [vmem:[%s7746_s2 + $0xb44] ss:$60 sps:$4 sm:$0xff]   ;;  %v5221_v15 = vld [vmem:[%s7746_s2 + $0x354] ss:$60 sps:$4 sm:$0xff]   ;;  %v5227_v19 = vld [vmem:[%s7746_s2 + $0x2dc] ss:$60 sps:$4 sm:$0xff]  }
  0x17   :  { %3442 = vmatprep.mubr.bf16.mxu1 %v6110_v63  ;;  %v5213_v12 = vld [vmem:[%s7746_s2 + $0x3c0] ss:$60 sps:$4 sm:$0xff]   ;;  %v5216_v16 = vld [vmem:[%s7746_s2 + $0x1068] ss:$60 sps:$4 sm:$0xff]   ;;  %v5219_v17 = vld [vmem:[%s7746_s2 + $0x350] ss:$60 sps:$4 sm:$0xff]  }
  0x18   :  { %3380 = vmatpush1.bf16.msra.mxu0 %v5153_v23  ;;  %v5214_v13 = vld [vmem:[%s7746_s2 + $0xb40] ss:$60 sps:$4 sm:$0xff]   ;;  %v5224_v18 = vld [vmem:[%s7746_s2 + $0xff4] ss:$60 sps:$4 sm:$0xff]   ;;  %v5260_v43 = vld [vmem:[%s7746_s2 + $0xc] ss:$60 sps:$4 sm:$0xff]  }
  0x19   :  { %3421 = vmatpush1.bf16.msra.mxu1 %v5154_v24  ;;  %3381 = vmatprep.subr.bf16.mxu0 %v5155_v25  ;;  %v5222_v20 = vld [vmem:[%s7746_s2 + $0xff0] ss:$60 sps:$4 sm:$0xff]   ;;  %v5225_v21 = vld [vmem:[%s7746_s2 + $0x2d8] ss:$60 sps:$4 sm:$0xff]   ;;  %v5233_v23 = vld [vmem:[%s7746_s2 + $0x264] ss:$60 sps:$4 sm:$0xff]  }
  0x1a   :  { %3422 = vmatprep.subr.bf16.mxu1 %v5157_v26  ;;  %v5230_v22 = vld [vmem:[%s7746_s2 + $0xf7c] ss:$60 sps:$4 sm:$0xff]   ;;  %v5236_v26 = vld [vmem:[%s7746_s2 + $0xf04] ss:$60 sps:$4 sm:$0xff]   ;;  %v5263_v44 = vld [vmem:[%s7746_s2 + $0x96c] ss:$60 sps:$4 sm:$0xff]  }
  0x1b   :  { %v5228_v24 = vld [vmem:[%s7746_s2 + $0xf78] ss:$60 sps:$4 sm:$0xff]   ;;  %v5231_v25 = vld [vmem:[%s7746_s2 + $0x260] ss:$60 sps:$4 sm:$0xff]   ;;  %vm4466_vm1 = vcmask 1041408   ;;  %vm4469_vm2 = vcmask 1043458  }
  0x1c   :  { %3382 = vmatpush1.bf16.msra.mxu0 %v5159_v27  ;;  %v5239_v27 = vld [vmem:[%s7746_s2 + $0x1ec] ss:$60 sps:$4 sm:$0xff]   ;;  %v5246_v37 = vld [vmem:[%s7746_s2 + $0xf8] ss:$60 sps:$4 sm:$0xff]   ;;  %v5254_v39 = vld [vmem:[%s7746_s2 + $0x84] ss:$60 sps:$4 sm:$0xff]  }
  0x1d   :  { %3423 = vmatpush1.bf16.msra.mxu1 %v5160_v28  ;;  %3383 = vmatprep.subr.bf16.mxu0 %v5161_v29  ;;  %v5234_v28 = vld [vmem:[%s7746_s2 + $0xf00] ss:$60 sps:$4 sm:$0xff]   ;;  %v5237_v29 = vld [vmem:[%s7746_s2 + $0x1e8] ss:$60 sps:$4 sm:$0xff]   ;;  %v5249_v38 = vld [vmem:[%s7746_s2 + $0xa58] ss:$60 sps:$4 sm:$0xff]  }
  0x1e   :  { %3424 = vmatprep.subr.bf16.mxu1 %v5163_v30  ;;  %v5242_v30 = vld [vmem:[%s7746_s2 + $0x174] ss:$60 sps:$4 sm:$0xff]   ;;  %v5272_v53 = vld [vmem:[%s7746_s2 + $0x69c] ss:$60 sps:$4 sm:$0xff]   ;;  %vm4467_vm3 = vsmask.f32 1280 }
  0x1f   :  { %v5270_v56 = vld [vmem:[%s7746_s2 + $0x698] ss:$60 sps:$4 sm:$0xff]   ;;  %vm4470_vm4 = vsmask.f32 3328  ;;  %vm7006_vm5 = vmand %vm4466_vm1, %vm4467_vm3  ;;  %vm4473_vm6 = vcmask 1045508   ;;  %vm4477_vm11 = vcmask 1047558  }
  0x20   :  { %3384 = vmatpush1.bf16.msra.mxu0 %v5165_v31  ;;  %v5245_v31 = vld [vmem:[%s7746_s2 + $0xad4] ss:$60 sps:$4 sm:$0xff]   ;;  %vm7014_vm7 = vmand %vm4469_vm2, %vm4470_vm4  ;;  %vm4474_vm8 = vsmask.f32 5376  ;;  %vm4478_vm13 = vsmask.f32 7424 }
  0x21   :  { %3425 = vmatpush1.bf16.msra.mxu1 %v5166_v32  ;;  %3385 = vmatprep.subr.bf16.mxu0 %v5167_v33  ;;  %v6213_v32 = vld.sshfl [vmem:[%s7747_s0 + $0x8] sm:$0x3 pattern:$0x76325410]  ;;  %v5240_v33 = vld [vmem:[%s7746_s2 + $0x170] ss:$60 sps:$4 sm:$0xff]   ;;  %vm4472_vm9 = vmor %vm7014_vm7, %vm7006_vm5 }
  0x22   :  { %3426 = vmatprep.subr.bf16.mxu1 %v5169_v34  ;;  %v5243_v34 = vld [vmem:[%s7746_s2 + $0xad0] ss:$60 sps:$4 sm:$0xff]   ;;  %vm4475_vm10 = vmand %vm4473_vm6, %vm4474_vm8  ;;  %vm5917_vm1 = vmmov 0  }
  0x23   :  { %vm7044_vm12 = vmor %vm4475_vm10, %vm4472_vm9 }
  0x24   :  { %3386 = vmatpush2.bf16.msra.mxu0 %v5171_v35  ;;  %v5248_v35 = vld [vmem:[%s7746_s2 + $0xfc] ss:$60 sps:$4 sm:$0xff]   ;;  %vm7067_vm14 = vmand %vm4477_vm11, %vm4478_vm13 }
  0x25   :  { %3427 = vmatpush2.bf16.msra.mxu1 %v5172_v36  ;;  %3387 = vmatprep.subr.bf16.mxu0 %v5173_v40  ;;  %v5251_v36 = vld [vmem:[%s7746_s2 + $0xa5c] ss:$60 sps:$4 sm:$0xff]   ;;  %v5257_v40 = vld [vmem:[%s7746_s2 + $0x9e4] ss:$60 sps:$4 sm:$0xff]   ;;  %vm7087_vm15 = vmor %vm7067_vm14, %vm7044_vm12 }
  0x26   :  { %3428 = vmatprep.subr.bf16.mxu1 %v5175_v41  ;;  %v5252_v41 = vld [vmem:[%s7746_s2 + $0x80] ss:$60 sps:$4 sm:$0xff]  }
  0x28   :  { %3388 = vmatpush2.bf16.msra.mxu0 %v5177_v42  ;;  %v5255_v42 = vld [vmem:[%s7746_s2 + $0x9e0] ss:$60 sps:$4 sm:$0xff]  }
  0x29   :  { %3429 = vmatpush2.bf16.msra.mxu1 %v5178_v45  ;;  %3389 = vmatprep.subr.bf16.mxu0 %v5179_v46  ;;  %v5258_v45 = vld [vmem:[%s7746_s2 + $0x8] ss:$60 sps:$4 sm:$0xff]   ;;  %v593_v46 = vld [vmem:[%s7748_s1] sm:$0x7] }
  0x2a   :  { %3430 = vmatprep.subr.bf16.mxu1 %v5181_v47  ;;  %v5261_v47 = vld [vmem:[%s7746_s2 + $0x968] ss:$60 sps:$4 sm:$0xff]   ;;  %596 = vperm.xlu0 %5118, %v593_v46   ;;  %v5345_v46 = vld [vmem:[%s7746_s2 + $0xa60] ss:$60 sps:$4 sm:$0xff]  }
  0x2c   :  { %3390 = vmatpush2.bf16.msra.mxu0 %v5183_v48  ;;  %v5266_v48 = vld [vmem:[%s7746_s2 + $0x714] ss:$60 sps:$4 sm:$0xff]  }
  0x2d   :  { %3431 = vmatpush2.bf16.msra.mxu1 %v5184_v49  ;;  %3391 = vmatprep.subr.bf16.mxu0 %v5185_v51  ;;  %v5269_v49 = vld [vmem:[%s7746_s2 + $0x8f4] ss:$60 sps:$4 sm:$0xff]  }
  0x2e   :  { %3432 = vmatprep.subr.bf16.mxu1 %v5187_v52  ;;  %v5264_v51 = vld [vmem:[%s7746_s2 + $0x710] ss:$60 sps:$4 sm:$0xff]  }
  0x2f   :  { %v5267_v52 = vld [vmem:[%s7746_s2 + $0x8f0] ss:$60 sps:$4 sm:$0xff]  }
  0x30   :  { %3392 = vmatpush2.bf16.msra.mxu0 %v5189_v54  ;;  %v5275_v54 = vld [vmem:[%s7746_s2 + $0x87c] ss:$60 sps:$4 sm:$0xff]  }
  0x31   :  { %3433 = vmatpush2.bf16.msra.mxu1 %v5190_v57  ;;  %3393 = vmatprep.subr.bf16.mxu0 %v5191_v58  ;;  %v5273_v57 = vld [vmem:[%s7746_s2 + $0x878] ss:$60 sps:$4 sm:$0xff]   ;;  %v5278_v58 = vld [vmem:[%s7746_s2 + $0x624] ss:$60 sps:$4 sm:$0xff]  }
  0x32   :  { %3434 = vmatprep.subr.bf16.mxu1 %v5193_v59  ;;  %v5281_v59 = vld [vmem:[%s7746_s2 + $0x804] ss:$60 sps:$4 sm:$0xff]  }
  0x34   :  { %3394 = vmatpush2.bf16.msra.mxu0 %v5195_v62  ;;  %v5276_v62 = vld [vmem:[%s7746_s2 + $0x620] ss:$60 sps:$4 sm:$0xff]  }
  0x35   :  { %3435 = vmatpush2.bf16.msra.mxu1 %v5196_v0  ;;  %3395 = vmatprep.subr.bf16.mxu0 %v5197_v2  ;;  %v5279_v0 = vld [vmem:[%s7746_s2 + $0x800] ss:$60 sps:$4 sm:$0xff]   ;;  %v5284_v2 = vld [vmem:[%s7746_s2 + $0x5ac] ss:$60 sps:$4 sm:$0xff]  }
  0x36   :  { %3436 = vmatprep.subr.bf16.mxu1 %v5199_v3  ;;  %v5287_v3 = vld [vmem:[%s7746_s2 + $0x78c] ss:$60 sps:$4 sm:$0xff]  }
  0x38   :  { %3396 = vmatpush2.bf16.msra.mxu0 %v5201_v4  ;;  %v5282_v4 = vld [vmem:[%s7746_s2 + $0x5a8] ss:$60 sps:$4 sm:$0xff]  }
  0x39   :  { %3437 = vmatpush2.bf16.msra.mxu1 %v5202_v5  ;;  %3397 = vmatprep.subr.bf16.mxu0 %v5203_v6  ;;  %v5285_v5 = vld [vmem:[%s7746_s2 + $0x788] ss:$60 sps:$4 sm:$0xff]   ;;  %v5290_v6 = vld [vmem:[%s7746_s2 + $0x534] ss:$60 sps:$4 sm:$0xff]  }
  0x3a   :  { %3438 = vmatprep.subr.bf16.mxu1 %v5205_v7  ;;  %v5293_v7 = vld [vmem:[%s7746_s2 + $0xe94] ss:$60 sps:$4 sm:$0xff]  }
  0x3c   :  { %3398 = vmatpush2.bf16.msra.mxu0 %v5207_v8  ;;  %v5288_v8 = vld [vmem:[%s7746_s2 + $0x530] ss:$60 sps:$4 sm:$0xff]  }
  0x3d   :  { %3439 = vmatpush2.bf16.msra.mxu1 %v5208_v9  ;;  %3399 = vmatprep.subr.bf16.mxu0 %v5209_v10  ;;  %v5291_v9 = vld [vmem:[%s7746_s2 + $0xe90] ss:$60 sps:$4 sm:$0xff]   ;;  %v5296_v10 = vld [vmem:[%s7746_s2 + $0x4bc] ss:$60 sps:$4 sm:$0xff]  }
  0x3e   :  { %3440 = vmatprep.subr.bf16.mxu1 %v5211_v11  ;;  %v5299_v11 = vld [vmem:[%s7746_s2 + $0xe1c] ss:$60 sps:$4 sm:$0xff]  }
  0x40   :  { %3400 = vmatpush2.bf16.msra.mxu0 %v5213_v12  ;;  %v5294_v12 = vld [vmem:[%s7746_s2 + $0x4b8] ss:$60 sps:$4 sm:$0xff]  }
  0x41   :  { %3441 = vmatpush2.bf16.msra.mxu1 %v5214_v13  ;;  %3459 = vmatprep.subr.bf16.mxu0 %v5218_v14  ;;  %v5297_v13 = vld [vmem:[%s7746_s2 + $0xe18] ss:$60 sps:$4 sm:$0xff]   ;;  %v5302_v14 = vld [vmem:[%s7746_s2 + $0x444] ss:$60 sps:$4 sm:$0xff]  }
  0x42   :  { %3492 = vmatprep.subr.bf16.mxu1 %v5221_v15  ;;  %v5305_v15 = vld [vmem:[%s7746_s2 + $0xda4] ss:$60 sps:$4 sm:$0xff]  }
  0x43   :  { %3402 = vmatmul.mubr.bf16.vlgmr.msra.gmra.mxu0 %v6086_v55 }
  0x44   :  { %3443 = vmatmul.mubr.bf16.vlgmr.msra.gmra.mxu1 %v6102_v61  ;;  %3460 = vmatpush1.bf16.msra.mxu0 %v5216_v16  ;;  %v5300_v16 = vld [vmem:[%s7746_s2 + $0x440] ss:$60 sps:$4 sm:$0xff]  }
  0x45   :  { %3493 = vmatpush1.bf16.msra.mxu1 %v5219_v17  ;;  %3461 = vmatprep.subr.bf16.mxu0 %v5224_v18  ;;  %v5303_v17 = vld [vmem:[%s7746_s2 + $0xda0] ss:$60 sps:$4 sm:$0xff]   ;;  %v5308_v18 = vld [vmem:[%s7746_s2 + $0x3cc] ss:$60 sps:$4 sm:$0xff]  }
  0x46   :  { %3494 = vmatprep.subr.bf16.mxu1 %v5227_v19  ;;  %3483 = vmatprep.mubr.bf16.mxu0 %v5914_v1  ;;  %v5311_v19 = vld [vmem:[%s7746_s2 + $0xd2c] ss:$60 sps:$4 sm:$0xff]  }
  0x47   :  { %3524 = vmatprep.mubr.bf16.mxu1 %v6099_v60 }
  0x48   :  { %3462 = vmatpush1.bf16.msra.mxu0 %v5222_v20  ;;  %v5306_v20 = vld [vmem:[%s7746_s2 + $0x3c8] ss:$60 sps:$4 sm:$0xff]  }
  0x49   :  { %3495 = vmatpush1.bf16.msra.mxu1 %v5225_v21  ;;  %3463 = vmatprep.subr.bf16.mxu0 %v5230_v22  ;;  %v5309_v21 = vld [vmem:[%s7746_s2 + $0xd28] ss:$60 sps:$4 sm:$0xff]   ;;  %v5314_v22 = vld [vmem:[%s7746_s2 + $0xcb4] ss:$60 sps:$4 sm:$0xff]  }
  0x4a   :  { %3496 = vmatprep.subr.bf16.mxu1 %v5233_v23  ;;  %v5317_v23 = vld [vmem:[%s7746_s2 + $0x1074] ss:$60 sps:$4 sm:$0xff]  }
  0x4c   :  { %3464 = vmatpush1.bf16.msra.mxu0 %v5228_v24  ;;  %v5312_v24 = vld [vmem:[%s7746_s2 + $0xcb0] ss:$60 sps:$4 sm:$0xff]  }
  0x4d   :  { %3497 = vmatpush1.bf16.msra.mxu1 %v5231_v25  ;;  %3465 = vmatprep.subr.bf16.mxu0 %v5236_v26  ;;  %v5315_v25 = vld [vmem:[%s7746_s2 + $0x1070] ss:$60 sps:$4 sm:$0xff]   ;;  %v5320_v26 = vld [vmem:[%s7746_s2 + $0xc3c] ss:$60 sps:$4 sm:$0xff]  }
  0x4e   :  { %3498 = vmatprep.subr.bf16.mxu1 %v5239_v27  ;;  %v5323_v27 = vld [vmem:[%s7746_s2 + $0xffc] ss:$60 sps:$4 sm:$0xff]  }
  0x50   :  { %3466 = vmatpush1.bf16.msra.mxu0 %v5234_v28  ;;  %v5318_v28 = vld [vmem:[%s7746_s2 + $0xc38] ss:$60 sps:$4 sm:$0xff]  }
  0x51   :  { %3499 = vmatpush1.bf16.msra.mxu1 %v5237_v29  ;;  %3533 = vmatprep.subr.bf16.mxu0 %v5245_v31  ;;  %v5321_v29 = vld [vmem:[%s7746_s2 + $0xff8] ss:$60 sps:$4 sm:$0xff]   ;;  %v5329_v31 = vld [vmem:[%s7746_s2 + $0xf84] ss:$60 sps:$4 sm:$0xff]  }
  0x52   :  { %3500 = vmatprep.subr.bf16.mxu1 %v5242_v30  ;;  %v5326_v30 = vld [vmem:[%s7746_s2 + $0xbc4] ss:$60 sps:$4 sm:$0xff]  }
  0x53   :  { %5038 = vmatmul.mubr.msk.bf16.vlgmr.msra.gmra.mxu0 %vm3365_vm0, %v6213_v32 }
  0x54   :  { %3534 = vmatpush1.bf16.msra.mxu0 %v5243_v34  ;;  %3565 = vmatprep.mubr.bf16.mxu0 %v6110_v63  ;;  %v5327_v34 = vld [vmem:[%s7746_s2 + $0xf80] ss:$60 sps:$4 sm:$0xff]  }
  0x55   :  { %3501 = vmatpush1.bf16.msra.mxu1 %v5240_v33  ;;  %3535 = vmatprep.subr.bf16.mxu0 %v5251_v36  ;;  %v5324_v33 = vld [vmem:[%s7746_s2 + $0xbc0] ss:$60 sps:$4 sm:$0xff]   ;;  %v5335_v36 = vld [vmem:[%s7746_s2 + $0xf0c] ss:$60 sps:$4 sm:$0xff]  }
  0x56   :  { %3502 = vmatprep.subr.bf16.mxu1 %v5248_v35  ;;  %v5332_v35 = vld [vmem:[%s7746_s2 + $0xb4c] ss:$60 sps:$4 sm:$0xff]  }
  0x58   :  { %3536 = vmatpush1.bf16.msra.mxu0 %v5249_v38  ;;  %v5333_v38 = vld [vmem:[%s7746_s2 + $0xf08] ss:$60 sps:$4 sm:$0xff]  }
  0x59   :  { %3503 = vmatpush1.bf16.msra.mxu1 %v5246_v37  ;;  %3537 = vmatprep.subr.bf16.mxu0 %v5257_v40  ;;  %v5330_v37 = vld [vmem:[%s7746_s2 + $0xb48] ss:$60 sps:$4 sm:$0xff]   ;;  %v5341_v40 = vld [vmem:[%s7746_s2 + $0xadc] ss:$60 sps:$4 sm:$0xff]  }
  0x5a   :  { %3504 = vmatprep.subr.bf16.mxu1 %v5254_v39  ;;  %v5338_v39 = vld [vmem:[%s7746_s2 + $0x35c] ss:$60 sps:$4 sm:$0xff]  }
  0x5c   :  { %3538 = vmatpush1.bf16.msra.mxu0 %v5255_v42  ;;  %v5339_v42 = vld [vmem:[%s7746_s2 + $0xad8] ss:$60 sps:$4 sm:$0xff]  }
  0x5d   :  { %3505 = vmatpush1.bf16.msra.mxu1 %v5252_v41  ;;  %3539 = vmatprep.subr.bf16.mxu0 %v5263_v44  ;;  %v5336_v41 = vld [vmem:[%s7746_s2 + $0x358] ss:$60 sps:$4 sm:$0xff]   ;;  %v5347_v44 = vld [vmem:[%s7746_s2 + $0xa64] ss:$60 sps:$4 sm:$0xff]  }
  0x5e   :  { %3506 = vmatprep.subr.bf16.mxu1 %v5260_v43  ;;  %v5344_v43 = vld [vmem:[%s7746_s2 + $0x2e4] ss:$60 sps:$4 sm:$0xff]  }
  0x60   :  { %3540 = vmatpush1.bf16.msra.mxu0 %v5261_v47  ;;  %v5350_v47 = vld [vmem:[%s7746_s2 + $0x26c] ss:$60 sps:$4 sm:$0xff]  }
  0x61   :  { %3507 = vmatpush1.bf16.msra.mxu1 %v5258_v45  ;;  %3541 = vmatprep.subr.bf16.mxu0 %v5269_v49  ;;  %v5342_v45 = vld [vmem:[%s7746_s2 + $0x2e0] ss:$60 sps:$4 sm:$0xff]   ;;  %v5351_v49 = vld [vmem:[%s7746_s2 + $0x9e8] ss:$60 sps:$4 sm:$0xff]  }
  0x62   :  { %3508 = vmatprep.subr.bf16.mxu1 %v5266_v48  ;;  %v5348_v48 = vld [vmem:[%s7746_s2 + $0x268] ss:$60 sps:$4 sm:$0xff]  }
  0x64   :  { %3542 = vmatpush1.bf16.msra.mxu0 %v5267_v52  ;;  %v5359_v52 = vld [vmem:[%s7746_s2 + $0x974] ss:$60 sps:$4 sm:$0xff]  }
  0x65   :  { %3509 = vmatpush2.bf16.msra.mxu1 %v5264_v51  ;;  %3543 = vmatprep.subr.bf16.mxu0 %v5275_v54  ;;  %v5356_v51 = vld [vmem:[%s7746_s2 + $0x1f4] ss:$60 sps:$4 sm:$0xff]  }
  0x66   :  { %3510 = vmatprep.subr.bf16.mxu1 %v5272_v53  ;;  %v5354_v53 = vld [vmem:[%s7746_s2 + $0x1f0] ss:$60 sps:$4 sm:$0xff]  }
  0x67   :  { %v5357_v54 = vld [vmem:[%s7746_s2 + $0x970] ss:$60 sps:$4 sm:$0xff]  }
  0x68   :  { %3544 = vmatpush1.bf16.msra.mxu0 %v5273_v57  ;;  %v5365_v57 = vld [vmem:[%s7746_s2 + $0x8fc] ss:$60 sps:$4 sm:$0xff]  }
  0x69   :  { %3511 = vmatpush2.bf16.msra.mxu1 %v5270_v56  ;;  %3545 = vmatprep.subr.bf16.mxu0 %v5281_v59  ;;  %v5362_v56 = vld [vmem:[%s7746_s2 + $0x17c] ss:$60 sps:$4 sm:$0xff]  }
  0x6a   :  { %3512 = vmatprep.subr.bf16.mxu1 %v5278_v58  ;;  %v5360_v58 = vld [vmem:[%s7746_s2 + $0x178] ss:$60 sps:$4 sm:$0xff]  }
  0x6b   :  { %v5363_v59 = vld [vmem:[%s7746_s2 + $0x8f8] ss:$60 sps:$4 sm:$0xff]  }
  0x6c   :  { %3546 = vmatpush1.bf16.msra.mxu0 %v5279_v0  ;;  %v5371_v0 = vld [vmem:[%s7746_s2 + $0x884] ss:$60 sps:$4 sm:$0xff]  }
  0x6d   :  { %3513 = vmatpush2.bf16.msra.mxu1 %v5276_v62  ;;  %3547 = vmatprep.subr.bf16.mxu0 %v5287_v3  ;;  %v5368_v62 = vld [vmem:[%s7746_s2 + $0x104] ss:$60 sps:$4 sm:$0xff]  }
  0x6e   :  { %3514 = vmatprep.subr.bf16.mxu1 %v5284_v2  ;;  %v5366_v2 = vld [vmem:[%s7746_s2 + $0x100] ss:$60 sps:$4 sm:$0xff]  }
  0x6f   :  { %v5369_v3 = vld [vmem:[%s7746_s2 + $0x880] ss:$60 sps:$4 sm:$0xff]  }
  0x70   :  { %3548 = vmatpush1.bf16.msra.mxu0 %v5285_v5  ;;  %v5377_v5 = vld [vmem:[%s7746_s2 + $0x80c] ss:$60 sps:$4 sm:$0xff]  }
  0x71   :  { %3515 = vmatpush2.bf16.msra.mxu1 %v5282_v4  ;;  %3549 = vmatprep.subr.bf16.mxu0 %v5293_v7  ;;  %v5374_v4 = vld [vmem:[%s7746_s2 + $0x8c] ss:$60 sps:$4 sm:$0xff]  }
  0x72   :  { %3516 = vmatprep.subr.bf16.mxu1 %v5290_v6  ;;  %v5372_v6 = vld [vmem:[%s7746_s2 + $0x88] ss:$60 sps:$4 sm:$0xff]  }
  0x73   :  { %v5375_v7 = vld [vmem:[%s7746_s2 + $0x808] ss:$60 sps:$4 sm:$0xff]  }
  0x74   :  { %3550 = vmatpush2.bf16.msra.mxu0 %v5291_v9  ;;  %v5383_v9 = vld [vmem:[%s7746_s2 + $0x794] ss:$60 sps:$4 sm:$0xff]  }
  0x75   :  { %3517 = vmatpush2.bf16.msra.mxu1 %v5288_v8  ;;  %3551 = vmatprep.subr.bf16.mxu0 %v5299_v11  ;;  %v5380_v8 = vld [vmem:[%s7746_s2 + $0x14] ss:$60 sps:$4 sm:$0xff]  }
  0x76   :  { %3518 = vmatprep.subr.bf16.mxu1 %v5296_v10  ;;  %v5378_v10 = vld [vmem:[%s7746_s2 + $0x10] ss:$60 sps:$4 sm:$0xff]  }
  0x77   :  { %v5381_v11 = vld [vmem:[%s7746_s2 + $0x790] ss:$60 sps:$4 sm:$0xff]  }
  0x78   :  { %3552 = vmatpush2.bf16.msra.mxu0 %v5297_v13  ;;  %v5389_v13 = vld [vmem:[%s7746_s2 + $0xe9c] ss:$60 sps:$4 sm:$0xff]  }
  0x79   :  { %3519 = vmatpush2.bf16.msra.mxu1 %v5294_v12  ;;  %3553 = vmatprep.subr.bf16.mxu0 %v5305_v15  ;;  %v5386_v12 = vld [vmem:[%s7746_s2 + $0x71c] ss:$60 sps:$4 sm:$0xff]  }
  0x7a   :  { %3520 = vmatprep.subr.bf16.mxu1 %v5302_v14  ;;  %v5384_v14 = vld [vmem:[%s7746_s2 + $0x718] ss:$60 sps:$4 sm:$0xff]  }
  0x7b   :  { %v5387_v15 = vld [vmem:[%s7746_s2 + $0xe98] ss:$60 sps:$4 sm:$0xff]  }
  0x7c   :  { %3554 = vmatpush2.bf16.msra.mxu0 %v5303_v17  ;;  %v5395_v17 = vld [vmem:[%s7746_s2 + $0xe24] ss:$60 sps:$4 sm:$0xff]  }
  0x7d   :  { %3521 = vmatpush2.bf16.msra.mxu1 %v5300_v16  ;;  %3555 = vmatprep.subr.bf16.mxu0 %v5311_v19  ;;  %v5392_v16 = vld [vmem:[%s7746_s2 + $0x6a4] ss:$60 sps:$4 sm:$0xff]  }
  0x7e   :  { %3522 = vmatprep.subr.bf16.mxu1 %v5308_v18  ;;  %v5390_v18 = vld [vmem:[%s7746_s2 + $0x6a0] ss:$60 sps:$4 sm:$0xff]  }
  0x7f   :  { %v5393_v19 = vld [vmem:[%s7746_s2 + $0xe20] ss:$60 sps:$4 sm:$0xff]  }
  0x80   :  { %3556 = vmatpush2.bf16.msra.mxu0 %v5309_v21  ;;  %v5401_v21 = vld [vmem:[%s7746_s2 + $0xdac] ss:$60 sps:$4 sm:$0xff]  }
  0x81   :  { %3523 = vmatpush2.bf16.msra.mxu1 %v5306_v20  ;;  %3557 = vmatprep.subr.bf16.mxu0 %v5314_v22  ;;  %v5398_v20 = vld [vmem:[%s7746_s2 + $0x62c] ss:$60 sps:$4 sm:$0xff]  }
  0x82   :  { %3582 = vmatprep.subr.bf16.mxu1 %v5317_v23  ;;  %v5396_v22 = vld [vmem:[%s7746_s2 + $0x628] ss:$60 sps:$4 sm:$0xff]  }
  0x83   :  { %v5399_v23 = vld [vmem:[%s7746_s2 + $0xda8] ss:$60 sps:$4 sm:$0xff]  }
  0x84   :  { %3525 = vmatmul.mubr.bf16.vlgmr.msra.gmra.mxu1 %v6086_v55  ;;  %3558 = vmatpush2.bf16.msra.mxu0 %v5312_v24  ;;  %v5404_v24 = vld [vmem:[%s7746_s2 + $0x5b4] ss:$60 sps:$4 sm:$0xff]  }
  0x85   :  { %3583 = vmatpush1.bf16.msra.mxu1 %v5315_v25  ;;  %3559 = vmatprep.subr.bf16.mxu0 %v5320_v26  ;;  %v5407_v25 = vld [vmem:[%s7746_s2 + $0xd34] ss:$60 sps:$4 sm:$0xff]  }
  0x86   :  { %3584 = vmatprep.subr.bf16.mxu1 %v5323_v27  ;;  %3606 = vmatprep.mubr.bf16.mxu1 %v5914_v1  ;;  %v5402_v26 = vld [vmem:[%s7746_s2 + $0x5b0] ss:$60 sps:$4 sm:$0xff]  }
  0x87   :  { %v5405_v27 = vld [vmem:[%s7746_s2 + $0xd30] ss:$60 sps:$4 sm:$0xff]  }
  0x88   :  { %3560 = vmatpush2.bf16.msra.mxu0 %v5318_v28  ;;  %v5410_v28 = vld [vmem:[%s7746_s2 + $0x53c] ss:$60 sps:$4 sm:$0xff]  }
  0x89   :  { %3585 = vmatpush1.bf16.msra.mxu1 %v5321_v29  ;;  %3561 = vmatprep.subr.bf16.mxu0 %v5326_v30  ;;  %v5413_v29 = vld [vmem:[%s7746_s2 + $0xcbc] ss:$60 sps:$4 sm:$0xff]  }
  0x8a   :  { %3586 = vmatprep.subr.bf16.mxu1 %v5329_v31  ;;  %v5408_v30 = vld [vmem:[%s7746_s2 + $0x538] ss:$60 sps:$4 sm:$0xff]  }
  0x8b   :  { %v5411_v31 = vld [vmem:[%s7746_s2 + $0xcb8] ss:$60 sps:$4 sm:$0xff]  }
  0x8c   :  { %3562 = vmatpush2.bf16.msra.mxu0 %v5324_v33  ;;  %v5416_v33 = vld [vmem:[%s7746_s2 + $0x4c4] ss:$60 sps:$4 sm:$0xff]  }
  0x8d   :  { %3587 = vmatpush1.bf16.msra.mxu1 %v5327_v34  ;;  %3563 = vmatprep.subr.bf16.mxu0 %v5332_v35  ;;  %v5419_v34 = vld [vmem:[%s7746_s2 + $0xc44] ss:$60 sps:$4 sm:$0xff]  }
  0x8e   :  { %3588 = vmatprep.subr.bf16.mxu1 %v5335_v36  ;;  %v5414_v35 = vld [vmem:[%s7746_s2 + $0x4c0] ss:$60 sps:$4 sm:$0xff]  }
  0x8f   :  { %v5417_v36 = vld [vmem:[%s7746_s2 + $0xc40] ss:$60 sps:$4 sm:$0xff]  }
  0x90   :  { %3564 = vmatpush2.bf16.msra.mxu0 %v5330_v37  ;;  %v5422_v37 = vld [vmem:[%s7746_s2 + $0x44c] ss:$60 sps:$4 sm:$0xff]  }
  0x91   :  { %3589 = vmatpush1.bf16.msra.mxu1 %v5333_v38  ;;  %3615 = vmatprep.subr.bf16.mxu0 %v5338_v39  ;;  %v5425_v38 = vld [vmem:[%s7746_s2 + $0xbcc] ss:$60 sps:$4 sm:$0xff]  }
  0x92   :  { %3656 = vmatprep.subr.bf16.mxu1 %v5341_v40  ;;  %v5420_v39 = vld [vmem:[%s7746_s2 + $0x448] ss:$60 sps:$4 sm:$0xff]  }
  0x93   :  { %3566 = vmatmul.mubr.bf16.vlgmr.msra.gmra.mxu0 %v6102_v61  ;;  %v5423_v40 = vld [vmem:[%s7746_s2 + $0xbc8] ss:$60 sps:$4 sm:$0xff]  }
  0x94   :  { %5039 = vmatmul.mubr.msk.bf16.vlgmr.msra.gmra.mxu1 %vm3365_vm0, %v6213_v32  ;;  %3616 = vmatpush1.bf16.msra.mxu0 %v5336_v41  ;;  %v5353_v32 = vld [vmem:[%s7746_s2 + $0x9ec] ss:$60 sps:$4 sm:$0xff]   ;;  %v5428_v41 = vld [vmem:[%s7746_s2 + $0x3d4] ss:$60 sps:$4 sm:$0xff]  }
  0x95   :  { %3657 = vmatpush1.bf16.msra.mxu1 %v5339_v42  ;;  %3617 = vmatprep.subr.bf16.mxu0 %v5344_v43  ;;  %v5431_v42 = vld [vmem:[%s7746_s2 + $0xb54] ss:$60 sps:$4 sm:$0xff]  }
  0x96   :  { %3658 = vmatprep.subr.bf16.mxu1 %v5347_v44  ;;  %3647 = vmatprep.mubr.bf16.mxu0 %v6099_v60  ;;  %v5426_v43 = vld [vmem:[%s7746_s2 + $0x3d0] ss:$60 sps:$4 sm:$0xff]  }
  0x97   :  { %3688 = vmatprep.mubr.bf16.mxu1 %v6110_v63  ;;  %v5429_v44 = vld [vmem:[%s7746_s2 + $0xb50] ss:$60 sps:$4 sm:$0xff]  }
  0x98   :  { %3618 = vmatpush1.bf16.msra.mxu0 %v5342_v45  ;;  %v5434_v45 = vld [vmem:[%s7746_s2 + $0x107c] ss:$60 sps:$4 sm:$0xff]  }
  0x99   :  { %3659 = vmatpush1.bf16.msra.mxu1 %v5345_v46  ;;  %3619 = vmatprep.subr.bf16.mxu0 %v5350_v47  ;;  %v5437_v46 = vld [vmem:[%s7746_s2 + $0x364] ss:$60 sps:$4 sm:$0xff]   ;;  %v5432_v47 = vld [vmem:[%s7746_s2 + $0x1078] ss:$60 sps:$4 sm:$0xff]  }
  0x9a   :  { %3660 = vmatprep.subr.bf16.mxu1 %v5353_v32  ;;  %v5435_v32 = vld [vmem:[%s7746_s2 + $0x360] ss:$60 sps:$4 sm:$0xff]  }
  0x9c   :  { %3620 = vmatpush1.bf16.msra.mxu0 %v5348_v48  ;;  %v5440_v48 = vld [vmem:[%s7746_s2 + $0x1004] ss:$60 sps:$4 sm:$0xff]  }
  0x9d   :  { %3661 = vmatpush1.bf16.msra.mxu1 %v5351_v49  ;;  %3621 = vmatprep.subr.bf16.mxu0 %v5356_v51  ;;  %v5443_v49 = vld [vmem:[%s7746_s2 + $0x2ec] ss:$60 sps:$4 sm:$0xff]   ;;  %v5438_v51 = vld [vmem:[%s7746_s2 + $0x1000] ss:$60 sps:$4 sm:$0xff]  }
  0x9e   :  { %3662 = vmatprep.subr.bf16.mxu1 %v5359_v52  ;;  %v5441_v52 = vld [vmem:[%s7746_s2 + $0x2e8] ss:$60 sps:$4 sm:$0xff]  }
  0xa0   :  { %3622 = vmatpush1.bf16.msra.mxu0 %v5354_v53  ;;  %v5446_v53 = vld [vmem:[%s7746_s2 + $0xf8c] ss:$60 sps:$4 sm:$0xff]  }
  0xa1   :  { %3663 = vmatpush1.bf16.msra.mxu1 %v5357_v54  ;;  %3623 = vmatprep.subr.bf16.mxu0 %v5362_v56  ;;  %v5449_v54 = vld [vmem:[%s7746_s2 + $0x274] ss:$60 sps:$4 sm:$0xff]   ;;  %v5444_v56 = vld [vmem:[%s7746_s2 + $0xf88] ss:$60 sps:$4 sm:$0xff]  }
  0xa2   :  { %3664 = vmatprep.subr.bf16.mxu1 %v5365_v57  ;;  %v5447_v57 = vld [vmem:[%s7746_s2 + $0x270] ss:$60 sps:$4 sm:$0xff]  }
  0xa4   :  { %3624 = vmatpush1.bf16.msra.mxu0 %v5360_v58  ;;  %v5452_v58 = vld [vmem:[%s7746_s2 + $0xf14] ss:$60 sps:$4 sm:$0xff]  }
  0xa5   :  { %3665 = vmatpush1.bf16.msra.mxu1 %v5363_v59  ;;  %3625 = vmatprep.subr.bf16.mxu0 %v5368_v62  ;;  %v5455_v59 = vld [vmem:[%s7746_s2 + $0x1fc] ss:$60 sps:$4 sm:$0xff]   ;;  %v5450_v62 = vld [vmem:[%s7746_s2 + $0xf10] ss:$60 sps:$4 sm:$0xff]  }
  0xa6   :  { %3666 = vmatprep.subr.bf16.mxu1 %v5371_v0  ;;  %v5453_v0 = vld [vmem:[%s7746_s2 + $0x1f8] ss:$60 sps:$4 sm:$0xff]  }
  0xa8   :  { %3626 = vmatpush1.bf16.msra.mxu0 %v5366_v2  ;;  %v5458_v2 = vld [vmem:[%s7746_s2 + $0x184] ss:$60 sps:$4 sm:$0xff]  }
  0xa9   :  { %3667 = vmatpush1.bf16.msra.mxu1 %v5369_v3  ;;  %3627 = vmatprep.subr.bf16.mxu0 %v5374_v4  ;;  %v5461_v3 = vld [vmem:[%s7746_s2 + $0xae4] ss:$60 sps:$4 sm:$0xff]  }
  0xaa   :  { %3668 = vmatprep.subr.bf16.mxu1 %v5377_v5  ;;  %v5456_v4 = vld [vmem:[%s7746_s2 + $0x180] ss:$60 sps:$4 sm:$0xff]  }
  0xab   :  { %v5459_v5 = vld [vmem:[%s7746_s2 + $0xae0] ss:$60 sps:$4 sm:$0xff]  }
  0xac   :  { %3628 = vmatpush1.bf16.msra.mxu0 %v5372_v6  ;;  %v5464_v6 = vld [vmem:[%s7746_s2 + $0x10c] ss:$60 sps:$4 sm:$0xff]  }
  0xad   :  { %3669 = vmatpush1.bf16.msra.mxu1 %v5375_v7  ;;  %3629 = vmatprep.subr.bf16.mxu0 %v5380_v8  ;;  %v5467_v7 = vld [vmem:[%s7746_s2 + $0xa6c] ss:$60 sps:$4 sm:$0xff]  }
  0xae   :  { %3670 = vmatprep.subr.bf16.mxu1 %v5383_v9  ;;  %v6679_v8 = vld.sshfl [vmem:[%s7747_s0 + $0x8] sm:$0x3 pattern:$0x76325410] }
  0xaf   :  { %v5462_v9 = vld [vmem:[%s7746_s2 + $0x108] ss:$60 sps:$4 sm:$0xff]  }
  0xb0   :  { %3630 = vmatpush1.bf16.msra.mxu0 %v5378_v10  ;;  %v5465_v10 = vld [vmem:[%s7746_s2 + $0xa68] ss:$60 sps:$4 sm:$0xff]  }
  0xb1   :  { %3671 = vmatpush1.bf16.msra.mxu1 %v5381_v11  ;;  %3631 = vmatprep.subr.bf16.mxu0 %v5386_v12  ;;  %v5470_v11 = vld [vmem:[%s7746_s2 + $0x94] ss:$60 sps:$4 sm:$0xff]  }
  0xb2   :  { %3672 = vmatprep.subr.bf16.mxu1 %v5389_v13  ;;  %v5473_v12 = vld [vmem:[%s7746_s2 + $0x9f4] ss:$60 sps:$4 sm:$0xff]  }
  0xb3   :  { %v5468_v13 = vld [vmem:[%s7746_s2 + $0x90] ss:$60 sps:$4 sm:$0xff]  }
  0xb4   :  { %3632 = vmatpush2.bf16.msra.mxu0 %v5384_v14  ;;  %v5471_v14 = vld [vmem:[%s7746_s2 + $0x9f0] ss:$60 sps:$4 sm:$0xff]  }
  0xb5   :  { %3673 = vmatpush2.bf16.msra.mxu1 %v5387_v15  ;;  %3633 = vmatprep.subr.bf16.mxu0 %v5392_v16  ;;  %v5476_v15 = vld [vmem:[%s7746_s2 + $0x1c] ss:$60 sps:$4 sm:$0xff]  }
  0xb6   :  { %3674 = vmatprep.subr.bf16.mxu1 %v5395_v17  ;;  %v5479_v16 = vld [vmem:[%s7746_s2 + $0x97c] ss:$60 sps:$4 sm:$0xff]  }
  0xb7   :  { %v5474_v17 = vld [vmem:[%s7746_s2 + $0x18] ss:$60 sps:$4 sm:$0xff]  }
  0xb8   :  { %3634 = vmatpush2.bf16.msra.mxu0 %v5390_v18  ;;  %v5477_v18 = vld [vmem:[%s7746_s2 + $0x978] ss:$60 sps:$4 sm:$0xff]  }
  0xb9   :  { %3675 = vmatpush2.bf16.msra.mxu1 %v5393_v19  ;;  %3635 = vmatprep.subr.bf16.mxu0 %v5398_v20  ;;  %v5482_v19 = vld [vmem:[%s7746_s2 + $0x724] ss:$60 sps:$4 sm:$0xff]  }
  0xba   :  { %3676 = vmatprep.subr.bf16.mxu1 %v5401_v21  ;;  %v5485_v20 = vld [vmem:[%s7746_s2 + $0x904] ss:$60 sps:$4 sm:$0xff]  }
  0xbb   :  { %v5480_v21 = vld [vmem:[%s7746_s2 + $0x720] ss:$60 sps:$4 sm:$0xff]  }
  0xbc   :  { %3636 = vmatpush2.bf16.msra.mxu0 %v5396_v22  ;;  %v5483_v22 = vld [vmem:[%s7746_s2 + $0x900] ss:$60 sps:$4 sm:$0xff]  }
  0xbd   :  { %3677 = vmatpush2.bf16.msra.mxu1 %v5399_v23  ;;  %3637 = vmatprep.subr.bf16.mxu0 %v5404_v24  ;;  %v5488_v23 = vld [vmem:[%s7746_s2 + $0x6ac] ss:$60 sps:$4 sm:$0xff]  }
  0xbe   :  { %3678 = vmatprep.subr.bf16.mxu1 %v5407_v25  ;;  %v5491_v24 = vld [vmem:[%s7746_s2 + $0x88c] ss:$60 sps:$4 sm:$0xff]  }
  0xbf   :  { %v5486_v25 = vld [vmem:[%s7746_s2 + $0x6a8] ss:$60 sps:$4 sm:$0xff]  }
  0xc0   :  { %3638 = vmatpush2.bf16.msra.mxu0 %v5402_v26  ;;  %v5489_v26 = vld [vmem:[%s7746_s2 + $0x888] ss:$60 sps:$4 sm:$0xff]  }
  0xc1   :  { %3679 = vmatpush2.bf16.msra.mxu1 %v5405_v27  ;;  %3639 = vmatprep.subr.bf16.mxu0 %v5410_v28  ;;  %v5494_v27 = vld [vmem:[%s7746_s2 + $0x634] ss:$60 sps:$4 sm:$0xff]  }
  0xc2   :  { %3680 = vmatprep.subr.bf16.mxu1 %v5413_v29  ;;  %v5497_v28 = vld [vmem:[%s7746_s2 + $0x814] ss:$60 sps:$4 sm:$0xff]  }
  0xc3   :  { %v5492_v29 = vld [vmem:[%s7746_s2 + $0x630] ss:$60 sps:$4 sm:$0xff]  }
  0xc4   :  { %3640 = vmatpush2.bf16.msra.mxu0 %v5408_v30  ;;  %v5495_v30 = vld [vmem:[%s7746_s2 + $0x810] ss:$60 sps:$4 sm:$0xff]  }
  0xc5   :  { %3681 = vmatpush2.bf16.msra.mxu1 %v5411_v31  ;;  %3641 = vmatprep.subr.bf16.mxu0 %v5416_v33  ;;  %v5500_v31 = vld [vmem:[%s7746_s2 + $0x5bc] ss:$60 sps:$4 sm:$0xff]  }
  0xc6   :  { %3682 = vmatprep.subr.bf16.mxu1 %v5419_v34  ;;  %v5503_v33 = vld [vmem:[%s7746_s2 + $0x79c] ss:$60 sps:$4 sm:$0xff]  }
  0xc7   :  { %v5498_v34 = vld [vmem:[%s7746_s2 + $0x5b8] ss:$60 sps:$4 sm:$0xff]  }
  0xc8   :  { %3642 = vmatpush2.bf16.msra.mxu0 %v5414_v35  ;;  %v5501_v35 = vld [vmem:[%s7746_s2 + $0x798] ss:$60 sps:$4 sm:$0xff]  }
  0xc9   :  { %3683 = vmatpush2.bf16.msra.mxu1 %v5417_v36  ;;  %3643 = vmatprep.subr.bf16.mxu0 %v5422_v37  ;;  %v5506_v36 = vld [vmem:[%s7746_s2 + $0x544] ss:$60 sps:$4 sm:$0xff]  }
  0xca   :  { %3684 = vmatprep.subr.bf16.mxu1 %v5425_v38  ;;  %v5509_v37 = vld [vmem:[%s7746_s2 + $0xea4] ss:$60 sps:$4 sm:$0xff]  }
  0xcb   :  { %v5504_v38 = vld [vmem:[%s7746_s2 + $0x540] ss:$60 sps:$4 sm:$0xff]  }
  0xcc   :  { %3644 = vmatpush2.bf16.msra.mxu0 %v5420_v39  ;;  %v5507_v39 = vld [vmem:[%s7746_s2 + $0xea0] ss:$60 sps:$4 sm:$0xff]  }
  0xcd   :  { %3685 = vmatpush2.bf16.msra.mxu1 %v5423_v40  ;;  %3645 = vmatprep.subr.bf16.mxu0 %v5428_v41  ;;  %v5512_v40 = vld [vmem:[%s7746_s2 + $0x4cc] ss:$60 sps:$4 sm:$0xff]   ;;  %v6777_v41 = vpop.permute.xlu0 %596 }
  0xce   :  { %3686 = vmatprep.subr.bf16.mxu1 %v5431_v42  ;;  %v5515_v42 = vld [vmem:[%s7746_s2 + $0xe2c] ss:$60 sps:$4 sm:$0xff]  }
  0xd0   :  { %3646 = vmatpush2.bf16.msra.mxu0 %v5426_v43 }
  0xd1   :  { %3687 = vmatpush2.bf16.msra.mxu1 %v5429_v44  ;;  %3705 = vmatprep.subr.bf16.mxu0 %v5434_v45  ;;  %v5510_v45 = vld [vmem:[%s7746_s2 + $0x4c8] ss:$60 sps:$4 sm:$0xff]  }
  0xd2   :  { %3738 = vmatprep.subr.bf16.mxu1 %v5437_v46 }
  0xd3   :  { %3648 = vmatmul.mubr.bf16.vlgmr.msra.gmra.mxu0 %v6086_v55 }
  0xd4   :  { %3689 = vmatmul.mubr.bf16.vlgmr.msra.gmra.mxu1 %v6102_v61  ;;  %3706 = vmatpush1.bf16.msra.mxu0 %v5432_v47  ;;  %v5513_v47 = vld [vmem:[%s7746_s2 + $0xe28] ss:$60 sps:$4 sm:$0xff]  }
  0xd5   :  { %3739 = vmatpush1.bf16.msra.mxu1 %v5435_v32  ;;  %3707 = vmatprep.subr.bf16.mxu0 %v5440_v48  ;;  %v5518_v32 = vld [vmem:[%s7746_s2 + $0x454] ss:$60 sps:$4 sm:$0xff]  }
  0xd6   :  { %3740 = vmatprep.subr.bf16.mxu1 %v5443_v49  ;;  %3729 = vmatprep.mubr.bf16.mxu0 %v5914_v1 }
  0xd7   :  { %3770 = vmatprep.mubr.bf16.mxu1 %v6099_v60 }
  0xd8   :  { %3708 = vmatpush1.bf16.msra.mxu0 %v5438_v51  ;;  %v5521_v51 = vld [vmem:[%s7746_s2 + $0xdb4] ss:$60 sps:$4 sm:$0xff]  }
  0xd9   :  { %3741 = vmatpush1.bf16.msra.mxu1 %v5441_v52  ;;  %3709 = vmatprep.subr.bf16.mxu0 %v5446_v53 }
  0xda   :  { %3742 = vmatprep.subr.bf16.mxu1 %v5449_v54 }
  0xdc   :  { %3710 = vmatpush1.bf16.msra.mxu0 %v5444_v56 }
  0xdd   :  { %3743 = vmatpush1.bf16.msra.mxu1 %v5447_v57  ;;  %3711 = vmatprep.subr.bf16.mxu0 %v5452_v58  ;;  %v5516_v57 = vld [vmem:[%s7746_s2 + $0x450] ss:$60 sps:$4 sm:$0xff]  }
  0xde   :  { %3744 = vmatprep.subr.bf16.mxu1 %v5455_v59  ;;  %v5519_v59 = vld [vmem:[%s7746_s2 + $0xdb0] ss:$60 sps:$4 sm:$0xff]  }
  0xe0   :  { %3712 = vmatpush1.bf16.msra.mxu0 %v5450_v62  ;;  %v5524_v62 = vld [vmem:[%s7746_s2 + $0x3dc] ss:$60 sps:$4 sm:$0xff]  }
  0xe1   :  { %3745 = vmatpush1.bf16.msra.mxu1 %v5453_v0  ;;  %3779 = vmatprep.subr.bf16.mxu0 %v5461_v3  ;;  %v5527_v3 = vld [vmem:[%s7746_s2 + $0xd3c] ss:$60 sps:$4 sm:$0xff]  }
  0xe2   :  { %3746 = vmatprep.subr.bf16.mxu1 %v5458_v2 }
  0xe3   :  { %5040 = vmatmul.mubr.msk.bf16.vlgmr.msra.gmra.mxu0 %vm3365_vm0, %v6679_v8 }
  0xe4   :  { %3780 = vmatpush1.bf16.msra.mxu0 %v5459_v5  ;;  %3811 = vmatprep.mubr.bf16.mxu0 %v6110_v63  ;;  %v5525_v5 = vld [vmem:[%s7746_s2 + $0xd38] ss:$60 sps:$4 sm:$0xff]  }
  0xe5   :  { %3747 = vmatpush1.bf16.msra.mxu1 %v5456_v4  ;;  %3781 = vmatprep.subr.bf16.mxu0 %v5467_v7  ;;  %v5522_v4 = vld [vmem:[%s7746_s2 + $0x3d8] ss:$60 sps:$4 sm:$0xff]   ;;  %v5533_v7 = vld [vmem:[%s7746_s2 + $0x1084] ss:$60 sps:$4 sm:$0xff]  }
  0xe6   :  { %3748 = vmatprep.subr.bf16.mxu1 %v5464_v6  ;;  %v5530_v6 = vld [vmem:[%s7746_s2 + $0xcc4] ss:$60 sps:$4 sm:$0xff]  }
  0xe8   :  { %3782 = vmatpush1.bf16.msra.mxu0 %v5465_v10  ;;  %v5531_v10 = vld [vmem:[%s7746_s2 + $0x1080] ss:$60 sps:$4 sm:$0xff]  }
  0xe9   :  { %3749 = vmatpush1.bf16.msra.mxu1 %v5462_v9  ;;  %3783 = vmatprep.subr.bf16.mxu0 %v5473_v12  ;;  %v5528_v9 = vld [vmem:[%s7746_s2 + $0xcc0] ss:$60 sps:$4 sm:$0xff]   ;;  %v5539_v12 = vld [vmem:[%s7746_s2 + $0x100c] ss:$60 sps:$4 sm:$0xff]  }
  0xea   :  { %3750 = vmatprep.subr.bf16.mxu1 %v5470_v11  ;;  %v5536_v11 = vld [vmem:[%s7746_s2 + $0xc4c] ss:$60 sps:$4 sm:$0xff]  }
  0xec   :  { %3784 = vmatpush1.bf16.msra.mxu0 %v5471_v14  ;;  %v5537_v14 = vld [vmem:[%s7746_s2 + $0x1008] ss:$60 sps:$4 sm:$0xff]  }
  0xed   :  { %3751 = vmatpush1.bf16.msra.mxu1 %v5468_v13  ;;  %3785 = vmatprep.subr.bf16.mxu0 %v5479_v16  ;;  %v5534_v13 = vld [vmem:[%s7746_s2 + $0xc48] ss:$60 sps:$4 sm:$0xff]  }
  0xee   :  { %3752 = vmatprep.subr.bf16.mxu1 %v5476_v15 }
  0xf0   :  { %3786 = vmatpush1.bf16.msra.mxu0 %v5477_v18  ;;  %v5542_v18 = vld [vmem:[%s7746_s2 + $0xbd4] ss:$60 sps:$4 sm:$0xff]  }
  0xf1   :  { %3753 = vmatpush1.bf16.msra.mxu1 %v5474_v17  ;;  %3787 = vmatprep.subr.bf16.mxu0 %v5485_v20 }
  0xf2   :  { %3754 = vmatprep.subr.bf16.mxu1 %v5482_v19  ;;  %v5545_v19 = vld [vmem:[%s7746_s2 + $0xf94] ss:$60 sps:$4 sm:$0xff]  }
  0xf4   :  { %3788 = vmatpush1.bf16.msra.mxu0 %v5483_v22  ;;  %v5543_v22 = vld [vmem:[%s7746_s2 + $0xf90] ss:$60 sps:$4 sm:$0xff]  }
  0xf5   :  { %3755 = vmatpush2.bf16.msra.mxu1 %v5480_v21  ;;  %3789 = vmatprep.subr.bf16.mxu0 %v5491_v24  ;;  %v5540_v21 = vld [vmem:[%s7746_s2 + $0xbd0] ss:$60 sps:$4 sm:$0xff]  }
  0xf6   :  { %3756 = vmatprep.subr.bf16.mxu1 %v5488_v23 }
  0xf8   :  { %3790 = vmatpush1.bf16.msra.mxu0 %v5489_v26 }
  0xf9   :  { %3757 = vmatpush2.bf16.msra.mxu1 %v5486_v25  ;;  %3791 = vmatprep.subr.bf16.mxu0 %v5497_v28  ;;  %v5551_v28 = vld [vmem:[%s7746_s2 + $0xf1c] ss:$60 sps:$4 sm:$0xff]  }
  0xfa   :  { %3758 = vmatprep.subr.bf16.mxu1 %v5494_v27  ;;  %v5548_v27 = vld [vmem:[%s7746_s2 + $0xb5c] ss:$60 sps:$4 sm:$0xff]  }
  0xfc   :  { %3792 = vmatpush1.bf16.msra.mxu0 %v5495_v30  ;;  %v5546_v30 = vld [vmem:[%s7746_s2 + $0xb58] ss:$60 sps:$4 sm:$0xff]  }
  0xfd   :  { %3759 = vmatpush2.bf16.msra.mxu1 %v5492_v29  ;;  %3793 = vmatprep.subr.bf16.mxu0 %v5503_v33  ;;  %v5554_v33 = vld [vmem:[%s7746_s2 + $0x36c] ss:$60 sps:$4 sm:$0xff]  }
  0xfe   :  { %3760 = vmatprep.subr.bf16.mxu1 %v5500_v31  ;;  %v5549_v31 = vld [vmem:[%s7746_s2 + $0xf18] ss:$60 sps:$4 sm:$0xff]  }
 0x100   :  { %3794 = vmatpush1.bf16.msra.mxu0 %v5501_v35  ;;  %v5552_v35 = vld [vmem:[%s7746_s2 + $0x368] ss:$60 sps:$4 sm:$0xff]  }
 0x101   :  { %3761 = vmatpush2.bf16.msra.mxu1 %v5498_v34  ;;  %3795 = vmatprep.subr.bf16.mxu0 %v5509_v37  ;;  %v5557_v34 = vld [vmem:[%s7746_s2 + $0xaec] ss:$60 sps:$4 sm:$0xff]   ;;  %v5560_v37 = vld [vmem:[%s7746_s2 + $0x2f4] ss:$60 sps:$4 sm:$0xff]  }
 0x102   :  { %3762 = vmatprep.subr.bf16.mxu1 %v5506_v36  ;;  %v5555_v36 = vld [vmem:[%s7746_s2 + $0xae8] ss:$60 sps:$4 sm:$0xff]  }
 0x103   :  { %v3403_v43 = vpop.f32.mrf.mxu0 }
 0x104   :  { %v3444_v44 = vpop.f32.mrf.mxu1  ;;  %v3404_v46 = vadd.f32 %v3403_v43, %v6777_v41  ;;  %3796 = vmatpush2.bf16.msra.mxu0 %v5507_v39  ;;  %v5558_v39 = vld [vmem:[%s7746_s2 + $0x2f0] ss:$60 sps:$4 sm:$0xff]   ;;  %v5569_v43 = vld [vmem:[%s7746_s2 + $0x9fc] ss:$60 sps:$4 sm:$0xff]  }
 0x105   :  { %3763 = vmatpush2.bf16.msra.mxu1 %v5504_v38  ;;  %v3405_v48 = vpop.f32.mrf.mxu0  ;;  %3797 = vmatprep.subr.bf16.mxu0 %v5515_v42  ;;  %v5563_v38 = vld [vmem:[%s7746_s2 + $0xa74] ss:$60 sps:$4 sm:$0xff]   ;;  %v5566_v42 = vld [vmem:[%s7746_s2 + $0x27c] ss:$60 sps:$4 sm:$0xff]  }
 0x106   :  { %v3446_v49 = vpop.f32.mrf.mxu1  ;;  %3764 = vmatprep.subr.bf16.mxu1 %v5512_v40  ;;  %v3445_v52 = vadd.f32 %v3444_v44, %v3404_v46  ;;  %v3406_v53 = vadd.f32 %v3405_v48, %v6777_v41  ;;  %v5561_v40 = vld [vmem:[%s7746_s2 + $0xa70] ss:$60 sps:$4 sm:$0xff]   ;;  %v5564_v44 = vld [vmem:[%s7746_s2 + $0x278] ss:$60 sps:$4 sm:$0xff]   ;;  %v5575_v46 = vld [vmem:[%s7746_s2 + $0x984] ss:$60 sps:$4 sm:$0xff]  }
 0x107   :  { %v3407_v54 = vpop.f32.mrf.mxu0  ;;  %v5578_v48 = vld [vmem:[%s7746_s2 + $0x18c] ss:$60 sps:$4 sm:$0xff]  }
 0x108   :  { %v3448_v56 = vpop.f32.mrf.mxu1  ;;  %v3447_v58 = vadd.f32 %v3446_v49, %v3406_v53  ;;  %3798 = vmatpush2.bf16.msra.mxu0 %v5513_v47  ;;  %v5570_v47 = vld [vmem:[%s7746_s2 + $0x200] ss:$60 sps:$4 sm:$0xff]   ;;  %v5581_v49 = vld [vmem:[%s7746_s2 + $0x90c] ss:$60 sps:$4 sm:$0xff]   ;;  %v5584_v53 = vld [vmem:[%s7746_s2 + $0x114] ss:$60 sps:$4 sm:$0xff]  }
 0x109   :  { %3765 = vmatpush2.bf16.msra.mxu1 %v5510_v45  ;;  %v3408_v0 = vpop.f32.mrf.mxu0  ;;  %3799 = vmatprep.subr.bf16.mxu0 %v5521_v51  ;;  %v5572_v45 = vld [vmem:[%s7746_s2 + $0x204] ss:$60 sps:$4 sm:$0xff]   ;;  %v5587_v54 = vld [vmem:[%s7746_s2 + $0x894] ss:$60 sps:$4 sm:$0xff]  }
 0x10a   :  { %v3449_v2 = vpop.f32.mrf.mxu1  ;;  %3766 = vmatprep.subr.bf16.mxu1 %v5518_v32  ;;  %v5573_v32 = vld [vmem:[%s7746_s2 + $0x980] ss:$60 sps:$4 sm:$0xff]   ;;  %v5576_v51 = vld [vmem:[%s7746_s2 + $0x188] ss:$60 sps:$4 sm:$0xff]   ;;  %v5582_v56 = vld [vmem:[%s7746_s2 + $0x110] ss:$60 sps:$4 sm:$0xff]  }
 0x10b   :  { %v5591_v0 = vld [vmem:[%s7746_s2 + $0x818] ss:$60 sps:$4 sm:$0xff]   ;;  %v5596_v2 = vld [vmem:[%s7746_s2 + $0x24] ss:$60 sps:$4 sm:$0xff]  }
 0x10c   :  { %3800 = vmatpush2.bf16.msra.mxu0 %v5519_v59  ;;  %v5593_v59 = vld [vmem:[%s7746_s2 + $0x81c] ss:$60 sps:$4 sm:$0xff]  }
 0x10d   :  { %3767 = vmatpush2.bf16.msra.mxu1 %v5516_v57  ;;  %3801 = vmatprep.subr.bf16.mxu0 %v5527_v3  ;;  %v5585_v57 = vld [vmem:[%s7746_s2 + $0x890] ss:$60 sps:$4 sm:$0xff]   ;;  %v5599_v3 = vld [vmem:[%s7746_s2 + $0x7a4] ss:$60 sps:$4 sm:$0xff]  }
 0x10e   :  { %3768 = vmatprep.subr.bf16.mxu1 %v5524_v62  ;;  %v5588_v62 = vld [vmem:[%s7746_s2 + $0x98] ss:$60 sps:$4 sm:$0xff]  }
 0x110   :  { %3802 = vmatpush2.bf16.msra.mxu0 %v5525_v5  ;;  %v5597_v5 = vld [vmem:[%s7746_s2 + $0x7a0] ss:$60 sps:$4 sm:$0xff]  }
 0x111   :  { %3769 = vmatpush2.bf16.msra.mxu1 %v5522_v4  ;;  %3803 = vmatprep.subr.bf16.mxu0 %v5530_v6  ;;  %v5594_v4 = vld [vmem:[%s7746_s2 + $0x20] ss:$60 sps:$4 sm:$0xff]   ;;  %v5602_v6 = vld [vmem:[%s7746_s2 + $0x72c] ss:$60 sps:$4 sm:$0xff]  }
 0x112   :  { %3828 = vmatprep.subr.bf16.mxu1 %v5533_v7  ;;  %v5605_v7 = vld [vmem:[%s7746_s2 + $0xeac] ss:$60 sps:$4 sm:$0xff]  }
 0x113   :  { %v3485_v15 = vpop.f32.mrf.mxu0 }
 0x114   :  { %3771 = vmatmul.mubr.bf16.vlgmr.msra.gmra.mxu1 %v6086_v55  ;;  %v3486_v16 = vadd.f32 %v3485_v15, %v3445_v52  ;;  %3804 = vmatpush2.bf16.msra.mxu0 %v5528_v9  ;;  %v5579_v52 = vld [vmem:[%s7746_s2 + $0x908] ss:$60 sps:$4 sm:$0xff]  }
 0x115   :  { %3829 = vmatpush1.bf16.msra.mxu1 %v5531_v10  ;;  %v3487_v17 = vpop.f32.mrf.mxu0  ;;  %3805 = vmatprep.subr.bf16.mxu0 %v5536_v11  ;;  %v5600_v9 = vld [vmem:[%s7746_s2 + $0x728] ss:$60 sps:$4 sm:$0xff]   ;;  %v5608_v11 = vld [vmem:[%s7746_s2 + $0x6b4] ss:$60 sps:$4 sm:$0xff]  }
 0x116   :  { %3830 = vmatprep.subr.bf16.mxu1 %v5539_v12  ;;  %v3488_v20 = vadd.f32 %v3487_v17, %v3447_v58  ;;  %3852 = vmatprep.mubr.bf16.mxu1 %v5914_v1  ;;  %v4350_v24 = vmax.f32 %v3486_v16, 0.0  ;;  %v5590_v58 = vld [vmem:[%s7746_s2 + $0x9c] ss:$60 sps:$4 sm:$0xff]   ;;  %v5603_v10 = vld [vmem:[%s7746_s2 + $0xea8] ss:$60 sps:$4 sm:$0xff]  }
 0x117   :  { %v3489_v23 = vpop.f32.mrf.mxu0  ;;  %v5611_v12 = vld [vmem:[%s7746_s2 + $0xe34] ss:$60 sps:$4 sm:$0xff]   ;;  %v5614_v16 = vld [vmem:[%s7746_s2 + $0x63c] ss:$60 sps:$4 sm:$0xff]  }
 0x118   :  { %v4351_v25 = vmax.f32 %v3488_v20, 0.0  ;;  %3806 = vmatpush2.bf16.msra.mxu0 %v5534_v13  ;;  %v5606_v13 = vld [vmem:[%s7746_s2 + $0x6b0] ss:$60 sps:$4 sm:$0xff]   ;;  %v5617_v17 = vld [vmem:[%s7746_s2 + $0xdbc] ss:$60 sps:$4 sm:$0xff]  }
 0x119   :  { %3831 = vmatpush1.bf16.msra.mxu1 %v5537_v14  ;;  %v3490_v26 = vpop.f32.mrf.mxu0  ;;  %3807 = vmatprep.subr.bf16.mxu0 %v5542_v18  ;;  %v5609_v14 = vld [vmem:[%s7746_s2 + $0xe30] ss:$60 sps:$4 sm:$0xff]   ;;  %v5615_v20 = vld [vmem:[%s7746_s2 + $0xdb8] ss:$60 sps:$4 sm:$0xff]  }
 0x11a   :  { %3832 = vmatprep.subr.bf16.mxu1 %v5545_v19  ;;  %v6858_v29 = vpack.c.bf16 %v4351_v25, %v4350_v24  ;;  %v5612_v19 = vld [vmem:[%s7746_s2 + $0x638] ss:$60 sps:$4 sm:$0xff]   ;;  %v5623_v25 = vld [vmem:[%s7746_s2 + $0xd44] ss:$60 sps:$4 sm:$0xff]   ;;  %v5671_v26 = vld [vmem:[%s7746_s2 + $0x20c] ss:$60 sps:$4 sm:$0xff]  }
 0x11b   :  { %v5660_v23 = vld [vmem:[%s7746_s2 + $0xf98] ss:$60 sps:$4 sm:$0xff]  }
 0x11c   :  { %3808 = vmatpush2.bf16.msra.mxu0 %v5540_v21 }
 0x11d   :  { %3833 = vmatpush1.bf16.msra.mxu1 %v5543_v22  ;;  %3809 = vmatprep.subr.bf16.mxu0 %v5548_v27  ;;  %v5620_v22 = vld [vmem:[%s7746_s2 + $0x5c4] ss:$60 sps:$4 sm:$0xff]  }
 0x11e   :  { %3834 = vmatprep.subr.bf16.mxu1 %v5551_v28  ;;  %v5618_v27 = vld [vmem:[%s7746_s2 + $0x5c0] ss:$60 sps:$4 sm:$0xff]  }
 0x11f   :  { %v5621_v28 = vld [vmem:[%s7746_s2 + $0xd40] ss:$60 sps:$4 sm:$0xff]  }
 0x120   :  { %3810 = vmatpush2.bf16.msra.mxu0 %v5546_v30  ;;  %v5626_v30 = vld [vmem:[%s7746_s2 + $0x54c] ss:$60 sps:$4 sm:$0xff]  }
 0x121   :  { %3835 = vmatpush1.bf16.msra.mxu1 %v5549_v31  ;;  %3861 = vmatprep.subr.bf16.mxu0 %v5554_v33  ;;  %v5629_v31 = vld [vmem:[%s7746_s2 + $0xccc] ss:$60 sps:$4 sm:$0xff]  }
 0x122   :  { %3902 = vmatprep.subr.bf16.mxu1 %v5557_v34  ;;  %v5624_v33 = vld [vmem:[%s7746_s2 + $0x548] ss:$60 sps:$4 sm:$0xff]  }
 0x123   :  { %3812 = vmatmul.mubr.bf16.vlgmr.msra.gmra.mxu0 %v6102_v61  ;;  %v5627_v34 = vld [vmem:[%s7746_s2 + $0xcc8] ss:$60 sps:$4 sm:$0xff]  }
 0x124   :  { %5041 = vmatmul.mubr.msk.bf16.vlgmr.msra.gmra.mxu1 %vm3365_vm0, %v6679_v8  ;;  %3862 = vmatpush1.bf16.msra.mxu0 %v5552_v35  ;;  %v5567_v8 = vld [vmem:[%s7746_s2 + $0x9f8] ss:$60 sps:$4 sm:$0xff]  }
 0x125   :  { %3903 = vmatpush1.bf16.msra.mxu1 %v5555_v36  ;;  %3863 = vmatprep.subr.bf16.mxu0 %v5560_v37  ;;  %v5632_v35 = vld [vmem:[%s7746_s2 + $0x4d4] ss:$60 sps:$4 sm:$0xff]  }
 0x126   :  { %3904 = vmatprep.subr.bf16.mxu1 %v5563_v38  ;;  %3893 = vmatprep.mubr.bf16.mxu0 %v6099_v60  ;;  %v5635_v37 = vld [vmem:[%s7746_s2 + $0xc54] ss:$60 sps:$4 sm:$0xff]  }
 0x127   :  { %3934 = vmatprep.mubr.bf16.mxu1 %v6110_v63 }
 0x128   :  { %3864 = vmatpush1.bf16.msra.mxu0 %v5558_v39  ;;  %v5630_v39 = vld [vmem:[%s7746_s2 + $0x4d0] ss:$60 sps:$4 sm:$0xff]  }
 0x129   :  { %3905 = vmatpush1.bf16.msra.mxu1 %v5561_v40  ;;  %3865 = vmatprep.subr.bf16.mxu0 %v5566_v42  ;;  %v5633_v40 = vld [vmem:[%s7746_s2 + $0xc50] ss:$60 sps:$4 sm:$0xff]  }
 0x12a   :  { %3906 = vmatprep.subr.bf16.mxu1 %v5569_v43 }
 0x12c   :  { %3866 = vmatpush1.bf16.msra.mxu0 %v5564_v44 }
 0x12d   :  { %3907 = vmatpush1.bf16.msra.mxu1 %v5567_v8  ;;  %3867 = vmatprep.subr.bf16.mxu0 %v5572_v45 }
 0x12e   :  { %3908 = vmatprep.subr.bf16.mxu1 %v5575_v46 }
 0x130   :  { %3868 = vmatpush1.bf16.msra.mxu0 %v5570_v47  ;;  %v5638_v47 = vld [vmem:[%s7746_s2 + $0x45c] ss:$60 sps:$4 sm:$0xff]  }
 0x131   :  { %3909 = vmatpush1.bf16.msra.mxu1 %v5573_v32  ;;  %3869 = vmatprep.subr.bf16.mxu0 %v5578_v48  ;;  %v5641_v32 = vld [vmem:[%s7746_s2 + $0xbdc] ss:$60 sps:$4 sm:$0xff]  }
 0x132   :  { %3910 = vmatprep.subr.bf16.mxu1 %v5581_v49 }
 0x134   :  { %3870 = vmatpush1.bf16.msra.mxu0 %v5576_v51  ;;  %v5696_v51 = vld [vmem:[%s7746_s2 + $0x730] ss:$60 sps:$4 sm:$0xff]  }
 0x135   :  { %3911 = vmatpush1.bf16.msra.mxu1 %v5579_v52  ;;  %3871 = vmatprep.subr.bf16.mxu0 %v5584_v53  ;;  %v5636_v52 = vld [vmem:[%s7746_s2 + $0x458] ss:$60 sps:$4 sm:$0xff]  }
 0x136   :  { %3912 = vmatprep.subr.bf16.mxu1 %v5587_v54 }
 0x138   :  { %3872 = vmatpush1.bf16.msra.mxu0 %v5582_v56 }
 0x139   :  { %3913 = vmatpush1.bf16.msra.mxu1 %v5585_v57  ;;  %3873 = vmatprep.subr.bf16.mxu0 %v5590_v58  ;;  %v5639_v57 = vld [vmem:[%s7746_s2 + $0xbd8] ss:$60 sps:$4 sm:$0xff]  }
 0x13a   :  { %3914 = vmatprep.subr.bf16.mxu1 %v5593_v59 }
 0x13c   :  { %3874 = vmatpush1.bf16.msra.mxu0 %v5588_v62  ;;  %v5644_v62 = vld [vmem:[%s7746_s2 + $0x3e4] ss:$60 sps:$4 sm:$0xff]  }
 0x13d   :  { %3915 = vmatpush1.bf16.msra.mxu1 %v5591_v0  ;;  %3875 = vmatprep.subr.bf16.mxu0 %v5596_v2  ;;  %v5647_v0 = vld [vmem:[%s7746_s2 + $0xb64] ss:$60 sps:$4 sm:$0xff]  }
 0x13e   :  { %3916 = vmatprep.subr.bf16.mxu1 %v5599_v3 }
 0x140   :  { %3876 = vmatpush1.bf16.msra.mxu0 %v5594_v4 }
 0x141   :  { %3917 = vmatpush1.bf16.msra.mxu1 %v5597_v5  ;;  %3877 = vmatprep.subr.bf16.mxu0 %v5602_v6  ;;  %v5642_v6 = vld [vmem:[%s7746_s2 + $0x3e0] ss:$60 sps:$4 sm:$0xff]  }
 0x142   :  { %3918 = vmatprep.subr.bf16.mxu1 %v5605_v7  ;;  %v5645_v7 = vld [vmem:[%s7746_s2 + $0xb60] ss:$60 sps:$4 sm:$0xff]  }
 0x144   :  { %v3526_v15 = vpop.f32.mrf.mxu1  ;;  %3878 = vmatpush2.bf16.msra.mxu0 %v5600_v9  ;;  %v4481_v9 = vld [vmem:[%s7749_s3] sm:$0xff] }
 0x145   :  { %3919 = vmatpush2.bf16.msra.mxu1 %v5603_v10  ;;  %3879 = vmatprep.subr.bf16.mxu0 %v5608_v11  ;;  %v3527_v38 = vadd.f32 %v3526_v15, %v6777_v41  ;;  %v5650_v10 = vld [vmem:[%s7746_s2 + $0x108c] ss:$60 sps:$4 sm:$0xff]   ;;  %v5653_v11 = vld [vmem:[%s7746_s2 + $0x374] ss:$60 sps:$4 sm:$0xff]  }
 0x146   :  { %v3528_v18 = vpop.f32.mrf.mxu1  ;;  %3920 = vmatprep.subr.bf16.mxu1 %v5611_v12  ;;  %v4403_v12 = vrot.slane %v6858_v29, %v6071_v50  ;;  %v5651_v15 = vld [vmem:[%s7746_s2 + $0x370] ss:$60 sps:$4 sm:$0xff]   ;;  %v5659_v29 = vld [vmem:[%s7746_s2 + $0x2fc] ss:$60 sps:$4 sm:$0xff]  }
 0x147   :  { %v3529_v44 = vadd.f32 %v3528_v18, %v6777_v41 }
 0x148   :  { %v3530_v21 = vpop.f32.mrf.mxu1  ;;  %3880 = vmatpush2.bf16.msra.mxu0 %v5606_v13 }
 0x149   :  { %3921 = vmatpush2.bf16.msra.mxu1 %v5609_v14  ;;  %3881 = vmatprep.subr.bf16.mxu0 %v5614_v16  ;;  %v5648_v14 = vld [vmem:[%s7746_s2 + $0x1088] ss:$60 sps:$4 sm:$0xff]   ;;  %v5662_v21 = vld [vmem:[%s7746_s2 + $0xf9c] ss:$60 sps:$4 sm:$0xff]  }
 0x14a   :  { %v3531_v24 = vpop.f32.mrf.mxu1  ;;  %3922 = vmatprep.subr.bf16.mxu1 %v5617_v17  ;;  %v5656_v17 = vld [vmem:[%s7746_s2 + $0x1014] ss:$60 sps:$4 sm:$0xff]  }
 0x14b   :  { %v5663_v24 = vld [vmem:[%s7746_s2 + $0x280] ss:$60 sps:$4 sm:$0xff]  }
 0x14c   :  { %3882 = vmatpush2.bf16.msra.mxu0 %v5612_v19  ;;  %v5654_v19 = vld [vmem:[%s7746_s2 + $0x1010] ss:$60 sps:$4 sm:$0xff]  }
 0x14d   :  { %3923 = vmatpush2.bf16.msra.mxu1 %v5615_v20  ;;  %3883 = vmatprep.subr.bf16.mxu0 %v5620_v22  ;;  %v5657_v20 = vld [vmem:[%s7746_s2 + $0x2f8] ss:$60 sps:$4 sm:$0xff]   ;;  %v5665_v22 = vld [vmem:[%s7746_s2 + $0x284] ss:$60 sps:$4 sm:$0xff]  }
 0x14e   :  { %3924 = vmatprep.subr.bf16.mxu1 %v5623_v25  ;;  %v5668_v25 = vld [vmem:[%s7746_s2 + $0xf24] ss:$60 sps:$4 sm:$0xff]  }
 0x150   :  { %3884 = vmatpush2.bf16.msra.mxu0 %v5618_v27  ;;  %v5666_v27 = vld [vmem:[%s7746_s2 + $0xf20] ss:$60 sps:$4 sm:$0xff]  }
 0x151   :  { %3925 = vmatpush2.bf16.msra.mxu1 %v5621_v28  ;;  %3885 = vmatprep.subr.bf16.mxu0 %v5626_v30  ;;  %v5669_v28 = vld [vmem:[%s7746_s2 + $0x208] ss:$60 sps:$4 sm:$0xff]   ;;  %v5674_v30 = vld [vmem:[%s7746_s2 + $0x194] ss:$60 sps:$4 sm:$0xff]  }
 0x152   :  { %3926 = vmatprep.subr.bf16.mxu1 %v5629_v31  ;;  %v5677_v31 = vld [vmem:[%s7746_s2 + $0xaf4] ss:$60 sps:$4 sm:$0xff]  }
 0x153   :  { %v3567_v42 = vpop.f32.mrf.mxu0 }
 0x154   :  { %v3608_v43 = vpop.f32.mrf.mxu1  ;;  %v3568_v8 = vadd.f32 %v3567_v42, %v3527_v38  ;;  %3886 = vmatpush2.bf16.msra.mxu0 %v5624_v33  ;;  %v5672_v33 = vld [vmem:[%s7746_s2 + $0x190] ss:$60 sps:$4 sm:$0xff]   ;;  %v7181_v38 = vld.sshfl [vmem:[%s7747_s0 + $0x8] sm:$0x3 pattern:$0x76325410] }
 0x155   :  { %3927 = vmatpush2.bf16.msra.mxu1 %v5627_v34  ;;  %v3569_v45 = vpop.f32.mrf.mxu0  ;;  %3887 = vmatprep.subr.bf16.mxu0 %v5632_v35  ;;  %v5675_v34 = vld [vmem:[%s7746_s2 + $0xaf0] ss:$60 sps:$4 sm:$0xff]   ;;  %v5680_v35 = vld [vmem:[%s7746_s2 + $0x11c] ss:$60 sps:$4 sm:$0xff]   ;;  %v5686_v42 = vld [vmem:[%s7746_s2 + $0xa4] ss:$60 sps:$4 sm:$0xff]  }
 0x156   :  { %v3610_v46 = vpop.f32.mrf.mxu1  ;;  %3928 = vmatprep.subr.bf16.mxu1 %v5635_v37  ;;  %v3609_v48 = vadd.f32 %v3608_v43, %v3568_v8  ;;  %v3570_v49 = vadd.f32 %v3569_v45, %v3529_v44  ;;  %v5683_v37 = vld [vmem:[%s7746_s2 + $0xa7c] ss:$60 sps:$4 sm:$0xff]   ;;  %v5689_v43 = vld [vmem:[%s7746_s2 + $0xa04] ss:$60 sps:$4 sm:$0xff]   ;;  %v5692_v45 = vld [vmem:[%s7746_s2 + $0x2c] ss:$60 sps:$4 sm:$0xff]  }
 0x157   :  { %v3571_v53 = vpop.f32.mrf.mxu0  ;;  %v5684_v44 = vld [vmem:[%s7746_s2 + $0xa0] ss:$60 sps:$4 sm:$0xff]  }
 0x158   :  { %v3612_v54 = vpop.f32.mrf.mxu1  ;;  %v3611_v56 = vadd.f32 %v3610_v46, %v3570_v49  ;;  %3888 = vmatpush2.bf16.msra.mxu0 %v5630_v39  ;;  %v4352_v2 = vmax.f32 %v3609_v48, 0.0  ;;  %v5678_v39 = vld [vmem:[%s7746_s2 + $0x118] ss:$60 sps:$4 sm:$0xff]   ;;  %v5687_v8 = vld [vmem:[%s7746_s2 + $0xa00] ss:$60 sps:$4 sm:$0xff]  }
 0x159   :  { %3929 = vmatpush2.bf16.msra.mxu1 %v5633_v40  ;;  %v3572_v58 = vpop.f32.mrf.mxu0  ;;  %3889 = vmatprep.subr.bf16.mxu0 %v5638_v47  ;;  %v5681_v40 = vld [vmem:[%s7746_s2 + $0xa78] ss:$60 sps:$4 sm:$0xff]   ;;  %v5695_v46 = vld [vmem:[%s7746_s2 + $0x98c] ss:$60 sps:$4 sm:$0xff]  }
 0x15a   :  { %v3613_v59 = vpop.f32.mrf.mxu1  ;;  %3930 = vmatprep.subr.bf16.mxu1 %v5641_v32  ;;  %v4353_v3 = vmax.f32 %v3611_v56, 0.0  ;;  %v5690_v47 = vld [vmem:[%s7746_s2 + $0x28] ss:$60 sps:$4 sm:$0xff]   ;;  %v5698_v48 = vld [vmem:[%s7746_s2 + $0x734] ss:$60 sps:$4 sm:$0xff]  }
 0x15b   :  { %v5693_v32 = vld [vmem:[%s7746_s2 + $0x988] ss:$60 sps:$4 sm:$0xff]   ;;  %v5701_v49 = vld [vmem:[%s7746_s2 + $0x914] ss:$60 sps:$4 sm:$0xff]   ;;  %v5704_v53 = vld [vmem:[%s7746_s2 + $0x6bc] ss:$60 sps:$4 sm:$0xff]  }
 0x15c   :  { %v5047_v5 = vpack.c.bf16 %v4353_v3, %v4352_v2  ;;  %3890 = vmatpush2.bf16.msra.mxu0 %v5636_v52  ;;  %v5699_v52 = vld [vmem:[%s7746_s2 + $0x910] ss:$60 sps:$4 sm:$0xff]   ;;  %v5707_v54 = vld [vmem:[%s7746_s2 + $0x89c] ss:$60 sps:$4 sm:$0xff]   ;;  %v5710_v58 = vld [vmem:[%s7746_s2 + $0x644] ss:$60 sps:$4 sm:$0xff]  }
 0x15d   :  { %3931 = vmatpush2.bf16.msra.mxu1 %v5639_v57  ;;  %3891 = vmatprep.subr.bf16.mxu0 %v5644_v62  ;;  %v5702_v56 = vld [vmem:[%s7746_s2 + $0x6b8] ss:$60 sps:$4 sm:$0xff]   ;;  %v5713_v59 = vld [vmem:[%s7746_s2 + $0x824] ss:$60 sps:$4 sm:$0xff]   ;;  %v5716_v2 = vld [vmem:[%s7746_s2 + $0x5cc] ss:$60 sps:$4 sm:$0xff]  }
 0x15e   :  { %3932 = vmatprep.subr.bf16.mxu1 %v5647_v0  ;;  %v4410_v13 = vrot.slane %v5047_v5, %v6071_v50  ;;  %v5705_v57 = vld [vmem:[%s7746_s2 + $0x898] ss:$60 sps:$4 sm:$0xff]   ;;  %v5708_v62 = vld [vmem:[%s7746_s2 + $0x640] ss:$60 sps:$4 sm:$0xff]   ;;  %v5719_v3 = vld [vmem:[%s7746_s2 + $0x7ac] ss:$60 sps:$4 sm:$0xff]  }
 0x15f   :  { %v5711_v0 = vld [vmem:[%s7746_s2 + $0x820] ss:$60 sps:$4 sm:$0xff]   ;;  %v5714_v5 = vld [vmem:[%s7746_s2 + $0x5c8] ss:$60 sps:$4 sm:$0xff]  }
 0x160   :  { %v4411_v16 = vcombine.low %v4403_v12, %v4410_v13  ;;  %3892 = vmatpush2.bf16.msra.mxu0 %v5642_v6  ;;  %v5717_v6 = vld [vmem:[%s7746_s2 + $0x7a8] ss:$60 sps:$4 sm:$0xff]   ;;  %v5728_v12 = vld [vmem:[%s7746_s2 + $0x4dc] ss:$60 sps:$4 sm:$0xff]  }
 0x161   :  { %3933 = vmatpush2.bf16.msra.mxu1 %v5645_v7  ;;  %3951 = vmatprep.subr.bf16.mxu0 %v5650_v10  ;;  %v5722_v7 = vld [vmem:[%s7746_s2 + $0x554] ss:$60 sps:$4 sm:$0xff]   ;;  %v5731_v13 = vld [vmem:[%s7746_s2 + $0xe3c] ss:$60 sps:$4 sm:$0xff]  }
 0x162   :  { %3984 = vmatprep.subr.bf16.mxu1 %v5653_v11  ;;  %v4482_v18 = vsel %vm7087_vm15, %v4411_v16, %v4481_v9  ;;  %v5725_v9 = vld [vmem:[%s7746_s2 + $0xeb4] ss:$60 sps:$4 sm:$0xff]  }
 0x163   :  { %4483 = vst [vmem:[%s7749_s3] sm:$0xff] %v4482_v18  ;;  %3894 = vmatmul.mubr.bf16.vlgmr.msra.gmra.mxu0 %v6086_v55  ;;  %v5720_v10 = vld [vmem:[%s7746_s2 + $0x550] ss:$60 sps:$4 sm:$0xff]  }
 0x164   :  { %3935 = vmatmul.mubr.bf16.vlgmr.msra.gmra.mxu1 %v6102_v61  ;;  %3952 = vmatpush1.bf16.msra.mxu0 %v5648_v14  ;;  %v5723_v11 = vld [vmem:[%s7746_s2 + $0xeb0] ss:$60 sps:$4 sm:$0xff]  }
 0x165   :  { %3985 = vmatpush1.bf16.msra.mxu1 %v5651_v15  ;;  %3953 = vmatprep.subr.bf16.mxu0 %v5656_v17  ;;  %v5726_v17 = vld [vmem:[%s7746_s2 + $0x4d8] ss:$60 sps:$4 sm:$0xff]  }
 0x166   :  { %3986 = vmatprep.subr.bf16.mxu1 %v5659_v29  ;;  %3975 = vmatprep.mubr.bf16.mxu0 %v5914_v1  ;;  %v5729_v29 = vld [vmem:[%s7746_s2 + $0xe38] ss:$60 sps:$4 sm:$0xff]  }
 0x167   :  { %4016 = vmatprep.mubr.bf16.mxu1 %v6099_v60 }
 0x168   :  { %3954 = vmatpush1.bf16.msra.mxu0 %v5654_v19 }
 0x169   :  { %3987 = vmatpush1.bf16.msra.mxu1 %v5657_v20  ;;  %3955 = vmatprep.subr.bf16.mxu0 %v5662_v21  ;;  %v5734_v20 = vld [vmem:[%s7746_s2 + $0x464] ss:$60 sps:$4 sm:$0xff]  }
 0x16a   :  { %3988 = vmatprep.subr.bf16.mxu1 %v5665_v22  ;;  %v5737_v21 = vld [vmem:[%s7746_s2 + $0xdc4] ss:$60 sps:$4 sm:$0xff]  }
 0x16c   :  { %3956 = vmatpush1.bf16.msra.mxu0 %v5660_v23 }
 0x16d   :  { %3989 = vmatpush1.bf16.msra.mxu1 %v5663_v24  ;;  %3957 = vmatprep.subr.bf16.mxu0 %v5668_v25 }
 0x16e   :  { %3990 = vmatprep.subr.bf16.mxu1 %v5671_v26 }
 0x170   :  { %3958 = vmatpush1.bf16.msra.mxu0 %v5666_v27  ;;  %v5732_v27 = vld [vmem:[%s7746_s2 + $0x460] ss:$60 sps:$4 sm:$0xff]  }
 0x171   :  { %3991 = vmatpush1.bf16.msra.mxu1 %v5669_v28  ;;  %4025 = vmatprep.subr.bf16.mxu0 %v5677_v31  ;;  %v5735_v28 = vld [vmem:[%s7746_s2 + $0xdc0] ss:$60 sps:$4 sm:$0xff]  }
 0x172   :  { %3992 = vmatprep.subr.bf16.mxu1 %v5674_v30 }
 0x173   :  { %5042 = vmatmul.mubr.msk.bf16.vlgmr.msra.gmra.mxu0 %vm3365_vm0, %v7181_v38 }
 0x174   :  { %4026 = vmatpush1.bf16.msra.mxu0 %v5675_v34  ;;  %4057 = vmatprep.mubr.bf16.mxu0 %v6110_v63  ;;  %v5743_v34 = vld [vmem:[%s7746_s2 + $0xd4c] ss:$60 sps:$4 sm:$0xff]  }
 0x175   :  { %3993 = vmatpush1.bf16.msra.mxu1 %v5672_v33  ;;  %4027 = vmatprep.subr.bf16.mxu0 %v5683_v37  ;;  %v5740_v33 = vld [vmem:[%s7746_s2 + $0x3ec] ss:$60 sps:$4 sm:$0xff]  }
 0x176   :  { %3994 = vmatprep.subr.bf16.mxu1 %v5680_v35  ;;  %v5738_v35 = vld [vmem:[%s7746_s2 + $0x3e8] ss:$60 sps:$4 sm:$0xff]  }
 0x177   :  { %v5741_v37 = vld [vmem:[%s7746_s2 + $0xd48] ss:$60 sps:$4 sm:$0xff]  }
 0x178   :  { %4028 = vmatpush1.bf16.msra.mxu0 %v5681_v40  ;;  %v5749_v40 = vld [vmem:[%s7746_s2 + $0x1094] ss:$60 sps:$4 sm:$0xff]  }
 0x179   :  { %3995 = vmatpush1.bf16.msra.mxu1 %v5678_v39  ;;  %4029 = vmatprep.subr.bf16.mxu0 %v5689_v43  ;;  %v5746_v39 = vld [vmem:[%s7746_s2 + $0xcd4] ss:$60 sps:$4 sm:$0xff]  }
 0x17a   :  { %3996 = vmatprep.subr.bf16.mxu1 %v5686_v42  ;;  %v5744_v42 = vld [vmem:[%s7746_s2 + $0xcd0] ss:$60 sps:$4 sm:$0xff]  }
 0x17b   :  { %v5747_v43 = vld [vmem:[%s7746_s2 + $0x1090] ss:$60 sps:$4 sm:$0xff]  }
 0x17c   :  { %4030 = vmatpush1.bf16.msra.mxu0 %v5687_v8  ;;  %v5755_v8 = vld [vmem:[%s7746_s2 + $0x101c] ss:$60 sps:$4 sm:$0xff]  }
 0x17d   :  { %3997 = vmatpush1.bf16.msra.mxu1 %v5684_v44  ;;  %4031 = vmatprep.subr.bf16.mxu0 %v5695_v46  ;;  %v5752_v44 = vld [vmem:[%s7746_s2 + $0xc5c] ss:$60 sps:$4 sm:$0xff]  }
 0x17e   :  { %3998 = vmatprep.subr.bf16.mxu1 %v5692_v45 }
 0x180   :  { %4032 = vmatpush1.bf16.msra.mxu0 %v5693_v32  ;;  %v5753_v32 = vld [vmem:[%s7746_s2 + $0x1018] ss:$60 sps:$4 sm:$0xff]  }
 0x181   :  { %3999 = vmatpush1.bf16.msra.mxu1 %v5690_v47  ;;  %4033 = vmatprep.subr.bf16.mxu0 %v5701_v49  ;;  %v5750_v47 = vld [vmem:[%s7746_s2 + $0xc58] ss:$60 sps:$4 sm:$0xff]   ;;  %v5758_v49 = vld [vmem:[%s7746_s2 + $0xbe4] ss:$60 sps:$4 sm:$0xff]  }
 0x182   :  { %4000 = vmatprep.subr.bf16.mxu1 %v5698_v48 }
 0x184   :  { %4034 = vmatpush1.bf16.msra.mxu0 %v5699_v52 }
 0x185   :  { %4001 = vmatpush2.bf16.msra.mxu1 %v5696_v51  ;;  %4035 = vmatprep.subr.bf16.mxu0 %v5707_v54  ;;  %v5761_v51 = vld [vmem:[%s7746_s2 + $0xfa4] ss:$60 sps:$4 sm:$0xff]  }
 0x186   :  { %4002 = vmatprep.subr.bf16.mxu1 %v5704_v53 }
 0x188   :  { %4036 = vmatpush1.bf16.msra.mxu0 %v5705_v57  ;;  %v5756_v57 = vld [vmem:[%s7746_s2 + $0xbe0] ss:$60 sps:$4 sm:$0xff]  }
 0x189   :  { %4003 = vmatpush2.bf16.msra.mxu1 %v5702_v56  ;;  %4037 = vmatprep.subr.bf16.mxu0 %v5713_v59 }
 0x18a   :  { %4004 = vmatprep.subr.bf16.mxu1 %v5710_v58  ;;  %v5759_v58 = vld [vmem:[%s7746_s2 + $0xfa0] ss:$60 sps:$4 sm:$0xff]  }
 0x18c   :  { %4038 = vmatpush1.bf16.msra.mxu0 %v5711_v0  ;;  %v5767_v0 = vld [vmem:[%s7746_s2 + $0xf2c] ss:$60 sps:$4 sm:$0xff]  }
 0x18d   :  { %4005 = vmatpush2.bf16.msra.mxu1 %v5708_v62  ;;  %4039 = vmatprep.subr.bf16.mxu0 %v5719_v3  ;;  %v5764_v62 = vld [vmem:[%s7746_s2 + $0xb6c] ss:$60 sps:$4 sm:$0xff]  }
 0x18e   :  { %4006 = vmatprep.subr.bf16.mxu1 %v5716_v2  ;;  %v5762_v3 = vld [vmem:[%s7746_s2 + $0xb68] ss:$60 sps:$4 sm:$0xff]  }
 0x190   :  { %4040 = vmatpush1.bf16.msra.mxu0 %v5717_v6  ;;  %v5770_v6 = vld [vmem:[%s7746_s2 + $0x37c] ss:$60 sps:$4 sm:$0xff]  }
 0x191   :  { %4007 = vmatpush2.bf16.msra.mxu1 %v5714_v5  ;;  %4041 = vmatprep.subr.bf16.mxu0 %v5725_v9  ;;  %v5765_v5 = vld [vmem:[%s7746_s2 + $0xf28] ss:$60 sps:$4 sm:$0xff]   ;;  %v5768_v9 = vld [vmem:[%s7746_s2 + $0x378] ss:$60 sps:$4 sm:$0xff]  }
 0x192   :  { %4008 = vmatprep.subr.bf16.mxu1 %v5722_v7  ;;  %v5773_v7 = vld [vmem:[%s7746_s2 + $0xafc] ss:$60 sps:$4 sm:$0xff]  }
 0x193   :  { %v3649_v14 = vpop.f32.mrf.mxu0 }
 0x194   :  { %v3690_v15 = vpop.f32.mrf.mxu1  ;;  %v3650_v16 = vadd.f32 %v3649_v14, %v6777_v41  ;;  %4042 = vmatpush2.bf16.msra.mxu0 %v5723_v11  ;;  %v5776_v11 = vld [vmem:[%s7746_s2 + $0x304] ss:$60 sps:$4 sm:$0xff]  }
 0x195   :  { %4009 = vmatpush2.bf16.msra.mxu1 %v5720_v10  ;;  %v3651_v18 = vpop.f32.mrf.mxu0  ;;  %4043 = vmatprep.subr.bf16.mxu0 %v5731_v13  ;;  %v5771_v10 = vld [vmem:[%s7746_s2 + $0xaf8] ss:$60 sps:$4 sm:$0xff]   ;;  %v5774_v13 = vld [vmem:[%s7746_s2 + $0x300] ss:$60 sps:$4 sm:$0xff]  }
 0x196   :  { %v3692_v19 = vpop.f32.mrf.mxu1  ;;  %4010 = vmatprep.subr.bf16.mxu1 %v5728_v12  ;;  %v3691_v22 = vadd.f32 %v3690_v15, %v3650_v16  ;;  %v3652_v23 = vadd.f32 %v3651_v18, %v6777_v41  ;;  %v5779_v12 = vld [vmem:[%s7746_s2 + $0xa84] ss:$60 sps:$4 sm:$0xff]   ;;  %v5782_v15 = vld [vmem:[%s7746_s2 + $0x28c] ss:$60 sps:$4 sm:$0xff]   ;;  %v5788_v18 = vld [vmem:[%s7746_s2 + $0x214] ss:$60 sps:$4 sm:$0xff]  }
 0x197   :  { %v3653_v24 = vpop.f32.mrf.mxu0  ;;  %v5777_v14 = vld [vmem:[%s7746_s2 + $0xa80] ss:$60 sps:$4 sm:$0xff]   ;;  %v5785_v16 = vld [vmem:[%s7746_s2 + $0xa0c] ss:$60 sps:$4 sm:$0xff]  }
 0x198   :  { %v3694_v25 = vpop.f32.mrf.mxu1  ;;  %v3693_v26 = vadd.f32 %v3692_v19, %v3652_v23  ;;  %4044 = vmatpush2.bf16.msra.mxu0 %v5729_v29  ;;  %v5783_v29 = vld [vmem:[%s7746_s2 + $0xa08] ss:$60 sps:$4 sm:$0xff]   ;;  %v5791_v19 = vld [vmem:[%s7746_s2 + $0x994] ss:$60 sps:$4 sm:$0xff]   ;;  %v5797_v23 = vld [vmem:[%s7746_s2 + $0x91c] ss:$60 sps:$4 sm:$0xff]  }
 0x199   :  { %4011 = vmatpush2.bf16.msra.mxu1 %v5726_v17  ;;  %v3654_v30 = vpop.f32.mrf.mxu0  ;;  %4045 = vmatprep.subr.bf16.mxu0 %v5737_v21  ;;  %v5780_v17 = vld [vmem:[%s7746_s2 + $0x288] ss:$60 sps:$4 sm:$0xff]   ;;  %v5789_v21 = vld [vmem:[%s7746_s2 + $0x990] ss:$60 sps:$4 sm:$0xff]   ;;  %v5792_v24 = vld [vmem:[%s7746_s2 + $0x198] ss:$60 sps:$4 sm:$0xff]  }
 0x19a   :  { %v3695_v31 = vpop.f32.mrf.mxu1  ;;  %4012 = vmatprep.subr.bf16.mxu1 %v5734_v20  ;;  %v5786_v20 = vld [vmem:[%s7746_s2 + $0x210] ss:$60 sps:$4 sm:$0xff]   ;;  %v5795_v25 = vld [vmem:[%s7746_s2 + $0x918] ss:$60 sps:$4 sm:$0xff]   ;;  %v5801_v30 = vld [vmem:[%s7746_s2 + $0x8a0] ss:$60 sps:$4 sm:$0xff]  }
 0x19b   :  { %v5806_v31 = vld [vmem:[%s7746_s2 + $0xac] ss:$60 sps:$4 sm:$0xff]  }
 0x19c   :  { %4046 = vmatpush2.bf16.msra.mxu0 %v5735_v28  ;;  %v5798_v28 = vld [vmem:[%s7746_s2 + $0x120] ss:$60 sps:$4 sm:$0xff]  }
 0x19d   :  { %4013 = vmatpush2.bf16.msra.mxu1 %v5732_v27  ;;  %4047 = vmatprep.subr.bf16.mxu0 %v5743_v34  ;;  %v5803_v27 = vld [vmem:[%s7746_s2 + $0x8a4] ss:$60 sps:$4 sm:$0xff]  }
 0x19e   :  { %4014 = vmatprep.subr.bf16.mxu1 %v5740_v33  ;;  %v5809_v33 = vld [vmem:[%s7746_s2 + $0x82c] ss:$60 sps:$4 sm:$0xff]  }
 0x19f   :  { %v5804_v34 = vld [vmem:[%s7746_s2 + $0xa8] ss:$60 sps:$4 sm:$0xff]  }
 0x1a0   :  { %4048 = vmatpush2.bf16.msra.mxu0 %v5741_v37  ;;  %v5812_v37 = vld [vmem:[%s7746_s2 + $0x34] ss:$60 sps:$4 sm:$0xff]  }
 0x1a1   :  { %4015 = vmatpush2.bf16.msra.mxu1 %v5738_v35  ;;  %4049 = vmatprep.subr.bf16.mxu0 %v5746_v39  ;;  %v5807_v35 = vld [vmem:[%s7746_s2 + $0x828] ss:$60 sps:$4 sm:$0xff]   ;;  %v5815_v39 = vld [vmem:[%s7746_s2 + $0x7b4] ss:$60 sps:$4 sm:$0xff]  }
 0x1a2   :  { %4074 = vmatprep.subr.bf16.mxu1 %v5749_v40  ;;  %v5810_v40 = vld [vmem:[%s7746_s2 + $0x30] ss:$60 sps:$4 sm:$0xff]  }
 0x1a3   :  { %v3731_v45 = vpop.f32.mrf.mxu0 }
 0x1a4   :  { %4017 = vmatmul.mubr.bf16.vlgmr.msra.gmra.mxu1 %v6086_v55  ;;  %v3732_v46 = vadd.f32 %v3731_v45, %v3691_v22  ;;  %4050 = vmatpush2.bf16.msra.mxu0 %v5744_v42  ;;  %v5794_v22 = vld [vmem:[%s7746_s2 + $0x19c] ss:$60 sps:$4 sm:$0xff]   ;;  %v5813_v42 = vld [vmem:[%s7746_s2 + $0x7b0] ss:$60 sps:$4 sm:$0xff]  }
 0x1a5   :  { %4075 = vmatpush1.bf16.msra.mxu1 %v5747_v43  ;;  %v3733_v48 = vpop.f32.mrf.mxu0  ;;  %4051 = vmatprep.subr.bf16.mxu0 %v5752_v44  ;;  %v5818_v43 = vld [vmem:[%s7746_s2 + $0x73c] ss:$60 sps:$4 sm:$0xff]  }
 0x1a6   :  { %4076 = vmatprep.subr.bf16.mxu1 %v5755_v8  ;;  %v3734_v52 = vadd.f32 %v3733_v48, %v3693_v26  ;;  %4098 = vmatprep.mubr.bf16.mxu1 %v5914_v1  ;;  %v4354_v54 = vmax.f32 %v3732_v46, 0.0  ;;  %v5800_v26 = vld [vmem:[%s7746_s2 + $0x124] ss:$60 sps:$4 sm:$0xff]   ;;  %v5821_v44 = vld [vmem:[%s7746_s2 + $0xebc] ss:$60 sps:$4 sm:$0xff]  }
 0x1a7   :  { %v3735_v53 = vpop.f32.mrf.mxu0  ;;  %v5816_v8 = vld [vmem:[%s7746_s2 + $0x738] ss:$60 sps:$4 sm:$0xff]   ;;  %v5824_v46 = vld [vmem:[%s7746_s2 + $0x6c4] ss:$60 sps:$4 sm:$0xff]  }
 0x1a8   :  { %v4355_v56 = vmax.f32 %v3734_v52, 0.0  ;;  %4052 = vmatpush2.bf16.msra.mxu0 %v5750_v47  ;;  %v5819_v45 = vld [vmem:[%s7746_s2 + $0xeb8] ss:$60 sps:$4 sm:$0xff]   ;;  %v5827_v47 = vld [vmem:[%s7746_s2 + $0xe44] ss:$60 sps:$4 sm:$0xff]  }
 0x1a9   :  { %4077 = vmatpush1.bf16.msra.mxu1 %v5753_v32  ;;  %v3736_v59 = vpop.f32.mrf.mxu0  ;;  %4053 = vmatprep.subr.bf16.mxu0 %v5758_v49  ;;  %v5822_v48 = vld [vmem:[%s7746_s2 + $0x6c0] ss:$60 sps:$4 sm:$0xff]   ;;  %v5830_v52 = vld [vmem:[%s7746_s2 + $0x64c] ss:$60 sps:$4 sm:$0xff]  }
 0x1aa   :  { %4078 = vmatprep.subr.bf16.mxu1 %v5761_v51  ;;  %v7358_v2 = vpack.c.bf16 %v4355_v56, %v4354_v54  ;;  %v5825_v49 = vld [vmem:[%s7746_s2 + $0xe40] ss:$60 sps:$4 sm:$0xff]   ;;  %v5833_v53 = vld [vmem:[%s7746_s2 + $0xdcc] ss:$60 sps:$4 sm:$0xff]   ;;  %v5836_v59 = vld [vmem:[%s7746_s2 + $0x5d4] ss:$60 sps:$4 sm:$0xff]  }
 0x1ab   :  { %v5828_v56 = vld [vmem:[%s7746_s2 + $0x648] ss:$60 sps:$4 sm:$0xff]  }
 0x1ac   :  { %4054 = vmatpush2.bf16.msra.mxu0 %v5756_v57  ;;  %v5831_v57 = vld [vmem:[%s7746_s2 + $0xdc8] ss:$60 sps:$4 sm:$0xff]  }
 0x1ad   :  { %4079 = vmatpush1.bf16.msra.mxu1 %v5759_v58  ;;  %4055 = vmatprep.subr.bf16.mxu0 %v5764_v62  ;;  %v5839_v62 = vld [vmem:[%s7746_s2 + $0xd54] ss:$60 sps:$4 sm:$0xff]  }
 0x1ae   :  { %4080 = vmatprep.subr.bf16.mxu1 %v5767_v0  ;;  %v5834_v0 = vld [vmem:[%s7746_s2 + $0x5d0] ss:$60 sps:$4 sm:$0xff]  }
 0x1b0   :  { %4056 = vmatpush2.bf16.msra.mxu0 %v5762_v3  ;;  %v5837_v3 = vld [vmem:[%s7746_s2 + $0xd50] ss:$60 sps:$4 sm:$0xff]  }
 0x1b1   :  { %4081 = vmatpush1.bf16.msra.mxu1 %v5765_v5  ;;  %4107 = vmatprep.subr.bf16.mxu0 %v5770_v6  ;;  %v5842_v5 = vld [vmem:[%s7746_s2 + $0x55c] ss:$60 sps:$4 sm:$0xff]  }
 0x1b2   :  { %4148 = vmatprep.subr.bf16.mxu1 %v5773_v7  ;;  %v5845_v6 = vld [vmem:[%s7746_s2 + $0xcdc] ss:$60 sps:$4 sm:$0xff]  }
 0x1b3   :  { %4058 = vmatmul.mubr.bf16.vlgmr.msra.gmra.mxu0 %v6102_v61  ;;  %v5840_v7 = vld [vmem:[%s7746_s2 + $0x558] ss:$60 sps:$4 sm:$0xff]  }
 0x1b4   :  { %5043 = vmatmul.mubr.msk.bf16.vlgmr.msra.gmra.mxu1 %vm3365_vm0, %v7181_v38  ;;  %4108 = vmatpush1.bf16.msra.mxu0 %v5768_v9  ;;  %v5843_v9 = vld [vmem:[%s7746_s2 + $0xcd8] ss:$60 sps:$4 sm:$0xff]  }
 0x1b5   :  { %4149 = vmatpush1.bf16.msra.mxu1 %v5771_v10  ;;  %4109 = vmatprep.subr.bf16.mxu0 %v5776_v11  ;;  %v5848_v10 = vld [vmem:[%s7746_s2 + $0x4e4] ss:$60 sps:$4 sm:$0xff]  }
 0x1b6   :  { %4150 = vmatprep.subr.bf16.mxu1 %v5779_v12  ;;  %4139 = vmatprep.mubr.bf16.mxu0 %v6099_v60  ;;  %v5851_v11 = vld [vmem:[%s7746_s2 + $0xc64] ss:$60 sps:$4 sm:$0xff]  }
 0x1b7   :  { %4180 = vmatprep.mubr.bf16.mxu1 %v6110_v63 }
 0x1b8   :  { %4110 = vmatpush1.bf16.msra.mxu0 %v5774_v13 }
 0x1b9   :  { %4151 = vmatpush1.bf16.msra.mxu1 %v5777_v14  ;;  %4111 = vmatprep.subr.bf16.mxu0 %v5782_v15 }
 0x1ba   :  { %4152 = vmatprep.subr.bf16.mxu1 %v5785_v16 }
 0x1bc   :  { %4112 = vmatpush1.bf16.msra.mxu0 %v5780_v17  ;;  %v5846_v17 = vld [vmem:[%s7746_s2 + $0x4e0] ss:$60 sps:$4 sm:$0xff]  }
 0x1bd   :  { %4153 = vmatpush1.bf16.msra.mxu1 %v5783_v29  ;;  %4113 = vmatprep.subr.bf16.mxu0 %v5788_v18  ;;  %v5849_v29 = vld [vmem:[%s7746_s2 + $0xc60] ss:$60 sps:$4 sm:$0xff]  }
 0x1be   :  { %4154 = vmatprep.subr.bf16.mxu1 %v5791_v19 }
 0x1c0   :  { %4114 = vmatpush1.bf16.msra.mxu0 %v5786_v20  ;;  %v5854_v20 = vld [vmem:[%s7746_s2 + $0x46c] ss:$60 sps:$4 sm:$0xff]  }
 0x1c1   :  { %4155 = vmatpush1.bf16.msra.mxu1 %v5789_v21  ;;  %4115 = vmatprep.subr.bf16.mxu0 %v5794_v22  ;;  %v5857_v21 = vld [vmem:[%s7746_s2 + $0xbec] ss:$60 sps:$4 sm:$0xff]  }
 0x1c2   :  { %4156 = vmatprep.subr.bf16.mxu1 %v5797_v23 }
 0x1c4   :  { %4116 = vmatpush1.bf16.msra.mxu0 %v5792_v24 }
 0x1c5   :  { %4157 = vmatpush1.bf16.msra.mxu1 %v5795_v25  ;;  %4117 = vmatprep.subr.bf16.mxu0 %v5800_v26 }
 0x1c6   :  { %4158 = vmatprep.subr.bf16.mxu1 %v5803_v27  ;;  %v5852_v27 = vld [vmem:[%s7746_s2 + $0x468] ss:$60 sps:$4 sm:$0xff]  }
 0x1c8   :  { %4118 = vmatpush1.bf16.msra.mxu0 %v5798_v28  ;;  %v5855_v28 = vld [vmem:[%s7746_s2 + $0xbe8] ss:$60 sps:$4 sm:$0xff]  }
 0x1c9   :  { %4159 = vmatpush1.bf16.msra.mxu1 %v5801_v30  ;;  %4119 = vmatprep.subr.bf16.mxu0 %v5806_v31 }
 0x1ca   :  { %4160 = vmatprep.subr.bf16.mxu1 %v5809_v33  ;;  %v5860_v33 = vld [vmem:[%s7746_s2 + $0x3f4] ss:$60 sps:$4 sm:$0xff]  }
 0x1cc   :  { %4120 = vmatpush1.bf16.msra.mxu0 %v5804_v34  ;;  %v5863_v34 = vld [vmem:[%s7746_s2 + $0xb74] ss:$60 sps:$4 sm:$0xff]  }
 0x1cd   :  { %4161 = vmatpush1.bf16.msra.mxu1 %v5807_v35  ;;  %4121 = vmatprep.subr.bf16.mxu0 %v5812_v37 }
 0x1ce   :  { %4162 = vmatprep.subr.bf16.mxu1 %v5815_v39 }
 0x1d0   :  { %4122 = vmatpush1.bf16.msra.mxu0 %v5810_v40  ;;  %v5858_v40 = vld [vmem:[%s7746_s2 + $0x3f0] ss:$60 sps:$4 sm:$0xff]  }
 0x1d1   :  { %4163 = vmatpush1.bf16.msra.mxu1 %v5813_v42  ;;  %4123 = vmatprep.subr.bf16.mxu0 %v5818_v43  ;;  %v5861_v42 = vld [vmem:[%s7746_s2 + $0xb70] ss:$60 sps:$4 sm:$0xff]   ;;  %v5866_v43 = vld [vmem:[%s7746_s2 + $0x109c] ss:$60 sps:$4 sm:$0xff]  }
 0x1d2   :  { %4164 = vmatprep.subr.bf16.mxu1 %v5821_v44  ;;  %v5867_v44 = vld [vmem:[%s7746_s2 + $0x740] ss:$60 sps:$4 sm:$0xff]  }
 0x1d4   :  { %v3772_v32 = vpop.f32.mrf.mxu1  ;;  %4124 = vmatpush2.bf16.msra.mxu0 %v5816_v8  ;;  %v4420_v8 = vrot.slane %v7358_v2, %v6071_v50  ;;  %v5871_v2 = vld [vmem:[%s7746_s2 + $0x1024] ss:$60 sps:$4 sm:$0xff]  }
 0x1d5   :  { %4165 = vmatpush2.bf16.msra.mxu1 %v5819_v45  ;;  %4125 = vmatprep.subr.bf16.mxu0 %v5824_v46  ;;  %v3773_v12 = vadd.f32 %v3772_v32, %v6777_v41  ;;  %v4484_v46 = vld [vmem:[%s7749_s3 + $0x8] sm:$0xff]  ;;  %v5864_v32 = vld [vmem:[%s7746_s2 + $0x1098] ss:$60 sps:$4 sm:$0xff]  }
 0x1d6   :  { %v3774_v51 = vpop.f32.mrf.mxu1  ;;  %4166 = vmatprep.subr.bf16.mxu1 %v5827_v47 }
 0x1d7   :  { %v3775_v15 = vadd.f32 %v3774_v51, %v6777_v41 }
 0x1d8   :  { %v3776_v54 = vpop.f32.mrf.mxu1  ;;  %4126 = vmatpush2.bf16.msra.mxu0 %v5822_v48  ;;  %v5868_v48 = vld [vmem:[%s7746_s2 + $0x380] ss:$60 sps:$4 sm:$0xff]  }
 0x1d9   :  { %4167 = vmatpush2.bf16.msra.mxu1 %v5825_v49  ;;  %4127 = vmatprep.subr.bf16.mxu0 %v5830_v52  ;;  %v5872_v49 = vld [vmem:[%s7746_s2 + $0x6c8] ss:$60 sps:$4 sm:$0xff]   ;;  %v5869_v52 = vld [vmem:[%s7746_s2 + $0x1020] ss:$60 sps:$4 sm:$0xff]  }
 0x1da   :  { %v3777_v58 = vpop.f32.mrf.mxu1  ;;  %4168 = vmatprep.subr.bf16.mxu1 %v5833_v53  ;;  %v5873_v53 = vld [vmem:[%s7746_s2 + $0x308] ss:$60 sps:$4 sm:$0xff]  }
 0x1db   :  { %v5876_v54 = vld [vmem:[%s7746_s2 + $0xfac] ss:$60 sps:$4 sm:$0xff]  }
 0x1dc   :  { %4128 = vmatpush2.bf16.msra.mxu0 %v5828_v56  ;;  %v5877_v56 = vld [vmem:[%s7746_s2 + $0x650] ss:$60 sps:$4 sm:$0xff]  }
 0x1dd   :  { %4169 = vmatpush2.bf16.msra.mxu1 %v5831_v57  ;;  %4129 = vmatprep.subr.bf16.mxu0 %v5836_v59  ;;  %v5874_v57 = vld [vmem:[%s7746_s2 + $0xfa8] ss:$60 sps:$4 sm:$0xff]   ;;  %v5878_v58 = vld [vmem:[%s7746_s2 + $0x290] ss:$60 sps:$4 sm:$0xff]  }
 0x1de   :  { %4170 = vmatprep.subr.bf16.mxu1 %v5839_v62  ;;  %v5881_v59 = vld [vmem:[%s7746_s2 + $0xf34] ss:$60 sps:$4 sm:$0xff]  }
 0x1df   :  { %v5883_v62 = vld [vmem:[%s7746_s2 + $0x218] ss:$60 sps:$4 sm:$0xff]  }
 0x1e0   :  { %4130 = vmatpush2.bf16.msra.mxu0 %v5834_v0  ;;  %v5884_v0 = vld [vmem:[%s7746_s2 + $0x560] ss:$60 sps:$4 sm:$0xff]  }
 0x1e1   :  { %4171 = vmatpush2.bf16.msra.mxu1 %v5837_v3  ;;  %4131 = vmatprep.subr.bf16.mxu0 %v5842_v5  ;;  %v5885_v3 = vld [vmem:[%s7746_s2 + $0xec0] ss:$60 sps:$4 sm:$0xff]  }
 0x1e2   :  { %4172 = vmatprep.subr.bf16.mxu1 %v5845_v6  ;;  %v5886_v5 = vld [vmem:[%s7746_s2 + $0x1a0] ss:$60 sps:$4 sm:$0xff]  }
 0x1e3   :  { %v3813_v13 = vpop.f32.mrf.mxu0  ;;  %v5887_v6 = vld [vmem:[%s7746_s2 + $0xb00] ss:$60 sps:$4 sm:$0xff]  }
 0x1e4   :  { %v3854_v14 = vpop.f32.mrf.mxu1  ;;  %v3814_v16 = vadd.f32 %v3813_v13, %v3773_v12  ;;  %4132 = vmatpush2.bf16.msra.mxu0 %v5840_v7  ;;  %v5888_v7 = vld [vmem:[%s7746_s2 + $0x4e8] ss:$60 sps:$4 sm:$0xff]   ;;  %v5892_v12 = vld [vmem:[%s7746_s2 + $0x470] ss:$60 sps:$4 sm:$0xff]  }
 0x1e5   :  { %4173 = vmatpush2.bf16.msra.mxu1 %v5843_v9  ;;  %v3815_v18 = vpop.f32.mrf.mxu0  ;;  %4133 = vmatprep.subr.bf16.mxu0 %v5848_v10  ;;  %v5889_v9 = vld [vmem:[%s7746_s2 + $0xe48] ss:$60 sps:$4 sm:$0xff]   ;;  %v5893_v13 = vld [vmem:[%s7746_s2 + $0xdd0] ss:$60 sps:$4 sm:$0xff]  }
 0x1e6   :  { %v3856_v19 = vpop.f32.mrf.mxu1  ;;  %4174 = vmatprep.subr.bf16.mxu1 %v5851_v11  ;;  %v3855_v22 = vadd.f32 %v3854_v14, %v3814_v16  ;;  %v3816_v23 = vadd.f32 %v3815_v18, %v3775_v15  ;;  %v5890_v10 = vld [vmem:[%s7746_s2 + $0x128] ss:$60 sps:$4 sm:$0xff]   ;;  %v5894_v14 = vld [vmem:[%s7746_s2 + $0xb0] ss:$60 sps:$4 sm:$0xff]   ;;  %v5896_v16 = vld [vmem:[%s7746_s2 + $0x3f8] ss:$60 sps:$4 sm:$0xff]  }
 0x1e7   :  { %v3817_v24 = vpop.f32.mrf.mxu0  ;;  %v5891_v11 = vld [vmem:[%s7746_s2 + $0xa88] ss:$60 sps:$4 sm:$0xff]   ;;  %v5895_v15 = vld [vmem:[%s7746_s2 + $0xa10] ss:$60 sps:$4 sm:$0xff]   ;;  %v5900_v18 = vld [vmem:[%s7746_s2 + $0xce0] ss:$60 sps:$4 sm:$0xff]  }
 0x1e8   :  { %v3858_v25 = vpop.f32.mrf.mxu1  ;;  %v3857_v26 = vadd.f32 %v3856_v19, %v3816_v23  ;;  %4134 = vmatpush2.bf16.msra.mxu0 %v5846_v17  ;;  %v4356_v35 = vmax.f32 %v3855_v22, 0.0  ;;  %v5898_v17 = vld [vmem:[%s7746_s2 + $0x38] ss:$60 sps:$4 sm:$0xff]   ;;  %v5901_v19 = vld [vmem:[%s7746_s2 + $0x920] ss:$60 sps:$4 sm:$0xff]  }
 0x1e9   :  { %4175 = vmatpush2.bf16.msra.mxu1 %v5849_v29  ;;  %v3818_v30 = vpop.f32.mrf.mxu0  ;;  %4135 = vmatprep.subr.bf16.mxu0 %v5854_v20  ;;  %v5899_v29 = vld [vmem:[%s7746_s2 + $0x998] ss:$60 sps:$4 sm:$0xff]   ;;  %v5902_v20 = vld [vmem:[%s7746_s2 + $0x10a0] ss:$60 sps:$4 sm:$0xff]   ;;  %v5903_v22 = vld [vmem:[%s7746_s2 + $0xc68] ss:$60 sps:$4 sm:$0xff]  }
 0x1ea   :  { %v3859_v31 = vpop.f32.mrf.mxu1  ;;  %4176 = vmatprep.subr.bf16.mxu1 %v5857_v21  ;;  %v4357_v37 = vmax.f32 %v3857_v26, 0.0  ;;  %v5916_v21 = vmov 0.0   ;;  %v5904_v23 = vld [vmem:[%s7746_s2 + $0x8a8] ss:$60 sps:$4 sm:$0xff]   ;;  %v5906_v25 = vld [vmem:[%s7746_s2 + $0xbf0] ss:$60 sps:$4 sm:$0xff]  }
 0x1eb   :  { %v5905_v24 = vld [vmem:[%s7746_s2 + $0x1028] ss:$60 sps:$4 sm:$0xff]   ;;  %v5908_v26 = vld [vmem:[%s7746_s2 + $0xfb0] ss:$60 sps:$4 sm:$0xff]   ;;  %v5911_v30 = vld [vmem:[%s7746_s2 + $0xf38] ss:$60 sps:$4 sm:$0xff]  }
 0x1ec   :  { %v5049_v39 = vpack.c.bf16 %v4357_v37, %v4356_v35  ;;  %4136 = vmatpush2.bf16.msra.mxu0 %v5852_v27  ;;  %v5909_v27 = vld [vmem:[%s7746_s2 + $0xb78] ss:$60 sps:$4 sm:$0xff]  }
 0x1ed   :  { %4177 = vmatpush2.bf16.msra.mxu1 %v5855_v28  ;;  %4137 = vmatprep.subr.bf16.mxu0 %v5860_v33  ;;  %v5910_v28 = vld [vmem:[%s7746_s2 + $0x7b8] ss:$60 sps:$4 sm:$0xff]  }
 0x1ee   :  { %4178 = vmatprep.subr.bf16.mxu1 %v5863_v34  ;;  %v4427_v45 = vrot.slane %v5049_v39, %v6071_v50 }
 0x1f0   :  { %v4428_v47 = vcombine.low %v4420_v8, %v4427_v45  ;;  %4138 = vmatpush2.bf16.msra.mxu0 %v5858_v40 }
 0x1f1   :  { %4179 = vmatpush2.bf16.msra.mxu1 %v5861_v42  ;;  %4197 = vmatprep.subr.bf16.mxu0 %v5866_v43 }
 0x1f2   :  { %5053 = vmatprep.subr.bf16.mxu1 %v5867_v44  ;;  %v4485_v51 = vsel %vm7087_vm15, %v4428_v47, %v4484_v46 }
 0x1f3   :  { %4486 = vst [vmem:[%s7749_s3 + $0x8] sm:$0xff] %v4485_v51  ;;  %4140 = vmatmul.mubr.bf16.vlgmr.msra.gmra.mxu0 %v6086_v55 }
 0x1f4   :  { %4181 = vmatmul.mubr.bf16.vlgmr.msra.gmra.mxu1 %v6102_v61  ;;  %4198 = vmatpush1.bf16.msra.mxu0 %v5864_v32 }
 0x1f5   :  { %5054 = vmatpush3.bf16.msra.mxu1 %v5868_v48  ;;  %4199 = vmatprep.subr.bf16.mxu0 %v5871_v2 }
 0x1f6   :  { %5055 = vmatprep.subr.bf16.mxu1 %v5872_v49  ;;  %4221 = vmatprep.mubr.bf16.mxu0 %v5914_v1  ;;  %v5882_v1 = vld [vmem:[%s7746_s2 + $0x5d8] ss:$60 sps:$4 sm:$0xff]  }
 0x1f7   :  { %4262 = vmatprep.mubr.bf16.mxu1 %v6099_v60  ;;  %v5879_v60 = vld [vmem:[%s7746_s2 + $0xf30] ss:$60 sps:$4 sm:$0xff]  }
 0x1f8   :  { %4200 = vmatpush1.bf16.msra.mxu0 %v5869_v52 }
 0x1f9   :  { %5056 = vmatpush3.bf16.msra.mxu1 %v5873_v53  ;;  %4201 = vmatprep.subr.bf16.mxu0 %v5876_v54 }
 0x1fa   :  { %5057 = vmatprep.subr.bf16.mxu1 %v5877_v56 }
 0x1fc   :  { %4202 = vmatpush1.bf16.msra.mxu0 %v5874_v57 }
 0x1fd   :  { %5058 = vmatpush3.bf16.msra.mxu1 %v5878_v58  ;;  %4203 = vmatprep.subr.bf16.mxu0 %v5881_v59 }
 0x1fe   :  { %5059 = vmatprep.subr.bf16.mxu1 %v5882_v1 }
 0x200   :  { %4204 = vmatpush1.bf16.msra.mxu0 %v5879_v60 }
 0x201   :  { %5060 = vmatpush3.bf16.msra.mxu1 %v5883_v62  ;;  %5075 = vmatprep.subr.bf16.mxu0 %v5885_v3 }
 0x202   :  { %5061 = vmatprep.subr.bf16.mxu1 %v5884_v0 }
 0x203   :  { %5044 = vmatmul.mubr.msk.bf16.vlgmr.msra.gmra.mxu0 %vm3365_vm0, %v7181_v38 }
 0x204   :  { %5076 = vmatpush3.bf16.msra.mxu0 %v5887_v6  ;;  %4302 = vmatprep.mubr.bf16.mxu0 %v6110_v63  ;;  %v5897_v63 = vld [vmem:[%s7746_s2 + $0xd58] ss:$60 sps:$4 sm:$0xff]  }
 0x205   :  { %5062 = vmatpush3.bf16.msra.mxu1 %v5886_v5  ;;  %5077 = vmatprep.subr.bf16.mxu0 %v5889_v9 }
 0x206   :  { %5063 = vmatprep.subr.bf16.mxu1 %v5888_v7 }
 0x208   :  { %5078 = vmatpush3.bf16.msra.mxu0 %v5891_v11 }
 0x209   :  { %5064 = vmatpush3.bf16.msra.mxu1 %v5890_v10  ;;  %5079 = vmatprep.subr.bf16.mxu0 %v5893_v13 }
 0x20a   :  { %5065 = vmatprep.subr.bf16.mxu1 %v5892_v12 }
 0x20c   :  { %5080 = vmatpush3.bf16.msra.mxu0 %v5895_v15 }
 0x20d   :  { %5066 = vmatpush3.bf16.msra.mxu1 %v5894_v14  ;;  %5081 = vmatprep.subr.bf16.mxu0 %v5897_v63  ;;  %v4487_v63 = vld [vmem:[%s7749_s3 + $0x10] sm:$0xff] }
 0x20e   :  { %5067 = vmatprep.subr.bf16.mxu1 %v5896_v16 }
 0x210   :  { %5082 = vmatpush3.bf16.msra.mxu0 %v5899_v29 }
 0x211   :  { %5068 = vmatpush3.bf16.msra.mxu1 %v5898_v17  ;;  %5083 = vmatprep.subr.bf16.mxu0 %v5900_v18 }
 0x212   :  { %5102 = vmatprep.subr.bf16.mxu1 %v5916_v21 }
 0x214   :  { %4263 = vmatmul.mubr.bf16.vlgmr.msra.gmra.mxu1 %v6086_v55  ;;  %5084 = vmatpush3.bf16.msra.mxu0 %v5901_v19  ;;  %v5907_v55 = vld [vmem:[%s7746_s2 + $0x830] ss:$60 sps:$4 sm:$0xff]  }
 0x215   :  { %5103 = vmatpush3.bf16.msra.mxu1 %v5902_v20  ;;  %5085 = vmatprep.subr.bf16.mxu0 %v5903_v22 }
 0x216   :  { %5104 = vmatprep.subr.bf16.mxu1 %v5916_v21  ;;  %5110 = vmatprep.mubr.msk.bf16.mxu1 %vm5917_vm1, %v5916_v21 }
 0x218   :  { %5086 = vmatpush3.bf16.msra.mxu0 %v5904_v23 }
 0x219   :  { %5105 = vmatpush3.bf16.msra.mxu1 %v5905_v24  ;;  %5087 = vmatprep.subr.bf16.mxu0 %v5906_v25 }
 0x21a   :  { %5106 = vmatprep.subr.bf16.mxu1 %v5916_v21 }
 0x21c   :  { %5088 = vmatpush3.bf16.msra.mxu0 %v5907_v55 }
 0x21d   :  { %5107 = vmatpush3.bf16.msra.mxu1 %v5908_v26  ;;  %5089 = vmatprep.subr.bf16.mxu0 %v5909_v27 }
 0x21e   :  { %5108 = vmatprep.subr.bf16.mxu1 %v5916_v21 }
 0x220   :  { %5090 = vmatpush3.bf16.msra.mxu0 %v5910_v28 }
 0x221   :  { %5109 = vmatpush3.bf16.msra.mxu1 %v5911_v30 }
 0x223   :  { %v3895_v31 = vpop.f32.mrf.mxu0  ;;  %4303 = vmatmul.mubr.bf16.vlgmr.msra.gmra.mxu0 %v6102_v61 }
 0x224   :  { %5111 = vmatmul.mubr.msk.bf16.vlgmr.msra.gmra.mxu1 %vm3365_vm0, %v7181_v38  ;;  %v3936_v33 = vpop.f32.mrf.mxu1  ;;  %v3896_v34 = vadd.f32 %v3895_v31, %v6777_v41 }
 0x225   :  { %v3897_v35 = vpop.f32.mrf.mxu0 }
 0x226   :  { %v3938_v37 = vpop.f32.mrf.mxu1  ;;  %v3937_v39 = vadd.f32 %v3936_v33, %v3896_v34  ;;  %v3898_v40 = vadd.f32 %v3897_v35, %v6777_v41 }
 0x227   :  { %v3899_v42 = vpop.f32.mrf.mxu0 }
 0x228   :  { %v3940_v43 = vpop.f32.mrf.mxu1  ;;  %v3939_v44 = vadd.f32 %v3938_v37, %v3898_v40 }
 0x229   :  { %v3900_v8 = vpop.f32.mrf.mxu0 }
 0x22a   :  { %v3941_v45 = vpop.f32.mrf.mxu1 }
 0x233   :  { %v3977_v46 = vpop.f32.mrf.mxu0 }
 0x234   :  { %v3978_v47 = vadd.f32 %v3977_v46, %v3937_v39 }
 0x235   :  { %v3979_v32 = vpop.f32.mrf.mxu0 }
 0x236   :  { %v3980_v61 = vadd.f32 %v3979_v32, %v3939_v44  ;;  %v4358_v2 = vmax.f32 %v3978_v47, 0.0 }
 0x237   :  { %v3981_v48 = vpop.f32.mrf.mxu0 }
 0x238   :  { %v4359_v38 = vmax.f32 %v3980_v61, 0.0 }
 0x239   :  { %v3982_v49 = vpop.f32.mrf.mxu0 }
 0x23a   :  { %v5050_v51 = vpack.c.bf16 %v4359_v38, %v4358_v2 }
 0x23c   :  { %v4437_v15 = vrot.slane %v5050_v51, %v6071_v50 }
 0x264   :  { %v4018_v52 = vpop.f32.mrf.mxu1 }
 0x265   :  { %v4019_v57 = vadd.f32 %v4018_v52, %v6777_v41 }
 0x266   :  { %v4020_v53 = vpop.f32.mrf.mxu1 }
 0x267   :  { %v4021_v1 = vadd.f32 %v4020_v53, %v6777_v41 }
 0x268   :  { %v4022_v54 = vpop.f32.mrf.mxu1 }
 0x26a   :  { %v4023_v56 = vpop.f32.mrf.mxu1 }
 0x273   :  { %v4059_v58 = vpop.f32.mrf.mxu0 }
 0x274   :  { %v4100_v59 = vpop.f32.mrf.mxu1  ;;  %v4060_v60 = vadd.f32 %v4059_v58, %v4019_v57 }
 0x275   :  { %v4061_v62 = vpop.f32.mrf.mxu0 }
 0x276   :  { %v4102_v0 = vpop.f32.mrf.mxu1  ;;  %v4101_v3 = vadd.f32 %v4100_v59, %v4060_v60  ;;  %v4062_v5 = vadd.f32 %v4061_v62, %v4021_v1 }
 0x277   :  { %v4063_v6 = vpop.f32.mrf.mxu0 }
 0x278   :  { %v4104_v7 = vpop.f32.mrf.mxu1  ;;  %v4103_v9 = vadd.f32 %v4102_v0, %v4062_v5  ;;  %v4360_v12 = vmax.f32 %v4101_v3, 0.0 }
 0x279   :  { %v4064_v10 = vpop.f32.mrf.mxu0 }
 0x27a   :  { %v4105_v11 = vpop.f32.mrf.mxu1  ;;  %v4361_v13 = vmax.f32 %v4103_v9, 0.0 }
 0x27c   :  { %v5051_v14 = vpack.c.bf16 %v4361_v13, %v4360_v12 }
 0x27e   :  { %v4444_v16 = vrot.slane %v5051_v14, %v6071_v50 }
 0x280   :  { %v4445_v17 = vcombine.low %v4437_v15, %v4444_v16 }
 0x282   :  { %v4488_v29 = vsel %vm7087_vm15, %v4445_v17, %v4487_v63 }
 0x283   :  { %4489 = vst [vmem:[%s7749_s3 + $0x10] sm:$0xff] %v4488_v29 }
 0x2b3   :  { %v4141_v18 = vpop.f32.mrf.mxu0 }
 0x2b4   :  { %v4182_v19 = vpop.f32.mrf.mxu1  ;;  %v4142_v35 = vadd.f32 %v4141_v18, %v6777_v41 }
 0x2b5   :  { %v4143_v20 = vpop.f32.mrf.mxu0 }
 0x2b6   :  { %v4184_v21 = vpop.f32.mrf.mxu1  ;;  %v4144_v34 = vadd.f32 %v4143_v20, %v6777_v41  ;;  %v4183_v43 = vadd.f32 %v4182_v19, %v4142_v35 }
 0x2b7   :  { %v4145_v22 = vpop.f32.mrf.mxu0 }
 0x2b8   :  { %v4186_v23 = vpop.f32.mrf.mxu1  ;;  %v4185_v37 = vadd.f32 %v4184_v21, %v4144_v34 }
 0x2b9   :  { %v4146_v24 = vpop.f32.mrf.mxu0 }
 0x2ba   :  { %v4187_v25 = vpop.f32.mrf.mxu1 }
 0x2c3   :  { %v4223_v55 = vpop.f32.mrf.mxu0 }
 0x2c4   :  { %v4224_v46 = vadd.f32 %v4223_v55, %v4183_v43 }
 0x2c5   :  { %v4225_v26 = vpop.f32.mrf.mxu0 }
 0x2c6   :  { %v4226_v44 = vadd.f32 %v4225_v26, %v4185_v37  ;;  %v4362_v52 = vmax.f32 %v4224_v46, 0.0 }
 0x2c7   :  { %v4227_v27 = vpop.f32.mrf.mxu0 }
 0x2c8   :  { %v4363_v2 = vmax.f32 %v4226_v44, 0.0 }
 0x2c9   :  { %v4228_v28 = vpop.f32.mrf.mxu0 }
 0x2ca   :  { %v5052_v54 = vpack.c.bf16 %v4363_v2, %v4362_v52 }
 0x2cc   :  { %v4453_v58 = vrot.slane %v5052_v54, %v6071_v50 }
 0x2d4   :  { %v5069_v30 = vpop.f32.mrf.mxu1 }
 0x2d6   :  { %v5070_v31 = vpop.f32.mrf.mxu1 }
 0x2d7   :  { %v5071_v39 = vadd.f32 %v5070_v31, %v5069_v30 }
 0x2d8   :  { %v5072_v4 = vpop.f32.mrf.mxu1 }
 0x2d9   :  { %v4265_v47 = vadd.f32 %v5071_v39, %v6777_v41  ;;  %v4490_v41 = vld [vmem:[%s7749_s3 + $0x18] sm:$0x3f] }
 0x2da   :  { %v5073_v33 = vpop.f32.mrf.mxu1 }
 0x2e3   :  { %v5091_v40 = vpop.f32.mrf.mxu0 }
 0x2e4   :  { %v4344_v42 = vpop.f32.mrf.mxu1 }
 0x2e5   :  { %v5092_v8 = vpop.f32.mrf.mxu0 }
 0x2e6   :  { %v5112_v45 = vpop.f32.mrf.mxu1  ;;  %v5093_v32 = vadd.f32 %v5092_v8, %v5091_v40 }
 0x2e7   :  { %v5094_v61 = vpop.f32.mrf.mxu0 }
 0x2e8   :  { %v4347_v48 = vpop.f32.mrf.mxu1  ;;  %v4305_v38 = vadd.f32 %v5093_v32, %v4265_v47 }
 0x2e9   :  { %v5095_v49 = vpop.f32.mrf.mxu0 }
 0x2ea   :  { %v5113_v51 = vpop.f32.mrf.mxu1  ;;  %v4345_v53 = vadd.f32 %v4344_v42, %v4305_v38 }
 0x2ec   :  { %v4364_v56 = vmax.f32 %v4345_v53, 0.0 }
 0x2ee   :  { %v4379_v57 = vpack.c.bf16 %v4364_v56, %v4364_v56 }
 0x2f0   :  { %v4460_v59 = vrot.slane %v4379_v57, %v6071_v50 }
 0x2f2   :  { %v4461_v1 = vcombine.low %v4453_v58, %v4460_v59 }
 0x2f4   :  { %v4491_v60 = vsel %vm7044_vm12, %v4461_v1, %v4490_v41 }
 0x2f5   :  { %4492 = vst [vmem:[%s7749_s3 + $0x18] sm:$0x3f] %v4491_v60 }

// kernel: _forward_impl.3
= control target key start
LH: loop header
LB: loop body
LE: loop exit
PB: predicated region body
PF: predicated region fallthrough
CT: control target
= control target key end

     0   :  { %v17071_v36 = vmov 1983009808   ;;  %v280_v38 = vlaneseq  ;;  %vm1447_vm0 = vcmask 31744   ;;  %vm1451_vm1 = vcmask 1041408   ;;  %s17076_s27 = smov 124   ;;  %s23298_s2 = inlined_call_operand.vmem [shape: bf16[2700,507], index: 2, kind: input, shape index: {}]   ;;  %s23299_s0 = inlined_call_operand.vmem [shape: bf16[3,1920], index: 0, kind: input, shape index: {}]   ;;  %s23300_s3 = inlined_call_operand.vmem [shape: f32[1,507], index: 3, kind: input, shape index: {}]   ;;  %s23301_s4 = inlined_call_operand.vmem [shape: bf16[507,108], index: 4, kind: input, shape index: {}]   ;;  %s23302_s6 = inlined_call_operand.vmem [shape: bf16[108,27], index: 6, kind: input, shape index: {}]   ;;  %s23303_s9 = inlined_call_operand.vmem [shape: bf16[27,81], index: 9, kind: input, shape index: {}]   ;;  %s23304_s5 = inlined_call_operand.vmem [shape: f32[1,108], index: 5, kind: input, shape index: {}]   ;;  %s23305_s8 = inlined_call_operand.vmem [shape: bf16[54,81], index: 8, kind: input, shape index: {}]   ;;  %s23306_s7 = inlined_call_operand.vmem [shape: f32[1,27], index: 7, kind: input, shape index: {}]   ;;  %s23307_s1 = inlined_call_operand.vmem [shape: f32[2,54], index: 1, kind: input, shape index: {}]   ;;  %s23308_s11 = inlined_call_operand.vmem [shape: bf16[81,54], index: 11, kind: input, shape index: {}]   ;;  %s23309_s10 = inlined_call_operand.vmem [shape: f32[1,81], index: 10, kind: input, shape index: {}]   ;;  %s23310_s12 = inlined_call_operand.vmem [shape: f32[1,54], index: 12, kind: input, shape index: {}]   ;;  %s23311_s13 = inlined_call_operand.vmem [shape: f32[2,54], index: 13, kind: output, shape index: {}]  }
   0x1   :  { %v14917_v0 = vld [vmem:[%s23298_s2 + $0xe4] ss:$16 sps:$4 sm:$0xff]   ;;  %v14921_v2 = vld [vmem:[%s23298_s2 + $0xe0] ss:$16 sps:$4 sm:$0xff]   ;;  %v278_v37 = vunpack.c.l.s4 %v17071_v36  ;;  %vm3023_vm2 = vcmask 1045504   ;;  %vm6141_vm3 = vcmask 1044480  }
   0x2   :  { %v14919_v1 = vld [vmem:[%s23298_s2 + $0x2e4] ss:$16 sps:$4 sm:$0xff]   ;;  %1464 = vmatprep.subr.bf16.mxu0 %v14917_v0  ;;  %v14922_v3 = vld [vmem:[%s23298_s2 + $0x2e0] ss:$16 sps:$4 sm:$0xff]   ;;  %v17265_v43 = vshrl.u32 %v280_v38, 7  ;;  %vm6137_vm4 = vcmask 1006592  }
   0x3   :  { %1505 = vmatprep.subr.bf16.mxu1 %v14919_v1  ;;  %v14923_v4 = vld [vmem:[%s23298_s2 + $0xc4] ss:$16 sps:$4 sm:$0xff]   ;;  %1465 = vmatpush1.bf16.msra.mxu0 %v14921_v2  ;;  %v14927_v6 = vld [vmem:[%s23298_s2 + $0xc0] ss:$16 sps:$4 sm:$0xff]   ;;  %v279_v42 = vunpack.c.0.s8 %v278_v37  ;;  %vm17075_vm5 = vmmov 0   ;;  %vm6286_vm6 = vcmask 883712  }
   0x4   :  { %1506 = vmatpush1.bf16.msra.mxu1 %v14922_v3  ;;  %v14925_v5 = vld [vmem:[%s23298_s2 + $0x2c4] ss:$16 sps:$4 sm:$0xff]   ;;  %1466 = vmatprep.subr.bf16.mxu0 %v14923_v4  ;;  %v14928_v7 = vld [vmem:[%s23298_s2 + $0x2c0] ss:$16 sps:$4 sm:$0xff]   ;;  %vm6431_vm7 = vcmask 1042432   ;;  %vm6359_vm8 = vcmask 220160  }
   0x5   :  { %1507 = vmatprep.subr.bf16.mxu1 %v14925_v5  ;;  %v14929_v8 = vld [vmem:[%s23298_s2 + $0xa4] ss:$16 sps:$4 sm:$0xff]   ;;  %v14933_v10 = vld [vmem:[%s23298_s2 + $0xa0] ss:$16 sps:$4 sm:$0xff]   ;;  %v17283_v49 = vsub.s32 %v279_v42, %v17265_v43  ;;  %vm6857_vm9 = vcmask 1014784   ;;  %vm6427_vm10 = vcmask 441344  }
   0x6   :  { %v14931_v9 = vld [vmem:[%s23298_s2 + $0x2a4] ss:$16 sps:$4 sm:$0xff]   ;;  %v14934_v11 = vld [vmem:[%s23298_s2 + $0x2a0] ss:$16 sps:$4 sm:$0xff]   ;;  %vm6528_vm11 = vcmask 1040384   ;;  %vm6524_vm12 = vcmask 662528  }
   0x7   :  { %1467 = vmatpush1.bf16.msra.mxu0 %v14927_v6  ;;  %v14935_v12 = vld [vmem:[%s23298_s2 + $0x84] ss:$16 sps:$4 sm:$0xff]   ;;  %v14939_v14 = vld [vmem:[%s23298_s2 + $0x80] ss:$16 sps:$4 sm:$0xff]   ;;  %vm6574_vm13 = vcmask 434176  }
   0x8   :  { %1508 = vmatpush1.bf16.msra.mxu1 %v14928_v7  ;;  %1468 = vmatprep.subr.bf16.mxu0 %v14929_v8  ;;  %v14937_v13 = vld [vmem:[%s23298_s2 + $0x284] ss:$16 sps:$4 sm:$0xff]   ;;  %v14940_v15 = vld [vmem:[%s23298_s2 + $0x280] ss:$16 sps:$4 sm:$0xff]  }
   0x9   :  { %1509 = vmatprep.subr.bf16.mxu1 %v14931_v9  ;;  %v14941_v16 = vld [vmem:[%s23298_s2 + $0x64] ss:$16 sps:$4 sm:$0xff]   ;;  %v14945_v18 = vld [vmem:[%s23298_s2 + $0x60] ss:$16 sps:$4 sm:$0xff]  }
   0xa   :  { %v14943_v17 = vld [vmem:[%s23298_s2 + $0x264] ss:$16 sps:$4 sm:$0xff]   ;;  %v14946_v19 = vld [vmem:[%s23298_s2 + $0x260] ss:$16 sps:$4 sm:$0xff]  }
   0xb   :  { %1469 = vmatpush1.bf16.msra.mxu0 %v14933_v10  ;;  %v14947_v20 = vld [vmem:[%s23298_s2 + $0x44] ss:$16 sps:$4 sm:$0xff]   ;;  %v14951_v22 = vld [vmem:[%s23298_s2 + $0x40] ss:$16 sps:$4 sm:$0xff]  }
   0xc   :  { %1510 = vmatpush1.bf16.msra.mxu1 %v14934_v11  ;;  %1470 = vmatprep.subr.bf16.mxu0 %v14935_v12  ;;  %v14949_v21 = vld [vmem:[%s23298_s2 + $0x244] ss:$16 sps:$4 sm:$0xff]   ;;  %v14952_v23 = vld [vmem:[%s23298_s2 + $0x240] ss:$16 sps:$4 sm:$0xff]  }
   0xd   :  { %1511 = vmatprep.subr.bf16.mxu1 %v14937_v13  ;;  %v14953_v24 = vld [vmem:[%s23298_s2 + $0x24] ss:$16 sps:$4 sm:$0xff]   ;;  %v14957_v26 = vld [vmem:[%s23298_s2 + $0x20] ss:$16 sps:$4 sm:$0xff]  }
   0xe   :  { %v14955_v25 = vld [vmem:[%s23298_s2 + $0x224] ss:$16 sps:$4 sm:$0xff]   ;;  %v14958_v27 = vld [vmem:[%s23298_s2 + $0x220] ss:$16 sps:$4 sm:$0xff]  }
   0xf   :  { %1471 = vmatpush1.bf16.msra.mxu0 %v14939_v14  ;;  %v14959_v28 = vld [vmem:[%s23298_s2 + $0x4] ss:$16 sps:$4 sm:$0xff]   ;;  %v14963_v30 = vld [vmem:[%s23298_s2] ss:$16 sps:$4 sm:$0xff]  }
  0x10   :  { %1512 = vmatpush1.bf16.msra.mxu1 %v14940_v15  ;;  %1472 = vmatprep.subr.bf16.mxu0 %v14941_v16  ;;  %v14961_v29 = vld [vmem:[%s23298_s2 + $0x204] ss:$16 sps:$4 sm:$0xff]   ;;  %v14964_v31 = vld [vmem:[%s23298_s2 + $0x200] ss:$16 sps:$4 sm:$0xff]  }
  0x11   :  { %1513 = vmatprep.subr.bf16.mxu1 %v14943_v17  ;;  %v14965_v32 = vld [vmem:[%s23298_s2 + $0x1e4] ss:$16 sps:$4 sm:$0xff]   ;;  %v14969_v34 = vld [vmem:[%s23298_s2 + $0x1e0] ss:$16 sps:$4 sm:$0xff]  }
  0x12   :  { %v14967_v33 = vld [vmem:[%s23298_s2 + $0x3e4] ss:$16 sps:$4 sm:$0xff]   ;;  %v14970_v35 = vld [vmem:[%s23298_s2 + $0x3e0] ss:$16 sps:$4 sm:$0xff]  }
  0x13   :  { %1473 = vmatpush1.bf16.msra.mxu0 %v14945_v18  ;;  %v14971_v39 = vld [vmem:[%s23298_s2 + $0x1c4] ss:$16 sps:$4 sm:$0xff]   ;;  %v14975_v41 = vld [vmem:[%s23298_s2 + $0x1c0] ss:$16 sps:$4 sm:$0xff]   ;;  %v47_v18 = vld [vmem:[%s23299_s0 + $0x8] sm:$0x55] }
  0x14   :  { %1514 = vmatpush1.bf16.msra.mxu1 %v14946_v19  ;;  %1474 = vmatprep.subr.bf16.mxu0 %v14947_v20  ;;  %v14973_v40 = vld [vmem:[%s23298_s2 + $0x3c4] ss:$16 sps:$4 sm:$0xff]   ;;  %v14976_v44 = vld [vmem:[%s23298_s2 + $0x3c0] ss:$16 sps:$4 sm:$0xff]   ;;  %v293_v20 = vcombine.high %v47_v18, %v47_v18 }
  0x15   :  { %1515 = vmatprep.subr.bf16.mxu1 %v14949_v21  ;;  %v14977_v45 = vld [vmem:[%s23298_s2 + $0x1a4] ss:$16 sps:$4 sm:$0xff]   ;;  %v14981_v47 = vld [vmem:[%s23298_s2 + $0x1a0] ss:$16 sps:$4 sm:$0xff]   ;;  %v17391_v21 = vrot.slane %v47_v18, %v17283_v49  ;;  %v15103_v18 = vld [vmem:[%s23298_s2 + $0x4c] ss:$16 sps:$4 sm:$0xff]  }
  0x16   :  { %v14979_v46 = vld [vmem:[%s23298_s2 + $0x3a4] ss:$16 sps:$4 sm:$0xff]   ;;  %v14982_v48 = vld [vmem:[%s23298_s2 + $0x3a0] ss:$16 sps:$4 sm:$0xff]  }
  0x17   :  { %1475 = vmatpush1.bf16.msra.mxu0 %v14951_v22  ;;  %v14983_v50 = vld [vmem:[%s23298_s2 + $0x184] ss:$16 sps:$4 sm:$0xff]   ;;  %v14987_v53 = vld [vmem:[%s23298_s2 + $0x180] ss:$16 sps:$4 sm:$0xff]  }
  0x18   :  { %1516 = vmatpush1.bf16.msra.mxu1 %v14952_v23  ;;  %1476 = vmatprep.subr.bf16.mxu0 %v14953_v24  ;;  %v14985_v51 = vld [vmem:[%s23298_s2 + $0x384] ss:$16 sps:$4 sm:$0xff]   ;;  %v14988_v56 = vld [vmem:[%s23298_s2 + $0x380] ss:$16 sps:$4 sm:$0xff]  }
  0x19   :  { %1517 = vmatprep.subr.bf16.mxu1 %v14955_v25  ;;  %v46_v52 = vld [vmem:[%s23299_s0] sm:$0x55]  ;;  %v17403_v25 = vrot.slane %v293_v20, %v17283_v49  ;;  %v15101_v20 = vld [vmem:[%s23298_s2 + $0x48] ss:$16 sps:$4 sm:$0xff]  }
  0x1a   :  { %v17298_v54 = vrot.slane %v46_v52, %v17283_v49  ;;  %v276_v55 = vcombine.high %v46_v52, %v46_v52  ;;  %v14989_v57 = vld [vmem:[%s23298_s2 + $0x164] ss:$16 sps:$4 sm:$0xff]   ;;  %v14993_v61 = vld [vmem:[%s23298_s2 + $0x160] ss:$16 sps:$4 sm:$0xff]  }
  0x1b   :  { %1477 = vmatpush1.bf16.msra.mxu0 %v14957_v26  ;;  %v14991_v58 = vld [vmem:[%s23298_s2 + $0x364] ss:$16 sps:$4 sm:$0xff]   ;;  %v14994_v63 = vld [vmem:[%s23298_s2 + $0x360] ss:$16 sps:$4 sm:$0xff]   ;;  %v17407_v26 = vcombine.high %v17391_v21, %v17391_v21 }
  0x1c   :  { %1518 = vmatpush1.bf16.msra.mxu1 %v14958_v27  ;;  %1478 = vmatprep.subr.bf16.mxu0 %v14959_v28  ;;  %v17311_v59 = vcombine.high %v17298_v54, %v17298_v54  ;;  %v17314_v60 = vrot.slane %v276_v55, %v17283_v49  ;;  %v14995_v0 = vld [vmem:[%s23298_s2 + $0x144] ss:$16 sps:$4 sm:$0xff]   ;;  %v14999_v2 = vld [vmem:[%s23298_s2 + $0x140] ss:$16 sps:$4 sm:$0xff]   ;;  %v17414_v28 = vcombine.high %v17403_v25, %v17403_v25 }
  0x1d   :  { %1519 = vmatprep.subr.bf16.mxu1 %v14961_v29  ;;  %v14997_v1 = vld [vmem:[%s23298_s2 + $0x344] ss:$16 sps:$4 sm:$0xff]   ;;  %v15000_v3 = vld [vmem:[%s23298_s2 + $0x340] ss:$16 sps:$4 sm:$0xff]  }
  0x1e   :  { %1496 = vmatprep.mubr.bf16.mxu0 %v17311_v59  ;;  %v17322_v62 = vcombine.high %v17314_v60, %v17314_v60  ;;  %v15001_v4 = vld [vmem:[%s23298_s2 + $0x124] ss:$16 sps:$4 sm:$0xff]   ;;  %v15005_v6 = vld [vmem:[%s23298_s2 + $0x120] ss:$16 sps:$4 sm:$0xff]  }
  0x1f   :  { %1479 = vmatpush1.bf16.msra.mxu0 %v14963_v30  ;;  %v15003_v5 = vld [vmem:[%s23298_s2 + $0x324] ss:$16 sps:$4 sm:$0xff]   ;;  %v15006_v7 = vld [vmem:[%s23298_s2 + $0x320] ss:$16 sps:$4 sm:$0xff]  }
  0x20   :  { %1520 = vmatpush1.bf16.msra.mxu1 %v14964_v31  ;;  %1480 = vmatprep.subr.bf16.mxu0 %v14965_v32  ;;  %v15007_v8 = vld [vmem:[%s23298_s2 + $0x104] ss:$16 sps:$4 sm:$0xff]   ;;  %v15011_v10 = vld [vmem:[%s23298_s2 + $0x100] ss:$16 sps:$4 sm:$0xff]  }
  0x21   :  { %1521 = vmatprep.subr.bf16.mxu1 %v14967_v33  ;;  %1537 = vmatprep.mubr.bf16.mxu1 %v17322_v62  ;;  %v15009_v9 = vld [vmem:[%s23298_s2 + $0x304] ss:$16 sps:$4 sm:$0xff]   ;;  %v15012_v11 = vld [vmem:[%s23298_s2 + $0x300] ss:$16 sps:$4 sm:$0xff]  }
  0x22   :  { %v15016_v12 = vld [vmem:[%s23298_s2 + $0x4e4] ss:$16 sps:$4 sm:$0xff]   ;;  %v15014_v14 = vld [vmem:[%s23298_s2 + $0x4e0] ss:$16 sps:$4 sm:$0xff]  }
  0x23   :  { %1481 = vmatpush2.bf16.msra.mxu0 %v14969_v34  ;;  %v15019_v13 = vld [vmem:[%s23298_s2 + $0x6e4] ss:$16 sps:$4 sm:$0xff]   ;;  %v15017_v15 = vld [vmem:[%s23298_s2 + $0x6e0] ss:$16 sps:$4 sm:$0xff]  }
  0x24   :  { %1522 = vmatpush2.bf16.msra.mxu1 %v14970_v35  ;;  %1482 = vmatprep.subr.bf16.mxu0 %v14971_v39  ;;  %v15022_v16 = vld [vmem:[%s23298_s2 + $0x4c4] ss:$16 sps:$4 sm:$0xff]   ;;  %v15020_v19 = vld [vmem:[%s23298_s2 + $0x4c0] ss:$16 sps:$4 sm:$0xff]  }
  0x25   :  { %1523 = vmatprep.subr.bf16.mxu1 %v14973_v40  ;;  %v15025_v17 = vld [vmem:[%s23298_s2 + $0x6c4] ss:$16 sps:$4 sm:$0xff]   ;;  %v15023_v22 = vld [vmem:[%s23298_s2 + $0x6c0] ss:$16 sps:$4 sm:$0xff]  }
  0x26   :  { %v15028_v23 = vld [vmem:[%s23298_s2 + $0x4a4] ss:$16 sps:$4 sm:$0xff]   ;;  %v15026_v27 = vld [vmem:[%s23298_s2 + $0x4a0] ss:$16 sps:$4 sm:$0xff]  }
  0x27   :  { %1483 = vmatpush2.bf16.msra.mxu0 %v14975_v41  ;;  %v15031_v24 = vld [vmem:[%s23298_s2 + $0x6a4] ss:$16 sps:$4 sm:$0xff]   ;;  %v15029_v29 = vld [vmem:[%s23298_s2 + $0x6a0] ss:$16 sps:$4 sm:$0xff]  }
  0x28   :  { %1524 = vmatpush2.bf16.msra.mxu1 %v14976_v44  ;;  %1484 = vmatprep.subr.bf16.mxu0 %v14977_v45  ;;  %v15034_v30 = vld [vmem:[%s23298_s2 + $0x484] ss:$16 sps:$4 sm:$0xff]   ;;  %v15032_v32 = vld [vmem:[%s23298_s2 + $0x480] ss:$16 sps:$4 sm:$0xff]  }
  0x29   :  { %1525 = vmatprep.subr.bf16.mxu1 %v14979_v46  ;;  %v15037_v31 = vld [vmem:[%s23298_s2 + $0x684] ss:$16 sps:$4 sm:$0xff]   ;;  %v15035_v33 = vld [vmem:[%s23298_s2 + $0x680] ss:$16 sps:$4 sm:$0xff]  }
  0x2a   :  { %v15040_v34 = vld [vmem:[%s23298_s2 + $0x464] ss:$16 sps:$4 sm:$0xff]   ;;  %v15038_v36 = vld [vmem:[%s23298_s2 + $0x460] ss:$16 sps:$4 sm:$0xff]  }
  0x2b   :  { %1485 = vmatpush2.bf16.msra.mxu0 %v14981_v47  ;;  %v15043_v35 = vld [vmem:[%s23298_s2 + $0x664] ss:$16 sps:$4 sm:$0xff]   ;;  %v15041_v37 = vld [vmem:[%s23298_s2 + $0x660] ss:$16 sps:$4 sm:$0xff]  }
  0x2c   :  { %1526 = vmatpush2.bf16.msra.mxu1 %v14982_v48  ;;  %1486 = vmatprep.subr.bf16.mxu0 %v14983_v50  ;;  %v15046_v38 = vld [vmem:[%s23298_s2 + $0x444] ss:$16 sps:$4 sm:$0xff]   ;;  %v15044_v40 = vld [vmem:[%s23298_s2 + $0x440] ss:$16 sps:$4 sm:$0xff]  }
  0x2d   :  { %1527 = vmatprep.subr.bf16.mxu1 %v14985_v51  ;;  %v15049_v39 = vld [vmem:[%s23298_s2 + $0x644] ss:$16 sps:$4 sm:$0xff]   ;;  %v15047_v41 = vld [vmem:[%s23298_s2 + $0x640] ss:$16 sps:$4 sm:$0xff]  }
  0x2e   :  { %v15052_v42 = vld [vmem:[%s23298_s2 + $0x424] ss:$16 sps:$4 sm:$0xff]   ;;  %v15050_v45 = vld [vmem:[%s23298_s2 + $0x420] ss:$16 sps:$4 sm:$0xff]  }
  0x2f   :  { %1487 = vmatpush2.bf16.msra.mxu0 %v14987_v53  ;;  %v15055_v44 = vld [vmem:[%s23298_s2 + $0x624] ss:$16 sps:$4 sm:$0xff]   ;;  %v15053_v46 = vld [vmem:[%s23298_s2 + $0x620] ss:$16 sps:$4 sm:$0xff]  }
  0x30   :  { %1528 = vmatpush2.bf16.msra.mxu1 %v14988_v56  ;;  %1488 = vmatprep.subr.bf16.mxu0 %v14989_v57  ;;  %v15058_v47 = vld [vmem:[%s23298_s2 + $0x404] ss:$16 sps:$4 sm:$0xff]   ;;  %v15056_v51 = vld [vmem:[%s23298_s2 + $0x400] ss:$16 sps:$4 sm:$0xff]  }
  0x31   :  { %1529 = vmatprep.subr.bf16.mxu1 %v14991_v58  ;;  %v15061_v48 = vld [vmem:[%s23298_s2 + $0x604] ss:$16 sps:$4 sm:$0xff]   ;;  %v15059_v52 = vld [vmem:[%s23298_s2 + $0x600] ss:$16 sps:$4 sm:$0xff]  }
  0x32   :  { %v272_v50 = vld [vmem:[%s23298_s2 + $0x700] sm:$0x33] }
  0x33   :  { %1489 = vmatpush2.bf16.msra.mxu0 %v14993_v61  ;;  %v15064_v53 = vld [vmem:[%s23298_s2 + $0x5e4] ss:$16 sps:$4 sm:$0xff]   ;;  %v13389_v55 = vcombine.high %v272_v50, %v272_v50  ;;  %v13388_v56 = vcombine.low %v272_v50, %v272_v50  ;;  %v15062_v57 = vld [vmem:[%s23298_s2 + $0x5e0] ss:$16 sps:$4 sm:$0xff]   ;;  %v15142_v50 = vld [vmem:[%s23298_s2 + $0x16c] ss:$16 sps:$4 sm:$0xff]  }
  0x34   :  { %1530 = vmatpush2.bf16.msra.mxu1 %v14994_v63  ;;  %1490 = vmatprep.subr.bf16.mxu0 %v14995_v0  ;;  %v15070_v58 = vld [vmem:[%s23298_s2 + $0x5c4] ss:$16 sps:$4 sm:$0xff]   ;;  %v15073_v63 = vld [vmem:[%s23298_s2 + $0xec] ss:$16 sps:$4 sm:$0xff]   ;;  %v15068_v0 = vld [vmem:[%s23298_s2 + $0x5c0] ss:$16 sps:$4 sm:$0xff]  }
  0x35   :  { %1531 = vmatprep.subr.bf16.mxu1 %v14997_v1  ;;  %v1453_v61 = vsel %vm1451_vm1, %v13388_v56, 0  ;;  %v15071_v1 = vld [vmem:[%s23298_s2 + $0xe8] ss:$16 sps:$4 sm:$0xff]   ;;  %v15151_v56 = vld [vmem:[%s23298_s2 + $0x22c] ss:$16 sps:$4 sm:$0xff]  }
  0x37   :  { %1491 = vmatpush2.bf16.msra.mxu0 %v14999_v2  ;;  %v15076_v2 = vld [vmem:[%s23298_s2 + $0x5a4] ss:$16 sps:$4 sm:$0xff]  }
  0x38   :  { %1532 = vmatpush2.bf16.msra.mxu1 %v15000_v3  ;;  %1492 = vmatprep.subr.bf16.mxu0 %v15001_v4  ;;  %v15079_v3 = vld [vmem:[%s23298_s2 + $0xcc] ss:$16 sps:$4 sm:$0xff]   ;;  %v15074_v4 = vld [vmem:[%s23298_s2 + $0x5a0] ss:$16 sps:$4 sm:$0xff]  }
  0x39   :  { %1533 = vmatprep.subr.bf16.mxu1 %v15003_v5  ;;  %v15077_v5 = vld [vmem:[%s23298_s2 + $0xc8] ss:$16 sps:$4 sm:$0xff]  }
  0x3b   :  { %1493 = vmatpush2.bf16.msra.mxu0 %v15005_v6  ;;  %v15082_v6 = vld [vmem:[%s23298_s2 + $0x584] ss:$16 sps:$4 sm:$0xff]  }
  0x3c   :  { %1534 = vmatpush2.bf16.msra.mxu1 %v15006_v7  ;;  %1494 = vmatprep.subr.bf16.mxu0 %v15007_v8  ;;  %v15085_v7 = vld [vmem:[%s23298_s2 + $0xac] ss:$16 sps:$4 sm:$0xff]   ;;  %v15080_v8 = vld [vmem:[%s23298_s2 + $0x580] ss:$16 sps:$4 sm:$0xff]  }
  0x3d   :  { %1535 = vmatprep.subr.bf16.mxu1 %v15009_v9  ;;  %v15083_v9 = vld [vmem:[%s23298_s2 + $0xa8] ss:$16 sps:$4 sm:$0xff]  }
  0x3f   :  { %1495 = vmatpush2.bf16.msra.mxu0 %v15011_v10  ;;  %v15088_v10 = vld [vmem:[%s23298_s2 + $0x564] ss:$16 sps:$4 sm:$0xff]  }
  0x40   :  { %1536 = vmatpush2.bf16.msra.mxu1 %v15012_v11  ;;  %1546 = vmatprep.subr.bf16.mxu0 %v15016_v12  ;;  %v15086_v11 = vld [vmem:[%s23298_s2 + $0x560] ss:$16 sps:$4 sm:$0xff]   ;;  %v15089_v12 = vld [vmem:[%s23298_s2 + $0x88] ss:$16 sps:$4 sm:$0xff]  }
  0x41   :  { %1587 = vmatprep.subr.bf16.mxu1 %v15019_v13  ;;  %v15094_v13 = vld [vmem:[%s23298_s2 + $0x544] ss:$16 sps:$4 sm:$0xff]  }
  0x42   :  { %1497 = vmatmul.mubr.bf16.vlgmr.msra.gmra.mxu0 %v17298_v54 }
  0x43   :  { %1538 = vmatmul.mubr.bf16.vlgmr.msra.gmra.mxu1 %v17314_v60  ;;  %1547 = vmatpush1.bf16.msra.mxu0 %v15014_v14  ;;  %v15097_v14 = vld [vmem:[%s23298_s2 + $0x6c] ss:$16 sps:$4 sm:$0xff]  }
  0x44   :  { %1588 = vmatpush1.bf16.msra.mxu1 %v15017_v15  ;;  %1548 = vmatprep.subr.bf16.mxu0 %v15022_v16  ;;  %v15092_v15 = vld [vmem:[%s23298_s2 + $0x540] ss:$16 sps:$4 sm:$0xff]   ;;  %v15095_v16 = vld [vmem:[%s23298_s2 + $0x68] ss:$16 sps:$4 sm:$0xff]  }
  0x45   :  { %1589 = vmatprep.subr.bf16.mxu1 %v15025_v17  ;;  %1578 = vmatprep.mubr.bf16.mxu0 %v17407_v26  ;;  %v15100_v17 = vld [vmem:[%s23298_s2 + $0x524] ss:$16 sps:$4 sm:$0xff]  }
  0x46   :  { %13393 = vmatprep.mubr.msk.bf16.mxu1 %vm1447_vm0, %v17414_v28 }
  0x47   :  { %1549 = vmatpush1.bf16.msra.mxu0 %v15020_v19  ;;  %v15098_v19 = vld [vmem:[%s23298_s2 + $0x520] ss:$16 sps:$4 sm:$0xff]  }
  0x48   :  { %1590 = vmatpush1.bf16.msra.mxu1 %v15023_v22  ;;  %1550 = vmatprep.subr.bf16.mxu0 %v15028_v23  ;;  %v15106_v22 = vld [vmem:[%s23298_s2 + $0x504] ss:$16 sps:$4 sm:$0xff]   ;;  %v15109_v23 = vld [vmem:[%s23298_s2 + $0x2c] ss:$16 sps:$4 sm:$0xff]  }
  0x49   :  { %1591 = vmatprep.subr.bf16.mxu1 %v15031_v24  ;;  %v15104_v24 = vld [vmem:[%s23298_s2 + $0x500] ss:$16 sps:$4 sm:$0xff]  }
  0x4b   :  { %1551 = vmatpush1.bf16.msra.mxu0 %v15026_v27  ;;  %v15107_v27 = vld [vmem:[%s23298_s2 + $0x28] ss:$16 sps:$4 sm:$0xff]  }
  0x4c   :  { %1592 = vmatpush1.bf16.msra.mxu1 %v15029_v29  ;;  %1552 = vmatprep.subr.bf16.mxu0 %v15034_v30  ;;  %v15112_v29 = vld [vmem:[%s23298_s2 + $0xc] ss:$16 sps:$4 sm:$0xff]  }
  0x4d   :  { %1593 = vmatprep.subr.bf16.mxu1 %v15037_v31  ;;  %v15115_v30 = vld [vmem:[%s23298_s2 + $0x2ec] ss:$16 sps:$4 sm:$0xff]   ;;  %v15110_v31 = vld [vmem:[%s23298_s2 + $0x8] ss:$16 sps:$4 sm:$0xff]  }
  0x4f   :  { %1553 = vmatpush1.bf16.msra.mxu0 %v15032_v32  ;;  %v15113_v32 = vld [vmem:[%s23298_s2 + $0x2e8] ss:$16 sps:$4 sm:$0xff]  }
  0x50   :  { %1594 = vmatpush1.bf16.msra.mxu1 %v15035_v33  ;;  %1554 = vmatprep.subr.bf16.mxu0 %v15040_v34  ;;  %v15118_v33 = vld [vmem:[%s23298_s2 + $0x1ec] ss:$16 sps:$4 sm:$0xff]  }
  0x51   :  { %1595 = vmatprep.subr.bf16.mxu1 %v15043_v35  ;;  %v15121_v34 = vld [vmem:[%s23298_s2 + $0x2cc] ss:$16 sps:$4 sm:$0xff]   ;;  %v15116_v35 = vld [vmem:[%s23298_s2 + $0x1e8] ss:$16 sps:$4 sm:$0xff]  }
  0x53   :  { %1555 = vmatpush1.bf16.msra.mxu0 %v15038_v36  ;;  %v15119_v36 = vld [vmem:[%s23298_s2 + $0x2c8] ss:$16 sps:$4 sm:$0xff]  }
  0x54   :  { %1596 = vmatpush1.bf16.msra.mxu1 %v15041_v37  ;;  %1556 = vmatprep.subr.bf16.mxu0 %v15046_v38  ;;  %v15124_v37 = vld [vmem:[%s23298_s2 + $0x1cc] ss:$16 sps:$4 sm:$0xff]  }
  0x55   :  { %1597 = vmatprep.subr.bf16.mxu1 %v15049_v39  ;;  %v15127_v38 = vld [vmem:[%s23298_s2 + $0x2ac] ss:$16 sps:$4 sm:$0xff]   ;;  %v15122_v39 = vld [vmem:[%s23298_s2 + $0x1c8] ss:$16 sps:$4 sm:$0xff]  }
  0x57   :  { %1557 = vmatpush1.bf16.msra.mxu0 %v15044_v40  ;;  %v15125_v40 = vld [vmem:[%s23298_s2 + $0x2a8] ss:$16 sps:$4 sm:$0xff]  }
  0x58   :  { %1598 = vmatpush1.bf16.msra.mxu1 %v15047_v41  ;;  %1558 = vmatprep.subr.bf16.mxu0 %v15052_v42  ;;  %v15130_v41 = vld [vmem:[%s23298_s2 + $0x1ac] ss:$16 sps:$4 sm:$0xff]   ;;  %v15128_v42 = vld [vmem:[%s23298_s2 + $0x1a8] ss:$16 sps:$4 sm:$0xff]  }
  0x59   :  { %1599 = vmatprep.subr.bf16.mxu1 %v15055_v44  ;;  %v15131_v44 = vld [vmem:[%s23298_s2 + $0x288] ss:$16 sps:$4 sm:$0xff]  }
  0x5b   :  { %1559 = vmatpush1.bf16.msra.mxu0 %v15050_v45  ;;  %v15136_v45 = vld [vmem:[%s23298_s2 + $0x18c] ss:$16 sps:$4 sm:$0xff]  }
  0x5c   :  { %1600 = vmatpush1.bf16.msra.mxu1 %v15053_v46  ;;  %1560 = vmatprep.subr.bf16.mxu0 %v15058_v47  ;;  %v15139_v46 = vld [vmem:[%s23298_s2 + $0x26c] ss:$16 sps:$4 sm:$0xff]   ;;  %v15134_v47 = vld [vmem:[%s23298_s2 + $0x188] ss:$16 sps:$4 sm:$0xff]  }
  0x5d   :  { %1601 = vmatprep.subr.bf16.mxu1 %v15061_v48  ;;  %v15137_v48 = vld [vmem:[%s23298_s2 + $0x268] ss:$16 sps:$4 sm:$0xff]  }
  0x5f   :  { %1561 = vmatpush1.bf16.msra.mxu0 %v15056_v51  ;;  %v15145_v51 = vld [vmem:[%s23298_s2 + $0x24c] ss:$16 sps:$4 sm:$0xff]  }
  0x60   :  { %1602 = vmatpush1.bf16.msra.mxu1 %v15059_v52  ;;  %1562 = vmatprep.subr.bf16.mxu0 %v15064_v53  ;;  %v15140_v52 = vld [vmem:[%s23298_s2 + $0x168] ss:$16 sps:$4 sm:$0xff]  }
  0x61   :  { %13392 = vmatprep.subr.msk.bf16.mxu1 %vm1451_vm1, %v13389_v55  ;;  %v15143_v53 = vld [vmem:[%s23298_s2 + $0x248] ss:$16 sps:$4 sm:$0xff]   ;;  %v15148_v55 = vld [vmem:[%s23298_s2 + $0x14c] ss:$16 sps:$4 sm:$0xff]  }
  0x63   :  { %1563 = vmatpush2.bf16.msra.mxu0 %v15062_v57  ;;  %v15146_v57 = vld [vmem:[%s23298_s2 + $0x148] ss:$16 sps:$4 sm:$0xff]  }
  0x64   :  { %1618 = vmatpush2.bf16.msra.mxu1 %v1453_v61  ;;  %1564 = vmatprep.subr.bf16.mxu0 %v15070_v58  ;;  %v15149_v58 = vld [vmem:[%s23298_s2 + $0x228] ss:$16 sps:$4 sm:$0xff]   ;;  %v15154_v61 = vld [vmem:[%s23298_s2 + $0x12c] ss:$16 sps:$4 sm:$0xff]  }
  0x65   :  { %1628 = vmatprep.subr.bf16.mxu1 %v15073_v63  ;;  %v15157_v63 = vld [vmem:[%s23298_s2 + $0x20c] ss:$16 sps:$4 sm:$0xff]  }
  0x67   :  { %1620 = vmatmul.mubr.bf16.vlgmr.msra.gmra.mxu1 %v17403_v25  ;;  %1565 = vmatpush2.bf16.msra.mxu0 %v15068_v0  ;;  %v15152_v0 = vld [vmem:[%s23298_s2 + $0x128] ss:$16 sps:$4 sm:$0xff]  }
  0x68   :  { %1629 = vmatpush1.bf16.msra.mxu1 %v15071_v1  ;;  %1566 = vmatprep.subr.bf16.mxu0 %v15076_v2  ;;  %v15155_v1 = vld [vmem:[%s23298_s2 + $0x208] ss:$16 sps:$4 sm:$0xff]   ;;  %v15160_v2 = vld [vmem:[%s23298_s2 + $0x10c] ss:$16 sps:$4 sm:$0xff]  }
  0x69   :  { %1630 = vmatprep.subr.bf16.mxu1 %v15079_v3  ;;  %1660 = vmatprep.mubr.bf16.mxu1 %v17311_v59  ;;  %v15091_v59 = vld [vmem:[%s23298_s2 + $0x8c] ss:$16 sps:$4 sm:$0xff]  }
  0x6a   :  { %v15163_v3 = vld [vmem:[%s23298_s2 + $0x3ec] ss:$16 sps:$4 sm:$0xff]  }
  0x6b   :  { %1567 = vmatpush2.bf16.msra.mxu0 %v15074_v4  ;;  %v15158_v4 = vld [vmem:[%s23298_s2 + $0x108] ss:$16 sps:$4 sm:$0xff]  }
  0x6c   :  { %1631 = vmatpush1.bf16.msra.mxu1 %v15077_v5  ;;  %1568 = vmatprep.subr.bf16.mxu0 %v15082_v6  ;;  %v15161_v5 = vld [vmem:[%s23298_s2 + $0x3e8] ss:$16 sps:$4 sm:$0xff]   ;;  %v15166_v6 = vld [vmem:[%s23298_s2 + $0x3cc] ss:$16 sps:$4 sm:$0xff]  }
  0x6d   :  { %1632 = vmatprep.subr.bf16.mxu1 %v15085_v7  ;;  %v15169_v7 = vld [vmem:[%s23298_s2 + $0x4ec] ss:$16 sps:$4 sm:$0xff]  }
  0x6f   :  { %1569 = vmatpush2.bf16.msra.mxu0 %v15080_v8  ;;  %v15164_v8 = vld [vmem:[%s23298_s2 + $0x3c8] ss:$16 sps:$4 sm:$0xff]  }
  0x70   :  { %1633 = vmatpush1.bf16.msra.mxu1 %v15083_v9  ;;  %1570 = vmatprep.subr.bf16.mxu0 %v15088_v10  ;;  %v15167_v9 = vld [vmem:[%s23298_s2 + $0x4e8] ss:$16 sps:$4 sm:$0xff]   ;;  %v15172_v10 = vld [vmem:[%s23298_s2 + $0x3ac] ss:$16 sps:$4 sm:$0xff]  }
  0x71   :  { %1634 = vmatprep.subr.bf16.mxu1 %v15091_v59  ;;  %v15175_v59 = vld [vmem:[%s23298_s2 + $0x4cc] ss:$16 sps:$4 sm:$0xff]  }
  0x73   :  { %1571 = vmatpush2.bf16.msra.mxu0 %v15086_v11  ;;  %v15170_v11 = vld [vmem:[%s23298_s2 + $0x3a8] ss:$16 sps:$4 sm:$0xff]  }
  0x74   :  { %1635 = vmatpush1.bf16.msra.mxu1 %v15089_v12  ;;  %1572 = vmatprep.subr.bf16.mxu0 %v15094_v13  ;;  %v15173_v12 = vld [vmem:[%s23298_s2 + $0x4c8] ss:$16 sps:$4 sm:$0xff]   ;;  %v15178_v13 = vld [vmem:[%s23298_s2 + $0x38c] ss:$16 sps:$4 sm:$0xff]  }
  0x75   :  { %1636 = vmatprep.subr.bf16.mxu1 %v15097_v14  ;;  %v15176_v14 = vld [vmem:[%s23298_s2 + $0x388] ss:$16 sps:$4 sm:$0xff]  }
  0x77   :  { %1573 = vmatpush2.bf16.msra.mxu0 %v15092_v15  ;;  %v15179_v15 = vld [vmem:[%s23298_s2 + $0x4a8] ss:$16 sps:$4 sm:$0xff]  }
  0x78   :  { %1637 = vmatpush1.bf16.msra.mxu1 %v15095_v16  ;;  %1574 = vmatprep.subr.bf16.mxu0 %v15100_v17  ;;  %v15184_v16 = vld [vmem:[%s23298_s2 + $0x36c] ss:$16 sps:$4 sm:$0xff]   ;;  %v15182_v17 = vld [vmem:[%s23298_s2 + $0x368] ss:$16 sps:$4 sm:$0xff]  }
  0x79   :  { %1638 = vmatprep.subr.bf16.mxu1 %v15103_v18  ;;  %v15185_v18 = vld [vmem:[%s23298_s2 + $0x488] ss:$16 sps:$4 sm:$0xff]  }
  0x7b   :  { %1575 = vmatpush2.bf16.msra.mxu0 %v15098_v19  ;;  %v15190_v19 = vld [vmem:[%s23298_s2 + $0x34c] ss:$16 sps:$4 sm:$0xff]  }
  0x7c   :  { %1639 = vmatpush1.bf16.msra.mxu1 %v15101_v20  ;;  %1576 = vmatprep.subr.bf16.mxu0 %v15106_v22  ;;  %v15193_v20 = vld [vmem:[%s23298_s2 + $0x46c] ss:$16 sps:$4 sm:$0xff]   ;;  %v15188_v22 = vld [vmem:[%s23298_s2 + $0x348] ss:$16 sps:$4 sm:$0xff]  }
  0x7d   :  { %1640 = vmatprep.subr.bf16.mxu1 %v15109_v23  ;;  %v15191_v23 = vld [vmem:[%s23298_s2 + $0x468] ss:$16 sps:$4 sm:$0xff]  }
  0x7f   :  { %1577 = vmatpush2.bf16.msra.mxu0 %v15104_v24  ;;  %v15196_v24 = vld [vmem:[%s23298_s2 + $0x32c] ss:$16 sps:$4 sm:$0xff]  }
  0x80   :  { %1641 = vmatpush1.bf16.msra.mxu1 %v15107_v27  ;;  %1669 = vmatprep.subr.bf16.mxu0 %v15115_v30  ;;  %v15199_v27 = vld [vmem:[%s23298_s2 + $0x44c] ss:$16 sps:$4 sm:$0xff]   ;;  %v15197_v30 = vld [vmem:[%s23298_s2 + $0x448] ss:$16 sps:$4 sm:$0xff]  }
  0x81   :  { %1642 = vmatprep.subr.bf16.mxu1 %v15112_v29  ;;  %v15194_v29 = vld [vmem:[%s23298_s2 + $0x328] ss:$16 sps:$4 sm:$0xff]  }
  0x82   :  { %1579 = vmatmul.mubr.bf16.vlgmr.msra.gmra.mxu0 %v17391_v21 }
  0x83   :  { %1670 = vmatpush1.bf16.msra.mxu0 %v15113_v32  ;;  %1701 = vmatprep.mubr.bf16.mxu0 %v17322_v62  ;;  %v15133_v62 = vld [vmem:[%s23298_s2 + $0x28c] ss:$16 sps:$4 sm:$0xff]  }
  0x84   :  { %1643 = vmatpush1.bf16.msra.mxu1 %v15110_v31  ;;  %1671 = vmatprep.subr.bf16.mxu0 %v15121_v34  ;;  %v15202_v31 = vld [vmem:[%s23298_s2 + $0x30c] ss:$16 sps:$4 sm:$0xff]   ;;  %v15203_v34 = vld [vmem:[%s23298_s2 + $0x428] ss:$16 sps:$4 sm:$0xff]  }
  0x85   :  { %1644 = vmatprep.subr.bf16.mxu1 %v15118_v33  ;;  %v15205_v32 = vld [vmem:[%s23298_s2 + $0x42c] ss:$16 sps:$4 sm:$0xff]   ;;  %v15200_v33 = vld [vmem:[%s23298_s2 + $0x308] ss:$16 sps:$4 sm:$0xff]  }
  0x87   :  { %1672 = vmatpush1.bf16.msra.mxu0 %v15119_v36  ;;  %v15211_v36 = vld [vmem:[%s23298_s2 + $0x6ec] ss:$16 sps:$4 sm:$0xff]  }
  0x88   :  { %1645 = vmatpush2.bf16.msra.mxu1 %v15116_v35  ;;  %1673 = vmatprep.subr.bf16.mxu0 %v15127_v38  ;;  %v15208_v35 = vld [vmem:[%s23298_s2 + $0x40c] ss:$16 sps:$4 sm:$0xff]   ;;  %v15209_v38 = vld [vmem:[%s23298_s2 + $0x6e8] ss:$16 sps:$4 sm:$0xff]  }
  0x89   :  { %1646 = vmatprep.subr.bf16.mxu1 %v15124_v37  ;;  %v15206_v37 = vld [vmem:[%s23298_s2 + $0x408] ss:$16 sps:$4 sm:$0xff]  }
  0x8b   :  { %1674 = vmatpush1.bf16.msra.mxu0 %v15125_v40  ;;  %v15217_v40 = vld [vmem:[%s23298_s2 + $0x6cc] ss:$16 sps:$4 sm:$0xff]  }
  0x8c   :  { %1647 = vmatpush2.bf16.msra.mxu1 %v15122_v39  ;;  %1675 = vmatprep.subr.bf16.mxu0 %v15133_v62  ;;  %v15214_v39 = vld [vmem:[%s23298_s2 + $0x5ec] ss:$16 sps:$4 sm:$0xff]   ;;  %v15215_v62 = vld [vmem:[%s23298_s2 + $0x6c8] ss:$16 sps:$4 sm:$0xff]  }
  0x8d   :  { %1648 = vmatprep.subr.bf16.mxu1 %v15130_v41  ;;  %v15212_v41 = vld [vmem:[%s23298_s2 + $0x5e8] ss:$16 sps:$4 sm:$0xff]  }
  0x8f   :  { %1676 = vmatpush1.bf16.msra.mxu0 %v15131_v44  ;;  %v15218_v44 = vld [vmem:[%s23298_s2 + $0x5c8] ss:$16 sps:$4 sm:$0xff]  }
  0x90   :  { %1649 = vmatpush2.bf16.msra.mxu1 %v15128_v42  ;;  %1677 = vmatprep.subr.bf16.mxu0 %v15139_v46  ;;  %v15220_v42 = vld [vmem:[%s23298_s2 + $0x5cc] ss:$16 sps:$4 sm:$0xff]  }
  0x91   :  { %1650 = vmatprep.subr.bf16.mxu1 %v15136_v45  ;;  %v15221_v45 = vld [vmem:[%s23298_s2 + $0x6a8] ss:$16 sps:$4 sm:$0xff]   ;;  %v15226_v46 = vld [vmem:[%s23298_s2 + $0x5ac] ss:$16 sps:$4 sm:$0xff]  }
  0x93   :  { %1678 = vmatpush1.bf16.msra.mxu0 %v15137_v48  ;;  %v15227_v48 = vld [vmem:[%s23298_s2 + $0x688] ss:$16 sps:$4 sm:$0xff]  }
  0x94   :  { %1651 = vmatpush2.bf16.msra.mxu1 %v15134_v47  ;;  %1679 = vmatprep.subr.bf16.mxu0 %v15145_v51  ;;  %v15224_v47 = vld [vmem:[%s23298_s2 + $0x5a8] ss:$16 sps:$4 sm:$0xff]   ;;  %v15235_v51 = vld [vmem:[%s23298_s2 + $0x66c] ss:$16 sps:$4 sm:$0xff]  }
  0x95   :  { %1652 = vmatprep.subr.bf16.mxu1 %v15142_v50  ;;  %v15232_v50 = vld [vmem:[%s23298_s2 + $0x58c] ss:$16 sps:$4 sm:$0xff]  }
  0x97   :  { %1680 = vmatpush1.bf16.msra.mxu0 %v15143_v53  ;;  %v15233_v53 = vld [vmem:[%s23298_s2 + $0x668] ss:$16 sps:$4 sm:$0xff]  }
  0x98   :  { %1653 = vmatpush2.bf16.msra.mxu1 %v15140_v52  ;;  %1681 = vmatprep.subr.bf16.mxu0 %v15151_v56  ;;  %v15230_v52 = vld [vmem:[%s23298_s2 + $0x588] ss:$16 sps:$4 sm:$0xff]   ;;  %v15241_v56 = vld [vmem:[%s23298_s2 + $0x64c] ss:$16 sps:$4 sm:$0xff]  }
  0x99   :  { %1654 = vmatprep.subr.bf16.mxu1 %v15148_v55  ;;  %v15238_v55 = vld [vmem:[%s23298_s2 + $0x56c] ss:$16 sps:$4 sm:$0xff]  }
  0x9b   :  { %1682 = vmatpush1.bf16.msra.mxu0 %v15149_v58  ;;  %v15239_v58 = vld [vmem:[%s23298_s2 + $0x648] ss:$16 sps:$4 sm:$0xff]  }
  0x9c   :  { %1655 = vmatpush2.bf16.msra.mxu1 %v15146_v57  ;;  %1683 = vmatprep.subr.bf16.mxu0 %v15157_v63  ;;  %v15236_v57 = vld [vmem:[%s23298_s2 + $0x568] ss:$16 sps:$4 sm:$0xff]   ;;  %v15247_v63 = vld [vmem:[%s23298_s2 + $0x62c] ss:$16 sps:$4 sm:$0xff]  }
  0x9d   :  { %1656 = vmatprep.subr.bf16.mxu1 %v15154_v61  ;;  %v15244_v61 = vld [vmem:[%s23298_s2 + $0x54c] ss:$16 sps:$4 sm:$0xff]  }
  0x9f   :  { %1684 = vmatpush1.bf16.msra.mxu0 %v15155_v1  ;;  %v15245_v1 = vld [vmem:[%s23298_s2 + $0x628] ss:$16 sps:$4 sm:$0xff]  }
  0xa0   :  { %1657 = vmatpush2.bf16.msra.mxu1 %v15152_v0  ;;  %1685 = vmatprep.subr.bf16.mxu0 %v15163_v3  ;;  %v15242_v0 = vld [vmem:[%s23298_s2 + $0x548] ss:$16 sps:$4 sm:$0xff]   ;;  %v15253_v3 = vld [vmem:[%s23298_s2 + $0x60c] ss:$16 sps:$4 sm:$0xff]  }
  0xa1   :  { %1658 = vmatprep.subr.bf16.mxu1 %v15160_v2  ;;  %v15250_v2 = vld [vmem:[%s23298_s2 + $0x52c] ss:$16 sps:$4 sm:$0xff]  }
  0xa3   :  { %1686 = vmatpush2.bf16.msra.mxu0 %v15161_v5  ;;  %v273_v5 = vld [vmem:[%s23298_s2 + $0x708] sm:$0x33] }
  0xa4   :  { %1659 = vmatpush2.bf16.msra.mxu1 %v15158_v4  ;;  %1687 = vmatprep.subr.bf16.mxu0 %v15166_v6  ;;  %v1822_v4 = vld [vmem:[%s23299_s0] sm:$0x55] }
  0xa5   :  { %1710 = vmatprep.subr.bf16.mxu1 %v15169_v7  ;;  %v15259_v6 = vld [vmem:[%s23298_s2 + $0x7e4] ss:$16 sps:$4 sm:$0xff]  }
  0xa6   :  { %v17880_v7 = vld [vmem:[%s23298_s2 + $0x804] ss:$16 sps:$4 sm:$0xff]  }
  0xa7   :  { %1661 = vmatmul.mubr.bf16.vlgmr.msra.gmra.mxu1 %v17298_v54  ;;  %1688 = vmatpush2.bf16.msra.mxu0 %v15164_v8  ;;  %v15181_v54 = vld [vmem:[%s23298_s2 + $0x4ac] ss:$16 sps:$4 sm:$0xff]   ;;  %v15263_v8 = vld [vmem:[%s23298_s2 + $0x9e4] ss:$16 sps:$4 sm:$0xff]  }
  0xa8   :  { %1711 = vmatpush1.bf16.msra.mxu1 %v15167_v9  ;;  %1689 = vmatprep.subr.bf16.mxu0 %v15172_v10  ;;  %v15248_v9 = vld [vmem:[%s23298_s2 + $0x528] ss:$16 sps:$4 sm:$0xff]  }
  0xa9   :  { %1712 = vmatprep.subr.bf16.mxu1 %v15175_v59  ;;  %1742 = vmatprep.mubr.bf16.mxu1 %v17407_v26  ;;  %v15187_v26 = vld [vmem:[%s23298_s2 + $0x48c] ss:$16 sps:$4 sm:$0xff]   ;;  %v15251_v10 = vld [vmem:[%s23298_s2 + $0x608] ss:$16 sps:$4 sm:$0xff]   ;;  %v17894_v59 = vld [vmem:[%s23298_s2 + $0xa04] ss:$16 sps:$4 sm:$0xff]  }
  0xab   :  { %1690 = vmatpush2.bf16.msra.mxu0 %v15170_v11  ;;  %v2052_v11 = vcombine.high %v1822_v4, %v1822_v4 }
  0xac   :  { %1713 = vmatpush1.bf16.msra.mxu1 %v15173_v12  ;;  %1691 = vmatprep.subr.bf16.mxu0 %v15178_v13  ;;  %v15256_v12 = vld [vmem:[%s23298_s2 + $0x50c] ss:$16 sps:$4 sm:$0xff]   ;;  %v13390_v13 = vcombine.low %v273_v5, %v273_v5 }
  0xad   :  { %1714 = vmatprep.subr.bf16.mxu1 %v15181_v54  ;;  %v17902_v54 = vld [vmem:[%s23298_s2 + $0x7e0] ss:$16 sps:$4 sm:$0xff]  }
  0xaf   :  { %1692 = vmatpush2.bf16.msra.mxu0 %v15176_v14  ;;  %v17907_v14 = vld [vmem:[%s23298_s2 + $0x800] ss:$16 sps:$4 sm:$0xff]  }
  0xb0   :  { %1715 = vmatpush1.bf16.msra.mxu1 %v15179_v15  ;;  %1693 = vmatprep.subr.bf16.mxu0 %v15184_v16  ;;  %v17912_v15 = vld [vmem:[%s23298_s2 + $0x9e0] ss:$16 sps:$4 sm:$0xff]  }
  0xb1   :  { %1716 = vmatprep.subr.bf16.mxu1 %v15187_v26  ;;  %v17917_v16 = vld [vmem:[%s23298_s2 + $0xa00] ss:$16 sps:$4 sm:$0xff]   ;;  %v13391_v26 = vcombine.high %v273_v5, %v273_v5 }
  0xb3   :  { %1694 = vmatpush2.bf16.msra.mxu0 %v15182_v17  ;;  %v3078_v17 = vrot.slane %v15259_v6, 2 }
  0xb4   :  { %1717 = vmatpush1.bf16.msra.mxu1 %v15185_v18  ;;  %1695 = vmatprep.subr.bf16.mxu0 %v15190_v19  ;;  %v3086_v18 = vrot.slane %v17880_v7, 2  ;;  %v15271_v19 = vld [vmem:[%s23298_s2 + $0x7c4] ss:$16 sps:$4 sm:$0xff]  }
  0xb5   :  { %1718 = vmatprep.subr.bf16.mxu1 %v15193_v20  ;;  %v15254_v20 = vld [vmem:[%s23298_s2 + $0x508] ss:$16 sps:$4 sm:$0xff]  }
  0xb7   :  { %1696 = vmatpush2.bf16.msra.mxu0 %v15188_v22  ;;  %v3206_v22 = vrot.slane %v15263_v8, 2  ;;  %v15291_v8 = vld [vmem:[%s23298_s2 + $0x964] ss:$16 sps:$4 sm:$0xff]  }
  0xb8   :  { %1719 = vmatpush1.bf16.msra.mxu1 %v15191_v23  ;;  %1697 = vmatprep.subr.bf16.mxu0 %v15196_v24  ;;  %v3214_v23 = vrot.slane %v17894_v59, 2  ;;  %v15273_v24 = vld [vmem:[%s23298_s2 + $0x9c4] ss:$16 sps:$4 sm:$0xff]  }
  0xb9   :  { %1720 = vmatprep.subr.bf16.mxu1 %v15199_v27  ;;  %v17931_v27 = vrot.slane %v1822_v4, %v17283_v49 }
  0xbb   :  { %1698 = vmatpush2.bf16.msra.mxu0 %v15194_v29  ;;  %v17934_v29 = vrot.slane %v2052_v11, %v17283_v49 }
  0xbc   :  { %1721 = vmatpush1.bf16.msra.mxu1 %v15197_v30  ;;  %1699 = vmatprep.subr.bf16.mxu0 %v15202_v31  ;;  %v1459_v30 = vsel %vm1451_vm1, %v13390_v13, 0  ;;  %v3076_v31 = vrot.slane %v17902_v54, 2 }
  0xbd   :  { %1722 = vmatprep.subr.bf16.mxu1 %v15205_v32  ;;  %v17941_v32 = vld [vmem:[%s23298_s2 + $0x7c0] ss:$16 sps:$4 sm:$0xff]  }
  0xbf   :  { %1700 = vmatpush2.bf16.msra.mxu0 %v15200_v33  ;;  %v3084_v33 = vrot.slane %v17907_v14, 2 }
  0xc0   :  { %1723 = vmatpush1.bf16.msra.mxu1 %v15203_v34  ;;  %1751 = vmatprep.subr.bf16.mxu0 %v15211_v36  ;;  %v3204_v34 = vrot.slane %v17912_v15, 2  ;;  %v3087_v36 = vsel %vm3023_vm2, %v3078_v17, %v3086_v18  ;;  %v15294_v15 = vld [vmem:[%s23298_s2 + $0x960] ss:$16 sps:$4 sm:$0xff]  }
  0xc1   :  { %1724 = vmatprep.subr.bf16.mxu1 %v15208_v35  ;;  %v3212_v35 = vrot.slane %v17917_v16, 2  ;;  %v15376_v16 = vld [vmem:[%s23298_s2 + $0xba4] ss:$16 sps:$4 sm:$0xff]  }
  0xc2   :  { %1702 = vmatmul.mubr.bf16.vlgmr.msra.gmra.mxu0 %v17314_v60  ;;  %v15223_v60 = vld [vmem:[%s23298_s2 + $0x6ac] ss:$16 sps:$4 sm:$0xff]  }
  0xc3   :  { %1752 = vmatpush1.bf16.msra.mxu0 %v15209_v38  ;;  %13395 = vmatprep.mubr.msk.bf16.mxu0 %vm1447_vm0, %v17414_v28  ;;  %v15229_v28 = vld [vmem:[%s23298_s2 + $0x68c] ss:$16 sps:$4 sm:$0xff]   ;;  %v15276_v38 = vld [vmem:[%s23298_s2 + $0x9c0] ss:$16 sps:$4 sm:$0xff]  }
  0xc4   :  { %1725 = vmatpush1.bf16.msra.mxu1 %v15206_v37  ;;  %1753 = vmatprep.subr.bf16.mxu0 %v15217_v40  ;;  %v3070_v37 = vrot.slane %v15271_v19, 2  ;;  %v3215_v40 = vsel %vm3023_vm2, %v3206_v22, %v3214_v23  ;;  %v3174_v19 = vrot.slane %v15291_v8, 2  ;;  %v18083_v8 = vld [vmem:[%s23298_s2 + $0x8e0] ss:$16 sps:$4 sm:$0xff]  }
  0xc5   :  { %1726 = vmatprep.subr.bf16.mxu1 %v15214_v39  ;;  %v15277_v39 = vld [vmem:[%s23298_s2 + $0x7a4] ss:$16 sps:$4 sm:$0xff]  }
  0xc7   :  { %1754 = vmatpush1.bf16.msra.mxu0 %v15215_v62  ;;  %v15279_v62 = vld [vmem:[%s23298_s2 + $0x9a4] ss:$16 sps:$4 sm:$0xff]  }
  0xc8   :  { %1727 = vmatpush2.bf16.msra.mxu1 %v15212_v41  ;;  %1755 = vmatprep.subr.bf16.mxu0 %v15223_v60  ;;  %v3198_v41 = vrot.slane %v15273_v24, 2  ;;  %v2068_v60 = vcombine.high %v17934_v29, %v17934_v29  ;;  %v15299_v24 = vld [vmem:[%s23298_s2 + $0x740] ss:$16 sps:$4 sm:$0xff]  }
  0xc9   :  { %1728 = vmatprep.subr.bf16.mxu1 %v15220_v42  ;;  %v2067_v42 = vcombine.high %v17931_v27, %v17931_v27 }
  0xcb   :  { %1756 = vmatpush1.bf16.msra.mxu0 %v15221_v45  ;;  %v3085_v45 = vsel %vm3023_vm2, %v3076_v31, %v3084_v33 }
  0xcc   :  { %1729 = vmatpush2.bf16.msra.mxu1 %v15218_v44  ;;  %1757 = vmatprep.subr.bf16.mxu0 %v15229_v28  ;;  %v15281_v44 = vld [vmem:[%s23298_s2 + $0x7a0] ss:$16 sps:$4 sm:$0xff]   ;;  %v3213_v28 = vsel %vm3023_vm2, %v3204_v34, %v3212_v35 }
  0xcd   :  { %1730 = vmatprep.subr.bf16.mxu1 %v15226_v46  ;;  %v3068_v46 = vrot.slane %v17941_v32, 2 }
  0xcf   :  { %1758 = vmatpush1.bf16.msra.mxu0 %v15227_v48  ;;  %v3196_v48 = vrot.slane %v15276_v38, 2 }
  0xd0   :  { %1731 = vmatpush2.bf16.msra.mxu1 %v15224_v47  ;;  %1759 = vmatprep.subr.bf16.mxu0 %v15235_v51  ;;  %v3079_v47 = vsel %vm3023_vm2, %v3070_v37, %v3078_v17  ;;  %v15282_v51 = vld [vmem:[%s23298_s2 + $0x9a0] ss:$16 sps:$4 sm:$0xff]  }
  0xd1   :  { %1732 = vmatprep.subr.bf16.mxu1 %v15232_v50  ;;  %v3062_v50 = vrot.slane %v15277_v39, 2 }
  0xd3   :  { %1760 = vmatpush1.bf16.msra.mxu0 %v15233_v53  ;;  %v3207_v53 = vsel %vm3023_vm2, %v3198_v41, %v3206_v22  ;;  %v15297_v22 = vld [vmem:[%s23298_s2 + $0x944] ss:$16 sps:$4 sm:$0xff]  }
  0xd4   :  { %1733 = vmatpush2.bf16.msra.mxu1 %v15230_v52  ;;  %1761 = vmatprep.subr.bf16.mxu0 %v15241_v56  ;;  %v15283_v52 = vld [vmem:[%s23298_s2 + $0x784] ss:$16 sps:$4 sm:$0xff]  }
  0xd5   :  { %1734 = vmatprep.subr.bf16.mxu1 %v15238_v55  ;;  %v3190_v55 = vrot.slane %v15279_v62, 2  ;;  %v15285_v56 = vld [vmem:[%s23298_s2 + $0x984] ss:$16 sps:$4 sm:$0xff]   ;;  %v3054_v5 = vrot.slane %v15283_v52, 2 }
  0xd6   :  { %v3182_v6 = vrot.slane %v15285_v56, 2  ;;  %v15303_v62 = vld [vmem:[%s23298_s2 + $0x924] ss:$16 sps:$4 sm:$0xff]  }
  0xd7   :  { %1762 = vmatpush1.bf16.msra.mxu0 %v15239_v58  ;;  %v17989_v58 = vshrl.u32 %v2068_v60, 16  ;;  %v3199_v4 = vsel %vm3023_vm2, %v3190_v55, %v3198_v41  ;;  %v15301_v41 = vld [vmem:[%s23298_s2 + $0x724] ss:$16 sps:$4 sm:$0xff]   ;;  %v3158_v52 = vrot.slane %v15303_v62, 2 }
  0xd8   :  { %1735 = vmatpush2.bf16.msra.mxu1 %v15236_v57  ;;  %1763 = vmatprep.subr.bf16.mxu0 %v15247_v63  ;;  %v17987_v57 = vshrl.u32 %v2067_v42, 16  ;;  %v15288_v63 = vld [vmem:[%s23298_s2 + $0x980] ss:$16 sps:$4 sm:$0xff]   ;;  %v3191_v17 = vsel %vm3023_vm2, %v3182_v6, %v3190_v55  ;;  %v3183_v38 = vsel %vm3023_vm2, %v3174_v19, %v3182_v6  ;;  %v3036_v42 = vrot.slane %v15299_v24, 2  ;;  %v18078_v6 = vld [vmem:[%s23298_s2 + $0xb04] ss:$16 sps:$4 sm:$0xff]  }
  0xd9   :  { %1736 = vmatprep.subr.bf16.mxu1 %v15244_v61  ;;  %v15287_v61 = vld [vmem:[%s23298_s2 + $0x780] ss:$16 sps:$4 sm:$0xff]   ;;  %v3180_v13 = vrot.slane %v15288_v63, 2  ;;  %v15324_v24 = vld [vmem:[%s23298_s2 + $0xac4] ss:$16 sps:$4 sm:$0xff]  }
  0xda   :  { %v15312_v55 = vld [vmem:[%s23298_s2 + $0x900] ss:$16 sps:$4 sm:$0xff]  }
  0xdb   :  { %1764 = vmatpush1.bf16.msra.mxu0 %v15245_v1  ;;  %v3205_v1 = vsel %vm3023_vm2, %v3196_v48, %v3204_v34 }
  0xdc   :  { %1737 = vmatpush2.bf16.msra.mxu1 %v15242_v0  ;;  %1765 = vmatprep.subr.bf16.mxu0 %v15253_v3  ;;  %v3077_v0 = vsel %vm3023_vm2, %v3068_v46, %v3076_v31  ;;  %v3071_v3 = vsel %vm3023_vm2, %v3062_v50, %v3070_v37 }
  0xdd   :  { %1738 = vmatprep.subr.bf16.mxu1 %v15250_v2  ;;  %v3060_v2 = vrot.slane %v15281_v44, 2  ;;  %v15305_v44 = vld [vmem:[%s23298_s2 + $0x720] ss:$16 sps:$4 sm:$0xff]  }
  0xde   :  { %v3025_v56 = vrot.slane %v15305_v44, 2 }
  0xdf   :  { %1766 = vmatpush1.bf16.msra.mxu0 %v15251_v10  ;;  %v15293_v10 = vld [vmem:[%s23298_s2 + $0x760] ss:$16 sps:$4 sm:$0xff]   ;;  %v3069_v11 = vsel %vm3023_vm2, %v3060_v2, %v3068_v46 }
  0xe0   :  { %1739 = vmatpush2.bf16.msra.mxu1 %v15248_v9  ;;  %13394 = vmatprep.subr.msk.bf16.mxu0 %vm1451_vm1, %v13391_v26  ;;  %v3052_v9 = vrot.slane %v15287_v61, 2  ;;  %v3063_v26 = vsel %vm3023_vm2, %v3054_v5, %v3062_v50  ;;  %v3044_v34 = vrot.slane %v15293_v10, 2  ;;  %v15311_v61 = vld [vmem:[%s23298_s2 + $0x700] ss:$16 sps:$4 sm:$0xfc]   ;;  %v3037_v10 = vsel %vm3023_vm2, %v3025_v56, %v3036_v42 }
  0xe1   :  { %1740 = vmatprep.subr.bf16.mxu1 %v15256_v12 }
  0xe2   :  { %v3061_v31 = vsel %vm3023_vm2, %v3052_v9, %v3060_v2  ;;  %v3045_v63 = vsel %vm3023_vm2, %v3036_v42, %v3044_v34  ;;  %v3262_v42 = vrot.slane %v15324_v24, 2  ;;  %v15342_v24 = vld [vmem:[%s23298_s2 + $0xa64] ss:$16 sps:$4 sm:$0xff]  }
  0xe3   :  { %1782 = vmatpush2.bf16.msra.mxu0 %v1459_v30  ;;  %v15300_v30 = vld [vmem:[%s23298_s2 + $0x940] ss:$16 sps:$4 sm:$0xff]  }
  0xe4   :  { %1741 = vmatpush2.bf16.msra.mxu1 %v15254_v20  ;;  %3715 = vmatprep.subr.bf16.mxu0 %v3087_v36  ;;  %v15295_v20 = vld [vmem:[%s23298_s2 + $0x744] ss:$16 sps:$4 sm:$0xff]   ;;  %v3172_v36 = vrot.slane %v15294_v15, 2  ;;  %v3164_v60 = vrot.slane %v15300_v30, 2  ;;  %v3140_v30 = vrot.slane %v18083_v8, 2 }
  0xe5   :  { %3756 = vmatprep.subr.bf16.mxu1 %v3215_v40  ;;  %v3038_v39 = vrot.slane %v15295_v20, 2  ;;  %v3166_v40 = vrot.slane %v15297_v22, 2  ;;  %v3278_v22 = vrot.slane %v18078_v6, 2 }
  0xe6   :  { %1784 = vmatmul.mubr.bf16.vlgmr.msra.gmra.mxu0 %v17403_v25  ;;  %v15289_v25 = vld [vmem:[%s23298_s2 + $0x764] ss:$16 sps:$4 sm:$0xff]   ;;  %v3181_v46 = vsel %vm3023_vm2, %v3172_v36, %v3180_v13 }
  0xe7   :  { %1743 = vmatmul.mubr.bf16.vlgmr.msra.gmra.mxu1 %v17391_v21  ;;  %3716 = vmatpush1.bf16.msra.mxu0 %v3085_v45  ;;  %v3188_v21 = vrot.slane %v15282_v51, 2  ;;  %v3046_v54 = vrot.slane %v15289_v25, 2  ;;  %v3053_v45 = vsel %vm3023_vm2, %v3044_v34, %v3052_v9  ;;  %v3175_v50 = vsel %vm3023_vm2, %v3166_v40, %v3174_v19  ;;  %v18088_v9 = vld [vmem:[%s23298_s2 + $0xae0] ss:$16 sps:$4 sm:$0xff]  }
  0xe8   :  { %3757 = vmatpush1.bf16.msra.mxu1 %v3213_v28  ;;  %3717 = vmatprep.subr.bf16.mxu0 %v3079_v47  ;;  %v15306_v28 = vld [vmem:[%s23298_s2 + $0x920] ss:$16 sps:$4 sm:$0xff]   ;;  %v15307_v47 = vld [vmem:[%s23298_s2 + $0x704] ss:$16 sps:$4 sm:$0xfc]   ;;  %v3028_v51 = vrot.slane %v15301_v41, 2 }
  0xe9   :  { %3758 = vmatprep.subr.bf16.mxu1 %v3207_v53  ;;  %3747 = vmatprep.mubr.bf16.mxu0 %v17987_v57  ;;  %v3197_v12 = vsel %vm3023_vm2, %v3188_v21, %v3196_v48  ;;  %v3189_v32 = vsel %vm3023_vm2, %v3180_v13, %v3188_v21  ;;  %v3055_v37 = vsel %vm3023_vm2, %v3046_v54, %v3054_v5  ;;  %v15309_v53 = vld [vmem:[%s23298_s2 + $0x904] ss:$16 sps:$4 sm:$0xff]   ;;  %v3027_v2 = vrot.slane %v15307_v47, 2  ;;  %v15326_v34 = vld [vmem:[%s23298_s2 + $0x8c0] ss:$16 sps:$4 sm:$0xff]  }
  0xea   :  { %3788 = vmatprep.mubr.bf16.mxu1 %v17989_v58  ;;  %v3047_v48 = vsel %vm3023_vm2, %v3038_v39, %v3046_v54  ;;  %v15313_v21 = vld [vmem:[%s23298_s2 + $0x8e4] ss:$16 sps:$4 sm:$0xff]   ;;  %v3039_v25 = vsel %vm3023_vm2, %v3028_v51, %v3038_v39  ;;  %v3024_v13 = vrot.slane %v15311_v61, 2  ;;  %v3148_v54 = vrot.slane %v15312_v55, 2  ;;  %v15327_v39 = vld [vmem:[%s23298_s2 + $0xac0] ss:$16 sps:$4 sm:$0xff]  }
  0xeb   :  { %3718 = vmatpush1.bf16.msra.mxu0 %v3077_v0  ;;  %v3173_v0 = vsel %vm3023_vm2, %v3164_v60, %v3172_v36  ;;  %v15315_v5 = vld [vmem:[%s23298_s2 + $0xae4] ss:$16 sps:$4 sm:$0xff]   ;;  %v3142_v15 = vrot.slane %v15313_v21, 2  ;;  %v3132_v55 = vrot.slane %v15326_v34, 2 }
  0xec   :  { %3759 = vmatpush1.bf16.msra.mxu1 %v3205_v1  ;;  %3719 = vmatprep.subr.bf16.mxu0 %v3071_v3  ;;  %v3156_v1 = vrot.slane %v15306_v28, 2  ;;  %v3167_v3 = vsel %vm3023_vm2, %v3158_v52, %v3166_v40  ;;  %v3270_v20 = vrot.slane %v15315_v5, 2  ;;  %v3026_v36 = vsel %vm3023_vm2, %v3024_v13, %v3025_v56  ;;  %v15328_v40 = vld [vmem:[%s23298_s2 + $0x8a4] ss:$16 sps:$4 sm:$0xff]  }
  0xed   :  { %3760 = vmatprep.subr.bf16.mxu1 %v3199_v4  ;;  %v3150_v4 = vrot.slane %v15309_v53, 2  ;;  %v3149_v47 = vsel %vm3023_vm2, %v3140_v30, %v3148_v54  ;;  %v3260_v56 = vrot.slane %v15327_v39, 2  ;;  %v15334_v61 = vld [vmem:[%s23298_s2 + $0x884] ss:$16 sps:$4 sm:$0xff]  }
  0xee   :  { %v3279_v62 = vsel %vm3023_vm2, %v3270_v20, %v3278_v22  ;;  %v15336_v21 = vld [vmem:[%s23298_s2 + $0xa84] ss:$16 sps:$4 sm:$0xff]   ;;  %v3118_v13 = vrot.slane %v15334_v61, 2 }
  0xef   :  { %3720 = vmatpush1.bf16.msra.mxu0 %v3069_v11  ;;  %v18094_v11 = vld [vmem:[%s23298_s2 + $0xb00] ss:$16 sps:$4 sm:$0xff]   ;;  %v3159_v19 = vsel %vm3023_vm2, %v3150_v4, %v3158_v52  ;;  %v3151_v41 = vsel %vm3023_vm2, %v3142_v15, %v3150_v4  ;;  %v15346_v39 = vld [vmem:[%s23298_s2 + $0x844] ss:$16 sps:$4 sm:$0xff]  }
  0xf0   :  { %3761 = vmatpush1.bf16.msra.mxu1 %v3197_v12  ;;  %3721 = vmatprep.subr.bf16.mxu0 %v3063_v26  ;;  %v3165_v12 = vsel %vm3023_vm2, %v3156_v1, %v3164_v60  ;;  %v15322_v26 = vld [vmem:[%s23298_s2 + $0x8c4] ss:$16 sps:$4 sm:$0xff]  }
  0xf1   :  { %3762 = vmatprep.subr.bf16.mxu1 %v3191_v17  ;;  %v3029_v17 = vsel %vm3023_vm2, %v3027_v2, %v3028_v51  ;;  %v15330_v60 = vld [vmem:[%s23298_s2 + $0xaa4] ss:$16 sps:$4 sm:$0xff]  }
  0xf2   :  { %v3254_v2 = vrot.slane %v15330_v60, 2  ;;  %v15348_v60 = vld [vmem:[%s23298_s2 + $0xa44] ss:$16 sps:$4 sm:$0xff]  }
  0xf3   :  { %3722 = vmatpush1.bf16.msra.mxu0 %v3061_v31  ;;  %v3268_v31 = vrot.slane %v18088_v9, 2  ;;  %v15354_v61 = vld [vmem:[%s23298_s2 + $0xa24] ss:$16 sps:$4 sm:$0xff]  }
  0xf4   :  { %3763 = vmatpush1.bf16.msra.mxu1 %v3189_v32  ;;  %3723 = vmatprep.subr.bf16.mxu0 %v3055_v37  ;;  %v3276_v32 = vrot.slane %v18094_v11, 2  ;;  %v3157_v37 = vsel %vm3023_vm2, %v3148_v54, %v3156_v1  ;;  %v3126_v1 = vrot.slane %v15328_v40, 2  ;;  %v15338_v54 = vld [vmem:[%s23298_s2 + $0x880] ss:$16 sps:$4 sm:$0xff]  }
  0xf5   :  { %3764 = vmatprep.subr.bf16.mxu1 %v3183_v38  ;;  %v3134_v38 = vrot.slane %v15322_v26, 2 }
  0xf6   :  { %v3277_v52 = vsel %vm3023_vm2, %v3268_v31, %v3276_v32  ;;  %v3127_v40 = vsel %vm3023_vm2, %v3118_v13, %v3126_v1 }
  0xf7   :  { %3724 = vmatpush1.bf16.msra.mxu0 %v3053_v45  ;;  %v3143_v53 = vsel %vm3023_vm2, %v3134_v38, %v3142_v15  ;;  %v15339_v15 = vld [vmem:[%s23298_s2 + $0xa80] ss:$16 sps:$4 sm:$0xff]   ;;  %v3135_v26 = vsel %vm3023_vm2, %v3126_v1, %v3134_v38 }
  0xf8   :  { %3765 = vmatpush1.bf16.msra.mxu1 %v3181_v46  ;;  %3725 = vmatprep.subr.bf16.mxu0 %v3047_v48  ;;  %v18130_v46 = vld [vmem:[%s23298_s2 + $0x8a0] ss:$16 sps:$4 sm:$0xff]   ;;  %v3244_v38 = vrot.slane %v15339_v15, 2 }
  0xf9   :  { %3766 = vmatprep.subr.bf16.mxu1 %v3175_v50  ;;  %v15333_v48 = vld [vmem:[%s23298_s2 + $0xaa0] ss:$16 sps:$4 sm:$0xff]   ;;  %v3124_v4 = vrot.slane %v18130_v46, 2 }
  0xfa   :  { %v3252_v5 = vrot.slane %v15333_v48, 2  ;;  %v15350_v48 = vld [vmem:[%s23298_s2 + $0x840] ss:$16 sps:$4 sm:$0xff]  }
  0xfb   :  { %3726 = vmatpush1.bf16.msra.mxu0 %v3045_v63  ;;  %v3133_v34 = vsel %vm3023_vm2, %v3124_v4, %v3132_v55  ;;  %v15357_v1 = vld [vmem:[%s23298_s2 + $0xa20] ss:$16 sps:$4 sm:$0xff]  }
  0xfc   :  { %3767 = vmatpush1.bf16.msra.mxu1 %v3173_v0  ;;  %3727 = vmatprep.subr.bf16.mxu0 %v3039_v25  ;;  %v3271_v0 = vsel %vm3023_vm2, %v3262_v42, %v3270_v20  ;;  %v15340_v20 = vld [vmem:[%s23298_s2 + $0x864] ss:$16 sps:$4 sm:$0xff]  }
  0xfd   :  { %3768 = vmatprep.subr.bf16.mxu1 %v3167_v3 }
  0xff   :  { %3728 = vmatpush1.bf16.msra.mxu0 %v3037_v10  ;;  %v3141_v10 = vsel %vm3023_vm2, %v3132_v55, %v3140_v30  ;;  %v15344_v30 = vld [vmem:[%s23298_s2 + $0x860] ss:$16 sps:$4 sm:$0xff]   ;;  %v3102_v55 = vrot.slane %v15346_v39, 2 }
 0x100   :  { %3769 = vmatpush1.bf16.msra.mxu1 %v3165_v12  ;;  %3729 = vmatprep.subr.bf16.mxu0 %v3029_v17  ;;  %v3269_v12 = vsel %vm3023_vm2, %v3260_v56, %v3268_v31  ;;  %v3263_v17 = vsel %vm3023_vm2, %v3254_v2, %v3262_v42  ;;  %v15345_v31 = vld [vmem:[%s23298_s2 + $0xa60] ss:$16 sps:$4 sm:$0xff]   ;;  %v3238_v42 = vrot.slane %v15342_v24, 2 }
 0x101   :  { %3770 = vmatprep.subr.bf16.mxu1 %v3159_v19  ;;  %v3246_v19 = vrot.slane %v15336_v21, 2 }
 0x102   :  { %v1498_v44 = vpop.f32.mrf.mxu0 }
 0x103   :  { %v1539_v45 = vpop.f32.mrf.mxu1  ;;  %3730 = vmatpush1.bf16.msra.mxu0 %v3026_v36  ;;  %v3261_v36 = vsel %vm3023_vm2, %v3252_v5, %v3260_v56  ;;  %v3230_v56 = vrot.slane %v15348_v60, 2 }
 0x104   :  { %v18132_v28 = vadd.f32 %v1539_v45, %v1498_v44  ;;  %3771 = vmatpush1.bf16.msra.mxu1 %v3157_v37  ;;  %v1500_v50 = vpop.f32.mrf.mxu0  ;;  %3731 = vmatprep.subr.bf16.mxu0 %v3151_v41  ;;  %v3116_v37 = vrot.slane %v15338_v54, 2  ;;  %v3255_v41 = vsel %vm3023_vm2, %v3246_v19, %v3254_v2  ;;  %v3108_v44 = vrot.slane %v15344_v30, 2 }
 0x105   :  { %v1541_v51 = vpop.f32.mrf.mxu1  ;;  %3772 = vmatprep.subr.bf16.mxu1 %v3279_v62  ;;  %v3110_v62 = vrot.slane %v15340_v20, 2  ;;  %v3236_v45 = vrot.slane %v15345_v31, 2  ;;  %v3220_v54 = vrot.slane %v15357_v1, 2  ;;  %v15363_v20 = vld [vmem:[%s23298_s2 + $0xde4] ss:$16 sps:$4 sm:$0xff]  }
 0x106   :  { %v18145_v63 = vadd.f32 %v1541_v51, %v1500_v50  ;;  %v1502_v25 = vpop.f32.mrf.mxu0  ;;  %v3125_v46 = vsel %vm3023_vm2, %v3116_v37, %v3124_v4  ;;  %v15351_v50 = vld [vmem:[%s23298_s2 + $0xa40] ss:$16 sps:$4 sm:$0xff]   ;;  %v15352_v51 = vld [vmem:[%s23298_s2 + $0x824] ss:$16 sps:$4 sm:$0xff]   ;;  %v3117_v2 = vsel %vm3023_vm2, %v3108_v44, %v3116_v37  ;;  %v3462_v60 = vrot.slane %v15363_v20, 2 }
 0x107   :  { %v1543_v3 = vpop.f32.mrf.mxu1  ;;  %3732 = vmatpush2.bf16.msra.mxu0 %v3149_v47  ;;  %v3253_v47 = vsel %vm3023_vm2, %v3244_v38, %v3252_v5  ;;  %v3245_v21 = vsel %vm3023_vm2, %v3236_v45, %v3244_v38  ;;  %v3100_v25 = vrot.slane %v15350_v48, 2  ;;  %v3111_v4 = vsel %vm3023_vm2, %v3102_v55, %v3110_v62  ;;  %v18239_v37 = vld [vmem:[%s23298_s2 + $0xc00] ss:$16 sps:$4 sm:$0xff]  }
 0x108   :  { %3773 = vmatpush2.bf16.msra.mxu1 %v3277_v52  ;;  %v1503_v8 = vpop.f32.mrf.mxu0  ;;  %3733 = vmatprep.subr.bf16.mxu0 %v3143_v53  ;;  %v3119_v52 = vsel %vm3023_vm2, %v3110_v62, %v3118_v13  ;;  %v3247_v53 = vsel %vm3023_vm2, %v3238_v42, %v3246_v19  ;;  %v3228_v3 = vrot.slane %v15351_v50, 2  ;;  %v3239_v5 = vsel %vm3023_vm2, %v3230_v56, %v3238_v42  ;;  %v18224_v19 = vld [vmem:[%s23298_s2 + $0xc04] ss:$16 sps:$4 sm:$0xff]  }
 0x109   :  { %v1544_v9 = vpop.f32.mrf.mxu1  ;;  %3774 = vmatprep.subr.bf16.mxu1 %v3271_v0  ;;  %v15356_v0 = vld [vmem:[%s23298_s2 + $0x820] ss:$16 sps:$4 sm:$0xff]   ;;  %v3094_v8 = vrot.slane %v15352_v51, 2  ;;  %v3109_v15 = vsel %vm3023_vm2, %v3100_v25, %v3108_v44  ;;  %v18256_v62 = vld [vmem:[%s23298_s2 + $0xbc4] ss:$16 sps:$4 sm:$0xff]   ;;  %v3340_v48 = vrot.slane %v18239_v37, 2 }
 0x10a   :  { %v3222_v9 = vrot.slane %v15354_v61, 2  ;;  %v3092_v13 = vrot.slane %v15356_v0, 2  ;;  %v3229_v7 = vsel %vm3023_vm2, %v3220_v54, %v3228_v3  ;;  %v3326_v51 = vrot.slane %v18256_v62, 2  ;;  %v15375_v0 = vld [vmem:[%s23298_s2 + $0xdc0] ss:$16 sps:$4 sm:$0xff]  }
 0x10b   :  { %3734 = vmatpush2.bf16.msra.mxu0 %v3141_v10  ;;  %v2048_v10 = vld [vmem:[%s23298_s2 + $0xe00] sm:$0xff]  ;;  %v3103_v24 = vsel %vm3023_vm2, %v3094_v8, %v3102_v55  ;;  %v3095_v39 = vsel %vm3023_vm2, %v3086_v18, %v3094_v8  ;;  %v3342_v18 = vrot.slane %v18224_v19, 2  ;;  %v3221_v55 = vsel %vm3023_vm2, %v3212_v35, %v3220_v54  ;;  %v18667_v19 = vld [vmem:[%s23298_s2 + $0x908] ss:$16 sps:$4 sm:$0xff]  }
 0x10c   :  { %3775 = vmatpush2.bf16.msra.mxu1 %v3269_v12  ;;  %3735 = vmatprep.subr.bf16.mxu0 %v3135_v26  ;;  %v1823_v12 = vld [vmem:[%s23299_s0 + $0x8] sm:$0x55]  ;;  %v3237_v26 = vsel %vm3023_vm2, %v3228_v3, %v3236_v45  ;;  %v3231_v30 = vsel %vm3023_vm2, %v3222_v9, %v3230_v56  ;;  %v13621_v31 = vcombine.high %v2048_v10, %v2048_v10  ;;  %v18314_v3 = vld [vmem:[%s23298_s2 + $0xba0] ss:$16 sps:$4 sm:$0xff]   ;;  %v3452_v54 = vrot.slane %v15375_v0, 2 }
 0x10d   :  { %3776 = vmatprep.subr.bf16.mxu1 %v3263_v17  ;;  %v15359_v17 = vld [vmem:[%s23298_s2 + $0xbe4] ss:$16 sps:$4 sm:$0xff]   ;;  %v3101_v38 = vsel %vm3023_vm2, %v3092_v13, %v3100_v25  ;;  %v13620_v59 = vcombine.low %v2048_v10, %v2048_v10  ;;  %v2093_v25 = vshrl.u32 %v17934_v29, 16 }
 0x10e   :  { %v3334_v42 = vrot.slane %v15359_v17, 2  ;;  %v18265_v44 = vrot.slane %v13621_v31, 2  ;;  %v15384_v17 = vld [vmem:[%s23298_s2 + $0xd84] ss:$16 sps:$4 sm:$0xff]   ;;  %v15386_v31 = vld [vmem:[%s23298_s2 + $0xb80] ss:$16 sps:$4 sm:$0xff]  }
 0x10f   :  { %3736 = vmatpush2.bf16.msra.mxu0 %v3133_v34  ;;  %v18234_v34 = vld [vmem:[%s23298_s2 + $0xbe0] ss:$16 sps:$4 sm:$0xff]   ;;  %v18288_v56 = vrot.slane %v13620_v59, 2  ;;  %v3438_v59 = vrot.slane %v15384_v17, 2  ;;  %v15402_v17 = vld [vmem:[%s23298_s2 + $0xd24] ss:$16 sps:$4 sm:$0xff]  }
 0x110   :  { %3777 = vmatpush2.bf16.msra.mxu1 %v3261_v36  ;;  %3737 = vmatprep.subr.bf16.mxu0 %v3127_v40  ;;  %v2069_v36 = vcombine.high %v1823_v12, %v1823_v12  ;;  %v3223_v40 = vsel %vm3023_vm2, %v3214_v23, %v3222_v9  ;;  %v18263_v23 = vld [vmem:[%s23298_s2 + $0xdc4] ss:$16 sps:$4 sm:$0xff]   ;;  %v3343_v1 = vsel %vm3023_vm2, %v3334_v42, %v3342_v18 }
 0x111   :  { %3778 = vmatprep.subr.bf16.mxu1 %v3255_v41  ;;  %v18251_v41 = vld [vmem:[%s23298_s2 + $0xde0] ss:$16 sps:$4 sm:$0xff]   ;;  %v3454_v61 = vrot.slane %v18263_v23, 2  ;;  %v3471_v14 = vsel %vm3023_vm2, %v3462_v60, %v18265_v44  ;;  %v15388_v23 = vld [vmem:[%s23298_s2 + $0xb64] ss:$16 sps:$4 sm:$0xff]  }
 0x112   :  { %v18268_v45 = vrot.slane %v2069_v36, %v17283_v49  ;;  %v3460_v50 = vrot.slane %v18251_v41, 2  ;;  %v15387_v36 = vld [vmem:[%s23298_s2 + $0xd80] ss:$16 sps:$4 sm:$0xff]  }
 0x113   :  { %3738 = vmatpush2.bf16.msra.mxu0 %v3125_v46  ;;  %v18271_v46 = vrot.slane %v1823_v12, %v17283_v49  ;;  %v3335_v12 = vsel %vm3023_vm2, %v3326_v51, %v3334_v42 }
 0x114   :  { %3779 = vmatpush2.bf16.msra.mxu1 %v3253_v47  ;;  %3739 = vmatprep.subr.bf16.mxu0 %v3119_v52  ;;  %v3332_v47 = vrot.slane %v18234_v34, 2  ;;  %v18280_v52 = vld [vmem:[%s23298_s2 + $0xbc0] ss:$16 sps:$4 sm:$0xff]   ;;  %v2085_v35 = vcombine.high %v18268_v45, %v18268_v45  ;;  %v3469_v10 = vsel %vm3023_vm2, %v3460_v50, %v18288_v56 }
 0x115   :  { %3780 = vmatprep.subr.bf16.mxu1 %v3247_v53  ;;  %v3093_v53 = vsel %vm3023_vm2, %v3084_v33, %v3092_v13  ;;  %v15378_v33 = vld [vmem:[%s23298_s2 + $0xda4] ss:$16 sps:$4 sm:$0xff]   ;;  %v3324_v9 = vrot.slane %v18280_v52, 2  ;;  %v3463_v13 = vsel %vm3023_vm2, %v3454_v61, %v3462_v60 }
 0x116   :  { %v3341_v8 = vsel %vm3023_vm2, %v3332_v47, %v3340_v48  ;;  %v18337_v20 = vshrl.u32 %v2085_v35, 16  ;;  %v15390_v60 = vld [vmem:[%s23298_s2 + $0xd64] ss:$16 sps:$4 sm:$0xff]  }
 0x117   :  { %3740 = vmatpush2.bf16.msra.mxu0 %v3117_v2  ;;  %v2084_v2 = vcombine.high %v18271_v46, %v18271_v46  ;;  %v3333_v34 = vsel %vm3023_vm2, %v3324_v9, %v3332_v47  ;;  %v15394_v52 = vld [vmem:[%s23298_s2 + $0xb44] ss:$16 sps:$4 sm:$0xff]   ;;  %v3430_v35 = vrot.slane %v15390_v60, 2  ;;  %v15408_v60 = vld [vmem:[%s23298_s2 + $0xd00] ss:$16 sps:$4 sm:$0xff]  }
 0x118   :  { %3781 = vmatpush2.bf16.msra.mxu1 %v3245_v21  ;;  %3741 = vmatprep.subr.bf16.mxu0 %v3111_v4  ;;  %v2087_v21 = vshrl.u32 %v17931_v27, 16  ;;  %v18319_v4 = vld [vmem:[%s23298_s2 + $0xda0] ss:$16 sps:$4 sm:$0xff]   ;;  %v15539_v27 = vld [vmem:[%s23298_s2 + $0xa4c] ss:$16 sps:$4 sm:$0xff]  }
 0x119   :  { %3782 = vmatprep.subr.bf16.mxu1 %v3239_v5  ;;  %v18324_v5 = vld [vmem:[%s23298_s2 + $0xb84] ss:$16 sps:$4 sm:$0xff]   ;;  %v3444_v41 = vrot.slane %v18319_v4, 2  ;;  %v15399_v4 = vld [vmem:[%s23298_s2 + $0xd40] ss:$16 sps:$4 sm:$0xff]  }
 0x11a   :  { %v3310_v62 = vrot.slane %v18324_v5, 2 }
 0x11b   :  { %3742 = vmatpush2.bf16.msra.mxu0 %v3109_v15  ;;  %v3318_v15 = vrot.slane %v15376_v16, 2  ;;  %v3453_v0 = vsel %vm3023_vm2, %v3444_v41, %v3452_v54 }
 0x11c   :  { %3783 = vmatpush2.bf16.msra.mxu1 %v3237_v26  ;;  %3743 = vmatprep.subr.bf16.mxu0 %v3103_v24  ;;  %v3446_v26 = vrot.slane %v15378_v33, 2  ;;  %v18339_v24 = vshrl.u32 %v2084_v2, 16  ;;  %v3302_v33 = vrot.slane %v15388_v23, 2  ;;  %v15396_v2 = vld [vmem:[%s23298_s2 + $0xd44] ss:$16 sps:$4 sm:$0xff]  }
 0x11d   :  { %3784 = vmatprep.subr.bf16.mxu1 %v3231_v30  ;;  %v15406_v23 = vld [vmem:[%s23298_s2 + $0xd04] ss:$16 sps:$4 sm:$0xff]  }
 0x11e   :  { %v3455_v42 = vsel %vm3023_vm2, %v3446_v26, %v3454_v61  ;;  %v3447_v16 = vsel %vm3023_vm2, %v3438_v59, %v3446_v26  ;;  %v15400_v26 = vld [vmem:[%s23298_s2 + $0xb24] ss:$16 sps:$4 sm:$0xff]  }
 0x11f   :  { %3744 = vmatpush2.bf16.msra.mxu0 %v3101_v38 }
 0x120   :  { %3785 = vmatpush2.bf16.msra.mxu1 %v3229_v7  ;;  %3745 = vmatprep.subr.bf16.mxu0 %v3095_v39  ;;  %v3461_v39 = vsel %vm3023_vm2, %v3452_v54, %v3460_v50  ;;  %v3327_v7 = vsel %vm3023_vm2, %v3318_v15, %v3326_v51  ;;  %v15392_v50 = vld [vmem:[%s23298_s2 + $0xb60] ss:$16 sps:$4 sm:$0xff]   ;;  %v3439_v54 = vsel %vm3023_vm2, %v3430_v35, %v3438_v59  ;;  %v3414_v59 = vrot.slane %v15402_v17, 2 }
 0x121   :  { %3786 = vmatprep.subr.bf16.mxu1 %v3223_v40  ;;  %v3316_v40 = vrot.slane %v18314_v3, 2  ;;  %v15393_v51 = vld [vmem:[%s23298_s2 + $0xd60] ss:$16 sps:$4 sm:$0xff]  }
 0x122   :  { %v15398_v3 = vld [vmem:[%s23298_s2 + $0xb40] ss:$16 sps:$4 sm:$0xff]  }
 0x123   :  { %3746 = vmatpush2.bf16.msra.mxu0 %v3093_v53  ;;  %v3308_v53 = vrot.slane %v15386_v31, 2  ;;  %v3325_v61 = vsel %vm3023_vm2, %v3316_v40, %v3324_v9  ;;  %v3300_v9 = vrot.slane %v15392_v50, 2  ;;  %v15404_v31 = vld [vmem:[%s23298_s2 + $0xb20] ss:$16 sps:$4 sm:$0xff]  }
 0x124   :  { %3787 = vmatpush2.bf16.msra.mxu1 %v3221_v55  ;;  %3797 = vmatprep.subr.bf16.mxu0 %v3343_v1  ;;  %v3436_v1 = vrot.slane %v15387_v36, 2 }
 0x125   :  { %3838 = vmatprep.subr.bf16.mxu1 %v3471_v14  ;;  %v3319_v14 = vsel %vm3023_vm2, %v3310_v62, %v3318_v15  ;;  %v3317_v5 = vsel %vm3023_vm2, %v3308_v53, %v3316_v40  ;;  %v3422_v15 = vrot.slane %v15396_v2, 2  ;;  %v3309_v36 = vsel %vm3023_vm2, %v3300_v9, %v3308_v53 }
 0x126   :  { %3748 = vmatmul.mubr.bf16.vlgmr.msra.gmra.mxu0 %v2087_v21  ;;  %v3292_v40 = vrot.slane %v15398_v3, 2  ;;  %v3404_v3 = vrot.slane %v15408_v60, 2 }
 0x127   :  { %v18341_v30 = vpop.f32.mrf.mxu1  ;;  %3789 = vmatmul.mubr.bf16.vlgmr.msra.gmra.mxu1 %v2093_v25  ;;  %3798 = vmatpush1.bf16.msra.mxu0 %v3341_v8  ;;  %v3445_v8 = vsel %vm3023_vm2, %v3436_v1, %v3444_v41  ;;  %v3420_v41 = vrot.slane %v15399_v4, 2 }
 0x128   :  { %3839 = vmatpush1.bf16.msra.mxu1 %v3469_v10  ;;  %3799 = vmatprep.subr.bf16.mxu0 %v3335_v12  ;;  %v3428_v10 = vrot.slane %v15393_v51, 2  ;;  %v3294_v12 = vrot.slane %v15394_v52, 2  ;;  %v3284_v51 = vrot.slane %v15404_v31, 2 }
 0x129   :  { %v18354_v38 = vpop.f32.mrf.mxu1  ;;  %3840 = vmatprep.subr.bf16.mxu1 %v3463_v13  ;;  %13625 = vmatprep.mubr.msk.bf16.mxu1 %vm1447_vm0, %v18337_v20  ;;  %v3311_v13 = vsel %vm3023_vm2, %v3302_v33, %v3310_v62 }
 0x12a   :  { %3829 = vmatprep.mubr.bf16.mxu0 %v18339_v24  ;;  %v3303_v62 = vsel %vm3023_vm2, %v3294_v12, %v3302_v33  ;;  %v3429_v50 = vsel %vm3023_vm2, %v3420_v41, %v3428_v10  ;;  %v18442_v33 = vld [vmem:[%s23298_s2 + $0x80c] ss:$16 sps:$4 sm:$0xff]   ;;  %v3285_v6 = vsel %vm3023_vm2, %v3276_v32, %v3284_v51 }
 0x12b   :  { %v1625_v47 = vpop.f32.mrf.mxu1  ;;  %3800 = vmatpush1.bf16.msra.mxu0 %v3333_v34  ;;  %v15405_v34 = vld [vmem:[%s23298_s2 + $0xd20] ss:$16 sps:$4 sm:$0xff]   ;;  %v3090_v32 = vrot.slane %v18442_v33, 2 }
 0x12c   :  { %3841 = vmatpush1.bf16.msra.mxu1 %v3461_v39  ;;  %3801 = vmatprep.subr.bf16.mxu0 %v3327_v7  ;;  %v3437_v39 = vsel %vm3023_vm2, %v3428_v10, %v3436_v1  ;;  %v3431_v7 = vsel %vm3023_vm2, %v3422_v15, %v3430_v35  ;;  %v3301_v47 = vsel %vm3023_vm2, %v3292_v40, %v3300_v9  ;;  %v3412_v52 = vrot.slane %v15405_v34, 2  ;;  %v15411_v1 = vld [vmem:[%s23298_s2 + $0xce0] ss:$16 sps:$4 sm:$0xff]   ;;  %v18458_v10 = vld [vmem:[%s23298_s2 + $0x7e8] ss:$16 sps:$4 sm:$0xff]  }
 0x12d   :  { %v1626_v55 = vpop.f32.mrf.mxu1  ;;  %3842 = vmatprep.subr.bf16.mxu1 %v3455_v42  ;;  %v3286_v42 = vrot.slane %v15400_v26, 2  ;;  %v3293_v35 = vsel %vm3023_vm2, %v3284_v51, %v3292_v40  ;;  %v18453_v9 = vld [vmem:[%s23298_s2 + $0xcc0] ss:$16 sps:$4 sm:$0xff]  }
 0x12e   :  { %v3423_v55 = vsel %vm3023_vm2, %v3414_v59, %v3422_v15  ;;  %v3421_v2 = vsel %vm3023_vm2, %v3412_v52, %v3420_v41  ;;  %v3413_v15 = vsel %vm3023_vm2, %v3404_v3, %v3412_v52  ;;  %v18486_v34 = vld [vmem:[%s23298_s2 + $0xca0] ss:$16 sps:$4 sm:$0xff]  }
 0x12f   :  { %3802 = vmatpush1.bf16.msra.mxu0 %v3325_v61  ;;  %v3295_v53 = vsel %vm3023_vm2, %v3286_v42, %v3294_v12  ;;  %v3406_v61 = vrot.slane %v15406_v23, 2  ;;  %v3287_v4 = vsel %vm3023_vm2, %v3278_v22, %v3286_v42  ;;  %v18463_v12 = vld [vmem:[%s23298_s2 + $0x808] ss:$16 sps:$4 sm:$0xff]   ;;  %v3396_v22 = vrot.slane %v15411_v1, 2  ;;  %v18506_v42 = vld [vmem:[%s23298_s2 + $0x7ac] ss:$16 sps:$4 sm:$0xff]  }
 0x130   :  { %3843 = vmatpush1.bf16.msra.mxu1 %v3453_v0  ;;  %3803 = vmatprep.subr.bf16.mxu0 %v3319_v14  ;;  %v15409_v0 = vld [vmem:[%s23298_s2 + $0xce4] ss:$16 sps:$4 sm:$0xff]   ;;  %v3088_v60 = vrot.slane %v18463_v12, 2  ;;  %v3380_v1 = vrot.slane %v18486_v34, 2 }
 0x131   :  { %3844 = vmatprep.subr.bf16.mxu1 %v3447_v16  ;;  %v18432_v14 = vld [vmem:[%s23298_s2 + $0xcc4] ss:$16 sps:$4 sm:$0xff]   ;;  %v18437_v16 = vld [vmem:[%s23298_s2 + $0x7ec] ss:$16 sps:$4 sm:$0xff]   ;;  %v3405_v41 = vsel %vm3023_vm2, %v3396_v22, %v3404_v3 }
 0x132   :  { %v3390_v26 = vrot.slane %v18432_v14, 2  ;;  %v3082_v11 = vrot.slane %v18437_v16, 2 }
 0x133   :  { %3804 = vmatpush1.bf16.msra.mxu0 %v3317_v5  ;;  %v3415_v5 = vsel %vm3023_vm2, %v3406_v61, %v3414_v59 }
 0x134   :  { %3845 = vmatpush1.bf16.msra.mxu1 %v3445_v8  ;;  %3805 = vmatprep.subr.bf16.mxu0 %v3311_v13  ;;  %v3398_v8 = vrot.slane %v15409_v0, 2  ;;  %v18471_v13 = vld [vmem:[%s23298_s2 + $0xca4] ss:$16 sps:$4 sm:$0xff]   ;;  %v3091_v23 = vsel %vm3023_vm2, %v3082_v11, %v3090_v32 }
 0x135   :  { %3846 = vmatprep.subr.bf16.mxu1 %v3439_v54  ;;  %v18476_v54 = vld [vmem:[%s23298_s2 + $0x7cc] ss:$16 sps:$4 sm:$0xff]   ;;  %v3382_v51 = vrot.slane %v18471_v13, 2 }
 0x136   :  { %v3407_v17 = vsel %vm3023_vm2, %v3398_v8, %v3406_v61  ;;  %v3074_v52 = vrot.slane %v18476_v54, 2 }
 0x137   :  { %3806 = vmatpush1.bf16.msra.mxu0 %v3309_v36  ;;  %v18491_v36 = vld [vmem:[%s23298_s2 + $0x7c8] ss:$16 sps:$4 sm:$0xff]  }
 0x138   :  { %3847 = vmatpush1.bf16.msra.mxu1 %v3437_v39  ;;  %3807 = vmatprep.subr.bf16.mxu0 %v3303_v62  ;;  %v18496_v39 = vld [vmem:[%s23298_s2 + $0xc84] ss:$16 sps:$4 sm:$0xff]   ;;  %v3704_v62 = vsel %vm1451_vm1, %v18288_v56, 0  ;;  %v3080_v56 = vrot.slane %v18458_v10, 2  ;;  %v3072_v14 = vrot.slane %v18491_v36, 2  ;;  %v3083_v3 = vsel %vm3023_vm2, %v3074_v52, %v3082_v11 }
 0x139   :  { %3848 = vmatprep.subr.bf16.mxu1 %v3431_v7  ;;  %v3388_v7 = vrot.slane %v18453_v9, 2  ;;  %v3374_v16 = vrot.slane %v18496_v39, 2  ;;  %v15438_v10 = vld [vmem:[%s23298_s2 + $0xc60] ss:$16 sps:$4 sm:$0xff]   ;;  %v15445_v39 = vld [vmem:[%s23298_s2 + $0x768] ss:$16 sps:$4 sm:$0xff]  }
 0x13a   :  { %v3089_v0 = vsel %vm3023_vm2, %v3080_v56, %v3088_v60  ;;  %v3081_v13 = vsel %vm3023_vm2, %v3072_v14, %v3080_v56  ;;  %v15444_v36 = vld [vmem:[%s23298_s2 + $0xc40] ss:$16 sps:$4 sm:$0xff]  }
 0x13b   :  { %3808 = vmatpush1.bf16.msra.mxu0 %v3301_v47  ;;  %v3383_v11 = vsel %vm3023_vm2, %v3374_v16, %v3382_v51 }
 0x13c   :  { %3849 = vmatpush1.bf16.msra.mxu1 %v3429_v50  ;;  %3809 = vmatprep.subr.bf16.mxu0 %v3295_v53 }
 0x13d   :  { %3850 = vmatprep.subr.bf16.mxu1 %v3423_v55  ;;  %v2105_v55 = vshrl.u32 %v18268_v45, 16  ;;  %v15616_v45 = vld [vmem:[%s23298_s2 + $0x10b0] ss:$16 sps:$4 sm:$0xff]  }
 0x13f   :  { %3810 = vmatpush1.bf16.msra.mxu0 %v3293_v35 }
 0x140   :  { %3851 = vmatpush1.bf16.msra.mxu1 %v3421_v2  ;;  %3811 = vmatprep.subr.bf16.mxu0 %v3287_v4  ;;  %v3391_v2 = vsel %vm3023_vm2, %v3382_v51, %v3390_v26  ;;  %v3066_v4 = vrot.slane %v18506_v42, 2 }
 0x141   :  { %3852 = vmatprep.subr.bf16.mxu1 %v3415_v5  ;;  %v15434_v5 = vld [vmem:[%s23298_s2 + $0xc64] ss:$16 sps:$4 sm:$0xff]  }
 0x142   :  { %v1580_v31 = vpop.f32.mrf.mxu0 }
 0x143   :  { %v1581_v40 = vadd.f32 %v1580_v31, %v18132_v28  ;;  %3812 = vmatpush1.bf16.msra.mxu0 %v3285_v6  ;;  %v3399_v28 = vsel %vm3023_vm2, %v3390_v26, %v3398_v8  ;;  %v15436_v8 = vld [vmem:[%s23298_s2 + $0x78c] ss:$16 sps:$4 sm:$0xff]   ;;  %v15439_v6 = vld [vmem:[%s23298_s2 + $0x788] ss:$16 sps:$4 sm:$0xff]   ;;  %v3366_v31 = vrot.slane %v15434_v5, 2 }
 0x144   :  { %3853 = vmatpush1.bf16.msra.mxu1 %v3413_v15  ;;  %v1582_v59 = vpop.f32.mrf.mxu0  ;;  %3813 = vmatprep.subr.bf16.mxu0 %v3407_v17  ;;  %v15440_v15 = vld [vmem:[%s23298_s2 + $0xc44] ss:$16 sps:$4 sm:$0xff]   ;;  %v15442_v26 = vld [vmem:[%s23298_s2 + $0x76c] ss:$16 sps:$4 sm:$0xff]   ;;  %v3075_v17 = vsel %vm3023_vm2, %v3066_v4, %v3074_v52  ;;  %v3058_v34 = vrot.slane %v15436_v8, 2  ;;  %v3056_v42 = vrot.slane %v15439_v6, 2 }
 0x145   :  { %13624 = vmatprep.subr.msk.bf16.mxu1 %vm1451_vm1, %v18265_v44  ;;  %v18517_v47 = vadd.f32 %v18341_v30, %v1581_v40  ;;  %v1583_v50 = vadd.f32 %v1582_v59, %v18145_v63  ;;  %v18525_v44 = vld [vmem:[%s23298_s2 + $0xc80] ss:$16 sps:$4 sm:$0xff]   ;;  %v3397_v30 = vsel %vm3023_vm2, %v3388_v7, %v3396_v22  ;;  %v3389_v22 = vsel %vm3023_vm2, %v3380_v1, %v3388_v7  ;;  %v15457_v5 = vld [vmem:[%s23298_s2 + $0x9ec] ss:$16 sps:$4 sm:$0xff]  }
 0x146   :  { %v1584_v53 = vpop.f32.mrf.mxu0  ;;  %v3372_v9 = vrot.slane %v18525_v44, 2  ;;  %v3364_v40 = vrot.slane %v15438_v10, 2  ;;  %v18589_v59 = vld [vmem:[%s23298_s2 + $0xc20] ss:$16 sps:$4 sm:$0xff]   ;;  %v3067_v56 = vsel %vm3023_vm2, %v3058_v34, %v3066_v4  ;;  %v3050_v51 = vrot.slane %v15442_v26, 2 }
 0x147   :  { %v18529_v61 = vadd.f32 %v18354_v38, %v1583_v50  ;;  %3814 = vmatpush2.bf16.msra.mxu0 %v3405_v41  ;;  %v15433_v38 = vld [vmem:[%s23298_s2 + $0x7a8] ss:$16 sps:$4 sm:$0xff]   ;;  %v15446_v41 = vld [vmem:[%s23298_s2 + $0xc24] ss:$16 sps:$4 sm:$0xff]   ;;  %v3358_v50 = vrot.slane %v15440_v15, 2  ;;  %v3356_v53 = vrot.slane %v15444_v36, 2 }
 0x148   :  { %3869 = vmatpush2.bf16.msra.mxu1 %v3704_v62  ;;  %v1585_v63 = vpop.f32.mrf.mxu0  ;;  %3815 = vmatprep.subr.bf16.mxu0 %v3399_v28  ;;  %v3064_v54 = vrot.slane %v15433_v38, 2  ;;  %v15448_v62 = vld [vmem:[%s23298_s2 + $0x74c] ss:$16 sps:$4 sm:$0xff]   ;;  %v18594_v28 = vld [vmem:[%s23298_s2 + $0x748] ss:$16 sps:$4 sm:$0xff]   ;;  %v3373_v52 = vsel %vm3023_vm2, %v3364_v40, %v3372_v9 }
 0x149   :  { %3879 = vmatprep.subr.bf16.mxu1 %v3091_v23  ;;  %v1796_v35 = vcombine.low %v18517_v47, %v18529_v61  ;;  %v3375_v23 = vsel %vm3023_vm2, %v3366_v31, %v3374_v16  ;;  %v15452_v63 = vld [vmem:[%s23298_s2 + $0x72c] ss:$16 sps:$4 sm:$0xff]   ;;  %v3042_v16 = vrot.slane %v15448_v62, 2  ;;  %v15454_v38 = vld [vmem:[%s23298_s2 + $0x728] ss:$16 sps:$4 sm:$0xff]   ;;  %v3365_v8 = vsel %vm3023_vm2, %v3356_v53, %v3364_v40 }
 0x14a   :  { %v3073_v7 = vsel %vm3023_vm2, %v3064_v54, %v3072_v14  ;;  %v3065_v44 = vsel %vm3023_vm2, %v3056_v42, %v3064_v54  ;;  %v3350_v14 = vrot.slane %v15446_v41, 2  ;;  %v15455_v4 = vld [vmem:[%s23298_s2 + $0x70c] ss:$16 sps:$4 sm:$0xfc]   ;;  %v3034_v54 = vrot.slane %v15452_v63, 2 }
 0x14b   :  { %3871 = vmatmul.mubr.bf16.vlgmr.msra.gmra.mxu1 %v2105_v55  ;;  %3816 = vmatpush2.bf16.msra.mxu0 %v3397_v30  ;;  %v3048_v30 = vrot.slane %v15445_v39, 2  ;;  %v18621_v10 = vld [vmem:[%s23298_s2 + $0xa0c] ss:$16 sps:$4 sm:$0xff]   ;;  %v15461_v6 = vld [vmem:[%s23298_s2 + $0x708] ss:$16 sps:$4 sm:$0xfc]  }
 0x14c   :  { %3880 = vmatpush1.bf16.msra.mxu1 %v3089_v0  ;;  %3817 = vmatprep.subr.bf16.mxu0 %v3391_v2  ;;  %v3367_v0 = vsel %vm3023_vm2, %v3358_v50, %v3366_v31  ;;  %v3348_v2 = vrot.slane %v18589_v59, 2  ;;  %v18631_v15 = vld [vmem:[%s23298_s2 + $0x9e8] ss:$16 sps:$4 sm:$0xff]   ;;  %v3031_v26 = vrot.slane %v15454_v38, 2  ;;  %v3033_v36 = vrot.slane %v15455_v4, 2 }
 0x14d   :  { %3881 = vmatprep.subr.bf16.mxu1 %v3083_v3  ;;  %3911 = vmatprep.mubr.bf16.mxu1 %v17987_v57  ;;  %v3381_v57 = vsel %vm3023_vm2, %v3372_v9, %v3380_v1  ;;  %v3059_v1 = vsel %vm3023_vm2, %v3050_v51, %v3058_v34  ;;  %v3040_v3 = vrot.slane %v18594_v28, 2  ;;  %v3057_v9 = vsel %vm3023_vm2, %v3048_v30, %v3056_v42  ;;  %v18648_v39 = vld [vmem:[%s23298_s2 + $0x90c] ss:$16 sps:$4 sm:$0xff]   ;;  %v18661_v59 = vld [vmem:[%s23298_s2 + $0x8e8] ss:$16 sps:$4 sm:$0xff]  }
 0x14e   :  { %v3357_v31 = vsel %vm3023_vm2, %v3348_v2, %v3356_v53  ;;  %v15468_v40 = vld [vmem:[%s23298_s2 + $0x9cc] ss:$16 sps:$4 sm:$0xff]   ;;  %v3351_v41 = vsel %vm3023_vm2, %v3342_v18, %v3350_v14  ;;  %v3043_v62 = vsel %vm3023_vm2, %v3034_v54, %v3042_v16  ;;  %v3030_v42 = vrot.slane %v15461_v6, 2  ;;  %v15472_v18 = vld [vmem:[%s23298_s2 + $0x9c8] ss:$16 sps:$4 sm:$0xff]  }
 0x14f   :  { %3818 = vmatpush2.bf16.msra.mxu0 %v3389_v22  ;;  %v3359_v22 = vsel %vm3023_vm2, %v3350_v14, %v3358_v50  ;;  %v3049_v34 = vsel %vm3023_vm2, %v3040_v3, %v3048_v30  ;;  %v3208_v28 = vrot.slane %v18631_v15, 2  ;;  %v3035_v50 = vsel %vm3023_vm2, %v3033_v36, %v3034_v54  ;;  %v18692_v63 = vld [vmem:[%s23298_s2 + $0x8c8] ss:$16 sps:$4 sm:$0xff]   ;;  %v15479_v4 = vld [vmem:[%s23298_s2 + $0x8ac] ss:$16 sps:$4 sm:$0xff]  }
 0x150   :  { %3882 = vmatpush1.bf16.msra.mxu1 %v3081_v13  ;;  %3819 = vmatprep.subr.bf16.mxu0 %v3383_v11  ;;  %v3051_v13 = vsel %vm3023_vm2, %v3042_v16, %v3050_v51  ;;  %v18636_v11 = vld [vmem:[%s23298_s2 + $0xa08] ss:$16 sps:$4 sm:$0xff]   ;;  %v3154_v53 = vrot.slane %v18648_v39, 2  ;;  %v3202_v30 = vrot.slane %v15468_v40, 2  ;;  %v3032_v14 = vsel %vm3023_vm2, %v3030_v42, %v3031_v26 }
 0x151   :  { %3883 = vmatprep.subr.bf16.mxu1 %v3075_v17  ;;  %v18641_v17 = vld [vmem:[%s23298_s2 + $0x8ec] ss:$16 sps:$4 sm:$0xff]   ;;  %v3216_v51 = vrot.slane %v18636_v11, 2  ;;  %v3144_v38 = vrot.slane %v18661_v59, 2  ;;  %v15483_v54 = vld [vmem:[%s23298_s2 + $0x8a8] ss:$16 sps:$4 sm:$0xff]  }
 0x152   :  { %v3136_v15 = vrot.slane %v18692_v63, 2  ;;  %v3130_v36 = vrot.slane %v15479_v4, 2  ;;  %v15484_v40 = vld [vmem:[%s23298_s2 + $0x988] ss:$16 sps:$4 sm:$0xff]   ;;  %v15487_v59 = vld [vmem:[%s23298_s2 + $0x96c] ss:$16 sps:$4 sm:$0xff]  }
 0x153   :  { %3820 = vmatpush2.bf16.msra.mxu0 %v3381_v57  ;;  %v3210_v57 = vrot.slane %v15457_v5, 2  ;;  %v3217_v16 = vsel %vm3023_vm2, %v3208_v28, %v3216_v51  ;;  %v15519_v39 = vld [vmem:[%s23298_s2 + $0xbe8] ss:$16 sps:$4 sm:$0xff]  }
 0x154   :  { %3884 = vmatpush1.bf16.msra.mxu1 %v3073_v7  ;;  %3821 = vmatprep.subr.bf16.mxu0 %v3375_v23  ;;  %v3218_v7 = vrot.slane %v18621_v10, 2  ;;  %v3349_v23 = vsel %vm3023_vm2, %v3340_v48, %v3348_v2  ;;  %v3146_v48 = vrot.slane %v18641_v17, 2  ;;  %v3152_v2 = vrot.slane %v18667_v19, 2  ;;  %v19013_v10 = vld [vmem:[%s23298_s2 + $0xd08] ss:$16 sps:$4 sm:$0xff]  }
 0x155   :  { %3885 = vmatprep.subr.bf16.mxu1 %v3067_v56  ;;  %v3041_v56 = vsel %vm3023_vm2, %v3031_v26, %v3040_v3  ;;  %v3200_v3 = vrot.slane %v15472_v18, 2 }
 0x156   :  { %v3219_v37 = vsel %vm3023_vm2, %v3210_v57, %v3218_v7  ;;  %v3155_v5 = vsel %vm3023_vm2, %v3146_v48, %v3154_v53 }
 0x157   :  { %3822 = vmatpush2.bf16.msra.mxu0 %v3373_v52  ;;  %v15473_v52 = vld [vmem:[%s23298_s2 + $0x8cc] ss:$16 sps:$4 sm:$0xff]  }
 0x158   :  { %3886 = vmatpush1.bf16.msra.mxu1 %v3065_v44  ;;  %3823 = vmatprep.subr.bf16.mxu0 %v3367_v0  ;;  %v15475_v44 = vld [vmem:[%s23298_s2 + $0x9ac] ss:$16 sps:$4 sm:$0xff]   ;;  %v18697_v0 = vld [vmem:[%s23298_s2 + $0x9a8] ss:$16 sps:$4 sm:$0xff]  }
 0x159   :  { %3887 = vmatprep.subr.bf16.mxu1 %v3059_v1  ;;  %v2099_v1 = vshrl.u32 %v18271_v46, 16  ;;  %v3194_v6 = vrot.slane %v15475_v44, 2  ;;  %v3192_v26 = vrot.slane %v18697_v0, 2  ;;  %v3184_v44 = vrot.slane %v15484_v40, 2  ;;  %v15613_v46 = vld [vmem:[%s23298_s2 + $0xeb0] ss:$16 sps:$4 sm:$0xff]  }
 0x15a   :  { %v3178_v0 = vrot.slane %v15487_v59, 2 }
 0x15b   :  { %3824 = vmatpush2.bf16.msra.mxu0 %v3365_v8  ;;  %v3211_v8 = vsel %vm3023_vm2, %v3202_v30, %v3210_v57  ;;  %v3203_v57 = vsel %vm3023_vm2, %v3194_v6, %v3202_v30 }
 0x15c   :  { %3888 = vmatpush1.bf16.msra.mxu1 %v3057_v9  ;;  %3825 = vmatprep.subr.bf16.mxu0 %v3359_v22  ;;  %v3138_v9 = vrot.slane %v15473_v52, 2  ;;  %v15481_v22 = vld [vmem:[%s23298_s2 + $0x98c] ss:$16 sps:$4 sm:$0xff]   ;;  %v3128_v52 = vrot.slane %v15483_v54, 2 }
 0x15d   :  { %3889 = vmatprep.subr.bf16.mxu1 %v3051_v13  ;;  %v3186_v42 = vrot.slane %v15481_v22, 2 }
 0x15e   :  { %v3137_v4 = vsel %vm3023_vm2, %v3128_v52, %v3136_v15 }
 0x15f   :  { %3826 = vmatpush2.bf16.msra.mxu0 %v3357_v31  ;;  %v3153_v31 = vsel %vm3023_vm2, %v3144_v38, %v3152_v2  ;;  %v3195_v30 = vsel %vm3023_vm2, %v3186_v42, %v3194_v6  ;;  %v15499_v6 = vld [vmem:[%s23298_s2 + $0x92c] ss:$16 sps:$4 sm:$0xff]   ;;  %v3187_v54 = vsel %vm3023_vm2, %v3178_v0, %v3186_v42 }
 0x160   :  { %3890 = vmatpush1.bf16.msra.mxu1 %v3049_v34  ;;  %3827 = vmatprep.subr.bf16.mxu0 %v3351_v41  ;;  %v3209_v34 = vsel %vm3023_vm2, %v3200_v3, %v3208_v28  ;;  %v15485_v41 = vld [vmem:[%s23298_s2 + $0x88c] ss:$16 sps:$4 sm:$0xff]   ;;  %v15489_v28 = vld [vmem:[%s23298_s2 + $0x888] ss:$16 sps:$4 sm:$0xff]  }
 0x161   :  { %3891 = vmatprep.subr.bf16.mxu1 %v3043_v62  ;;  %v3147_v62 = vsel %vm3023_vm2, %v3138_v9, %v3146_v48  ;;  %v3139_v48 = vsel %vm3023_vm2, %v3130_v36, %v3138_v9  ;;  %v3122_v63 = vrot.slane %v15485_v41, 2  ;;  %v15497_v9 = vld [vmem:[%s23298_s2 + $0x84c] ss:$16 sps:$4 sm:$0xff]  }
 0x163   :  { %3828 = vmatpush2.bf16.msra.mxu0 %v3349_v23  ;;  %v3131_v22 = vsel %vm3023_vm2, %v3122_v63, %v3130_v36  ;;  %v15502_v36 = vld [vmem:[%s23298_s2 + $0x928] ss:$16 sps:$4 sm:$0xff]  }
 0x164   :  { %3892 = vmatpush1.bf16.msra.mxu1 %v3041_v56  ;;  %3920 = vmatprep.subr.bf16.mxu0 %v3219_v37  ;;  %v3145_v56 = vsel %vm3023_vm2, %v3136_v15, %v3144_v38  ;;  %v15490_v37 = vld [vmem:[%s23298_s2 + $0x968] ss:$16 sps:$4 sm:$0xff]  }
 0x165   :  { %3893 = vmatprep.subr.bf16.mxu1 %v3035_v50  ;;  %v3201_v50 = vsel %vm3023_vm2, %v3192_v26, %v3200_v3  ;;  %v15495_v38 = vld [vmem:[%s23298_s2 + $0x868] ss:$16 sps:$4 sm:$0xff]  }
 0x166   :  { %3830 = vmatmul.mubr.bf16.vlgmr.msra.gmra.mxu0 %v2099_v1  ;;  %v15496_v3 = vld [vmem:[%s23298_s2 + $0x948] ss:$16 sps:$4 sm:$0xff]   ;;  %v3112_v15 = vrot.slane %v15495_v38, 2 }
 0x167   :  { %v18716_v13 = vpop.f32.mrf.mxu1  ;;  %3921 = vmatpush1.bf16.msra.mxu0 %v3217_v16  ;;  %3952 = vmatprep.mubr.bf16.mxu0 %v17989_v58  ;;  %v15491_v58 = vld [vmem:[%s23298_s2 + $0x86c] ss:$16 sps:$4 sm:$0xff]   ;;  %v3120_v16 = vrot.slane %v15489_v28, 2  ;;  %v3106_v28 = vrot.slane %v15497_v9, 2 }
 0x168   :  { %3894 = vmatpush1.bf16.msra.mxu1 %v3032_v14  ;;  %3922 = vmatprep.subr.bf16.mxu0 %v3211_v8  ;;  %v15493_v14 = vld [vmem:[%s23298_s2 + $0x94c] ss:$16 sps:$4 sm:$0xff]   ;;  %v3176_v8 = vrot.slane %v15490_v37, 2 }
 0x169   :  { %v18725_v17 = vpop.f32.mrf.mxu1  ;;  %3895 = vmatprep.subr.bf16.mxu1 %v3155_v5  ;;  %v3193_v5 = vsel %vm3023_vm2, %v3184_v44, %v3192_v26  ;;  %v15501_v26 = vld [vmem:[%s23298_s2 + $0x848] ss:$16 sps:$4 sm:$0xff]   ;;  %v3129_v40 = vsel %vm3023_vm2, %v3120_v16, %v3128_v52  ;;  %v18797_v52 = vld [vmem:[%s23298_s2 + $0xb0c] ss:$16 sps:$4 sm:$0xff]  }
 0x16a   :  { %v3185_v41 = vsel %vm3023_vm2, %v3176_v8, %v3184_v44  ;;  %v3121_v44 = vsel %vm3023_vm2, %v3112_v15, %v3120_v16  ;;  %v18816_v16 = vld [vmem:[%s23298_s2 + $0xacc] ss:$16 sps:$4 sm:$0xff]  }
 0x16b   :  { %v1666_v18 = vpop.f32.mrf.mxu1  ;;  %3923 = vmatpush1.bf16.msra.mxu0 %v3209_v34  ;;  %v3170_v34 = vrot.slane %v15493_v14, 2 }
 0x16c   :  { %3896 = vmatpush2.bf16.msra.mxu1 %v3153_v31  ;;  %3924 = vmatprep.subr.bf16.mxu0 %v3203_v57  ;;  %v3114_v31 = vrot.slane %v15491_v58, 2  ;;  %v15503_v57 = vld [vmem:[%s23298_s2 + $0x82c] ss:$16 sps:$4 sm:$0xff]   ;;  %v3162_v18 = vrot.slane %v15499_v6, 2  ;;  %v3160_v58 = vrot.slane %v15502_v36, 2 }
 0x16d   :  { %v1667_v23 = vpop.f32.mrf.mxu1  ;;  %3897 = vmatprep.subr.bf16.mxu1 %v3147_v62  ;;  %v3168_v62 = vrot.slane %v15496_v3, 2  ;;  %v3179_v59 = vsel %vm3023_vm2, %v3170_v34, %v3178_v0  ;;  %v3098_v14 = vrot.slane %v15503_v57, 2  ;;  %v15523_v36 = vld [vmem:[%s23298_s2 + $0xbcc] ss:$16 sps:$4 sm:$0xff]  }
 0x16e   :  { %v3123_v42 = vsel %vm3023_vm2, %v3114_v31, %v3122_v63  ;;  %v15505_v23 = vld [vmem:[%s23298_s2 + $0x828] ss:$16 sps:$4 sm:$0xff]   ;;  %v3115_v63 = vsel %vm3023_vm2, %v3106_v28, %v3114_v31  ;;  %v3171_v0 = vsel %vm3023_vm2, %v3162_v18, %v3170_v34  ;;  %v3163_v6 = vsel %vm3023_vm2, %v3154_v53, %v3162_v18 }
 0x16f   :  { %3925 = vmatpush1.bf16.msra.mxu0 %v3201_v50  ;;  %v15506_v50 = vld [vmem:[%s23298_s2 + $0xaec] ss:$16 sps:$4 sm:$0xff]   ;;  %v3177_v37 = vsel %vm3023_vm2, %v3168_v62, %v3176_v8  ;;  %v3169_v3 = vsel %vm3023_vm2, %v3160_v58, %v3168_v62  ;;  %v3107_v9 = vsel %vm3023_vm2, %v3098_v14, %v3106_v28  ;;  %v3099_v57 = vsel %vm3023_vm2, %v3090_v32, %v3098_v14 }
 0x170   :  { %3898 = vmatpush2.bf16.msra.mxu1 %v3145_v56  ;;  %3926 = vmatprep.subr.bf16.mxu0 %v3195_v30  ;;  %v3104_v56 = vrot.slane %v15501_v26, 2  ;;  %v18809_v30 = vld [vmem:[%s23298_s2 + $0xb08] ss:$16 sps:$4 sm:$0xff]   ;;  %v18828_v8 = vld [vmem:[%s23298_s2 + $0xc0c] ss:$16 sps:$4 sm:$0xff]  }
 0x171   :  { %3899 = vmatprep.subr.bf16.mxu1 %v3139_v48  ;;  %v18804_v48 = vld [vmem:[%s23298_s2 + $0xae8] ss:$16 sps:$4 sm:$0xff]   ;;  %v3280_v34 = vrot.slane %v18809_v30, 2  ;;  %v15521_v62 = vld [vmem:[%s23298_s2 + $0xaac] ss:$16 sps:$4 sm:$0xff]  }
 0x172   :  { %v3113_v38 = vsel %vm3023_vm2, %v3104_v56, %v3112_v15  ;;  %v3272_v31 = vrot.slane %v18804_v48, 2  ;;  %v3266_v15 = vrot.slane %v18816_v16, 2  ;;  %v15518_v26 = vld [vmem:[%s23298_s2 + $0xac8] ss:$16 sps:$4 sm:$0xff]  }
 0x173   :  { %3927 = vmatpush1.bf16.msra.mxu0 %v3193_v5  ;;  %v18823_v5 = vld [vmem:[%s23298_s2 + $0xbec] ss:$16 sps:$4 sm:$0xff]   ;;  %v3264_v12 = vrot.slane %v15518_v26, 2  ;;  %v15531_v16 = vld [vmem:[%s23298_s2 + $0xa88] ss:$16 sps:$4 sm:$0xff]  }
 0x174   :  { %3900 = vmatpush2.bf16.msra.mxu1 %v3137_v4  ;;  %3928 = vmatprep.subr.bf16.mxu0 %v3187_v54  ;;  %v3096_v4 = vrot.slane %v15505_v23, 2  ;;  %v3282_v54 = vrot.slane %v18797_v52, 2  ;;  %v3281_v32 = vsel %vm3023_vm2, %v3272_v31, %v3280_v34  ;;  %v15526_v23 = vld [vmem:[%s23298_s2 + $0xbc8] ss:$16 sps:$4 sm:$0xff]   ;;  %v15535_v26 = vld [vmem:[%s23298_s2 + $0xb8c] ss:$16 sps:$4 sm:$0xff]  }
 0x175   :  { %3901 = vmatprep.subr.bf16.mxu1 %v3131_v22  ;;  %v3274_v22 = vrot.slane %v15506_v50, 2  ;;  %v19061_v30 = vld [vmem:[%s23298_s2 + $0xda8] ss:$16 sps:$4 sm:$0xff]  }
 0x176   :  { %v3105_v53 = vsel %vm3023_vm2, %v3096_v4, %v3104_v56  ;;  %v3097_v33 = vsel %vm3023_vm2, %v3088_v60, %v3096_v4  ;;  %v15527_v56 = vld [vmem:[%s23298_s2 + $0xa8c] ss:$16 sps:$4 sm:$0xff]  }
 0x177   :  { %3929 = vmatpush1.bf16.msra.mxu0 %v3185_v41  ;;  %v18851_v41 = vld [vmem:[%s23298_s2 + $0xc08] ss:$16 sps:$4 sm:$0xff]   ;;  %v3283_v19 = vsel %vm3023_vm2, %v3274_v22, %v3282_v54  ;;  %v3275_v50 = vsel %vm3023_vm2, %v3266_v15, %v3274_v22  ;;  %v3250_v4 = vrot.slane %v15527_v56, 2  ;;  %v15533_v22 = vld [vmem:[%s23298_s2 + $0xa6c] ss:$16 sps:$4 sm:$0xff]  }
 0x178   :  { %3902 = vmatpush2.bf16.msra.mxu1 %v3129_v40  ;;  %3930 = vmatprep.subr.bf16.mxu0 %v3179_v59  ;;  %v3161_v40 = vsel %vm3023_vm2, %v3152_v2, %v3160_v58  ;;  %v3338_v2 = vrot.slane %v18823_v5, 2  ;;  %v18870_v59 = vld [vmem:[%s23298_s2 + $0xaa8] ss:$16 sps:$4 sm:$0xff]   ;;  %v3344_v60 = vrot.slane %v18851_v41, 2  ;;  %v15604_v41 = vld [vmem:[%s23298_s2 + $0x10f0] ss:$16 sps:$4 sm:$0xff]  }
 0x179   :  { %3903 = vmatprep.subr.bf16.mxu1 %v3123_v42  ;;  %v3346_v42 = vrot.slane %v18828_v8, 2 }
 0x17b   :  { %3931 = vmatpush1.bf16.msra.mxu0 %v3177_v37  ;;  %v15529_v37 = vld [vmem:[%s23298_s2 + $0xbac] ss:$16 sps:$4 sm:$0xff]   ;;  %v3347_v48 = vsel %vm3023_vm2, %v3338_v2, %v3346_v42 }
 0x17c   :  { %3904 = vmatpush2.bf16.msra.mxu1 %v3121_v44  ;;  %3932 = vmatprep.subr.bf16.mxu0 %v3171_v0  ;;  %v3336_v44 = vrot.slane %v15519_v39, 2  ;;  %v3330_v0 = vrot.slane %v15523_v36, 2 }
 0x17d   :  { %3905 = vmatprep.subr.bf16.mxu1 %v3115_v63  ;;  %v3258_v63 = vrot.slane %v15521_v62, 2  ;;  %v15538_v62 = vld [vmem:[%s23298_s2 + $0xb88] ss:$16 sps:$4 sm:$0xff]  }
 0x17f   :  { %3933 = vmatpush1.bf16.msra.mxu0 %v3169_v3  ;;  %v3328_v3 = vrot.slane %v15526_v23, 2  ;;  %v3267_v39 = vsel %vm3023_vm2, %v3258_v63, %v3266_v15  ;;  %v3312_v23 = vrot.slane %v15538_v62, 2 }
 0x180   :  { %3906 = vmatpush2.bf16.msra.mxu1 %v3113_v38  ;;  %3934 = vmatprep.subr.bf16.mxu0 %v3163_v6  ;;  %v3256_v38 = vrot.slane %v18870_v59, 2  ;;  %v15532_v6 = vld [vmem:[%s23298_s2 + $0xba8] ss:$16 sps:$4 sm:$0xff]   ;;  %v3259_v59 = vsel %vm3023_vm2, %v3250_v4, %v3258_v63 }
 0x181   :  { %3907 = vmatprep.subr.bf16.mxu1 %v3107_v9  ;;  %v3345_v9 = vsel %vm3023_vm2, %v3336_v44, %v3344_v60  ;;  %v3337_v15 = vsel %vm3023_vm2, %v3328_v3, %v3336_v44 }
 0x182   :  { %v1703_v28 = vpop.f32.mrf.mxu0  ;;  %v3265_v36 = vsel %vm3023_vm2, %v3256_v38, %v3264_v12 }
 0x183   :  { %v18873_v18 = vadd.f32 %v1703_v28, %v18716_v13  ;;  %3935 = vmatpush1.bf16.msra.mxu0 %v3161_v40  ;;  %v15537_v40 = vld [vmem:[%s23298_s2 + $0xa68] ss:$16 sps:$4 sm:$0xff]  }
 0x184   :  { %3908 = vmatpush2.bf16.msra.mxu1 %v3105_v53  ;;  %v1705_v13 = vpop.f32.mrf.mxu0  ;;  %3936 = vmatprep.subr.bf16.mxu0 %v3283_v19  ;;  %v3322_v53 = vrot.slane %v15529_v37, 2  ;;  %v3320_v19 = vrot.slane %v15532_v6, 2 }
 0x185   :  { %3909 = vmatprep.subr.bf16.mxu1 %v3099_v57  ;;  %v18893_v58 = vadd.f32 %v1705_v13, %v18725_v17  ;;  %v3273_v17 = vsel %vm3023_vm2, %v3264_v12, %v3272_v31  ;;  %v3339_v31 = vsel %vm3023_vm2, %v3330_v0, %v3338_v2  ;;  %v3248_v57 = vrot.slane %v15531_v16, 2  ;;  %v15544_v12 = vld [vmem:[%s23298_s2 + $0xb68] ss:$16 sps:$4 sm:$0xff]  }
 0x186   :  { %v1707_v14 = vpop.f32.mrf.mxu0  ;;  %v3242_v2 = vrot.slane %v15533_v22, 2  ;;  %v3331_v28 = vsel %vm3023_vm2, %v3322_v53, %v3330_v0  ;;  %v3329_v13 = vsel %vm3023_vm2, %v3320_v19, %v3328_v3  ;;  %v15547_v0 = vld [vmem:[%s23298_s2 + $0xb4c] ss:$16 sps:$4 sm:$0xff]   ;;  %v15550_v16 = vld [vmem:[%s23298_s2 + $0xb48] ss:$16 sps:$4 sm:$0xff]   ;;  %v3321_v3 = vsel %vm3023_vm2, %v3312_v23, %v3320_v19 }
 0x187   :  { %3937 = vmatpush2.bf16.msra.mxu0 %v3281_v32  ;;  %v3240_v32 = vrot.slane %v15537_v40, 2  ;;  %v3257_v56 = vsel %vm3023_vm2, %v3248_v57, %v3256_v38  ;;  %v15549_v14 = vld [vmem:[%s23298_s2 + $0xa28] ss:$16 sps:$4 sm:$0xff]   ;;  %v3296_v62 = vrot.slane %v15550_v16, 2 }
 0x188   :  { %3910 = vmatpush2.bf16.msra.mxu1 %v3097_v33  ;;  %v1708_v5 = vpop.f32.mrf.mxu0  ;;  %3938 = vmatprep.subr.bf16.mxu0 %v3275_v50  ;;  %v3314_v33 = vrot.slane %v15535_v26, 2  ;;  %v15543_v50 = vld [vmem:[%s23298_s2 + $0xa48] ss:$16 sps:$4 sm:$0xff]   ;;  %v3251_v44 = vsel %vm3023_vm2, %v3242_v2, %v3250_v4 }
 0x189   :  { %3961 = vmatprep.subr.bf16.mxu1 %v3347_v48  ;;  %v3234_v48 = vrot.slane %v15539_v27, 2  ;;  %v3249_v38 = vsel %vm3023_vm2, %v3240_v32, %v3248_v57  ;;  %v3232_v4 = vrot.slane %v15543_v50, 2  ;;  %v3304_v5 = vrot.slane %v15544_v12, 2 }
 0x18a   :  { %v3323_v37 = vsel %vm3023_vm2, %v3314_v33, %v3322_v53 }
 0x18b   :  { %3912 = vmatmul.mubr.bf16.vlgmr.msra.gmra.mxu1 %v2087_v21  ;;  %3939 = vmatpush2.bf16.msra.mxu0 %v3273_v17  ;;  %v15541_v21 = vld [vmem:[%s23298_s2 + $0xb6c] ss:$16 sps:$4 sm:$0xff]   ;;  %v3243_v6 = vsel %vm3023_vm2, %v3234_v48, %v3242_v2  ;;  %v3241_v53 = vsel %vm3023_vm2, %v3232_v4, %v3240_v32  ;;  %v3313_v40 = vsel %vm3023_vm2, %v3304_v5, %v3312_v23 }
 0x18c   :  { %3962 = vmatpush1.bf16.msra.mxu1 %v3345_v9  ;;  %3940 = vmatprep.subr.bf16.mxu0 %v3267_v39  ;;  %v3306_v63 = vrot.slane %v15541_v21, 2  ;;  %v15551_v17 = vld [vmem:[%s23298_s2 + $0xb2c] ss:$16 sps:$4 sm:$0xff]   ;;  %v3298_v39 = vrot.slane %v15547_v0, 2  ;;  %v3305_v21 = vsel %vm3023_vm2, %v3296_v62, %v3304_v5  ;;  %v17072_v5 = vmov 1966171168  }
 0x18d   :  { %3963 = vmatprep.subr.bf16.mxu1 %v3339_v31  ;;  %3993 = vmatprep.mubr.bf16.mxu1 %v18339_v24  ;;  %v15545_v24 = vld [vmem:[%s23298_s2 + $0xa2c] ss:$16 sps:$4 sm:$0xff]   ;;  %v3224_v31 = vrot.slane %v15549_v14, 2  ;;  %v3290_v2 = vrot.slane %v15551_v17, 2  ;;  %v1799_v17 = vunpack.c.l.s4 %v17072_v5  ;;  %v15585_v5 = vld [vmem:[%s23298_s2 + $0xd68] ss:$16 sps:$4 sm:$0xff]  }
 0x18e   :  { %v2049_v9 = vld [vmem:[%s23298_s2 + $0xe08] sm:$0xff]  ;;  %v3315_v22 = vsel %vm3023_vm2, %v3306_v63, %v3314_v33  ;;  %v3226_v26 = vrot.slane %v15545_v24, 2  ;;  %v3307_v19 = vsel %vm3023_vm2, %v3298_v39, %v3306_v63 }
 0x18f   :  { %3941 = vmatpush2.bf16.msra.mxu0 %v3265_v36  ;;  %v15553_v36 = vld [vmem:[%s23298_s2 + $0xb28] ss:$16 sps:$4 sm:$0xff]   ;;  %v18986_v33 = vld [vmem:[%s23298_s2 + $0xcec] ss:$16 sps:$4 sm:$0xff]   ;;  %v3233_v27 = vsel %vm3023_vm2, %v3224_v31, %v3232_v4  ;;  %v13622_v23 = vcombine.low %v2049_v9, %v2049_v9  ;;  %v3299_v12 = vsel %vm3023_vm2, %v3290_v2, %v3298_v39  ;;  %v3225_v63 = vsel %vm3023_vm2, %v3216_v51, %v3224_v31 }
 0x190   :  { %3964 = vmatpush1.bf16.msra.mxu1 %v3337_v15  ;;  %3942 = vmatprep.subr.bf16.mxu0 %v3259_v59  ;;  %v15554_v15 = vld [vmem:[%s23298_s2 + $0xdec] ss:$16 sps:$4 sm:$0xff]   ;;  %v3235_v57 = vsel %vm3023_vm2, %v3226_v26, %v3234_v48  ;;  %v13623_v59 = vcombine.high %v2049_v9, %v2049_v9  ;;  %v3288_v32 = vrot.slane %v15553_v36, 2  ;;  %v3227_v50 = vsel %vm3023_vm2, %v3218_v7, %v3226_v26  ;;  %v19018_v7 = vld [vmem:[%s23298_s2 + $0xdc8] ss:$16 sps:$4 sm:$0xff]  }
 0x191   :  { %3965 = vmatprep.subr.bf16.mxu1 %v3331_v28  ;;  %v18981_v28 = vld [vmem:[%s23298_s2 + $0xde8] ss:$16 sps:$4 sm:$0xff]   ;;  %v3466_v24 = vrot.slane %v15554_v15, 2  ;;  %v3291_v14 = vsel %vm3023_vm2, %v3282_v54, %v3290_v2  ;;  %v19027_v16 = vrot.slane %v13622_v23, 2  ;;  %v3402_v51 = vrot.slane %v18986_v33, 2 }
 0x192   :  { %v3464_v48 = vrot.slane %v18981_v28, 2  ;;  %v3297_v0 = vsel %vm3023_vm2, %v3288_v32, %v3296_v62  ;;  %v19046_v4 = vld [vmem:[%s23298_s2 + $0xcc8] ss:$16 sps:$4 sm:$0xff]   ;;  %v3289_v9 = vsel %vm3023_vm2, %v3280_v34, %v3288_v32  ;;  %v3456_v39 = vrot.slane %v19018_v7, 2  ;;  %v19070_v62 = vld [vmem:[%s23298_s2 + $0xcac] ss:$16 sps:$4 sm:$0xff]  }
 0x193   :  { %3943 = vmatpush2.bf16.msra.mxu0 %v3257_v56  ;;  %v18993_v56 = vld [vmem:[%s23298_s2 + $0xd0c] ss:$16 sps:$4 sm:$0xff]   ;;  %v19087_v2 = vld [vmem:[%s23298_s2 + $0xd88] ss:$16 sps:$4 sm:$0xff]   ;;  %v3710_v8 = vsel %vm1451_vm1, %v19027_v16, 0 }
 0x194   :  { %3966 = vmatpush1.bf16.msra.mxu1 %v3329_v13  ;;  %3944 = vmatprep.subr.bf16.mxu0 %v3251_v44  ;;  %v15563_v13 = vld [vmem:[%s23298_s2 + $0xdcc] ss:$16 sps:$4 sm:$0xff]   ;;  %v19002_v44 = vrot.slane %v13623_v59, 2  ;;  %v3410_v52 = vrot.slane %v18993_v56, 2  ;;  %v3473_v26 = vsel %vm3023_vm2, %v3464_v48, %v19027_v16  ;;  %v1800_v59 = vunpack.c.0.s8 %v1799_v17  ;;  %v15609_v16 = vld [vmem:[%s23298_s2 + $0xed4] ss:$16 sps:$4 sm:$0xff]  }
 0x195   :  { %3967 = vmatprep.subr.bf16.mxu1 %v3323_v37  ;;  %v19007_v37 = vld [vmem:[%s23298_s2 + $0xce8] ss:$16 sps:$4 sm:$0xff]   ;;  %v3458_v54 = vrot.slane %v15563_v13, 2  ;;  %v19075_v36 = vld [vmem:[%s23298_s2 + $0xd8c] ss:$16 sps:$4 sm:$0xff]   ;;  %v3465_v32 = vsel %vm3023_vm2, %v3456_v39, %v3464_v48  ;;  %v3448_v13 = vrot.slane %v19061_v30, 2 }
 0x196   :  { %v3475_v11 = vsel %vm3023_vm2, %v3466_v24, %v19002_v44  ;;  %v3411_v34 = vsel %vm3023_vm2, %v3402_v51, %v3410_v52  ;;  %v19097_v33 = vld [vmem:[%s23298_s2 + $0xc8c] ss:$16 sps:$4 sm:$0xff]   ;;  %v3442_v7 = vrot.slane %v19075_v36, 2  ;;  %v19112_v48 = vld [vmem:[%s23298_s2 + $0xc88] ss:$16 sps:$4 sm:$0xff]   ;;  %v3432_v36 = vrot.slane %v15585_v5, 2 }
 0x197   :  { %3945 = vmatpush2.bf16.msra.mxu0 %v3249_v38  ;;  %v19032_v38 = vld [vmem:[%s23298_s2 + $0xccc] ss:$16 sps:$4 sm:$0xff]  }
 0x198   :  { %3968 = vmatpush1.bf16.msra.mxu1 %v3321_v3  ;;  %3946 = vmatprep.subr.bf16.mxu0 %v3243_v6  ;;  %v19037_v3 = vld [vmem:[%s23298_s2 + $0xdac] ss:$16 sps:$4 sm:$0xff]   ;;  %v3400_v6 = vrot.slane %v19007_v37, 2  ;;  %v3394_v31 = vrot.slane %v19032_v38, 2  ;;  %v3386_v37 = vrot.slane %v19070_v62, 2 }
 0x199   :  { %3969 = vmatprep.subr.bf16.mxu1 %v3315_v22  ;;  %v3408_v22 = vrot.slane %v19013_v10, 2  ;;  %v15588_v30 = vld [vmem:[%s23298_s2 + $0xd4c] ss:$16 sps:$4 sm:$0xff]   ;;  %v15591_v62 = vld [vmem:[%s23298_s2 + $0xd48] ss:$16 sps:$4 sm:$0xff]  }
 0x19b   :  { %3947 = vmatpush2.bf16.msra.mxu0 %v3241_v53  ;;  %v3450_v53 = vrot.slane %v19037_v3, 2  ;;  %v3409_v29 = vsel %vm3023_vm2, %v3400_v6, %v3408_v22 }
 0x19c   :  { %3970 = vmatpush1.bf16.msra.mxu1 %v3313_v40  ;;  %3948 = vmatprep.subr.bf16.mxu0 %v3235_v57  ;;  %v3467_v40 = vsel %vm3023_vm2, %v3458_v54, %v3466_v24 }
 0x19d   :  { %3971 = vmatprep.subr.bf16.mxu1 %v3307_v19  ;;  %v19082_v19 = vld [vmem:[%s23298_s2 + $0xca8] ss:$16 sps:$4 sm:$0xff]   ;;  %v3459_v23 = vsel %vm3023_vm2, %v3450_v53, %v3458_v54 }
 0x19e   :  { %v3384_v54 = vrot.slane %v19082_v19, 2 }
 0x19f   :  { %3949 = vmatpush2.bf16.msra.mxu0 %v3233_v27 }
 0x1a0   :  { %3972 = vmatpush1.bf16.msra.mxu1 %v3305_v21  ;;  %3950 = vmatprep.subr.bf16.mxu0 %v3227_v50  ;;  %v15582_v50 = vld [vmem:[%s23298_s2 + $0xd6c] ss:$16 sps:$4 sm:$0xff]  }
 0x1a1   :  { %3973 = vmatprep.subr.bf16.mxu1 %v3299_v12 }
 0x1a3   :  { %3951 = vmatpush2.bf16.msra.mxu0 %v3225_v63 }
 0x1a4   :  { %3974 = vmatpush1.bf16.msra.mxu1 %v3297_v0  ;;  %4002 = vmatprep.subr.bf16.mxu0 %v3475_v11 }
 0x1a5   :  { %3975 = vmatprep.subr.bf16.mxu1 %v3291_v14  ;;  %v19117_v14 = vsub.s32 %v1800_v59, %v17265_v43 }
 0x1a6   :  { %v1785_v57 = vpop.f32.mrf.mxu0  ;;  %3953 = vmatmul.mubr.bf16.vlgmr.msra.gmra.mxu0 %v2093_v25  ;;  %v3392_v25 = vrot.slane %v19046_v4, 2  ;;  %v3378_v4 = vrot.slane %v19097_v33, 2 }
 0x1a7   :  { %v1744_v15 = vpop.f32.mrf.mxu1  ;;  %4003 = vmatpush1.bf16.msra.mxu0 %v3473_v26  ;;  %13627 = vmatprep.mubr.msk.bf16.mxu0 %vm1447_vm0, %v18337_v20  ;;  %v3440_v20 = vrot.slane %v19087_v2, 2  ;;  %v3434_v26 = vrot.slane %v15582_v50, 2 }
 0x1a8   :  { %v1745_v28 = vadd.f32 %v1744_v15, %v18873_v18  ;;  %3976 = vmatpush1.bf16.msra.mxu1 %v3289_v9  ;;  %v1787_v21 = vpop.f32.mrf.mxu0  ;;  %4004 = vmatprep.subr.bf16.mxu0 %v3467_v40  ;;  %v3403_v18 = vsel %vm3023_vm2, %v3394_v31, %v3402_v51  ;;  %v3457_v51 = vsel %vm3023_vm2, %v3448_v13, %v3456_v39  ;;  %v15586_v39 = vld [vmem:[%s23298_s2 + $0xc6c] ss:$16 sps:$4 sm:$0xff]  }
 0x1a9   :  { %v1746_v27 = vpop.f32.mrf.mxu1  ;;  %3977 = vmatprep.subr.bf16.mxu1 %v3411_v34  ;;  %v3395_v9 = vsel %vm3023_vm2, %v3386_v37, %v3394_v31  ;;  %v19139_v34 = vrot.slane %v1796_v35, %v19117_v14  ;;  %v3376_v31 = vrot.slane %v19112_v48, 2  ;;  %v3393_v47 = vsel %vm3023_vm2, %v3384_v54, %v3392_v25  ;;  %v15592_v15 = vld [vmem:[%s23298_s2 + $0xc4c] ss:$16 sps:$4 sm:$0xff]  }
 0x1aa   :  { %v1786_v12 = vadd.f32 %v1785_v57, %v1745_v28  ;;  %v1747_v24 = vadd.f32 %v1746_v27, %v18893_v58  ;;  %v1789_v0 = vpop.f32.mrf.mxu0  ;;  %v3401_v58 = vsel %vm3023_vm2, %v3392_v25, %v3400_v6  ;;  %v3451_v6 = vsel %vm3023_vm2, %v3442_v7, %v3450_v53  ;;  %v15590_v53 = vld [vmem:[%s23298_s2 + $0xc68] ss:$16 sps:$4 sm:$0xff]   ;;  %v15594_v57 = vld [vmem:[%s23298_s2 + $0xd2c] ss:$16 sps:$4 sm:$0xff]  }
 0x1ab   :  { %v1748_v63 = vpop.f32.mrf.mxu1  ;;  %4005 = vmatpush1.bf16.msra.mxu0 %v3465_v32  ;;  %v3449_v61 = vsel %vm3023_vm2, %v3440_v20, %v3448_v13  ;;  %v3387_v35 = vsel %vm3023_vm2, %v3378_v4, %v3386_v37  ;;  %v3443_v2 = vsel %vm3023_vm2, %v3434_v26, %v3442_v7  ;;  %v3370_v59 = vrot.slane %v15586_v39, 2  ;;  %v15596_v25 = vld [vmem:[%s23298_s2 + $0xc48] ss:$16 sps:$4 sm:$0xff]   ;;  %v4073_v0 = vld [vmem:[%s23299_s0] sm:$0xaa] }
 0x1ac   :  { %v1788_v38 = vadd.f32 %v1787_v21, %v1747_v24  ;;  %3978 = vmatpush2.bf16.msra.mxu1 %v3409_v29  ;;  %v1790_v11 = vpop.f32.mrf.mxu0  ;;  %4006 = vmatprep.subr.bf16.mxu0 %v3459_v23  ;;  %v3426_v28 = vrot.slane %v15588_v30, 2  ;;  %v3368_v29 = vrot.slane %v15590_v53, 2  ;;  %v3385_v33 = vsel %vm3023_vm2, %v3376_v31, %v3384_v54  ;;  %v15597_v32 = vld [vmem:[%s23298_s2 + $0xd28] ss:$16 sps:$4 sm:$0xff]   ;;  %v15612_v39 = vld [vmem:[%s23298_s2 + $0x10d4] ss:$16 sps:$4 sm:$0xff]  }
 0x1ad   :  { %v1749_v3 = vpop.f32.mrf.mxu1  ;;  %3979 = vmatprep.subr.bf16.mxu1 %v3403_v18  ;;  %v3441_v27 = vsel %vm3023_vm2, %v3432_v36, %v3440_v20  ;;  %v3424_v21 = vrot.slane %v15591_v62, 2  ;;  %v15598_v18 = vld [vmem:[%s23298_s2 + $0xc2c] ss:$16 sps:$4 sm:$0xff]   ;;  %v3379_v23 = vsel %vm3023_vm2, %v3370_v59, %v3378_v4  ;;  %v3362_v50 = vrot.slane %v15592_v15, 2  ;;  %v15600_v63 = vld [vmem:[%s23298_s2 + $0xc28] ss:$16 sps:$4 sm:$0xff]  }
 0x1ae   :  { %v1797_v17 = vcombine.low %v1786_v12, %v1788_v38  ;;  %v3435_v13 = vsel %vm3023_vm2, %v3426_v28, %v3434_v26  ;;  %v3418_v12 = vrot.slane %v15594_v57, 2  ;;  %v3360_v24 = vrot.slane %v15596_v25, 2  ;;  %v15607_v30 = vld [vmem:[%s23298_s2 + $0xed0] ss:$16 sps:$4 sm:$0xff]   ;;  %v15627_v15 = vld [vmem:[%s23298_s2 + $0xe74] ss:$16 sps:$4 sm:$0xff]  }
 0x1af   :  { %4007 = vmatpush1.bf16.msra.mxu0 %v3457_v51  ;;  %v3377_v37 = vsel %vm3023_vm2, %v3368_v29, %v3376_v31  ;;  %v3433_v7 = vsel %vm3023_vm2, %v3424_v21, %v3432_v36  ;;  %v3416_v48 = vrot.slane %v15597_v32, 2  ;;  %v3371_v38 = vsel %vm3023_vm2, %v3362_v50, %v3370_v59  ;;  %v15610_v31 = vld [vmem:[%s23298_s2 + $0x10d0] ss:$16 sps:$4 sm:$0xff]   ;;  %v15630_v57 = vld [vmem:[%s23298_s2 + $0x1074] ss:$16 sps:$4 sm:$0xff]  }
 0x1b0   :  { %v19142_v40 = vrot.slane %v1797_v17, %v19117_v14  ;;  %3980 = vmatpush2.bf16.msra.mxu1 %v3401_v58  ;;  %4008 = vmatprep.subr.bf16.mxu0 %v3451_v6  ;;  %v3427_v58 = vsel %vm3023_vm2, %v3418_v12, %v3426_v28  ;;  %v3354_v3 = vrot.slane %v15598_v18, 2  ;;  %v3369_v11 = vsel %vm3023_vm2, %v3360_v24, %v3368_v29  ;;  %v15622_v36 = vld [vmem:[%s23298_s2 + $0x1090] ss:$16 sps:$4 sm:$0xff]   ;;  %v15633_v28 = vld [vmem:[%s23298_s2 + $0xe54] ss:$16 sps:$4 sm:$0xff]  }
 0x1b1   :  { %3981 = vmatprep.subr.bf16.mxu1 %v3395_v9  ;;  %v3425_v51 = vsel %vm3023_vm2, %v3416_v48, %v3424_v21  ;;  %v3352_v54 = vrot.slane %v15600_v63, 2  ;;  %v3419_v4 = vsel %vm3023_vm2, %v3410_v52, %v3418_v12  ;;  %v4303_v5 = vcombine.high %v4073_v0, %v4073_v0  ;;  %v15606_v52 = vld [vmem:[%s23298_s2 + $0x10f4] ss:$16 sps:$4 sm:$0xff]   ;;  %v15628_v59 = vld [vmem:[%s23298_s2 + $0x1070] ss:$16 sps:$4 sm:$0xff]  }
 0x1b2   :  { %v1812_v19 = vcombine.low %v19139_v34, %v19142_v40  ;;  %v3363_v20 = vsel %vm3023_vm2, %v3354_v3, %v3362_v50  ;;  %v3417_v9 = vsel %vm3023_vm2, %v3408_v22, %v3416_v48  ;;  %v3355_v6 = vsel %vm3023_vm2, %v3346_v42, %v3354_v3  ;;  %v15603_v42 = vld [vmem:[%s23298_s2 + $0xef4] ss:$16 sps:$4 sm:$0xff]   ;;  %v15601_v22 = vld [vmem:[%s23298_s2 + $0xef0] ss:$16 sps:$4 sm:$0xff]   ;;  %v15917_v34 = vld [vmem:[%s23298_s2 + $0x1478] ss:$16 sps:$4 sm:$0xff]  }
 0x1b3   :  { %4009 = vmatpush1.bf16.msra.mxu0 %v3449_v61  ;;  %v3361_v17 = vsel %vm3023_vm2, %v3352_v54, %v3360_v24  ;;  %v19200_v26 = vrot.slane %v4073_v0, %v17283_v49  ;;  %v19203_v56 = vrot.slane %v4303_v5, %v17283_v49  ;;  %v3353_v10 = vsel %vm3023_vm2, %v3344_v60, %v3352_v54  ;;  %v15618_v61 = vld [vmem:[%s23298_s2 + $0x10b4] ss:$16 sps:$4 sm:$0xff]   ;;  %v15631_v25 = vld [vmem:[%s23298_s2 + $0xe50] ss:$16 sps:$4 sm:$0xff]   ;;  %v15922_v40 = vld [vmem:[%s23298_s2 + $0x137c] ss:$16 sps:$4 sm:$0xff]  }
 0x1b4   :  { %3982 = vmatpush2.bf16.msra.mxu1 %v3393_v47  ;;  %4010 = vmatprep.subr.bf16.mxu0 %v3443_v2  ;;  %v15615_v47 = vld [vmem:[%s23298_s2 + $0xeb4] ss:$16 sps:$4 sm:$0xff]   ;;  %v15625_v2 = vld [vmem:[%s23298_s2 + $0xe70] ss:$16 sps:$4 sm:$0xff]  }
 0x1b5   :  { %3983 = vmatprep.subr.bf16.mxu1 %v3387_v35  ;;  %v4318_v60 = vcombine.high %v19200_v26, %v19200_v26  ;;  %v15619_v35 = vld [vmem:[%s23298_s2 + $0xe90] ss:$16 sps:$4 sm:$0xff]   ;;  %v15636_v29 = vld [vmem:[%s23298_s2 + $0x1054] ss:$16 sps:$4 sm:$0xff]  }
 0x1b6   :  { %v15642_v21 = vld [vmem:[%s23298_s2 + $0x1034] ss:$16 sps:$4 sm:$0xff]   ;;  %v15637_v32 = vld [vmem:[%s23298_s2 + $0xe30] ss:$16 sps:$4 sm:$0xff]  }
 0x1b7   :  { %4011 = vmatpush1.bf16.msra.mxu0 %v3441_v27  ;;  %v19240_v53 = vrot.slane %v4318_v60, 1  ;;  %v15639_v27 = vld [vmem:[%s23298_s2 + $0xe34] ss:$16 sps:$4 sm:$0xff]   ;;  %v15640_v18 = vld [vmem:[%s23298_s2 + $0x1030] ss:$16 sps:$4 sm:$0xff]  }
 0x1b8   :  { %3984 = vmatpush2.bf16.msra.mxu1 %v3385_v33  ;;  %4012 = vmatprep.subr.bf16.mxu0 %v3435_v13  ;;  %v15634_v33 = vld [vmem:[%s23298_s2 + $0x1050] ss:$16 sps:$4 sm:$0xff]   ;;  %v15648_v13 = vld [vmem:[%s23298_s2 + $0x1014] ss:$16 sps:$4 sm:$0xff]  }
 0x1b9   :  { %3985 = vmatprep.subr.bf16.mxu1 %v3379_v23  ;;  %v15645_v23 = vld [vmem:[%s23298_s2 + $0xe14] ss:$16 sps:$4 sm:$0xff]   ;;  %v15643_v50 = vld [vmem:[%s23298_s2 + $0xe10] ss:$16 sps:$4 sm:$0xff]  }
 0x1ba   :  { %v15646_v12 = vld [vmem:[%s23298_s2 + $0x1010] ss:$16 sps:$4 sm:$0xff]   ;;  %v15651_v24 = vld [vmem:[%s23298_s2 + $0xff4] ss:$16 sps:$4 sm:$0xff]  }
 0x1bb   :  { %4013 = vmatpush1.bf16.msra.mxu0 %v3433_v7  ;;  %v15649_v7 = vld [vmem:[%s23298_s2 + $0xff0] ss:$16 sps:$4 sm:$0xff]  }
 0x1bc   :  { %3986 = vmatpush2.bf16.msra.mxu1 %v3377_v37  ;;  %4014 = vmatprep.subr.bf16.mxu0 %v3427_v58  ;;  %v15654_v37 = vld [vmem:[%s23298_s2 + $0x11f4] ss:$16 sps:$4 sm:$0xff]   ;;  %v15652_v48 = vld [vmem:[%s23298_s2 + $0x11f0] ss:$16 sps:$4 sm:$0xff]  }
 0x1bd   :  { %3987 = vmatprep.subr.bf16.mxu1 %v3371_v38  ;;  %v15667_v60 = vld [vmem:[%s23298_s2 + $0xf90] ss:$16 sps:$4 sm:$0xff]  }
 0x1bf   :  { %4015 = vmatpush1.bf16.msra.mxu0 %v3425_v51  ;;  %v15660_v51 = vld [vmem:[%s23298_s2 + $0x11d4] ss:$16 sps:$4 sm:$0xff]  }
 0x1c0   :  { %3988 = vmatpush2.bf16.msra.mxu1 %v3369_v11  ;;  %4016 = vmatprep.subr.bf16.mxu0 %v3419_v4  ;;  %v15657_v11 = vld [vmem:[%s23298_s2 + $0xfd4] ss:$16 sps:$4 sm:$0xff]   ;;  %v15658_v4 = vld [vmem:[%s23298_s2 + $0x11d0] ss:$16 sps:$4 sm:$0xff]  }
 0x1c1   :  { %3989 = vmatprep.subr.bf16.mxu1 %v3363_v20  ;;  %v15655_v20 = vld [vmem:[%s23298_s2 + $0xfd0] ss:$16 sps:$4 sm:$0xff]  }
 0x1c3   :  { %4017 = vmatpush1.bf16.msra.mxu0 %v3417_v9 }
 0x1c4   :  { %3990 = vmatpush2.bf16.msra.mxu1 %v3361_v17  ;;  %13626 = vmatprep.subr.msk.bf16.mxu0 %vm1451_vm1, %v19002_v44  ;;  %v4319_v44 = vcombine.high %v19203_v56, %v19203_v56 }
 0x1c5   :  { %3991 = vmatprep.subr.bf16.mxu1 %v3355_v6 }
 0x1c6   :  { %v19242_v62 = vrot.slane %v4319_v44, 1  ;;  %v15670_v44 = vld [vmem:[%s23298_s2 + $0x1190] ss:$16 sps:$4 sm:$0xff]  }
 0x1c7   :  { %4033 = vmatpush2.bf16.msra.mxu0 %v3710_v8  ;;  %v15666_v8 = vld [vmem:[%s23298_s2 + $0x11b4] ss:$16 sps:$4 sm:$0xff]  }
 0x1c8   :  { %3992 = vmatpush2.bf16.msra.mxu1 %v3353_v10  ;;  %5497 = vmatprep.subr.bf16.mxu0 %v15603_v42  ;;  %v15663_v10 = vld [vmem:[%s23298_s2 + $0xfb4] ss:$16 sps:$4 sm:$0xff]   ;;  %v15661_v42 = vld [vmem:[%s23298_s2 + $0xfb0] ss:$16 sps:$4 sm:$0xff]  }
 0x1c9   :  { %5538 = vmatprep.subr.bf16.mxu1 %v15606_v52  ;;  %v15664_v52 = vld [vmem:[%s23298_s2 + $0x11b0] ss:$16 sps:$4 sm:$0xff]  }
 0x1ca   :  { %4035 = vmatmul.mubr.bf16.vlgmr.msra.gmra.mxu0 %v2105_v55  ;;  %v15621_v55 = vld [vmem:[%s23298_s2 + $0xe94] ss:$16 sps:$4 sm:$0xff]  }
 0x1cb   :  { %3994 = vmatmul.mubr.bf16.vlgmr.msra.gmra.mxu1 %v2099_v1  ;;  %5498 = vmatpush1.bf16.msra.mxu0 %v15601_v22  ;;  %v15624_v1 = vld [vmem:[%s23298_s2 + $0x1094] ss:$16 sps:$4 sm:$0xff]  }
 0x1cc   :  { %5539 = vmatpush1.bf16.msra.mxu1 %v15604_v41  ;;  %5499 = vmatprep.subr.bf16.mxu0 %v15609_v16  ;;  %v15669_v22 = vld [vmem:[%s23298_s2 + $0xf94] ss:$16 sps:$4 sm:$0xff]  }
 0x1cd   :  { %5540 = vmatprep.subr.bf16.mxu1 %v15612_v39  ;;  %5529 = vmatprep.mubr.bf16.mxu0 %v19240_v53  ;;  %v15672_v41 = vld [vmem:[%s23298_s2 + $0x1194] ss:$16 sps:$4 sm:$0xff]  }
 0x1ce   :  { %5570 = vmatprep.mubr.bf16.mxu1 %v19242_v62  ;;  %v15675_v16 = vld [vmem:[%s23298_s2 + $0xf74] ss:$16 sps:$4 sm:$0xff]  }
 0x1cf   :  { %5500 = vmatpush1.bf16.msra.mxu0 %v15607_v30  ;;  %v15678_v39 = vld [vmem:[%s23298_s2 + $0x1174] ss:$16 sps:$4 sm:$0xff]   ;;  %v15673_v30 = vld [vmem:[%s23298_s2 + $0xf70] ss:$16 sps:$4 sm:$0xff]  }
 0x1d0   :  { %5541 = vmatpush1.bf16.msra.mxu1 %v15610_v31  ;;  %5501 = vmatprep.subr.bf16.mxu0 %v15615_v47  ;;  %v15676_v31 = vld [vmem:[%s23298_s2 + $0x1170] ss:$16 sps:$4 sm:$0xff]   ;;  %v15681_v47 = vld [vmem:[%s23298_s2 + $0xf54] ss:$16 sps:$4 sm:$0xff]  }
 0x1d1   :  { %5542 = vmatprep.subr.bf16.mxu1 %v15618_v61  ;;  %v15684_v61 = vld [vmem:[%s23298_s2 + $0x1154] ss:$16 sps:$4 sm:$0xff]  }
 0x1d3   :  { %5502 = vmatpush1.bf16.msra.mxu0 %v15613_v46  ;;  %v4074_v46 = vld [vmem:[%s23299_s0 + $0x8] sm:$0xaa] }
 0x1d4   :  { %5543 = vmatpush1.bf16.msra.mxu1 %v15616_v45  ;;  %5503 = vmatprep.subr.bf16.mxu0 %v15621_v55  ;;  %v15679_v45 = vld [vmem:[%s23298_s2 + $0xf50] ss:$16 sps:$4 sm:$0xff]  }
 0x1d5   :  { %5544 = vmatprep.subr.bf16.mxu1 %v15624_v1  ;;  %v15682_v55 = vld [vmem:[%s23298_s2 + $0x1150] ss:$16 sps:$4 sm:$0xff]   ;;  %v15687_v1 = vld [vmem:[%s23298_s2 + $0xf34] ss:$16 sps:$4 sm:$0xff]  }
 0x1d7   :  { %5504 = vmatpush1.bf16.msra.mxu0 %v15619_v35  ;;  %v15690_v35 = vld [vmem:[%s23298_s2 + $0x1134] ss:$16 sps:$4 sm:$0xff]  }
 0x1d8   :  { %5545 = vmatpush1.bf16.msra.mxu1 %v15622_v36  ;;  %5505 = vmatprep.subr.bf16.mxu0 %v15627_v15  ;;  %v4320_v36 = vcombine.high %v4074_v46, %v4074_v46  ;;  %v15685_v15 = vld [vmem:[%s23298_s2 + $0xf30] ss:$16 sps:$4 sm:$0xff]  }
 0x1d9   :  { %5546 = vmatprep.subr.bf16.mxu1 %v15630_v57  ;;  %v15688_v57 = vld [vmem:[%s23298_s2 + $0x1130] ss:$16 sps:$4 sm:$0xff]  }
 0x1db   :  { %5506 = vmatpush1.bf16.msra.mxu0 %v15625_v2  ;;  %v15693_v2 = vld [vmem:[%s23298_s2 + $0xf14] ss:$16 sps:$4 sm:$0xff]  }
 0x1dc   :  { %5547 = vmatpush1.bf16.msra.mxu1 %v15628_v59  ;;  %5507 = vmatprep.subr.bf16.mxu0 %v15633_v28  ;;  %v15696_v59 = vld [vmem:[%s23298_s2 + $0x1114] ss:$16 sps:$4 sm:$0xff]   ;;  %v19420_v28 = vrot.slane %v4320_v36, %v17283_v49 }
 0x1dd   :  { %5548 = vmatprep.subr.bf16.mxu1 %v15636_v29  ;;  %v19423_v29 = vrot.slane %v4074_v46, %v17283_v49  ;;  %v15742_v46 = vld [vmem:[%s23298_s2 + $0x1214] ss:$16 sps:$4 sm:$0xff]  }
 0x1de   :  { %v15748_v36 = vld [vmem:[%s23298_s2 + $0x13f4] ss:$16 sps:$4 sm:$0xff]  }
 0x1df   :  { %5508 = vmatpush1.bf16.msra.mxu0 %v15631_v25  ;;  %v15691_v25 = vld [vmem:[%s23298_s2 + $0xf10] ss:$16 sps:$4 sm:$0xff]  }
 0x1e0   :  { %5549 = vmatpush1.bf16.msra.mxu1 %v15634_v33  ;;  %5509 = vmatprep.subr.bf16.mxu0 %v15639_v27  ;;  %v15694_v33 = vld [vmem:[%s23298_s2 + $0x1110] ss:$16 sps:$4 sm:$0xff]   ;;  %v15700_v27 = vld [vmem:[%s23298_s2 + $0x12f4] ss:$16 sps:$4 sm:$0xff]  }
 0x1e1   :  { %5550 = vmatprep.subr.bf16.mxu1 %v15642_v21  ;;  %v15703_v21 = vld [vmem:[%s23298_s2 + $0x14f4] ss:$16 sps:$4 sm:$0xff]  }
 0x1e3   :  { %5510 = vmatpush1.bf16.msra.mxu0 %v15637_v32  ;;  %v15698_v32 = vld [vmem:[%s23298_s2 + $0x12f0] ss:$16 sps:$4 sm:$0xff]  }
 0x1e4   :  { %5551 = vmatpush1.bf16.msra.mxu1 %v15640_v18  ;;  %5511 = vmatprep.subr.bf16.mxu0 %v15645_v23  ;;  %v15701_v18 = vld [vmem:[%s23298_s2 + $0x14f0] ss:$16 sps:$4 sm:$0xff]   ;;  %v4336_v23 = vcombine.high %v19420_v28, %v19420_v28 }
 0x1e5   :  { %5552 = vmatprep.subr.bf16.mxu1 %v15648_v13  ;;  %v4335_v13 = vcombine.high %v19423_v29, %v19423_v29 }
 0x1e6   :  { %v3749_v63 = vpop.f32.mrf.mxu0 }
 0x1e7   :  { %v3790_v0 = vpop.f32.mrf.mxu1  ;;  %5512 = vmatpush1.bf16.msra.mxu0 %v15643_v50  ;;  %v4337_v50 = vrot.slane %v19200_v26, 1  ;;  %v15863_v26 = vld [vmem:[%s23298_s2 + $0x12b8] ss:$16 sps:$4 sm:$0xff]  }
 0x1e8   :  { %v19334_v38 = vadd.f32 %v3790_v0, %v3749_v63  ;;  %5553 = vmatpush1.bf16.msra.mxu1 %v15646_v12  ;;  %v3751_v58 = vpop.f32.mrf.mxu0  ;;  %5513 = vmatprep.subr.bf16.mxu0 %v15651_v24  ;;  %v4339_v12 = vrot.slane %v19203_v56, 1  ;;  %v15706_v24 = vld [vmem:[%s23298_s2 + $0x12d4] ss:$16 sps:$4 sm:$0xff]   ;;  %v19461_v63 = vrot.slane %v4336_v23, 1  ;;  %v19463_v0 = vrot.slane %v4335_v13, 1 }
 0x1e9   :  { %v3792_v3 = vpop.f32.mrf.mxu1  ;;  %5554 = vmatprep.subr.bf16.mxu1 %v15654_v37  ;;  %v15709_v37 = vld [vmem:[%s23298_s2 + $0x14d4] ss:$16 sps:$4 sm:$0xff]   ;;  %v15752_v23 = vld [vmem:[%s23298_s2 + $0x13d0] ss:$16 sps:$4 sm:$0xff]   ;;  %v15755_v13 = vld [vmem:[%s23298_s2 + $0xef8] ss:$16 sps:$4 sm:$0xff]  }
 0x1ea   :  { %v19342_v54 = vadd.f32 %v3792_v3, %v3751_v58  ;;  %v3753_v5 = vpop.f32.mrf.mxu0 }
 0x1eb   :  { %v3794_v17 = vpop.f32.mrf.mxu1  ;;  %5514 = vmatpush2.bf16.msra.mxu0 %v15649_v7  ;;  %v15704_v7 = vld [vmem:[%s23298_s2 + $0x12d0] ss:$16 sps:$4 sm:$0xff]  }
 0x1ec   :  { %5555 = vmatpush2.bf16.msra.mxu1 %v15652_v48  ;;  %v3754_v9 = vpop.f32.mrf.mxu0  ;;  %5515 = vmatprep.subr.bf16.mxu0 %v15657_v11  ;;  %v15707_v48 = vld [vmem:[%s23298_s2 + $0x14d0] ss:$16 sps:$4 sm:$0xff]   ;;  %v15712_v11 = vld [vmem:[%s23298_s2 + $0x12b4] ss:$16 sps:$4 sm:$0xff]  }
 0x1ed   :  { %v3795_v6 = vpop.f32.mrf.mxu1  ;;  %5556 = vmatprep.subr.bf16.mxu1 %v15660_v51  ;;  %v15715_v51 = vld [vmem:[%s23298_s2 + $0x14b4] ss:$16 sps:$4 sm:$0xff]  }
 0x1ee   :  { %v15718_v9 = vld [vmem:[%s23298_s2 + $0x1294] ss:$16 sps:$4 sm:$0xff]  }
 0x1ef   :  { %5516 = vmatpush2.bf16.msra.mxu0 %v15655_v20  ;;  %v15710_v20 = vld [vmem:[%s23298_s2 + $0x12b0] ss:$16 sps:$4 sm:$0xff]   ;;  %v15721_v6 = vld [vmem:[%s23298_s2 + $0x1494] ss:$16 sps:$4 sm:$0xff]  }
 0x1f0   :  { %5557 = vmatpush2.bf16.msra.mxu1 %v15658_v4  ;;  %5517 = vmatprep.subr.bf16.mxu0 %v15663_v10  ;;  %v15713_v4 = vld [vmem:[%s23298_s2 + $0x14b0] ss:$16 sps:$4 sm:$0xff]  }
 0x1f1   :  { %5558 = vmatprep.subr.bf16.mxu1 %v15666_v8  ;;  %v15716_v10 = vld [vmem:[%s23298_s2 + $0x1290] ss:$16 sps:$4 sm:$0xff]  }
 0x1f2   :  { %v15719_v8 = vld [vmem:[%s23298_s2 + $0x1490] ss:$16 sps:$4 sm:$0xff]  }
 0x1f3   :  { %5518 = vmatpush2.bf16.msra.mxu0 %v15661_v42  ;;  %v15724_v42 = vld [vmem:[%s23298_s2 + $0x1274] ss:$16 sps:$4 sm:$0xff]  }
 0x1f4   :  { %5559 = vmatpush2.bf16.msra.mxu1 %v15664_v52  ;;  %5519 = vmatprep.subr.bf16.mxu0 %v15669_v22  ;;  %v15727_v52 = vld [vmem:[%s23298_s2 + $0x1474] ss:$16 sps:$4 sm:$0xff]   ;;  %v15722_v22 = vld [vmem:[%s23298_s2 + $0x1270] ss:$16 sps:$4 sm:$0xff]  }
 0x1f5   :  { %5560 = vmatprep.subr.bf16.mxu1 %v15672_v41  ;;  %v15725_v41 = vld [vmem:[%s23298_s2 + $0x1470] ss:$16 sps:$4 sm:$0xff]  }
 0x1f7   :  { %5520 = vmatpush2.bf16.msra.mxu0 %v15667_v60  ;;  %v15730_v60 = vld [vmem:[%s23298_s2 + $0x1254] ss:$16 sps:$4 sm:$0xff]  }
 0x1f8   :  { %5561 = vmatpush2.bf16.msra.mxu1 %v15670_v44  ;;  %5521 = vmatprep.subr.bf16.mxu0 %v15675_v16  ;;  %v15733_v44 = vld [vmem:[%s23298_s2 + $0x1454] ss:$16 sps:$4 sm:$0xff]   ;;  %v15728_v16 = vld [vmem:[%s23298_s2 + $0x1250] ss:$16 sps:$4 sm:$0xff]  }
 0x1f9   :  { %5562 = vmatprep.subr.bf16.mxu1 %v15678_v39  ;;  %v15731_v39 = vld [vmem:[%s23298_s2 + $0x1450] ss:$16 sps:$4 sm:$0xff]  }
 0x1fb   :  { %5522 = vmatpush2.bf16.msra.mxu0 %v15673_v30  ;;  %v15736_v30 = vld [vmem:[%s23298_s2 + $0x1234] ss:$16 sps:$4 sm:$0xff]  }
 0x1fc   :  { %5563 = vmatpush2.bf16.msra.mxu1 %v15676_v31  ;;  %5523 = vmatprep.subr.bf16.mxu0 %v15681_v47  ;;  %v15739_v31 = vld [vmem:[%s23298_s2 + $0x1434] ss:$16 sps:$4 sm:$0xff]   ;;  %v15734_v47 = vld [vmem:[%s23298_s2 + $0x1230] ss:$16 sps:$4 sm:$0xff]  }
 0x1fd   :  { %5564 = vmatprep.subr.bf16.mxu1 %v15684_v61  ;;  %v15737_v61 = vld [vmem:[%s23298_s2 + $0x1430] ss:$16 sps:$4 sm:$0xff]  }
 0x1ff   :  { %5524 = vmatpush2.bf16.msra.mxu0 %v15679_v45  ;;  %v15745_v45 = vld [vmem:[%s23298_s2 + $0x1414] ss:$16 sps:$4 sm:$0xff]  }
 0x200   :  { %5565 = vmatpush2.bf16.msra.mxu1 %v15682_v55  ;;  %5525 = vmatprep.subr.bf16.mxu0 %v15687_v1  ;;  %v4299_v55 = vld [vmem:[%s23298_s2 + $0x1510] sm:$0x33] }
 0x201   :  { %5566 = vmatprep.subr.bf16.mxu1 %v15690_v35  ;;  %v15740_v1 = vld [vmem:[%s23298_s2 + $0x1210] ss:$16 sps:$4 sm:$0xff]  }
 0x202   :  { %v15743_v35 = vld [vmem:[%s23298_s2 + $0x1410] ss:$16 sps:$4 sm:$0xff]  }
 0x203   :  { %5526 = vmatpush2.bf16.msra.mxu0 %v15685_v15  ;;  %v13853_v15 = vcombine.high %v4299_v55, %v4299_v55 }
 0x204   :  { %5567 = vmatpush2.bf16.msra.mxu1 %v15688_v57  ;;  %5527 = vmatprep.subr.bf16.mxu0 %v15693_v2  ;;  %v13852_v57 = vcombine.low %v4299_v55, %v4299_v55  ;;  %v15797_v55 = vld [vmem:[%s23298_s2 + $0x10f8] ss:$16 sps:$4 sm:$0xff]  }
 0x205   :  { %5568 = vmatprep.subr.bf16.mxu1 %v15696_v59 }
 0x207   :  { %5528 = vmatpush2.bf16.msra.mxu0 %v15691_v25  ;;  %v15746_v25 = vld [vmem:[%s23298_s2 + $0x13f0] ss:$16 sps:$4 sm:$0xff]  }
 0x208   :  { %5569 = vmatpush2.bf16.msra.mxu1 %v15694_v33  ;;  %5579 = vmatprep.subr.bf16.mxu0 %v15700_v27  ;;  %v15754_v33 = vld [vmem:[%s23298_s2 + $0x13d4] ss:$16 sps:$4 sm:$0xff]   ;;  %v15757_v27 = vld [vmem:[%s23298_s2 + $0xefc] ss:$16 sps:$4 sm:$0xff]  }
 0x209   :  { %5620 = vmatprep.subr.bf16.mxu1 %v15703_v21 }
 0x20a   :  { %5530 = vmatmul.mubr.bf16.vlgmr.msra.gmra.mxu0 %v4337_v50 }
 0x20b   :  { %v19465_v58 = vpop.f32.mrf.mxu1  ;;  %5571 = vmatmul.mubr.bf16.vlgmr.msra.gmra.mxu1 %v4339_v12  ;;  %5580 = vmatpush1.bf16.msra.mxu0 %v15698_v32 }
 0x20c   :  { %5621 = vmatpush1.bf16.msra.mxu1 %v15701_v18  ;;  %5581 = vmatprep.subr.bf16.mxu0 %v15706_v24 }
 0x20d   :  { %v19471_v3 = vpop.f32.mrf.mxu1  ;;  %5622 = vmatprep.subr.bf16.mxu1 %v15709_v37  ;;  %13857 = vmatprep.mubr.msk.bf16.mxu1 %vm1447_vm0, %v19461_v63  ;;  %v4343_v37 = vrot.slane %v19420_v28, 1 }
 0x20e   :  { %5611 = vmatprep.mubr.bf16.mxu0 %v19463_v0 }
 0x20f   :  { %v3876_v5 = vpop.f32.mrf.mxu1  ;;  %5582 = vmatpush1.bf16.msra.mxu0 %v15704_v7  ;;  %v15760_v7 = vld [vmem:[%s23298_s2 + $0x13b4] ss:$16 sps:$4 sm:$0xff]  }
 0x210   :  { %5623 = vmatpush1.bf16.msra.mxu1 %v15707_v48  ;;  %5583 = vmatprep.subr.bf16.mxu0 %v15712_v11  ;;  %v15763_v48 = vld [vmem:[%s23298_s2 + $0xedc] ss:$16 sps:$4 sm:$0xff]   ;;  %v15764_v5 = vld [vmem:[%s23298_s2 + $0x1390] ss:$16 sps:$4 sm:$0xff]  }
 0x211   :  { %v3877_v17 = vpop.f32.mrf.mxu1  ;;  %5624 = vmatprep.subr.bf16.mxu1 %v15715_v51  ;;  %v15758_v51 = vld [vmem:[%s23298_s2 + $0x13b0] ss:$16 sps:$4 sm:$0xff]  }
 0x212   :  { %v15767_v17 = vld [vmem:[%s23298_s2 + $0xeb8] ss:$16 sps:$4 sm:$0xff]  }
 0x213   :  { %5584 = vmatpush1.bf16.msra.mxu0 %v15710_v20  ;;  %v15761_v20 = vld [vmem:[%s23298_s2 + $0xed8] ss:$16 sps:$4 sm:$0xff]  }
 0x214   :  { %5625 = vmatpush1.bf16.msra.mxu1 %v15713_v4  ;;  %5585 = vmatprep.subr.bf16.mxu0 %v15718_v9  ;;  %v15769_v4 = vld [vmem:[%s23298_s2 + $0xebc] ss:$16 sps:$4 sm:$0xff]   ;;  %v15772_v9 = vld [vmem:[%s23298_s2 + $0x1374] ss:$16 sps:$4 sm:$0xff]  }
 0x215   :  { %5626 = vmatprep.subr.bf16.mxu1 %v15721_v6  ;;  %v15775_v6 = vld [vmem:[%s23298_s2 + $0xe9c] ss:$16 sps:$4 sm:$0xff]  }
 0x217   :  { %5586 = vmatpush1.bf16.msra.mxu0 %v15716_v10  ;;  %v15770_v10 = vld [vmem:[%s23298_s2 + $0x1370] ss:$16 sps:$4 sm:$0xff]  }
 0x218   :  { %5627 = vmatpush1.bf16.msra.mxu1 %v15719_v8  ;;  %5587 = vmatprep.subr.bf16.mxu0 %v15724_v42  ;;  %v15778_v8 = vld [vmem:[%s23298_s2 + $0x1354] ss:$16 sps:$4 sm:$0xff]   ;;  %v15781_v42 = vld [vmem:[%s23298_s2 + $0xe7c] ss:$16 sps:$4 sm:$0xff]  }
 0x219   :  { %5628 = vmatprep.subr.bf16.mxu1 %v15727_v52  ;;  %v15776_v52 = vld [vmem:[%s23298_s2 + $0x1350] ss:$16 sps:$4 sm:$0xff]  }
 0x21b   :  { %5588 = vmatpush1.bf16.msra.mxu0 %v15722_v22  ;;  %v15779_v22 = vld [vmem:[%s23298_s2 + $0xe78] ss:$16 sps:$4 sm:$0xff]  }
 0x21c   :  { %5629 = vmatpush1.bf16.msra.mxu1 %v15725_v41  ;;  %5589 = vmatprep.subr.bf16.mxu0 %v15730_v60  ;;  %v15784_v41 = vld [vmem:[%s23298_s2 + $0x1334] ss:$16 sps:$4 sm:$0xff]   ;;  %v15787_v60 = vld [vmem:[%s23298_s2 + $0xe5c] ss:$16 sps:$4 sm:$0xff]  }
 0x21d   :  { %5630 = vmatprep.subr.bf16.mxu1 %v15733_v44  ;;  %v15782_v44 = vld [vmem:[%s23298_s2 + $0x1330] ss:$16 sps:$4 sm:$0xff]  }
 0x21f   :  { %5590 = vmatpush1.bf16.msra.mxu0 %v15728_v16  ;;  %v15785_v16 = vld [vmem:[%s23298_s2 + $0xe58] ss:$16 sps:$4 sm:$0xff]  }
 0x220   :  { %5631 = vmatpush1.bf16.msra.mxu1 %v15731_v39  ;;  %5591 = vmatprep.subr.bf16.mxu0 %v15736_v30  ;;  %v15790_v39 = vld [vmem:[%s23298_s2 + $0x1314] ss:$16 sps:$4 sm:$0xff]   ;;  %v15793_v30 = vld [vmem:[%s23298_s2 + $0xe3c] ss:$16 sps:$4 sm:$0xff]  }
 0x221   :  { %5632 = vmatprep.subr.bf16.mxu1 %v15739_v31  ;;  %v15788_v31 = vld [vmem:[%s23298_s2 + $0x1310] ss:$16 sps:$4 sm:$0xff]  }
 0x223   :  { %5592 = vmatpush1.bf16.msra.mxu0 %v15734_v47  ;;  %v15791_v47 = vld [vmem:[%s23298_s2 + $0xe38] ss:$16 sps:$4 sm:$0xff]  }
 0x224   :  { %5633 = vmatpush1.bf16.msra.mxu1 %v15737_v61  ;;  %5593 = vmatprep.subr.bf16.mxu0 %v15742_v46  ;;  %v15796_v61 = vld [vmem:[%s23298_s2 + $0xe1c] ss:$16 sps:$4 sm:$0xff]  }
 0x225   :  { %5634 = vmatprep.subr.bf16.mxu1 %v15745_v45  ;;  %v15799_v46 = vld [vmem:[%s23298_s2 + $0x10fc] ss:$16 sps:$4 sm:$0xff]   ;;  %v15794_v45 = vld [vmem:[%s23298_s2 + $0xe18] ss:$16 sps:$4 sm:$0xff]  }
 0x226   :  { %v3831_v2 = vpop.f32.mrf.mxu0 }
 0x227   :  { %v3832_v59 = vadd.f32 %v3831_v2, %v19334_v38  ;;  %5594 = vmatpush1.bf16.msra.mxu0 %v15740_v1  ;;  %v5486_v38 = vsel %vm1451_vm1, %v13852_v57, 0  ;;  %v4341_v1 = vrot.slane %v19423_v29, 1  ;;  %v15803_v57 = vld [vmem:[%s23298_s2 + $0x10d8] ss:$16 sps:$4 sm:$0xff]  }
 0x228   :  { %5635 = vmatpush1.bf16.msra.mxu1 %v15743_v35  ;;  %v3833_v21 = vpop.f32.mrf.mxu0  ;;  %5595 = vmatprep.subr.bf16.mxu0 %v15748_v36  ;;  %v15802_v35 = vld [vmem:[%s23298_s2 + $0xffc] ss:$16 sps:$4 sm:$0xff]  }
 0x229   :  { %13856 = vmatprep.subr.msk.bf16.mxu1 %vm1451_vm1, %v13853_v15  ;;  %v19567_v32 = vadd.f32 %v19465_v58, %v3832_v59  ;;  %v3834_v18 = vadd.f32 %v3833_v21, %v19342_v54  ;;  %v15805_v36 = vld [vmem:[%s23298_s2 + $0x10dc] ss:$16 sps:$4 sm:$0xff]   ;;  %v15800_v15 = vld [vmem:[%s23298_s2 + $0xff8] ss:$16 sps:$4 sm:$0xff]  }
 0x22a   :  { %v3835_v24 = vpop.f32.mrf.mxu0  ;;  %v15808_v59 = vld [vmem:[%s23298_s2 + $0xfdc] ss:$16 sps:$4 sm:$0xff]   ;;  %v15809_v21 = vld [vmem:[%s23298_s2 + $0x10b8] ss:$16 sps:$4 sm:$0xff]  }
 0x22b   :  { %v19584_v54 = vadd.f32 %v19471_v3, %v3834_v18  ;;  %5596 = vmatpush2.bf16.msra.mxu0 %v15746_v25  ;;  %v15766_v3 = vld [vmem:[%s23298_s2 + $0x1394] ss:$16 sps:$4 sm:$0xff]   ;;  %v15811_v25 = vld [vmem:[%s23298_s2 + $0x10bc] ss:$16 sps:$4 sm:$0xff]   ;;  %v15812_v24 = vld [vmem:[%s23298_s2 + $0xfb8] ss:$16 sps:$4 sm:$0xff]  }
 0x22c   :  { %5651 = vmatpush2.bf16.msra.mxu1 %v5486_v38  ;;  %v3836_v58 = vpop.f32.mrf.mxu0  ;;  %5597 = vmatprep.subr.bf16.mxu0 %v15754_v33  ;;  %v15814_v18 = vld [vmem:[%s23298_s2 + $0xfbc] ss:$16 sps:$4 sm:$0xff]  }
 0x22d   :  { %5661 = vmatprep.subr.bf16.mxu1 %v15757_v27  ;;  %v4047_v11 = vcombine.low %v19567_v32, %v19584_v54  ;;  %v15806_v27 = vld [vmem:[%s23298_s2 + $0xfd8] ss:$16 sps:$4 sm:$0xff]  }
 0x22e   :  { %v15818_v58 = vld [vmem:[%s23298_s2 + $0xf98] ss:$16 sps:$4 sm:$0xff]  }
 0x22f   :  { %5653 = vmatmul.mubr.bf16.vlgmr.msra.gmra.mxu1 %v4343_v37  ;;  %5598 = vmatpush2.bf16.msra.mxu0 %v15752_v23  ;;  %v15817_v23 = vld [vmem:[%s23298_s2 + $0x109c] ss:$16 sps:$4 sm:$0xff]  }
 0x230   :  { %5662 = vmatpush1.bf16.msra.mxu1 %v15755_v13  ;;  %5599 = vmatprep.subr.bf16.mxu0 %v15760_v7  ;;  %v15820_v7 = vld [vmem:[%s23298_s2 + $0xf9c] ss:$16 sps:$4 sm:$0xff]  }
 0x231   :  { %5663 = vmatprep.subr.bf16.mxu1 %v15763_v48  ;;  %5693 = vmatprep.mubr.bf16.mxu1 %v19240_v53  ;;  %v15773_v53 = vld [vmem:[%s23298_s2 + $0xe98] ss:$16 sps:$4 sm:$0xff]   ;;  %v15823_v48 = vld [vmem:[%s23298_s2 + $0x107c] ss:$16 sps:$4 sm:$0xff]  }
 0x232   :  { %v15943_v29 = vld [vmem:[%s23301_s4 + $0x78] sm:$0xff]  }
 0x233   :  { %5600 = vmatpush2.bf16.msra.mxu0 %v15758_v51  ;;  %v15821_v51 = vld [vmem:[%s23298_s2 + $0x1078] ss:$16 sps:$4 sm:$0xff]  }
 0x234   :  { %5664 = vmatpush1.bf16.msra.mxu1 %v15761_v20  ;;  %5601 = vmatprep.subr.bf16.mxu0 %v15766_v3  ;;  %v15826_v20 = vld [vmem:[%s23298_s2 + $0xf7c] ss:$16 sps:$4 sm:$0xff]  }
 0x235   :  { %5665 = vmatprep.subr.bf16.mxu1 %v15769_v4  ;;  %v15829_v3 = vld [vmem:[%s23298_s2 + $0x105c] ss:$16 sps:$4 sm:$0xff]   ;;  %v15824_v4 = vld [vmem:[%s23298_s2 + $0xf78] ss:$16 sps:$4 sm:$0xff]  }
 0x237   :  { %5602 = vmatpush2.bf16.msra.mxu0 %v15764_v5  ;;  %v15827_v5 = vld [vmem:[%s23298_s2 + $0x1058] ss:$16 sps:$4 sm:$0xff]  }
 0x238   :  { %5666 = vmatpush1.bf16.msra.mxu1 %v15767_v17  ;;  %5603 = vmatprep.subr.bf16.mxu0 %v15772_v9  ;;  %v15832_v17 = vld [vmem:[%s23298_s2 + $0xf5c] ss:$16 sps:$4 sm:$0xff]  }
 0x239   :  { %5667 = vmatprep.subr.bf16.mxu1 %v15775_v6  ;;  %v15835_v9 = vld [vmem:[%s23298_s2 + $0x103c] ss:$16 sps:$4 sm:$0xff]   ;;  %v15830_v6 = vld [vmem:[%s23298_s2 + $0xf58] ss:$16 sps:$4 sm:$0xff]  }
 0x23b   :  { %5604 = vmatpush2.bf16.msra.mxu0 %v15770_v10  ;;  %v15833_v10 = vld [vmem:[%s23298_s2 + $0x1038] ss:$16 sps:$4 sm:$0xff]  }
 0x23c   :  { %5668 = vmatpush1.bf16.msra.mxu1 %v15773_v53  ;;  %5605 = vmatprep.subr.bf16.mxu0 %v15778_v8  ;;  %v15838_v53 = vld [vmem:[%s23298_s2 + $0xf3c] ss:$16 sps:$4 sm:$0xff]  }
 0x23d   :  { %5669 = vmatprep.subr.bf16.mxu1 %v15781_v42  ;;  %v15841_v8 = vld [vmem:[%s23298_s2 + $0x101c] ss:$16 sps:$4 sm:$0xff]   ;;  %v15836_v42 = vld [vmem:[%s23298_s2 + $0xf38] ss:$16 sps:$4 sm:$0xff]  }
 0x23f   :  { %5606 = vmatpush2.bf16.msra.mxu0 %v15776_v52  ;;  %v15839_v52 = vld [vmem:[%s23298_s2 + $0x1018] ss:$16 sps:$4 sm:$0xff]  }
 0x240   :  { %5670 = vmatpush1.bf16.msra.mxu1 %v15779_v22  ;;  %5607 = vmatprep.subr.bf16.mxu0 %v15784_v41  ;;  %v15844_v22 = vld [vmem:[%s23298_s2 + $0xf1c] ss:$16 sps:$4 sm:$0xff]  }
 0x241   :  { %5671 = vmatprep.subr.bf16.mxu1 %v15787_v60  ;;  %v15847_v41 = vld [vmem:[%s23298_s2 + $0x11fc] ss:$16 sps:$4 sm:$0xff]   ;;  %v15842_v60 = vld [vmem:[%s23298_s2 + $0xf18] ss:$16 sps:$4 sm:$0xff]  }
 0x243   :  { %5608 = vmatpush2.bf16.msra.mxu0 %v15782_v44  ;;  %v15845_v44 = vld [vmem:[%s23298_s2 + $0x11f8] ss:$16 sps:$4 sm:$0xff]  }
 0x244   :  { %5672 = vmatpush1.bf16.msra.mxu1 %v15785_v16  ;;  %5609 = vmatprep.subr.bf16.mxu0 %v15790_v39  ;;  %v15850_v39 = vld [vmem:[%s23298_s2 + $0x11dc] ss:$16 sps:$4 sm:$0xff]  }
 0x245   :  { %5673 = vmatprep.subr.bf16.mxu1 %v15793_v30  ;;  %v15853_v30 = vld [vmem:[%s23298_s2 + $0x12fc] ss:$16 sps:$4 sm:$0xff]  }
 0x247   :  { %5610 = vmatpush2.bf16.msra.mxu0 %v15788_v31 }
 0x248   :  { %5674 = vmatpush1.bf16.msra.mxu1 %v15791_v47  ;;  %5702 = vmatprep.subr.bf16.mxu0 %v15799_v46  ;;  %v15848_v46 = vld [vmem:[%s23298_s2 + $0x11d8] ss:$16 sps:$4 sm:$0xff]  }
 0x249   :  { %5675 = vmatprep.subr.bf16.mxu1 %v15796_v61 }
 0x24a   :  { %5612 = vmatmul.mubr.bf16.vlgmr.msra.gmra.mxu0 %v4341_v1 }
 0x24b   :  { %v19682_v2 = vpop.f32.mrf.mxu1  ;;  %5703 = vmatpush1.bf16.msra.mxu0 %v15797_v55  ;;  %5734 = vmatprep.mubr.bf16.mxu0 %v19242_v62  ;;  %v15815_v62 = vld [vmem:[%s23298_s2 + $0x1098] ss:$16 sps:$4 sm:$0xff]  }
 0x24c   :  { %5676 = vmatpush1.bf16.msra.mxu1 %v15794_v45  ;;  %5704 = vmatprep.subr.bf16.mxu0 %v15805_v36  ;;  %v15851_v45 = vld [vmem:[%s23298_s2 + $0x12f8] ss:$16 sps:$4 sm:$0xff]   ;;  %v15859_v36 = vld [vmem:[%s23298_s2 + $0x12dc] ss:$16 sps:$4 sm:$0xff]  }
 0x24d   :  { %v19692_v33 = vpop.f32.mrf.mxu1  ;;  %5677 = vmatprep.subr.bf16.mxu1 %v15802_v35  ;;  %v15856_v35 = vld [vmem:[%s23298_s2 + $0x11bc] ss:$16 sps:$4 sm:$0xff]  }
 0x24f   :  { %v3917_v38 = vpop.f32.mrf.mxu1  ;;  %5705 = vmatpush1.bf16.msra.mxu0 %v15803_v57  ;;  %v15854_v57 = vld [vmem:[%s23298_s2 + $0x11b8] ss:$16 sps:$4 sm:$0xff]  }
 0x250   :  { %5678 = vmatpush2.bf16.msra.mxu1 %v15800_v15  ;;  %5706 = vmatprep.subr.bf16.mxu0 %v15811_v25  ;;  %v15865_v25 = vld [vmem:[%s23298_s2 + $0x12bc] ss:$16 sps:$4 sm:$0xff]  }
 0x251   :  { %v3918_v13 = vpop.f32.mrf.mxu1  ;;  %5679 = vmatprep.subr.bf16.mxu1 %v15808_v59  ;;  %v15862_v59 = vld [vmem:[%s23298_s2 + $0x119c] ss:$16 sps:$4 sm:$0xff]  }
 0x252   :  { %v15874_v38 = vld [vmem:[%s23298_s2 + $0x115c] ss:$16 sps:$4 sm:$0xff]   ;;  %v15875_v13 = vld [vmem:[%s23298_s2 + $0x1278] ss:$16 sps:$4 sm:$0xff]  }
 0x253   :  { %5707 = vmatpush1.bf16.msra.mxu0 %v15809_v21  ;;  %v15866_v21 = vld [vmem:[%s23298_s2 + $0x1178] ss:$16 sps:$4 sm:$0xff]  }
 0x254   :  { %5680 = vmatpush2.bf16.msra.mxu1 %v15806_v27  ;;  %5708 = vmatprep.subr.bf16.mxu0 %v15817_v23  ;;  %v15871_v27 = vld [vmem:[%s23298_s2 + $0x129c] ss:$16 sps:$4 sm:$0xff]   ;;  %v15872_v23 = vld [vmem:[%s23298_s2 + $0x1158] ss:$16 sps:$4 sm:$0xff]  }
 0x255   :  { %5681 = vmatprep.subr.bf16.mxu1 %v15814_v18  ;;  %v15877_v18 = vld [vmem:[%s23298_s2 + $0x127c] ss:$16 sps:$4 sm:$0xff]  }
 0x257   :  { %5709 = vmatpush1.bf16.msra.mxu0 %v15815_v62  ;;  %v15883_v62 = vld [vmem:[%s23298_s2 + $0x125c] ss:$16 sps:$4 sm:$0xff]  }
 0x258   :  { %5682 = vmatpush2.bf16.msra.mxu1 %v15812_v24  ;;  %5710 = vmatprep.subr.bf16.mxu0 %v15823_v48  ;;  %v15880_v24 = vld [vmem:[%s23298_s2 + $0x113c] ss:$16 sps:$4 sm:$0xff]   ;;  %v15881_v48 = vld [vmem:[%s23298_s2 + $0x1258] ss:$16 sps:$4 sm:$0xff]  }
 0x259   :  { %5683 = vmatprep.subr.bf16.mxu1 %v15820_v7  ;;  %v15878_v7 = vld [vmem:[%s23298_s2 + $0x1138] ss:$16 sps:$4 sm:$0xff]  }
 0x25b   :  { %5711 = vmatpush1.bf16.msra.mxu0 %v15821_v51  ;;  %v15889_v51 = vld [vmem:[%s23298_s2 + $0x123c] ss:$16 sps:$4 sm:$0xff]  }
 0x25c   :  { %5684 = vmatpush2.bf16.msra.mxu1 %v15818_v58  ;;  %5712 = vmatprep.subr.bf16.mxu0 %v15829_v3  ;;  %v15886_v58 = vld [vmem:[%s23298_s2 + $0x111c] ss:$16 sps:$4 sm:$0xff]   ;;  %v15887_v3 = vld [vmem:[%s23298_s2 + $0x1238] ss:$16 sps:$4 sm:$0xff]  }
 0x25d   :  { %5685 = vmatprep.subr.bf16.mxu1 %v15826_v20  ;;  %v15884_v20 = vld [vmem:[%s23298_s2 + $0x1118] ss:$16 sps:$4 sm:$0xff]  }
 0x25f   :  { %5713 = vmatpush1.bf16.msra.mxu0 %v15827_v5  ;;  %v15895_v5 = vld [vmem:[%s23298_s2 + $0x14fc] ss:$16 sps:$4 sm:$0xff]  }
 0x260   :  { %5686 = vmatpush2.bf16.msra.mxu1 %v15824_v4  ;;  %5714 = vmatprep.subr.bf16.mxu0 %v15835_v9  ;;  %v15892_v4 = vld [vmem:[%s23298_s2 + $0x121c] ss:$16 sps:$4 sm:$0xff]   ;;  %v15893_v9 = vld [vmem:[%s23298_s2 + $0x14f8] ss:$16 sps:$4 sm:$0xff]  }
 0x261   :  { %5687 = vmatprep.subr.bf16.mxu1 %v15832_v17  ;;  %v15890_v17 = vld [vmem:[%s23298_s2 + $0x1218] ss:$16 sps:$4 sm:$0xff]  }
 0x263   :  { %5715 = vmatpush1.bf16.msra.mxu0 %v15833_v10  ;;  %v15901_v10 = vld [vmem:[%s23298_s2 + $0x14dc] ss:$16 sps:$4 sm:$0xff]  }
 0x264   :  { %5688 = vmatpush2.bf16.msra.mxu1 %v15830_v6  ;;  %5716 = vmatprep.subr.bf16.mxu0 %v15841_v8  ;;  %v15898_v6 = vld [vmem:[%s23298_s2 + $0x13fc] ss:$16 sps:$4 sm:$0xff]   ;;  %v15899_v8 = vld [vmem:[%s23298_s2 + $0x14d8] ss:$16 sps:$4 sm:$0xff]  }
 0x265   :  { %5689 = vmatprep.subr.bf16.mxu1 %v15838_v53  ;;  %v15896_v53 = vld [vmem:[%s23298_s2 + $0x13f8] ss:$16 sps:$4 sm:$0xff]  }
 0x266   :  { %v3954_v16 = vpop.f32.mrf.mxu0 }
 0x267   :  { %v19780_v31 = vadd.f32 %v3954_v16, %v19682_v2  ;;  %5717 = vmatpush1.bf16.msra.mxu0 %v15839_v52  ;;  %v15857_v2 = vld [vmem:[%s23298_s2 + $0x12d8] ss:$16 sps:$4 sm:$0xff]  }
 0x268   :  { %5690 = vmatpush2.bf16.msra.mxu1 %v15836_v42  ;;  %v3956_v47 = vpop.f32.mrf.mxu0  ;;  %5718 = vmatprep.subr.bf16.mxu0 %v15847_v41  ;;  %v15907_v41 = vld [vmem:[%s23298_s2 + $0x14bc] ss:$16 sps:$4 sm:$0xff]  }
 0x269   :  { %5691 = vmatprep.subr.bf16.mxu1 %v15844_v22  ;;  %v19783_v61 = vadd.f32 %v3956_v47, %v19692_v33  ;;  %v15860_v33 = vld [vmem:[%s23298_s2 + $0x1198] ss:$16 sps:$4 sm:$0xff]   ;;  %v15904_v22 = vld [vmem:[%s23298_s2 + $0x13dc] ss:$16 sps:$4 sm:$0xff]  }
 0x26a   :  { %v3958_v55 = vpop.f32.mrf.mxu0 }
 0x26b   :  { %5719 = vmatpush2.bf16.msra.mxu0 %v15845_v44 }
 0x26c   :  { %5692 = vmatpush2.bf16.msra.mxu1 %v15842_v60  ;;  %v3959_v15 = vpop.f32.mrf.mxu0  ;;  %5720 = vmatprep.subr.bf16.mxu0 %v15850_v39 }
 0x26d   :  { %5743 = vmatprep.subr.bf16.mxu1 %v15853_v30  ;;  %v15905_v30 = vld [vmem:[%s23298_s2 + $0x14b8] ss:$16 sps:$4 sm:$0xff]  }
 0x26e   :  { %v15911_v15 = vld [vmem:[%s23298_s2 + $0x1498] ss:$16 sps:$4 sm:$0xff]  }
 0x26f   :  { %5694 = vmatmul.mubr.bf16.vlgmr.msra.gmra.mxu1 %v4337_v50  ;;  %5721 = vmatpush2.bf16.msra.mxu0 %v15848_v46  ;;  %v15868_v50 = vld [vmem:[%s23298_s2 + $0x117c] ss:$16 sps:$4 sm:$0xff]  }
 0x270   :  { %5744 = vmatpush1.bf16.msra.mxu1 %v15851_v45  ;;  %5722 = vmatprep.subr.bf16.mxu0 %v15856_v35  ;;  %v15910_v46 = vld [vmem:[%s23298_s2 + $0x13bc] ss:$16 sps:$4 sm:$0xff]  }
 0x271   :  { %5745 = vmatprep.subr.bf16.mxu1 %v15859_v36  ;;  %5775 = vmatprep.mubr.bf16.mxu1 %v19463_v0  ;;  %v15869_v0 = vld [vmem:[%s23298_s2 + $0x1298] ss:$16 sps:$4 sm:$0xff]  }
 0x273   :  { %5723 = vmatpush2.bf16.msra.mxu0 %v15854_v57  ;;  %v45_v57 = vld [vmem:[%s23300_s3] sm:$0xf] }
 0x274   :  { %5746 = vmatpush1.bf16.msra.mxu1 %v15857_v2  ;;  %5724 = vmatprep.subr.bf16.mxu0 %v15862_v59  ;;  %v15916_v2 = vld [vmem:[%s23298_s2 + $0x139c] ss:$16 sps:$4 sm:$0xff]  }
 0x275   :  { %5747 = vmatprep.subr.bf16.mxu1 %v15865_v25  ;;  %v15919_v59 = vld [vmem:[%s23298_s2 + $0x147c] ss:$16 sps:$4 sm:$0xff]   ;;  %v1819_v25 = vrot.slane %v1812_v19, %v19117_v14 }
 0x276   :  { %v15925_v19 = vld [vmem:[%s23298_s2 + $0x145c] ss:$16 sps:$4 sm:$0xff]  }
 0x277   :  { %5725 = vmatpush2.bf16.msra.mxu0 %v15860_v33  ;;  %v4055_v33 = vrot.slane %v4047_v11, %v19117_v14  ;;  %v1821_v32 = vadd.f32 %v1819_v25, %v45_v57  ;;  %v15958_v57 = vld [vmem:[%s23301_s4 + $0xa0] sm:$0xff]   ;;  %v15959_v25 = vld [vmem:[%s23301_s4 + $0x58] sm:$0xff]  }
 0x278   :  { %5748 = vmatpush1.bf16.msra.mxu1 %v15863_v26  ;;  %5726 = vmatprep.subr.bf16.mxu0 %v15868_v50 }
 0x279   :  { %5749 = vmatprep.subr.bf16.mxu1 %v15871_v27  ;;  %v15914_v27 = vld [vmem:[%s23298_s2 + $0x1398] ss:$16 sps:$4 sm:$0xff]  }
 0x27b   :  { %5727 = vmatpush2.bf16.msra.mxu0 %v15866_v21  ;;  %v15920_v21 = vld [vmem:[%s23298_s2 + $0x1378] ss:$16 sps:$4 sm:$0xff]  }
 0x27c   :  { %5750 = vmatpush1.bf16.msra.mxu1 %v15869_v0  ;;  %5728 = vmatprep.subr.bf16.mxu0 %v15874_v38  ;;  %v15923_v0 = vld [vmem:[%s23298_s2 + $0x1458] ss:$16 sps:$4 sm:$0xff]   ;;  %v15928_v38 = vld [vmem:[%s23298_s2 + $0x135c] ss:$16 sps:$4 sm:$0xff]  }
 0x27d   :  { %5751 = vmatprep.subr.bf16.mxu1 %v15877_v18  ;;  %v15931_v18 = vld [vmem:[%s23298_s2 + $0x143c] ss:$16 sps:$4 sm:$0xff]  }
 0x27f   :  { %5729 = vmatpush2.bf16.msra.mxu0 %v15872_v23  ;;  %v15926_v23 = vld [vmem:[%s23298_s2 + $0x1358] ss:$16 sps:$4 sm:$0xff]  }
 0x280   :  { %5752 = vmatpush1.bf16.msra.mxu1 %v15875_v13  ;;  %5730 = vmatprep.subr.bf16.mxu0 %v15880_v24  ;;  %v15929_v13 = vld [vmem:[%s23298_s2 + $0x1438] ss:$16 sps:$4 sm:$0xff]   ;;  %v15934_v24 = vld [vmem:[%s23298_s2 + $0x133c] ss:$16 sps:$4 sm:$0xff]  }
 0x281   :  { %5753 = vmatprep.subr.bf16.mxu1 %v15883_v62  ;;  %v15937_v62 = vld [vmem:[%s23298_s2 + $0x141c] ss:$16 sps:$4 sm:$0xff]  }
 0x283   :  { %5731 = vmatpush2.bf16.msra.mxu0 %v15878_v7  ;;  %v4300_v7 = vld [vmem:[%s23298_s2 + $0x1518] sm:$0x33] }
 0x284   :  { %5754 = vmatpush1.bf16.msra.mxu1 %v15881_v48  ;;  %5732 = vmatprep.subr.bf16.mxu0 %v15886_v58  ;;  %v15932_v48 = vld [vmem:[%s23298_s2 + $0x1338] ss:$16 sps:$4 sm:$0xff]  }
 0x285   :  { %5755 = vmatprep.subr.bf16.mxu1 %v15889_v51  ;;  %v15935_v58 = vld [vmem:[%s23298_s2 + $0x1418] ss:$16 sps:$4 sm:$0xff]   ;;  %v15940_v51 = vld [vmem:[%s23298_s2 + $0x131c] ss:$16 sps:$4 sm:$0xff]  }
 0x287   :  { %5733 = vmatpush2.bf16.msra.mxu0 %v15884_v20  ;;  %v13855_v20 = vcombine.high %v4300_v7, %v4300_v7 }
 0x288   :  { %5756 = vmatpush1.bf16.msra.mxu1 %v15887_v3  ;;  %5784 = vmatprep.subr.bf16.mxu0 %v15895_v5  ;;  %v13854_v3 = vcombine.low %v4300_v7, %v4300_v7 }
 0x289   :  { %5757 = vmatprep.subr.bf16.mxu1 %v15892_v4  ;;  %v15938_v4 = vld [vmem:[%s23298_s2 + $0x1318] ss:$16 sps:$4 sm:$0xff]  }
 0x28a   :  { %v4036_v52 = vpop.f32.mrf.mxu0  ;;  %5735 = vmatmul.mubr.bf16.vlgmr.msra.gmra.mxu0 %v4339_v12  ;;  %v15902_v12 = vld [vmem:[%s23298_s2 + $0x13d8] ss:$16 sps:$4 sm:$0xff]   ;;  %v5492_v5 = vsel %vm1451_vm1, %v13854_v3, 0 }
 0x28b   :  { %v3995_v42 = vpop.f32.mrf.mxu1  ;;  %5785 = vmatpush1.bf16.msra.mxu0 %v15893_v9  ;;  %13859 = vmatprep.mubr.msk.bf16.mxu0 %vm1447_vm0, %v19461_v63  ;;  %v15908_v63 = vld [vmem:[%s23298_s2 + $0x13b8] ss:$16 sps:$4 sm:$0xff]  }
 0x28c   :  { %v3996_v60 = vadd.f32 %v3995_v42, %v19780_v31  ;;  %5758 = vmatpush1.bf16.msra.mxu1 %v15890_v17  ;;  %v4038_v16 = vpop.f32.mrf.mxu0  ;;  %5786 = vmatprep.subr.bf16.mxu0 %v15901_v10 }
 0x28d   :  { %v3997_v44 = vpop.f32.mrf.mxu1  ;;  %5759 = vmatprep.subr.bf16.mxu1 %v15898_v6 }
 0x28e   :  { %v4037_v39 = vadd.f32 %v4036_v52, %v3996_v60  ;;  %v3998_v56 = vadd.f32 %v3997_v44, %v19783_v61  ;;  %v4040_v47 = vpop.f32.mrf.mxu0  ;;  %v15913_v61 = vld [vmem:[%s23298_s2 + $0x149c] ss:$16 sps:$4 sm:$0xff]  }
 0x28f   :  { %v3999_v31 = vpop.f32.mrf.mxu1  ;;  %5787 = vmatpush1.bf16.msra.mxu0 %v15899_v8  ;;  %v15945_v44 = vld [vmem:[%s23301_s4 + $0x38] sm:$0xff]   ;;  %v15951_v47 = vld [vmem:[%s23301_s4 + $0x68] sm:$0xff]  }
 0x290   :  { %v4039_v45 = vadd.f32 %v4038_v16, %v3998_v56  ;;  %5760 = vmatpush2.bf16.msra.mxu1 %v15896_v53  ;;  %v4041_v35 = vpop.f32.mrf.mxu0  ;;  %5788 = vmatprep.subr.bf16.mxu0 %v15907_v41  ;;  %v15947_v56 = vld [vmem:[%s23301_s4 + $0x70] sm:$0xff]  }
 0x291   :  { %v4000_v55 = vpop.f32.mrf.mxu1  ;;  %5761 = vmatprep.subr.bf16.mxu1 %v15904_v22  ;;  %v15950_v31 = vld [vmem:[%s23301_s4 + $0xb0] sm:$0xff]  }
 0x292   :  { %v4048_v36 = vcombine.low %v4037_v39, %v4039_v45  ;;  %v15946_v39 = vld [vmem:[%s23301_s4 + $0xb8] sm:$0xff]   ;;  %v15954_v45 = vld [vmem:[%s23301_s4 + $0xa8] sm:$0xff]  }
 0x293   :  { %5789 = vmatpush1.bf16.msra.mxu0 %v15905_v30  ;;  %v15949_v30 = vld [vmem:[%s23301_s4 + $0x30] sm:$0xff]  }
 0x294   :  { %v4062_v26 = vrot.slane %v4048_v36, %v19117_v14  ;;  %5762 = vmatpush2.bf16.msra.mxu1 %v15902_v12  ;;  %5790 = vmatprep.subr.bf16.mxu0 %v15913_v61  ;;  %v15948_v12 = vld [vmem:[%s23301_s4 + $0xf0] sm:$0xff]   ;;  %v15953_v61 = vld [vmem:[%s23301_s4 + $0x28] sm:$0xff]   ;;  %v15955_v36 = vld [vmem:[%s23301_s4 + $0x60] sm:$0xff]  }
 0x295   :  { %5763 = vmatprep.subr.bf16.mxu1 %v15910_v46  ;;  %v15952_v46 = vld [vmem:[%s23301_s4 + $0xe8] sm:$0xff]  }
 0x296   :  { %v4063_v50 = vcombine.low %v4055_v33, %v4062_v26  ;;  %v15960_v33 = vld [vmem:[%s23301_s4 + $0xd8] sm:$0xff]  }
 0x297   :  { %5791 = vmatpush1.bf16.msra.mxu0 %v15911_v15  ;;  %v15957_v15 = vld [vmem:[%s23301_s4 + $0x20] sm:$0xff]   ;;  %v15961_v26 = vld [vmem:[%s23301_s4 + $0x18] sm:$0xff]  }
 0x298   :  { %v4070_v54 = vrot.slane %v4063_v50, %v19117_v14  ;;  %5764 = vmatpush2.bf16.msra.mxu1 %v15908_v63  ;;  %5792 = vmatprep.subr.bf16.mxu0 %v15919_v59  ;;  %v15956_v63 = vld [vmem:[%s23301_s4 + $0xe0] sm:$0xff]   ;;  %v15962_v50 = vld [vmem:[%s23301_s4 + $0x98] sm:$0xff]  }
 0x299   :  { %5765 = vmatprep.subr.bf16.mxu1 %v15916_v2 }
 0x29a   :  { %v19951_v11 = vadd.f32 %v4070_v54, %v1821_v32  ;;  %v15967_v32 = vld [vmem:[%s23301_s4 + $0x48] sm:$0xff]  }
 0x29b   :  { %5793 = vmatpush1.bf16.msra.mxu0 %v15917_v34  ;;  %v15964_v34 = vld [vmem:[%s23301_s4 + $0xd0] sm:$0xff]   ;;  %v15968_v54 = vld [vmem:[%s23301_s4 + $0xc8] sm:$0xff]  }
 0x29c   :  { %5766 = vmatpush2.bf16.msra.mxu1 %v15914_v27  ;;  %5794 = vmatprep.subr.bf16.mxu0 %v15925_v19  ;;  %v15963_v27 = vld [vmem:[%s23301_s4 + $0x50] sm:$0xff]  }
 0x29d   :  { %5767 = vmatprep.subr.bf16.mxu1 %v15922_v40  ;;  %v15965_v40 = vld [vmem:[%s23301_s4 + $0x10] sm:$0xff]  }
 0x29e   :  { %v15966_v19 = vld [vmem:[%s23301_s4 + $0x90] sm:$0xff]  }
 0x29f   :  { %5795 = vmatpush1.bf16.msra.mxu0 %v15923_v0  ;;  %v15970_v0 = vld [vmem:[%s23301_s4 + $0x88] sm:$0xff]  }
 0x2a0   :  { %5768 = vmatpush2.bf16.msra.mxu1 %v15920_v21  ;;  %5796 = vmatprep.subr.bf16.mxu0 %v15931_v18  ;;  %v15969_v21 = vld [vmem:[%s23301_s4 + $0x8] sm:$0xff]   ;;  %v15972_v18 = vld [vmem:[%s23301_s4 + $0xc0] sm:$0xff]  }
 0x2a1   :  { %5769 = vmatprep.subr.bf16.mxu1 %v15928_v38  ;;  %v15971_v38 = vld [vmem:[%s23301_s4 + $0x40] sm:$0xff]  }
 0x2a3   :  { %5797 = vmatpush1.bf16.msra.mxu0 %v15929_v13  ;;  %v15974_v13 = vld [vmem:[%s23301_s4 + $0x80] sm:$0xff]  }
 0x2a4   :  { %5770 = vmatpush2.bf16.msra.mxu1 %v15926_v23  ;;  %5798 = vmatprep.subr.bf16.mxu0 %v15937_v62  ;;  %v15973_v23 = vld [vmem:[%s23301_s4] sm:$0xff]  }
 0x2a5   :  { %5771 = vmatprep.subr.bf16.mxu1 %v15934_v24  ;;  %v23316_v24 = vmov 0.0  }
 0x2a7   :  { %5799 = vmatpush1.bf16.msra.mxu0 %v15935_v58 }
 0x2a8   :  { %5772 = vmatpush2.bf16.msra.mxu1 %v15932_v48  ;;  %13858 = vmatprep.subr.msk.bf16.mxu0 %vm1451_vm1, %v13855_v20 }
 0x2a9   :  { %5773 = vmatprep.subr.bf16.mxu1 %v15940_v51 }
 0x2ab   :  { %5815 = vmatpush2.bf16.msra.mxu0 %v5492_v5 }
 0x2ac   :  { %5774 = vmatpush2.bf16.msra.mxu1 %v15938_v4  ;;  %14668 = vmatprep.subr.bf16.mxu0 %v15943_v29 }
 0x2ae   :  { %5817 = vmatmul.mubr.bf16.vlgmr.msra.gmra.mxu0 %v4343_v37  ;;  %v15944_v37 = vld [vmem:[%s23301_s4 + $0xf8] sm:$0x3f]  }
 0x2af   :  { %5776 = vmatmul.mubr.bf16.vlgmr.msra.gmra.mxu1 %v4341_v1  ;;  %v17073_v1 = vmov 65535   ;;  %14669 = vmatpush3.bf16.msra.mxu0 %v15945_v44 }
 0x2b0   :  { %v6143_v28 = vsel %vm6141_vm3, 4294967295, %v17073_v1  ;;  %14670 = vmatprep.subr.bf16.mxu0 %v15947_v56 }
 0x2b1   :  { %v20009_v60 = vsel %vm3023_vm2, %v6143_v28, 0 }
 0x2b2   :  { %v6146_v16 = vand.u32 %v15944_v37, %v20009_v60 }
 0x2b3   :  { %14671 = vmatpush3.bf16.msra.mxu0 %v15949_v30 }
 0x2b4   :  { %14690 = vmatprep.subr.bf16.mxu1 %v6146_v16  ;;  %14672 = vmatprep.subr.bf16.mxu0 %v15951_v47 }
 0x2b5   :  { %14691 = vmatpush3.bf16.msra.mxu1 %v15946_v39 }
 0x2b6   :  { %14692 = vmatprep.subr.bf16.mxu1 %v15948_v12 }
 0x2b7   :  { %14673 = vmatpush3.bf16.msra.mxu0 %v15953_v61 }
 0x2b8   :  { %14674 = vmatprep.subr.bf16.mxu0 %v15955_v36  ;;  %v23315_v36 = vsub.s32 1, %v17265_v43 }
 0x2b9   :  { %14693 = vmatpush3.bf16.msra.mxu1 %v15950_v31 }
 0x2ba   :  { %14694 = vmatprep.subr.bf16.mxu1 %v15952_v46 }
 0x2bb   :  { %14675 = vmatpush3.bf16.msra.mxu0 %v15957_v15  ;;  %v23314_v15 = vsub.s32 3, %v17265_v43 }
 0x2bc   :  { %14676 = vmatprep.subr.bf16.mxu0 %v15959_v25  ;;  %v15975_v25 = vld [vmem:[%s23302_s6 + $0x30] sm:$0x3f]  }
 0x2bd   :  { %14695 = vmatpush3.bf16.msra.mxu1 %v15954_v45 }
 0x2be   :  { %14696 = vmatprep.subr.bf16.mxu1 %v15956_v63 }
 0x2bf   :  { %14677 = vmatpush3.bf16.msra.mxu0 %v15961_v26 }
 0x2c0   :  { %14678 = vmatprep.subr.bf16.mxu0 %v15963_v27 }
 0x2c1   :  { %14697 = vmatpush3.bf16.msra.mxu1 %v15958_v57  ;;  %v23313_v57 = vsub.s32 0, %v17265_v43 }
 0x2c2   :  { %14698 = vmatprep.subr.bf16.mxu1 %v15960_v33 }
 0x2c3   :  { %14679 = vmatpush3.bf16.msra.mxu0 %v15965_v40 }
 0x2c4   :  { %14680 = vmatprep.subr.bf16.mxu0 %v15967_v32  ;;  %v6291_v32 = vsel %vm3023_vm2, %v15975_v25, 0  ;;  %v16007_v25 = vld [vmem:[%s23298_s2 + $0x44] ss:$16 sps:$4 sm:$0xff]  }
 0x2c5   :  { %14699 = vmatpush3.bf16.msra.mxu1 %v15962_v50 }
 0x2c6   :  { %14700 = vmatprep.subr.bf16.mxu1 %v15964_v34 }
 0x2c7   :  { %14681 = vmatpush3.bf16.msra.mxu0 %v15969_v21  ;;  %v15977_v21 = vld [vmem:[%s23302_s6 + $0x20] sm:$0xff]  }
 0x2c8   :  { %14682 = vmatprep.subr.bf16.mxu0 %v15971_v38  ;;  %v15979_v38 = vld [vmem:[%s23302_s6 + $0x10] sm:$0xff]  }
 0x2c9   :  { %14701 = vmatpush3.bf16.msra.mxu1 %v15966_v19 }
 0x2ca   :  { %v5531_v17 = vpop.f32.mrf.mxu0  ;;  %14702 = vmatprep.subr.bf16.mxu1 %v15968_v54  ;;  %v15976_v54 = vld [vmem:[%s23302_s6 + $0x28] sm:$0xff]  }
 0x2cb   :  { %v5572_v9 = vpop.f32.mrf.mxu1  ;;  %14683 = vmatpush3.bf16.msra.mxu0 %v15973_v23  ;;  %v15981_v23 = vld [vmem:[%s23302_s6] sm:$0xff]  }
 0x2cc   :  { %v19998_v6 = vadd.f32 %v5572_v9, %v5531_v17  ;;  %v5533_v10 = vpop.f32.mrf.mxu0  ;;  %14802 = vmatprep.subr.bf16.mxu0 %v23316_v24 }
 0x2cd   :  { %v5574_v53 = vpop.f32.mrf.mxu1  ;;  %14703 = vmatpush3.bf16.msra.mxu1 %v15970_v0  ;;  %v15978_v0 = vld [vmem:[%s23302_s6 + $0x18] sm:$0xff]  }
 0x2ce   :  { %v20000_v8 = vadd.f32 %v5574_v53, %v5533_v10  ;;  %v5535_v42 = vpop.f32.mrf.mxu0  ;;  %14704 = vmatprep.subr.bf16.mxu1 %v15972_v18  ;;  %v15980_v18 = vld [vmem:[%s23302_s6 + $0x8] sm:$0xff]  }
 0x2cf   :  { %v5576_v52 = vpop.f32.mrf.mxu1 }
 0x2d0   :  { %v5536_v22 = vpop.f32.mrf.mxu0 }
 0x2d1   :  { %v5577_v41 = vpop.f32.mrf.mxu1  ;;  %14705 = vmatpush3.bf16.msra.mxu1 %v15974_v13  ;;  %v15982_v13 = vld [vmem:[%s23303_s9 + $0x8] sm:$0x3f]  }
 0x2d2   :  { %14820 = vmatprep.subr.bf16.mxu1 %v23316_v24 }
 0x2ef   :  { %v5654_v55 = vpop.f32.mrf.mxu1 }
 0x2f1   :  { %v5656_v35 = vpop.f32.mrf.mxu1 }
 0x2f3   :  { %v5658_v2 = vpop.f32.mrf.mxu1 }
 0x2f4   :  { %v23312_v2 = vsub.s32 2, %v17265_v43 }
 0x2f5   :  { %v5659_v59 = vpop.f32.mrf.mxu1 }
 0x30a   :  { %v5613_v62 = vpop.f32.mrf.mxu0 }
 0x30b   :  { %v5614_v7 = vadd.f32 %v5613_v62, %v19998_v6  ;;  %v6364_v62 = vand.u32 %v15982_v13, %v20009_v60  ;;  %v16026_v13 = vld [vmem:[%s23298_s2 + $0x160] ss:$16 sps:$4 sm:$0xff]  }
 0x30c   :  { %v5615_v48 = vpop.f32.mrf.mxu0 }
 0x30d   :  { %v5655_v58 = vadd.f32 %v5654_v55, %v5614_v7  ;;  %v5616_v51 = vadd.f32 %v5615_v48, %v20000_v8 }
 0x30e   :  { %v5617_v20 = vpop.f32.mrf.mxu0 }
 0x30f   :  { %v5657_v3 = vadd.f32 %v5656_v35, %v5616_v51 }
 0x310   :  { %v5618_v4 = vpop.f32.mrf.mxu0 }
 0x311   :  { %v5829_v5 = vcombine.low %v5655_v58, %v5657_v3  ;;  %v5945_v58 = vld [vmem:[%s23304_s5] sm:$0x1] }
 0x313   :  { %v5837_v61 = vrot.slane %v5829_v5, %v19117_v14 }
 0x32f   :  { %v5695_v17 = vpop.f32.mrf.mxu1 }
 0x331   :  { %v5697_v9 = vpop.f32.mrf.mxu1 }
 0x333   :  { %v5699_v10 = vpop.f32.mrf.mxu1 }
 0x335   :  { %v5700_v53 = vpop.f32.mrf.mxu1 }
 0x34a   :  { %v5736_v42 = vpop.f32.mrf.mxu0 }
 0x34b   :  { %v5737_v29 = vadd.f32 %v5736_v42, %v5695_v17 }
 0x34c   :  { %v5738_v52 = vpop.f32.mrf.mxu0 }
 0x34d   :  { %v5739_v6 = vadd.f32 %v5738_v52, %v5697_v9 }
 0x34e   :  { %v5740_v22 = vpop.f32.mrf.mxu0 }
 0x350   :  { %v5741_v41 = vpop.f32.mrf.mxu0 }
 0x351   :  { %v15983_v41 = vld [vmem:[%s23303_s9] sm:$0xff]  }
 0x36e   :  { %v5818_v28 = vpop.f32.mrf.mxu0 }
 0x36f   :  { %v5777_v1 = vpop.f32.mrf.mxu1 }
 0x370   :  { %v5778_v37 = vadd.f32 %v5777_v1, %v5737_v29  ;;  %v5820_v16 = vpop.f32.mrf.mxu0  ;;  %v6578_v29 = vld [vmem:[%s23299_s0 + $0x16] sm:$0x55]  ;;  %v6577_v1 = vld [vmem:[%s23299_s0 + $0xe] sm:$0x55] }
 0x371   :  { %v5779_v44 = vpop.f32.mrf.mxu1 }
 0x372   :  { %v5780_v8 = vadd.f32 %v5779_v44, %v5739_v6  ;;  %v5822_v56 = vpop.f32.mrf.mxu0  ;;  %v5819_v12 = vadd.f32 %v5818_v28, %v5778_v37  ;;  %v6831_v28 = vrot.slane %v6578_v29, %v17283_v49  ;;  %v6807_v6 = vcombine.high %v6577_v1, %v6577_v1  ;;  %v15990_v44 = vld [vmem:[%s23298_s2 + $0xe0] ss:$16 sps:$4 sm:$0xff]  }
 0x373   :  { %v5781_v39 = vpop.f32.mrf.mxu1  ;;  %v6814_v37 = vrot.slane %v6577_v1, %v17283_v49  ;;  %v6824_v56 = vcombine.high %v6578_v29, %v6578_v29  ;;  %v15985_v29 = vld [vmem:[%s23305_s8 + $0x10] sm:$0xff]  }
 0x374   :  { %v5821_v30 = vadd.f32 %v5820_v16, %v5780_v8  ;;  %v5823_v47 = vpop.f32.mrf.mxu0  ;;  %v15992_v16 = vld [vmem:[%s23298_s2 + $0xe4] ss:$16 sps:$4 sm:$0xff]   ;;  %6849 = vrot.lane.b32.xlu0 %v6831_v28, %s17076_s27  ;;  %v6821_v39 = vrot.slane %v6807_v6, %v17283_v49 }
 0x375   :  { %v5782_v31 = vpop.f32.mrf.mxu1  ;;  %v15995_v8 = vld [vmem:[%s23298_s2 + $0xc4] ss:$16 sps:$4 sm:$0xff]  }
 0x376   :  { %v5830_v46 = vcombine.low %v5819_v12, %v5821_v30  ;;  %6845 = vrot.lane.b32.xlu1 %v6821_v39, %s17076_s27  ;;  %v6823_v12 = vcombine.high %v6821_v39, %v6821_v39  ;;  %v6822_v30 = vcombine.high %v6814_v37, %v6814_v37  ;;  %v15993_v31 = vld [vmem:[%s23298_s2 + $0xc0] ss:$16 sps:$4 sm:$0xff]   ;;  %v15998_v47 = vld [vmem:[%s23298_s2 + $0xa4] ss:$16 sps:$4 sm:$0xff]  }
 0x378   :  { %v5844_v45 = vrot.slane %v5830_v46, %v19117_v14  ;;  %6847 = vrot.lane.b32.xlu0 %v6823_v12, %s17076_s27  ;;  %v6838_v46 = vrot.slane %v6824_v56, %v17283_v49  ;;  %v16038_v56 = vld [vmem:[%s23298_s2 + $0x4e0] ss:$16 sps:$4 sm:$0xff]  }
 0x37a   :  { %v5845_v55 = vcombine.low %v5837_v61, %v5844_v45  ;;  %6843 = vrot.lane.b32.xlu1 %v6822_v30, %s17076_s27  ;;  %v15996_v61 = vld [vmem:[%s23298_s2 + $0xa0] ss:$16 sps:$4 sm:$0xff]   ;;  %v16001_v45 = vld [vmem:[%s23298_s2 + $0x84] ss:$16 sps:$4 sm:$0xff]  }
 0x37c   :  { %v5852_v35 = vrot.slane %v5845_v55, %v19117_v14  ;;  %6841 = vrot.lane.b32.xlu0 %v6814_v37, %s17076_s27  ;;  %v6839_v55 = vcombine.high %v6831_v28, %v6831_v28  ;;  %v15986_v28 = vld [vmem:[%s23305_s8 + $0x8] sm:$0xff]  }
 0x37e   :  { %v5854_v63 = vadd.f32 %v5852_v35, %v19951_v11  ;;  %6853 = vrot.lane.b32.xlu1 %v6838_v46, %s17076_s27  ;;  %v15999_v35 = vld [vmem:[%s23298_s2 + $0x80] ss:$16 sps:$4 sm:$0xff]  }
 0x380   :  { %v5855_v59 = vmax.f32 %v5854_v63, 0.0  ;;  %v16004_v63 = vld [vmem:[%s23298_s2 + $0x64] ss:$16 sps:$4 sm:$0xff]  }
 0x382   :  { %v5864_v33 = vrot.slane %v5855_v59, %v23315_v36  ;;  %v5872_v26 = vrot.slane %v5855_v59, %v23314_v15  ;;  %v5860_v11 = vrot.slane %v5855_v59, %v23313_v57  ;;  %v5868_v50 = vrot.slane %v5855_v59, %v23312_v2  ;;  %6851 = vrot.lane.b32.xlu1 %v6839_v55, %s17076_s27  ;;  %v16002_v59 = vld [vmem:[%s23298_s2 + $0x60] ss:$16 sps:$4 sm:$0xff]   ;;  %v16049_v55 = vld [vmem:[%s23298_s2 + $0x484] ss:$16 sps:$4 sm:$0xff]   ;;  %v16500_v57 = vld [vmem:[%s23298_s2 + $0xaac] ss:$16 sps:$4 sm:$0xff]  }
 0x384   :  { %v5878_v27 = vpack.c.bf16 %v5864_v33, %v5864_v33  ;;  %v5880_v34 = vpack.c.bf16 %v5872_v26, %v5872_v26  ;;  %v5877_v40 = vpack.c.bf16 %v5860_v11, %v5860_v11  ;;  %v5879_v19 = vpack.c.bf16 %v5868_v50, %v5868_v50  ;;  %v16005_v33 = vld [vmem:[%s23298_s2 + $0x40] ss:$16 sps:$4 sm:$0xff]   ;;  %v16010_v26 = vld [vmem:[%s23298_s2 + $0x24] ss:$16 sps:$4 sm:$0xff]  }
 0x385   :  { %v16008_v11 = vld [vmem:[%s23298_s2 + $0x20] ss:$16 sps:$4 sm:$0xff]   ;;  %v16013_v50 = vld [vmem:[%s23298_s2 + $0x4] ss:$16 sps:$4 sm:$0xff]  }
 0x386   :  { %6180 = vmatprep.mubr.bf16.mxu0 %v5878_v27  ;;  %13892 = vmatprep.mubr.msk.bf16.mxu1 %vm6137_vm4, %v5880_v34  ;;  %v16011_v27 = vld [vmem:[%s23298_s2] ss:$16 sps:$4 sm:$0xff]   ;;  %v16016_v34 = vld [vmem:[%s23298_s2 + $0x1e4] ss:$16 sps:$4 sm:$0xff]  }
 0x387   :  { %6181 = vmatmul.mubr.bf16.vlgmr.msra.gmra.mxu0 %v5877_v40  ;;  %6221 = vmatmul.mubr.bf16.vlgmr.msra.gmra.mxu1 %v5879_v19  ;;  %v16014_v40 = vld [vmem:[%s23298_s2 + $0x1e0] ss:$16 sps:$4 sm:$0xff]   ;;  %v16019_v19 = vld [vmem:[%s23298_s2 + $0x1c4] ss:$16 sps:$4 sm:$0xff]  }
 0x388   :  { %14803 = vmatpush3.bf16.msra.mxu0 %v6291_v32  ;;  %14816 = vmatprep.mubr.msk.bf16.mxu0 %vm17075_vm5, %v23316_v24  ;;  %v16017_v32 = vld [vmem:[%s23298_s2 + $0x1c0] ss:$16 sps:$4 sm:$0xff]  }
 0x389   :  { %14804 = vmatprep.subr.bf16.mxu0 %v23316_v24  ;;  %14824 = vmatprep.mubr.msk.bf16.mxu1 %vm17075_vm5, %v23316_v24 }
 0x38a   :  { %14821 = vmatpush3.bf16.msra.mxu1 %v6364_v62  ;;  %v16031_v62 = vld [vmem:[%s23298_s2 + $0x144] ss:$16 sps:$4 sm:$0xff]  }
 0x38b   :  { %14822 = vmatprep.subr.bf16.mxu1 %v23316_v24 }
 0x38c   :  { %14805 = vmatpush3.bf16.msra.mxu0 %v15976_v54  ;;  %v16022_v54 = vld [vmem:[%s23298_s2 + $0x1a4] ss:$16 sps:$4 sm:$0xff]  }
 0x38d   :  { %14806 = vmatprep.subr.bf16.mxu0 %v23316_v24 }
 0x38e   :  { %14823 = vmatpush3.bf16.msra.mxu1 %v15983_v41 }
 0x38f   :  { %14828 = vmatprep.subr.bf16.mxu1 %v23316_v24 }
 0x390   :  { %14807 = vmatpush3.bf16.msra.mxu0 %v15977_v21  ;;  %v16020_v21 = vld [vmem:[%s23298_s2 + $0x1a0] ss:$16 sps:$4 sm:$0xff]  }
 0x391   :  { %14808 = vmatprep.subr.bf16.mxu0 %v23316_v24 }
 0x394   :  { %14809 = vmatpush3.bf16.msra.mxu0 %v15978_v0  ;;  %v16025_v0 = vld [vmem:[%s23298_s2 + $0x184] ss:$16 sps:$4 sm:$0xff]  }
 0x395   :  { %14810 = vmatprep.subr.bf16.mxu0 %v23316_v24 }
 0x398   :  { %14811 = vmatpush3.bf16.msra.mxu0 %v15979_v38  ;;  %v16023_v38 = vld [vmem:[%s23298_s2 + $0x180] ss:$16 sps:$4 sm:$0xff]  }
 0x399   :  { %14812 = vmatprep.subr.bf16.mxu0 %v23316_v24 }
 0x39c   :  { %14813 = vmatpush3.bf16.msra.mxu0 %v15980_v18  ;;  %v6840_v18 = vcombine.high %v6838_v46, %v6838_v46  ;;  %v16041_v46 = vld [vmem:[%s23298_s2 + $0x4c0] ss:$16 sps:$4 sm:$0xff]  }
 0x39d   :  { %14814 = vmatprep.subr.bf16.mxu0 %v23316_v24 }
 0x39e   :  { %6855 = vrot.lane.b32.xlu0 %v6840_v18, %s17076_s27  ;;  %v16076_v18 = vld [vmem:[%s23298_s2 + $0x564] ss:$16 sps:$4 sm:$0xff]  }
 0x3a0   :  { %14815 = vmatpush3.bf16.msra.mxu0 %v15981_v23  ;;  %v16028_v23 = vld [vmem:[%s23298_s2 + $0x164] ss:$16 sps:$4 sm:$0xff]  }
 0x3a1   :  { %8017 = vmatprep.subr.bf16.mxu0 %v15992_v16  ;;  %v6335_v16 = vld [vmem:[%s23307_s1] sm:$0x1] }
 0x3a2   :  { %v6336_v12 = vpack.c.bf16 %v6335_v16, %v6335_v16  ;;  %v16094_v16 = vld [vmem:[%s23298_s2 + $0x2c8] ss:$16 sps:$4 sm:$0xff]  }
 0x3e6   :  { %v20299_v1 = vpop.permute.xlu0 %6849 }
 0x3e8   :  { %v20305_v6 = vpop.permute.xlu1 %6845 }
 0x3ea   :  { %v20307_v37 = vpop.permute.xlu0 %6847 }
 0x3ee   :  { %v6842_v30 = vpop.permute.xlu0 %6841 }
 0x447   :  { %v14684_v7 = vpop.f32.mrf.mxu0  ;;  %v14706_v48 = vpop.f32.mrf.mxu1 }
 0x449   :  { %v14685_v51 = vpop.f32.mrf.mxu0  ;;  %v14707_v20 = vpop.f32.mrf.mxu1 }
 0x44a   :  { %v14686_v3 = vadd.f32 %v14685_v51, %v14684_v7  ;;  %v14708_v9 = vadd.f32 %v14707_v20, %v14706_v48  ;;  %v16029_v7 = vld [vmem:[%s23298_s2 + $0x140] ss:$16 sps:$4 sm:$0xff]   ;;  %v16034_v48 = vld [vmem:[%s23298_s2 + $0x124] ss:$16 sps:$4 sm:$0xff]  }
 0x44b   :  { %v14687_v4 = vpop.f32.mrf.mxu0  ;;  %v14709_v5 = vpop.f32.mrf.mxu1  ;;  %v16037_v51 = vld [vmem:[%s23298_s2 + $0x104] ss:$16 sps:$4 sm:$0xff]   ;;  %v16035_v20 = vld [vmem:[%s23298_s2 + $0x100] ss:$16 sps:$4 sm:$0xff]  }
 0x44c   :  { %v6183_v17 = vadd.f32 %v14686_v3, %v5945_v58  ;;  %v16032_v58 = vld [vmem:[%s23298_s2 + $0x120] ss:$16 sps:$4 sm:$0xff]   ;;  %v16040_v3 = vld [vmem:[%s23298_s2 + $0x4e4] ss:$16 sps:$4 sm:$0xff]  }
 0x44d   :  { %v14688_v10 = vpop.f32.mrf.mxu0  ;;  %v14710_v53 = vpop.f32.mrf.mxu1  ;;  %v6244_v4 = vld [vmem:[%s23306_s7] sm:$0x1] }
 0x44e   :  { %v6223_v42 = vadd.f32 %v14708_v9, %v6183_v17  ;;  %v15984_v9 = vld [vmem:[%s23305_s8 + $0x18] ss:$0 sps:$4 sm:$0x77]  }
 0x450   :  { %v6228_v52 = vmax.f32 %v6223_v42, 0.0 }
 0x452   :  { %v6229_v22 = vpack.c.bf16 %v6228_v52, %v6228_v52 }
 0x454   :  { %14817 = vmatmul.mubr.msk.bf16.vlgmr.msra.gmra.mxu0 %vm6286_vm6, %v6229_v22  ;;  %v6433_v22 = vsel %vm6431_vm7, %v15984_v9, 0  ;;  %v16088_v9 = vld [vmem:[%s23298_s2 + $0x504] ss:$16 sps:$4 sm:$0xff]  }
 0x455   :  { %8018 = vmatpush1.bf16.msra.mxu0 %v15990_v44  ;;  %v15987_v44 = vld [vmem:[%s23305_s8] sm:$0xff]  }
 0x456   :  { %8019 = vmatprep.subr.bf16.mxu0 %v15995_v8  ;;  %v6844_v8 = vpop.permute.xlu1 %6843 }
 0x457   :  { %v20318_v39 = vsel %vm6857_vm9, %v6844_v8, %v20305_v6 }
 0x458   :  { %8049 = vmatprep.mubr.bf16.mxu0 %v20318_v39 }
 0x459   :  { %8020 = vmatpush1.bf16.msra.mxu0 %v15993_v31  ;;  %v16043_v31 = vld [vmem:[%s23298_s2 + $0x4c4] ss:$16 sps:$4 sm:$0xff]  }
 0x45a   :  { %8021 = vmatprep.subr.bf16.mxu0 %v15998_v47  ;;  %v20328_v47 = vsel %vm6857_vm9, %v6842_v30, %v6844_v8  ;;  %v16097_v8 = vld [vmem:[%s23308_s11] sm:$0xff]  }
 0x45b   :  { %v16103_v30 = vld [vmem:[%s23298_s2 + $0x2e4] ss:$16 sps:$4 sm:$0xff]  }
 0x45d   :  { %8022 = vmatpush1.bf16.msra.mxu0 %v15996_v61  ;;  %v16046_v61 = vld [vmem:[%s23298_s2 + $0x4a4] ss:$16 sps:$4 sm:$0xff]  }
 0x45e   :  { %8023 = vmatprep.subr.bf16.mxu0 %v16001_v45  ;;  %v16044_v45 = vld [vmem:[%s23298_s2 + $0x4a0] ss:$16 sps:$4 sm:$0xff]  }
 0x461   :  { %8024 = vmatpush1.bf16.msra.mxu0 %v15999_v35  ;;  %v16047_v35 = vld [vmem:[%s23298_s2 + $0x480] ss:$16 sps:$4 sm:$0xff]  }
 0x462   :  { %8025 = vmatprep.subr.bf16.mxu0 %v16004_v63  ;;  %v16052_v63 = vld [vmem:[%s23298_s2 + $0x464] ss:$16 sps:$4 sm:$0xff]  }
 0x465   :  { %8026 = vmatpush1.bf16.msra.mxu0 %v16002_v59  ;;  %v16050_v59 = vld [vmem:[%s23298_s2 + $0x460] ss:$16 sps:$4 sm:$0xff]  }
 0x466   :  { %8027 = vmatprep.subr.bf16.mxu0 %v16007_v25  ;;  %v16055_v25 = vld [vmem:[%s23298_s2 + $0x444] ss:$16 sps:$4 sm:$0xff]  }
 0x469   :  { %8028 = vmatpush1.bf16.msra.mxu0 %v16005_v33  ;;  %v16053_v33 = vld [vmem:[%s23298_s2 + $0x440] ss:$16 sps:$4 sm:$0xff]  }
 0x46a   :  { %8029 = vmatprep.subr.bf16.mxu0 %v16010_v26  ;;  %v16058_v26 = vld [vmem:[%s23298_s2 + $0x424] ss:$16 sps:$4 sm:$0xff]  }
 0x46d   :  { %8030 = vmatpush1.bf16.msra.mxu0 %v16008_v11  ;;  %v16056_v11 = vld [vmem:[%s23298_s2 + $0x420] ss:$16 sps:$4 sm:$0xff]  }
 0x46e   :  { %8031 = vmatprep.subr.bf16.mxu0 %v16013_v50  ;;  %v16061_v50 = vld [vmem:[%s23298_s2 + $0x404] ss:$16 sps:$4 sm:$0xff]  }
 0x471   :  { %8032 = vmatpush1.bf16.msra.mxu0 %v16011_v27  ;;  %v16059_v27 = vld [vmem:[%s23298_s2 + $0x400] ss:$16 sps:$4 sm:$0xff]  }
 0x472   :  { %8033 = vmatprep.subr.bf16.mxu0 %v16016_v34  ;;  %v16064_v34 = vld [vmem:[%s23298_s2 + $0x5e4] ss:$16 sps:$4 sm:$0xff]  }
 0x475   :  { %8034 = vmatpush2.bf16.msra.mxu0 %v16014_v40  ;;  %v16062_v40 = vld [vmem:[%s23298_s2 + $0x5e0] ss:$16 sps:$4 sm:$0xff]  }
 0x476   :  { %8035 = vmatprep.subr.bf16.mxu0 %v16019_v19  ;;  %v16067_v19 = vld [vmem:[%s23298_s2 + $0x5c4] ss:$16 sps:$4 sm:$0xff]  }
 0x479   :  { %8036 = vmatpush2.bf16.msra.mxu0 %v16017_v32  ;;  %v16065_v32 = vld [vmem:[%s23298_s2 + $0x5c0] ss:$16 sps:$4 sm:$0xff]  }
 0x47a   :  { %8037 = vmatprep.subr.bf16.mxu0 %v16022_v54  ;;  %v16070_v54 = vld [vmem:[%s23298_s2 + $0x5a4] ss:$16 sps:$4 sm:$0xff]  }
 0x47d   :  { %8038 = vmatpush2.bf16.msra.mxu0 %v16020_v21  ;;  %v16068_v21 = vld [vmem:[%s23298_s2 + $0x5a0] ss:$16 sps:$4 sm:$0xff]  }
 0x47e   :  { %8039 = vmatprep.subr.bf16.mxu0 %v16025_v0  ;;  %v16073_v0 = vld [vmem:[%s23298_s2 + $0x584] ss:$16 sps:$4 sm:$0xff]  }
 0x481   :  { %8040 = vmatpush2.bf16.msra.mxu0 %v16023_v38  ;;  %v16071_v38 = vld [vmem:[%s23298_s2 + $0x580] ss:$16 sps:$4 sm:$0xff]  }
 0x482   :  { %8041 = vmatprep.subr.bf16.mxu0 %v16028_v23  ;;  %v16074_v23 = vld [vmem:[%s23298_s2 + $0x560] ss:$16 sps:$4 sm:$0xff]  }
 0x485   :  { %8042 = vmatpush2.bf16.msra.mxu0 %v16026_v13  ;;  %v16077_v13 = vld [vmem:[%s23308_s11 + $0x28] ss:$0 sps:$4 sm:$0x11]  }
 0x486   :  { %8043 = vmatprep.subr.bf16.mxu0 %v16031_v62  ;;  %v17077_v62 = vmov 0  }
 0x489   :  { %8044 = vmatpush2.bf16.msra.mxu0 %v16029_v7  ;;  %v20407_v7 = vsel %vm6528_vm11, 65535, %v17077_v62 }
 0x48a   :  { %8045 = vmatprep.subr.bf16.mxu0 %v16034_v48  ;;  %v16080_v48 = vld [vmem:[%s23298_s2 + $0x544] ss:$16 sps:$4 sm:$0xff]  }
 0x48d   :  { %8046 = vmatpush2.bf16.msra.mxu0 %v16032_v58  ;;  %v6532_v58 = vand.u32 %v16077_v13, %v20407_v7  ;;  %v16155_v13 = vld [vmem:[%s23298_s2 + $0x38c] ss:$16 sps:$4 sm:$0xff]  }
 0x48e   :  { %8047 = vmatprep.subr.bf16.mxu0 %v16037_v51  ;;  %v16078_v51 = vld [vmem:[%s23298_s2 + $0x540] ss:$16 sps:$4 sm:$0xff]  }
 0x491   :  { %8048 = vmatpush2.bf16.msra.mxu0 %v16035_v20  ;;  %v16081_v20 = vld [vmem:[%s23308_s11 + $0x20] sm:$0xff]  }
 0x492   :  { %8099 = vmatprep.subr.bf16.mxu0 %v16040_v3  ;;  %v16084_v3 = vld [vmem:[%s23298_s2 + $0x524] ss:$16 sps:$4 sm:$0xff]  }
 0x494   :  { %8050 = vmatmul.mubr.bf16.vlgmr.msra.gmra.mxu0 %v20328_v47 }
 0x495   :  { %8100 = vmatpush1.bf16.msra.mxu0 %v16038_v56  ;;  %v16100_v56 = vld [vmem:[%s23298_s2 + $0x2ac] ss:$16 sps:$4 sm:$0xff]  }
 0x496   :  { %8101 = vmatprep.subr.bf16.mxu0 %v16043_v31  ;;  %v16106_v31 = vld [vmem:[%s23298_s2 + $0x28c] ss:$16 sps:$4 sm:$0xff]  }
 0x499   :  { %8102 = vmatpush1.bf16.msra.mxu0 %v16041_v46  ;;  %v16104_v46 = vld [vmem:[%s23298_s2 + $0x288] ss:$16 sps:$4 sm:$0xff]  }
 0x49a   :  { %8103 = vmatprep.subr.bf16.mxu0 %v16046_v61  ;;  %v16112_v61 = vld [vmem:[%s23298_s2 + $0x26c] ss:$16 sps:$4 sm:$0xff]  }
 0x49d   :  { %8104 = vmatpush1.bf16.msra.mxu0 %v16044_v45  ;;  %v16110_v45 = vld [vmem:[%s23298_s2 + $0x268] ss:$16 sps:$4 sm:$0xff]  }
 0x49e   :  { %8105 = vmatprep.subr.bf16.mxu0 %v16049_v55  ;;  %v16118_v55 = vld [vmem:[%s23298_s2 + $0x24c] ss:$16 sps:$4 sm:$0xff]  }
 0x4a1   :  { %8106 = vmatpush1.bf16.msra.mxu0 %v16047_v35  ;;  %v16116_v35 = vld [vmem:[%s23298_s2 + $0x248] ss:$16 sps:$4 sm:$0xff]  }
 0x4a2   :  { %8107 = vmatprep.subr.bf16.mxu0 %v16052_v63  ;;  %v16124_v63 = vld [vmem:[%s23298_s2 + $0x22c] ss:$16 sps:$4 sm:$0xff]  }
 0x4a5   :  { %8108 = vmatpush1.bf16.msra.mxu0 %v16050_v59  ;;  %v16122_v59 = vld [vmem:[%s23298_s2 + $0x228] ss:$16 sps:$4 sm:$0xff]  }
 0x4a6   :  { %8109 = vmatprep.subr.bf16.mxu0 %v16055_v25  ;;  %v16130_v25 = vld [vmem:[%s23298_s2 + $0x20c] ss:$16 sps:$4 sm:$0xff]  }
 0x4a9   :  { %8110 = vmatpush1.bf16.msra.mxu0 %v16053_v33  ;;  %v16128_v33 = vld [vmem:[%s23298_s2 + $0x208] ss:$16 sps:$4 sm:$0xff]  }
 0x4aa   :  { %8111 = vmatprep.subr.bf16.mxu0 %v16058_v26  ;;  %v16136_v26 = vld [vmem:[%s23298_s2 + $0x3ec] ss:$16 sps:$4 sm:$0xff]  }
 0x4ad   :  { %8112 = vmatpush1.bf16.msra.mxu0 %v16056_v11  ;;  %v16134_v11 = vld [vmem:[%s23298_s2 + $0x3e8] ss:$16 sps:$4 sm:$0xff]  }
 0x4ae   :  { %8113 = vmatprep.subr.bf16.mxu0 %v16061_v50  ;;  %v8375_v50 = vld [vmem:[%s23299_s0 + $0xe] sm:$0x55] }
 0x4af   :  { %v8612_v62 = vrot.slane %v8375_v50, %v17283_v49 }
 0x4b1   :  { %8114 = vmatpush1.bf16.msra.mxu0 %v16059_v27  ;;  %v8605_v27 = vcombine.high %v8375_v50, %v8375_v50  ;;  %v20648_v50 = vld [vmem:[%s23298_s2 + $0x804] ss:$16 sps:$4 sm:$0xff]  }
 0x4b2   :  { %8115 = vmatprep.subr.bf16.mxu0 %v16064_v34  ;;  %v16142_v34 = vld [vmem:[%s23298_s2 + $0x3cc] ss:$16 sps:$4 sm:$0xff]  }
 0x4b5   :  { %8116 = vmatpush2.bf16.msra.mxu0 %v16062_v40  ;;  %v16140_v40 = vld [vmem:[%s23298_s2 + $0x3c8] ss:$16 sps:$4 sm:$0xff]  }
 0x4b6   :  { %8117 = vmatprep.subr.bf16.mxu0 %v16067_v19  ;;  %v8619_v19 = vrot.slane %v8605_v27, %v17283_v49 }
 0x4b9   :  { %8118 = vmatpush2.bf16.msra.mxu0 %v16065_v32  ;;  %v8621_v32 = vcombine.high %v8619_v19, %v8619_v19 }
 0x4ba   :  { %8119 = vmatprep.subr.bf16.mxu0 %v16070_v54  ;;  %v16148_v54 = vld [vmem:[%s23298_s2 + $0x3ac] ss:$16 sps:$4 sm:$0xff]  }
 0x4bd   :  { %8120 = vmatpush2.bf16.msra.mxu0 %v16068_v21  ;;  %v16146_v21 = vld [vmem:[%s23298_s2 + $0x3a8] ss:$16 sps:$4 sm:$0xff]  }
 0x4be   :  { %8121 = vmatprep.subr.bf16.mxu0 %v16073_v0  ;;  %v8649_v0 = vshrl.u32 %v8621_v32, 16  ;;  %v16240_v32 = vld [vmem:[%s23298_s2 + $0x7e0] ss:$16 sps:$4 sm:$0xff]  }
 0x4c0   :  { %8669 = vrot.lane.b32.xlu0 %v8649_v0, %s17076_s27  ;;  %v9651_v0 = vrot.slane %v16240_v32, 2 }
 0x4c1   :  { %8122 = vmatpush2.bf16.msra.mxu0 %v16071_v38  ;;  %v20536_v38 = vld [vmem:[%s23299_s0 + $0x16] sm:$0x55] }
 0x4c2   :  { %8123 = vmatprep.subr.bf16.mxu0 %v16076_v18  ;;  %v20540_v18 = vrot.slane %v20536_v38, %v17283_v49 }
 0x4c5   :  { %8124 = vmatpush2.bf16.msra.mxu0 %v16074_v23  ;;  %v8652_v23 = vshrl.u32 %v20540_v18, 16 }
 0x4c6   :  { %8125 = vmatprep.subr.bf16.mxu0 %v16080_v48  ;;  %v16153_v48 = vld [vmem:[%s23298_s2 + $0x388] ss:$16 sps:$4 sm:$0xff]  }
 0x4c7   :  { %8671 = vrot.lane.b32.xlu1 %v8652_v23, %s17076_s27 }
 0x4c9   :  { %8126 = vmatpush2.bf16.msra.mxu0 %v16078_v51  ;;  %v8620_v51 = vcombine.high %v8612_v62, %v8612_v62 }
 0x4ca   :  { %8127 = vmatprep.subr.bf16.mxu0 %v16084_v3  ;;  %v16161_v3 = vld [vmem:[%s23298_s2 + $0x36c] ss:$16 sps:$4 sm:$0xff]  }
 0x514   :  { %v6327_v5 = vpop.f32.mrf.mxu0 }
 0x515   :  { %v6328_v17 = vadd.f32 %v6327_v5, %v6244_v4  ;;  %v16082_v4 = vld [vmem:[%s23298_s2 + $0x520] ss:$16 sps:$4 sm:$0xff]   ;;  %v20426_v5 = vpop.permute.xlu1 %6853 }
 0x516   :  { %v14818_v10 = vpop.f32.mrf.mxu0  ;;  %8128 = vmatpush2.bf16.msra.mxu0 %v16082_v4  ;;  %v16159_v4 = vld [vmem:[%s23298_s2 + $0x368] ss:$16 sps:$4 sm:$0xff]  }
 0x517   :  { %v6333_v53 = vmax.f32 %v6328_v17, 0.0  ;;  %v16085_v17 = vld [vmem:[%s23308_s11 + $0x18] sm:$0xff]   ;;  %v16086_v10 = vld [vmem:[%s23298_s2 + $0x500] ss:$16 sps:$4 sm:$0xff]   ;;  %8129 = vmatprep.subr.bf16.mxu0 %v16088_v9 }
 0x518   :  { %v6330_v42 = vpop.f32.mrf.mxu0  ;;  %v16167_v9 = vld [vmem:[%s23298_s2 + $0x34c] ss:$16 sps:$4 sm:$0xff]  }
 0x519   :  { %v6334_v52 = vpack.c.bf16 %v6333_v53, %v6333_v53  ;;  %v16092_v53 = vld [vmem:[%s23298_s2 + $0x2ec] ss:$16 sps:$4 sm:$0xff]   ;;  %v6852_v42 = vpop.permute.xlu1 %6851 }
 0x51a   :  { %v14819_v41 = vpop.f32.mrf.mxu0  ;;  %8130 = vmatpush2.bf16.msra.mxu0 %v16086_v10  ;;  %v16165_v10 = vld [vmem:[%s23298_s2 + $0x348] ss:$16 sps:$4 sm:$0xff]  }
 0x51b   :  { %14825 = vmatmul.mubr.msk.bf16.vlgmr.msra.gmra.mxu1 %vm6359_vm8, %v6334_v52  ;;  %v20443_v52 = vsel %vm6857_vm9, %v6852_v42, %v20426_v5  ;;  %v20451_v41 = vsel %vm6857_vm9, %v20299_v1, %v6852_v42  ;;  %8222 = vmatprep.subr.bf16.mxu0 %v16092_v53  ;;  %v16173_v53 = vld [vmem:[%s23298_s2 + $0x32c] ss:$16 sps:$4 sm:$0xff]   ;;  %v16171_v42 = vld [vmem:[%s23298_s2 + $0x328] ss:$16 sps:$4 sm:$0xff]  }
 0x51c   :  { %14829 = vmatpush3.bf16.msra.mxu1 %v6433_v22  ;;  %14836 = vmatprep.mubr.msk.bf16.mxu1 %vm17075_vm5, %v23316_v24  ;;  %v16089_v22 = vld [vmem:[%s23308_s11 + $0x10] sm:$0xff]  }
 0x51d   :  { %14830 = vmatprep.subr.bf16.mxu1 %v23316_v24  ;;  %8131 = vmatprep.mubr.bf16.mxu0 %v20443_v52 }
 0x51e   :  { %8132 = vmatmul.mubr.bf16.vlgmr.msra.gmra.mxu0 %v20451_v41 }
 0x520   :  { %14831 = vmatpush3.bf16.msra.mxu1 %v15985_v29  ;;  %v16090_v29 = vld [vmem:[%s23298_s2 + $0x2e8] ss:$16 sps:$4 sm:$0xff]  }
 0x521   :  { %14832 = vmatprep.subr.bf16.mxu1 %v23316_v24  ;;  %8223 = vmatpush1.bf16.msra.mxu0 %v16090_v29  ;;  %v16177_v29 = vld [vmem:[%s23298_s2 + $0x308] ss:$16 sps:$4 sm:$0xff]  }
 0x524   :  { %14833 = vmatpush3.bf16.msra.mxu1 %v15986_v28  ;;  %v16093_v28 = vld [vmem:[%s23308_s11 + $0x8] sm:$0xff]  }
 0x525   :  { %14834 = vmatprep.subr.bf16.mxu1 %v23316_v24 }
 0x528   :  { %14835 = vmatpush3.bf16.msra.mxu1 %v15987_v44  ;;  %v16096_v44 = vld [vmem:[%s23298_s2 + $0x2cc] ss:$16 sps:$4 sm:$0xff]  }
 0x529   :  { %14840 = vmatprep.subr.bf16.mxu1 %v23316_v24  ;;  %8224 = vmatprep.subr.bf16.mxu0 %v16096_v44  ;;  %v16185_v44 = vld [vmem:[%s23298_s2 + $0x6ec] ss:$16 sps:$4 sm:$0xff]  }
 0x52a   :  { %8225 = vmatpush1.bf16.msra.mxu0 %v16094_v16  ;;  %v20590_v16 = vsel %vm6857_vm9, %v20307_v37, %v20299_v1  ;;  %v16197_v1 = vld [vmem:[%s23298_s2 + $0x6ac] ss:$16 sps:$4 sm:$0xff]  }
 0x52b   :  { %14837 = vmatmul.mubr.msk.bf16.vlgmr.msra.gmra.mxu1 %vm6427_vm10, %v6336_v12  ;;  %v16098_v12 = vld [vmem:[%s23298_s2 + $0x2a8] ss:$16 sps:$4 sm:$0xff]   ;;  %8226 = vmatprep.subr.bf16.mxu0 %v16100_v56 }
 0x52c   :  { %14852 = vmatprep.mubr.msk.bf16.mxu1 %vm17075_vm5, %v23316_v24  ;;  %14841 = vmatpush3.bf16.msra.mxu1 %v6532_v58  ;;  %v8646_v58 = vshrl.u32 %v8619_v19, 16  ;;  %v16189_v56 = vld [vmem:[%s23298_s2 + $0x6c8] ss:$16 sps:$4 sm:$0xff]   ;;  %v9661_v19 = vrot.slane %v20648_v50, 2 }
 0x52d   :  { %14842 = vmatprep.subr.bf16.mxu1 %v23316_v24  ;;  %8254 = vmatprep.mubr.bf16.mxu0 %v20590_v16 }
 0x52e   :  { %8227 = vmatpush1.bf16.msra.mxu0 %v16098_v12  ;;  %8667 = vrot.lane.b32.xlu0 %v8646_v58, %s17076_s27  ;;  %v16203_v12 = vld [vmem:[%s23298_s2 + $0x68c] ss:$16 sps:$4 sm:$0xff]  }
 0x52f   :  { %8228 = vmatprep.subr.bf16.mxu0 %v16106_v31  ;;  %v16209_v31 = vld [vmem:[%s23298_s2 + $0x66c] ss:$16 sps:$4 sm:$0xff]  }
 0x530   :  { %14843 = vmatpush3.bf16.msra.mxu1 %v16081_v20  ;;  %v8643_v20 = vshrl.u32 %v8620_v51, 16 }
 0x531   :  { %14844 = vmatprep.subr.bf16.mxu1 %v23316_v24 }
 0x532   :  { %8229 = vmatpush1.bf16.msra.mxu0 %v16104_v46  ;;  %8665 = vrot.lane.b32.xlu1 %v8643_v20, %s17076_s27  ;;  %v16207_v46 = vld [vmem:[%s23298_s2 + $0x668] ss:$16 sps:$4 sm:$0xff]  }
 0x533   :  { %8230 = vmatprep.subr.bf16.mxu0 %v16112_v61  ;;  %v16215_v61 = vld [vmem:[%s23298_s2 + $0x64c] ss:$16 sps:$4 sm:$0xff]  }
 0x534   :  { %14845 = vmatpush3.bf16.msra.mxu1 %v16085_v17  ;;  %v8640_v17 = vshrl.u32 %v8612_v62, 16 }
 0x535   :  { %14846 = vmatprep.subr.bf16.mxu1 %v23316_v24 }
 0x536   :  { %8231 = vmatpush1.bf16.msra.mxu0 %v16110_v45  ;;  %8663 = vrot.lane.b32.xlu0 %v8640_v17, %s17076_s27  ;;  %v16213_v45 = vld [vmem:[%s23298_s2 + $0x648] ss:$16 sps:$4 sm:$0xff]  }
 0x537   :  { %8232 = vmatprep.subr.bf16.mxu0 %v16118_v55  ;;  %v16221_v55 = vld [vmem:[%s23298_s2 + $0x62c] ss:$16 sps:$4 sm:$0xff]  }
 0x538   :  { %14847 = vmatpush3.bf16.msra.mxu1 %v16089_v22  ;;  %v16179_v22 = vld [vmem:[%s23298_s2 + $0x30c] ss:$16 sps:$4 sm:$0xff]  }
 0x539   :  { %14848 = vmatprep.subr.bf16.mxu1 %v23316_v24 }
 0x53a   :  { %8233 = vmatpush1.bf16.msra.mxu0 %v16116_v35  ;;  %v16219_v35 = vld [vmem:[%s23298_s2 + $0x628] ss:$16 sps:$4 sm:$0xff]  }
 0x53b   :  { %8234 = vmatprep.subr.bf16.mxu0 %v16124_v63  ;;  %v16227_v63 = vld [vmem:[%s23298_s2 + $0x60c] ss:$16 sps:$4 sm:$0xff]  }
 0x53c   :  { %14849 = vmatpush3.bf16.msra.mxu1 %v16093_v28  ;;  %v20582_v28 = vsel %vm6857_vm9, %v20305_v6, %v20307_v37  ;;  %v16191_v6 = vld [vmem:[%s23298_s2 + $0x6cc] ss:$16 sps:$4 sm:$0xff]   ;;  %v16195_v37 = vld [vmem:[%s23298_s2 + $0x6a8] ss:$16 sps:$4 sm:$0xff]  }
 0x53d   :  { %14850 = vmatprep.subr.bf16.mxu1 %v23316_v24 }
 0x53e   :  { %8235 = vmatpush1.bf16.msra.mxu0 %v16122_v59  ;;  %v16225_v59 = vld [vmem:[%s23298_s2 + $0x608] ss:$16 sps:$4 sm:$0xff]  }
 0x53f   :  { %8236 = vmatprep.subr.bf16.mxu0 %v16130_v25  ;;  %v6804_v25 = vld [vmem:[%s23298_s2 + $0x708] sm:$0x33] }
 0x540   :  { %14851 = vmatpush3.bf16.msra.mxu1 %v16097_v8  ;;  %v16183_v8 = vld [vmem:[%s23298_s2 + $0x6e8] ss:$16 sps:$4 sm:$0xff]  }
 0x541   :  { %8058 = vmatprep.subr.bf16.mxu1 %v16103_v30  ;;  %v16201_v30 = vld [vmem:[%s23298_s2 + $0x688] ss:$16 sps:$4 sm:$0xff]  }
 0x542   :  { %8237 = vmatpush1.bf16.msra.mxu0 %v16128_v33  ;;  %v14143_v33 = vcombine.high %v6804_v25, %v6804_v25 }
 0x543   :  { %8238 = vmatprep.subr.bf16.mxu0 %v16136_v26  ;;  %v14142_v26 = vcombine.low %v6804_v25, %v6804_v25  ;;  %v16271_v25 = vld [vmem:[%s23298_s2 + $0x740] ss:$16 sps:$4 sm:$0xff]  }
 0x545   :  { %v8012_v27 = vsel %vm1451_vm1, %v14142_v26, 0 }
 0x546   :  { %8239 = vmatpush2.bf16.msra.mxu0 %v16134_v11  ;;  %v16236_v11 = vld [vmem:[%s23298_s2 + $0x7e4] ss:$16 sps:$4 sm:$0xff]  }
 0x547   :  { %8240 = vmatprep.subr.bf16.mxu0 %v16142_v34  ;;  %v20652_v34 = vpop.permute.xlu0 %6855 }
 0x548   :  { %v20675_v62 = vsel %vm6857_vm9, %v20426_v5, %v20652_v34  ;;  %v16251_v5 = vld [vmem:[%s23298_s2 + $0x7a4] ss:$16 sps:$4 sm:$0xff]  }
 0x54a   :  { %8241 = vmatpush2.bf16.msra.mxu0 %v16140_v40  ;;  %v9653_v40 = vrot.slane %v16236_v11, 2  ;;  %v9611_v11 = vrot.slane %v16271_v25, 2  ;;  %v16302_v25 = vld [vmem:[%s23298_s2 + $0x8a4] ss:$16 sps:$4 sm:$0xff]  }
 0x54b   :  { %8242 = vmatprep.subr.bf16.mxu0 %v16148_v54  ;;  %v20663_v54 = vld [vmem:[%s23298_s2 + $0x800] ss:$16 sps:$4 sm:$0xff]  }
 0x54c   :  { %v9659_v23 = vrot.slane %v20663_v54, 2 }
 0x54e   :  { %8243 = vmatpush2.bf16.msra.mxu0 %v16146_v21  ;;  %v9662_v21 = vsel %vm3023_vm2, %v9653_v40, %v9661_v19  ;;  %v9660_v58 = vsel %vm3023_vm2, %v9651_v0, %v9659_v23 }
 0x54f   :  { %8244 = vmatprep.subr.bf16.mxu0 %v16155_v13  ;;  %v16245_v13 = vld [vmem:[%s23298_s2 + $0x7c4] ss:$16 sps:$4 sm:$0xff]  }
 0x550   :  { %v9645_v51 = vrot.slane %v16245_v13, 2 }
 0x552   :  { %8245 = vmatpush2.bf16.msra.mxu0 %v16153_v48  ;;  %v16247_v48 = vld [vmem:[%s23298_s2 + $0x7c0] ss:$16 sps:$4 sm:$0xff]  }
 0x553   :  { %8246 = vmatprep.subr.bf16.mxu0 %v16161_v3  ;;  %v9643_v20 = vrot.slane %v16247_v48, 2  ;;  %v8622_v3 = vcombine.high %v20536_v38, %v20536_v38 }
 0x555   :  { %v9652_v17 = vsel %vm3023_vm2, %v9643_v20, %v9651_v0  ;;  %v16277_v0 = vld [vmem:[%s23298_s2 + $0x720] ss:$16 sps:$4 sm:$0xff]  }
 0x556   :  { %8247 = vmatpush2.bf16.msra.mxu0 %v16159_v4  ;;  %v9654_v4 = vsel %vm3023_vm2, %v9645_v51, %v9653_v40  ;;  %v16275_v40 = vld [vmem:[%s23298_s2 + $0x724] ss:$16 sps:$4 sm:$0xff]   ;;  %v9600_v48 = vrot.slane %v16277_v0, 2 }
 0x557   :  { %8248 = vmatprep.subr.bf16.mxu0 %v16167_v9  ;;  %v20692_v9 = vrot.slane %v8622_v3, %v17283_v49  ;;  %v9603_v13 = vrot.slane %v16275_v40, 2 }
 0x559   :  { %v8658_v38 = vshrl.u32 %v20692_v9, 16 }
 0x55a   :  { %8249 = vmatpush2.bf16.msra.mxu0 %v16165_v10  ;;  %v16253_v10 = vld [vmem:[%s23298_s2 + $0x7a0] ss:$16 sps:$4 sm:$0xff]  }
 0x55b   :  { %8250 = vmatprep.subr.bf16.mxu0 %v16173_v53  ;;  %v9637_v53 = vrot.slane %v16251_v5, 2  ;;  %8675 = vrot.lane.b32.xlu1 %v8658_v38, %s17076_s27  ;;  %v16291_v38 = vld [vmem:[%s23298_s2 + $0x8e0] ss:$16 sps:$4 sm:$0xff]  }
 0x55e   :  { %8251 = vmatpush2.bf16.msra.mxu0 %v16171_v42  ;;  %v9635_v42 = vrot.slane %v16253_v10, 2  ;;  %v16287_v10 = vld [vmem:[%s23298_s2 + $0x8e4] ss:$16 sps:$4 sm:$0xff]  }
 0x55f   :  { %8252 = vmatprep.subr.bf16.mxu0 %v16179_v22  ;;  %v9646_v22 = vsel %vm3023_vm2, %v9637_v53, %v9645_v51  ;;  %v16281_v51 = vld [vmem:[%s23298_s2 + $0x704] ss:$16 sps:$4 sm:$0xfc]  }
 0x560   :  { %v9602_v3 = vrot.slane %v16281_v51, 2 }
 0x562   :  { %8253 = vmatpush2.bf16.msra.mxu0 %v16177_v29  ;;  %v16257_v29 = vld [vmem:[%s23298_s2 + $0x784] ss:$16 sps:$4 sm:$0xff]   ;;  %v9604_v5 = vsel %vm3023_vm2, %v9602_v3, %v9603_v13 }
 0x563   :  { %8304 = vmatprep.subr.bf16.mxu0 %v16185_v44  ;;  %v9644_v44 = vsel %vm3023_vm2, %v9635_v42, %v9643_v20  ;;  %v9612_v20 = vsel %vm3023_vm2, %v9600_v48, %v9611_v11  ;;  %v16115_v3 = vld [vmem:[%s23298_s2 + $0x2a4] ss:$16 sps:$4 sm:$0xff]  }
 0x565   :  { %8255 = vmatmul.mubr.bf16.vlgmr.msra.gmra.mxu0 %v20582_v28 }
 0x566   :  { %8305 = vmatpush1.bf16.msra.mxu0 %v16183_v8  ;;  %14147 = vmatprep.mubr.msk.bf16.mxu0 %vm1447_vm0, %v20652_v34  ;;  %v8637_v8 = vcombine.high %v20540_v18, %v20540_v18  ;;  %v16265_v18 = vld [vmem:[%s23298_s2 + $0x760] ss:$16 sps:$4 sm:$0xff]  }
 0x567   :  { %8306 = vmatprep.subr.bf16.mxu0 %v16191_v6  ;;  %v16259_v6 = vld [vmem:[%s23298_s2 + $0x780] ss:$16 sps:$4 sm:$0xff]  }
 0x56a   :  { %8307 = vmatpush1.bf16.msra.mxu0 %v16189_v56  ;;  %v9629_v56 = vrot.slane %v16257_v29, 2 }
 0x56b   :  { %8308 = vmatprep.subr.bf16.mxu0 %v16197_v1  ;;  %v8655_v1 = vshrl.u32 %v8637_v8, 16 }
 0x56d   :  { %8673 = vrot.lane.b32.xlu1 %v8655_v1, %s17076_s27 }
 0x56e   :  { %8309 = vmatpush1.bf16.msra.mxu0 %v16195_v37  ;;  %v9627_v37 = vrot.slane %v16259_v6, 2  ;;  %v6475_v6 = vld [vmem:[%s23309_s10] sm:$0x1] }
 0x56f   :  { %8310 = vmatprep.subr.bf16.mxu0 %v16203_v12  ;;  %v9638_v12 = vsel %vm3023_vm2, %v9629_v56, %v9637_v53  ;;  %v20749_v53 = vld [vmem:[%s23298_s2 + $0x904] ss:$16 sps:$4 sm:$0xff]  }
 0x570   :  { %v9725_v29 = vrot.slane %v20749_v53, 2 }
 0x572   :  { %8311 = vmatpush1.bf16.msra.mxu0 %v16201_v30  ;;  %v16263_v30 = vld [vmem:[%s23298_s2 + $0x764] ss:$16 sps:$4 sm:$0xff]  }
 0x573   :  { %8312 = vmatprep.subr.bf16.mxu0 %v16209_v31  ;;  %v9636_v31 = vsel %vm3023_vm2, %v9627_v37, %v9635_v42 }
 0x576   :  { %8313 = vmatpush1.bf16.msra.mxu0 %v16207_v46  ;;  %v9621_v46 = vrot.slane %v16263_v30, 2  ;;  %v16296_v30 = vld [vmem:[%s23298_s2 + $0x8c4] ss:$16 sps:$4 sm:$0xff]  }
 0x577   :  { %8314 = vmatprep.subr.bf16.mxu0 %v16215_v61 }
 0x57a   :  { %8315 = vmatpush1.bf16.msra.mxu0 %v16213_v45  ;;  %v9619_v45 = vrot.slane %v16265_v18, 2  ;;  %v16298_v18 = vld [vmem:[%s23298_s2 + $0x8c0] ss:$16 sps:$4 sm:$0xff]  }
 0x57b   :  { %8316 = vmatprep.subr.bf16.mxu0 %v16221_v55  ;;  %v9630_v55 = vsel %vm3023_vm2, %v9621_v46, %v9629_v56  ;;  %v9715_v56 = vrot.slane %v16291_v38, 2 }
 0x57e   :  { %8317 = vmatpush1.bf16.msra.mxu0 %v16219_v35  ;;  %v16269_v35 = vld [vmem:[%s23298_s2 + $0x744] ss:$16 sps:$4 sm:$0xff]  }
 0x57f   :  { %8318 = vmatprep.subr.bf16.mxu0 %v16227_v63 }
 0x582   :  { %8319 = vmatpush1.bf16.msra.mxu0 %v16225_v59  ;;  %v9628_v59 = vsel %vm3023_vm2, %v9619_v45, %v9627_v37 }
 0x583   :  { %14146 = vmatprep.subr.msk.bf16.mxu0 %vm1451_vm1, %v14143_v33  ;;  %v9613_v33 = vrot.slane %v16269_v35, 2  ;;  %v9707_v35 = vrot.slane %v16298_v18, 2  ;;  %v16127_v18 = vld [vmem:[%s23298_s2 + $0x264] ss:$16 sps:$4 sm:$0xff]  }
 0x586   :  { %8335 = vmatpush2.bf16.msra.mxu0 %v8012_v27  ;;  %v9622_v27 = vsel %vm3023_vm2, %v9613_v33, %v9621_v46 }
 0x587   :  { %10290 = vmatprep.subr.bf16.mxu0 %v9662_v21  ;;  %v9620_v21 = vsel %vm3023_vm2, %v9611_v11, %v9619_v45  ;;  %v9709_v45 = vrot.slane %v16296_v30, 2  ;;  %v9716_v11 = vsel %vm3023_vm2, %v9707_v35, %v9715_v56 }
 0x589   :  { %8337 = vmatmul.mubr.bf16.vlgmr.msra.gmra.mxu0 %v20675_v62 }
 0x58a   :  { %10291 = vmatpush1.bf16.msra.mxu0 %v9660_v58  ;;  %v9614_v58 = vsel %vm3023_vm2, %v9603_v13, %v9613_v33 }
 0x58b   :  { %10292 = vmatprep.subr.bf16.mxu0 %v9654_v4  ;;  %v16283_v4 = vld [vmem:[%s23298_s2 + $0x700] ss:$16 sps:$4 sm:$0xfc]  }
 0x58e   :  { %10293 = vmatpush1.bf16.msra.mxu0 %v9652_v17  ;;  %v9599_v17 = vrot.slane %v16283_v4, 2 }
 0x58f   :  { %10294 = vmatprep.subr.bf16.mxu0 %v9646_v22  ;;  %v9717_v22 = vrot.slane %v16287_v10, 2  ;;  %v16113_v10 = vld [vmem:[%s23298_s2 + $0x2a0] ss:$16 sps:$4 sm:$0xff]  }
 0x590   :  { %v9601_v42 = vsel %vm3023_vm2, %v9599_v17, %v9600_v48  ;;  %v16308_v48 = vld [vmem:[%s23298_s2 + $0x884] ss:$16 sps:$4 sm:$0xff]  }
 0x591   :  { %v9726_v37 = vsel %vm3023_vm2, %v9717_v22, %v9725_v29  ;;  %v9693_v4 = vrot.slane %v16308_v48, 2 }
 0x592   :  { %10295 = vmatpush1.bf16.msra.mxu0 %v9644_v44  ;;  %v20759_v44 = vld [vmem:[%s23298_s2 + $0x900] ss:$16 sps:$4 sm:$0xff]  }
 0x593   :  { %10296 = vmatprep.subr.bf16.mxu0 %v9638_v12  ;;  %v9723_v12 = vrot.slane %v20759_v44, 2  ;;  %v16516_v44 = vld [vmem:[%s23298_s2 + $0xaa4] ss:$16 sps:$4 sm:$0xff]  }
 0x596   :  { %10297 = vmatpush1.bf16.msra.mxu0 %v9636_v31 }
 0x597   :  { %10298 = vmatprep.subr.bf16.mxu0 %v9630_v55 }
 0x59a   :  { %10299 = vmatpush1.bf16.msra.mxu0 %v9628_v59  ;;  %v9718_v59 = vsel %vm3023_vm2, %v9709_v45, %v9717_v22  ;;  %v16121_v22 = vld [vmem:[%s23298_s2 + $0x284] ss:$16 sps:$4 sm:$0xff]  }
 0x59b   :  { %10300 = vmatprep.subr.bf16.mxu0 %v9622_v27  ;;  %v16304_v27 = vld [vmem:[%s23298_s2 + $0x8a0] ss:$16 sps:$4 sm:$0xff]  }
 0x59c   :  { %v9699_v0 = vrot.slane %v16304_v27, 2 }
 0x59e   :  { %10301 = vmatpush1.bf16.msra.mxu0 %v9620_v21  ;;  %v9701_v21 = vrot.slane %v16302_v25, 2  ;;  %v9708_v51 = vsel %vm3023_vm2, %v9699_v0, %v9707_v35  ;;  %v16125_v35 = vld [vmem:[%s23298_s2 + $0x260] ss:$16 sps:$4 sm:$0xff]   ;;  %v16133_v25 = vld [vmem:[%s23298_s2 + $0x244] ss:$16 sps:$4 sm:$0xff]  }
 0x59f   :  { %10302 = vmatprep.subr.bf16.mxu0 %v9614_v58  ;;  %v16107_v58 = vld [vmem:[%s23298_s2 + $0x2c0] ss:$16 sps:$4 sm:$0xff]  }
 0x5a0   :  { %v9710_v13 = vsel %vm3023_vm2, %v9701_v21, %v9709_v45  ;;  %v9702_v17 = vsel %vm3023_vm2, %v9693_v4, %v9701_v21  ;;  %v16139_v21 = vld [vmem:[%s23298_s2 + $0x224] ss:$16 sps:$4 sm:$0xff]  }
 0x5a2   :  { %10303 = vmatpush1.bf16.msra.mxu0 %v9612_v20  ;;  %v16310_v20 = vld [vmem:[%s23298_s2 + $0x880] ss:$16 sps:$4 sm:$0xff]  }
 0x5a3   :  { %10304 = vmatprep.subr.bf16.mxu0 %v9604_v5  ;;  %v9691_v5 = vrot.slane %v16310_v20, 2  ;;  %v16137_v20 = vld [vmem:[%s23298_s2 + $0x220] ss:$16 sps:$4 sm:$0xff]  }
 0x5a5   :  { %v9700_v38 = vsel %vm3023_vm2, %v9691_v5, %v9699_v0  ;;  %v20859_v0 = vpop.permute.xlu1 %8671 }
 0x5a6   :  { %10305 = vmatpush1.bf16.msra.mxu0 %v9601_v42  ;;  %v16316_v42 = vld [vmem:[%s23298_s2 + $0x860] ss:$16 sps:$4 sm:$0xff]  }
 0x5a7   :  { %10306 = vmatprep.subr.bf16.mxu0 %v9726_v37  ;;  %v16119_v37 = vld [vmem:[%s23298_s2 + $0x280] ss:$16 sps:$4 sm:$0xff]  }
 0x5a9   :  { %v8666_v54 = vpop.permute.xlu1 %8665 }
 0x5db   :  { %v6400_v61 = vpop.f32.mrf.mxu1 }
 0x5dd   :  { %v14826_v63 = vpop.f32.mrf.mxu1 }
 0x5df   :  { %v6403_v26 = vpop.f32.mrf.mxu1 }
 0x5e0   :  { %v16101_v26 = vld [vmem:[%s23298_s2 + $0x2e0] ss:$16 sps:$4 sm:$0xff]  }
 0x5e1   :  { %v14827_v32 = vpop.f32.mrf.mxu1 }
 0x5e2   :  { %v16109_v32 = vld [vmem:[%s23298_s2 + $0x2c4] ss:$16 sps:$4 sm:$0xff]  }
 0x5eb   :  { %v6469_v8 = vpop.f32.mrf.mxu1 }
 0x5ec   :  { %v6470_v1 = vadd.f32 %v6469_v8, %v6400_v61  ;;  %v9724_v61 = vsel %vm3023_vm2, %v9715_v56, %v9723_v12 }
 0x5ed   :  { %v14838_v31 = vpop.f32.mrf.mxu1  ;;  %10307 = vmatpush2.bf16.msra.mxu0 %v9724_v61 }
 0x5ee   :  { %v6476_v46 = vadd.f32 %v6475_v6, %v6470_v1  ;;  %10308 = vmatprep.subr.bf16.mxu0 %v9718_v59  ;;  %v9683_v6 = vrot.slane %v16316_v42, 2  ;;  %v16320_v1 = vld [vmem:[%s23298_s2 + $0x844] ss:$16 sps:$4 sm:$0xff]   ;;  %v16322_v31 = vld [vmem:[%s23298_s2 + $0x840] ss:$16 sps:$4 sm:$0xff]  }
 0x5ef   :  { %v6472_v55 = vpop.f32.mrf.mxu1  ;;  %v9675_v61 = vrot.slane %v16322_v31, 2  ;;  %v16328_v59 = vld [vmem:[%s23298_s2 + $0x820] ss:$16 sps:$4 sm:$0xff]  }
 0x5f0   :  { %v6477_v63 = vmax.f32 %v6476_v46, 0.0  ;;  %v9692_v30 = vsel %vm3023_vm2, %v9683_v6, %v9691_v5  ;;  %v9677_v46 = vrot.slane %v16320_v1, 2  ;;  %v16326_v55 = vld [vmem:[%s23298_s2 + $0x824] ss:$16 sps:$4 sm:$0xff]  }
 0x5f1   :  { %v14839_v33 = vpop.f32.mrf.mxu1  ;;  %10309 = vmatpush2.bf16.msra.mxu0 %v9716_v11  ;;  %v20849_v11 = vpop.permute.xlu0 %8669  ;;  %v16152_v1 = vld [vmem:[%s23298_s2 + $0x3e4] ss:$16 sps:$4 sm:$0xff]  }
 0x5f2   :  { %v6478_v40 = vpack.c.bf16 %v6477_v63, %v6477_v63  ;;  %10310 = vmatprep.subr.bf16.mxu0 %v9710_v13  ;;  %v9684_v63 = vsel %vm3023_vm2, %v9675_v61, %v9683_v6  ;;  %v9669_v33 = vrot.slane %v16326_v55, 2  ;;  %v16352_v55 = vld [vmem:[%s23298_s2 + $0xba0] ss:$16 sps:$4 sm:$0xff]  }
 0x5f4   :  { %14853 = vmatmul.mubr.msk.bf16.vlgmr.msra.gmra.mxu1 %vm6524_vm12, %v6478_v40  ;;  %v9678_v27 = vsel %vm3023_vm2, %v9669_v33, %v9677_v46  ;;  %v16131_v40 = vld [vmem:[%s23298_s2 + $0x240] ss:$16 sps:$4 sm:$0xff]   ;;  %v9670_v48 = vsel %vm3023_vm2, %v9661_v19, %v9669_v33  ;;  %v16356_v33 = vld [vmem:[%s23298_s2 + $0xb84] ss:$16 sps:$4 sm:$0xff]  }
 0x5f5   :  { %8059 = vmatpush1.bf16.msra.mxu1 %v16101_v26  ;;  %8090 = vmatprep.mubr.bf16.mxu1 %v20590_v16  ;;  %v16314_v16 = vld [vmem:[%s23298_s2 + $0x864] ss:$16 sps:$4 sm:$0xff]   ;;  %v9667_v26 = vrot.slane %v16328_v59, 2  ;;  %v20861_v13 = vpop.permute.xlu0 %8667  ;;  %v16339_v19 = vld [vmem:[%s23298_s2 + $0xbe0] ss:$16 sps:$4 sm:$0xff]   ;;  %v9891_v59 = vrot.slane %v16352_v55, 2 }
 0x5f6   :  { %8060 = vmatprep.subr.bf16.mxu1 %v16109_v32  ;;  %10311 = vmatpush2.bf16.msra.mxu0 %v9708_v51  ;;  %v9685_v8 = vrot.slane %v16314_v16, 2  ;;  %v20872_v51 = vld [vmem:[%s23298_s2 + $0xc04] ss:$16 sps:$4 sm:$0xff]  }
 0x5f7   :  { %10312 = vmatprep.subr.bf16.mxu0 %v9702_v17  ;;  %v9676_v32 = vsel %vm3023_vm2, %v9667_v26, %v9675_v61  ;;  %v9668_v50 = vsel %vm3023_vm2, %v9659_v23, %v9667_v26  ;;  %v9917_v5 = vrot.slane %v20872_v51, 2  ;;  %v20890_v17 = vld [vmem:[%s23298_s2 + $0xc00] ss:$16 sps:$4 sm:$0xff]   ;;  %v9907_v23 = vrot.slane %v16339_v19, 2  ;;  %v16182_v55 = vld [vmem:[%s23298_s2 + $0x344] ss:$16 sps:$4 sm:$0xff]  }
 0x5f8   :  { %v9694_v56 = vsel %vm3023_vm2, %v9685_v8, %v9693_v4  ;;  %v9686_v45 = vsel %vm3023_vm2, %v9677_v46, %v9685_v8  ;;  %v9915_v42 = vrot.slane %v20890_v17, 2  ;;  %v16143_v8 = vld [vmem:[%s23298_s2 + $0x200] ss:$16 sps:$4 sm:$0xff]   ;;  %v16350_v46 = vld [vmem:[%s23298_s2 + $0xba4] ss:$16 sps:$4 sm:$0xff]  }
 0x5f9   :  { %8061 = vmatpush1.bf16.msra.mxu1 %v16107_v58  ;;  %v16335_v58 = vld [vmem:[%s23298_s2 + $0xbe4] ss:$16 sps:$4 sm:$0xff]   ;;  %v8664_v16 = vpop.permute.xlu0 %8663  ;;  %v16150_v61 = vld [vmem:[%s23298_s2 + $0x3e0] ss:$16 sps:$4 sm:$0xff]  }
 0x5fa   :  { %8062 = vmatprep.subr.bf16.mxu1 %v16115_v3  ;;  %10313 = vmatpush2.bf16.msra.mxu0 %v9700_v38  ;;  %v16145_v3 = vld [vmem:[%s23298_s2 + $0x204] ss:$16 sps:$4 sm:$0xff]   ;;  %v9909_v4 = vrot.slane %v16335_v58, 2  ;;  %v20907_v6 = vsel %vm6857_vm9, %v8664_v16, %v8666_v54  ;;  %v16156_v26 = vld [vmem:[%s23298_s2 + $0x3c0] ss:$16 sps:$4 sm:$0xff]  }
 0x5fb   :  { %10314 = vmatprep.subr.bf16.mxu0 %v9694_v56  ;;  %v16346_v56 = vld [vmem:[%s23298_s2 + $0xbc0] ss:$16 sps:$4 sm:$0xff]  }
 0x5fc   :  { %v9918_v38 = vsel %vm3023_vm2, %v9909_v4, %v9917_v5  ;;  %v9899_v31 = vrot.slane %v16346_v56, 2  ;;  %v16370_v56 = vld [vmem:[%s23298_s2 + $0xb40] ss:$16 sps:$4 sm:$0xff]  }
 0x5fd   :  { %8063 = vmatpush1.bf16.msra.mxu1 %v16113_v10  ;;  %v20894_v10 = vsel %vm6857_vm9, %v8666_v54, %v20861_v13  ;;  %v6803_v17 = vld [vmem:[%s23298_s2 + $0x700] sm:$0x33] }
 0x5fe   :  { %8064 = vmatprep.subr.bf16.mxu1 %v16121_v22  ;;  %10315 = vmatpush2.bf16.msra.mxu0 %v9692_v30  ;;  %v16344_v22 = vld [vmem:[%s23298_s2 + $0xbc4] ss:$16 sps:$4 sm:$0xff]  }
 0x5ff   :  { %10316 = vmatprep.subr.bf16.mxu0 %v9686_v45  ;;  %10322 = vmatprep.mubr.bf16.mxu0 %v20894_v10  ;;  %v9901_v30 = vrot.slane %v16344_v22, 2  ;;  %v9908_v45 = vsel %vm3023_vm2, %v9899_v31, %v9907_v23  ;;  %v16168_v22 = vld [vmem:[%s23298_s2 + $0x380] ss:$16 sps:$4 sm:$0xff]  }
 0x601   :  { %8065 = vmatpush1.bf16.msra.mxu1 %v16119_v37  ;;  %v9916_v37 = vsel %vm3023_vm2, %v9907_v23, %v9915_v42 }
 0x602   :  { %8066 = vmatprep.subr.bf16.mxu1 %v16127_v18  ;;  %10317 = vmatpush2.bf16.msra.mxu0 %v9684_v63  ;;  %v9910_v18 = vsel %vm3023_vm2, %v9901_v30, %v9909_v4  ;;  %v9893_v63 = vrot.slane %v16350_v46, 2  ;;  %v16170_v4 = vld [vmem:[%s23298_s2 + $0x384] ss:$16 sps:$4 sm:$0xff]   ;;  %v16174_v46 = vld [vmem:[%s23298_s2 + $0x360] ss:$16 sps:$4 sm:$0xff]  }
 0x603   :  { %10318 = vmatprep.subr.bf16.mxu0 %v9678_v27  ;;  %v9900_v27 = vsel %vm3023_vm2, %v9891_v59, %v9899_v31 }
 0x605   :  { %8067 = vmatpush1.bf16.msra.mxu1 %v16125_v35  ;;  %v16158_v35 = vld [vmem:[%s23298_s2 + $0x3c4] ss:$16 sps:$4 sm:$0xff]  }
 0x606   :  { %8068 = vmatprep.subr.bf16.mxu1 %v16133_v25  ;;  %10319 = vmatpush2.bf16.msra.mxu0 %v9676_v32  ;;  %v9902_v25 = vsel %vm3023_vm2, %v9893_v63, %v9901_v30  ;;  %v16164_v32 = vld [vmem:[%s23298_s2 + $0x3a4] ss:$16 sps:$4 sm:$0xff]   ;;  %v9867_v30 = vrot.slane %v16370_v56, 2 }
 0x607   :  { %10320 = vmatprep.subr.bf16.mxu0 %v9670_v48  ;;  %v16395_v56 = vld [vmem:[%s23298_s2 + $0xcc4] ss:$16 sps:$4 sm:$0xff]  }
 0x609   :  { %8069 = vmatpush1.bf16.msra.mxu1 %v16131_v40  ;;  %v16358_v40 = vld [vmem:[%s23298_s2 + $0xb80] ss:$16 sps:$4 sm:$0xff]  }
 0x60a   :  { %8070 = vmatprep.subr.bf16.mxu1 %v16139_v21  ;;  %10321 = vmatpush2.bf16.msra.mxu0 %v9668_v50  ;;  %v9885_v21 = vrot.slane %v16356_v33, 2  ;;  %v9883_v48 = vrot.slane %v16358_v40, 2  ;;  %v16162_v50 = vld [vmem:[%s23298_s2 + $0x3a0] ss:$16 sps:$4 sm:$0xff]   ;;  %v16188_v40 = vld [vmem:[%s23298_s2 + $0x324] ss:$16 sps:$4 sm:$0xff]  }
 0x60b   :  { %10372 = vmatprep.subr.bf16.mxu0 %v9918_v38  ;;  %v16368_v38 = vld [vmem:[%s23298_s2 + $0xb44] ss:$16 sps:$4 sm:$0xff]   ;;  %v16180_v33 = vld [vmem:[%s23298_s2 + $0x340] ss:$16 sps:$4 sm:$0xff]  }
 0x60c   :  { %v9894_v58 = vsel %vm3023_vm2, %v9885_v21, %v9893_v63  ;;  %v9892_v19 = vsel %vm3023_vm2, %v9883_v48, %v9891_v59 }
 0x60d   :  { %8071 = vmatpush1.bf16.msra.mxu1 %v16137_v20  ;;  %10323 = vmatmul.mubr.bf16.vlgmr.msra.gmra.mxu0 %v20907_v6  ;;  %v16362_v20 = vld [vmem:[%s23298_s2 + $0xb64] ss:$16 sps:$4 sm:$0xff]  }
 0x60e   :  { %8072 = vmatprep.subr.bf16.mxu1 %v16145_v3  ;;  %10373 = vmatpush1.bf16.msra.mxu0 %v9916_v37  ;;  %v16364_v3 = vld [vmem:[%s23298_s2 + $0xb60] ss:$16 sps:$4 sm:$0xff]   ;;  %v9877_v54 = vrot.slane %v16362_v20, 2  ;;  %v9869_v37 = vrot.slane %v16368_v38, 2  ;;  %v21019_v20 = vld [vmem:[%s23298_s2 + $0xd04] ss:$16 sps:$4 sm:$0xff]  }
 0x60f   :  { %10374 = vmatprep.subr.bf16.mxu0 %v9910_v18  ;;  %v9875_v23 = vrot.slane %v16364_v3, 2  ;;  %v16374_v18 = vld [vmem:[%s23298_s2 + $0xb24] ss:$16 sps:$4 sm:$0xff]   ;;  %v16390_v3 = vld [vmem:[%s23298_s2 + $0xce0] ss:$16 sps:$4 sm:$0xff]  }
 0x610   :  { %v9886_v16 = vsel %vm3023_vm2, %v9877_v54, %v9885_v21  ;;  %v9878_v31 = vsel %vm3023_vm2, %v9869_v37, %v9877_v54  ;;  %v9971_v38 = vrot.slane %v16390_v3, 2 }
 0x611   :  { %8073 = vmatpush1.bf16.msra.mxu1 %v16143_v8  ;;  %v9884_v8 = vsel %vm3023_vm2, %v9875_v23, %v9883_v48 }
 0x612   :  { %8074 = vmatprep.subr.bf16.mxu1 %v16152_v1  ;;  %10375 = vmatpush1.bf16.msra.mxu0 %v9908_v45  ;;  %v16176_v1 = vld [vmem:[%s23298_s2 + $0x364] ss:$16 sps:$4 sm:$0xff]   ;;  %v16376_v45 = vld [vmem:[%s23298_s2 + $0xb20] ss:$16 sps:$4 sm:$0xff]  }
 0x613   :  { %10376 = vmatprep.subr.bf16.mxu0 %v9902_v25  ;;  %v9859_v63 = vrot.slane %v16376_v45, 2  ;;  %v20994_v25 = vld [vmem:[%s23298_s2 + $0xb04] ss:$16 sps:$4 sm:$0xff]  }
 0x614   :  { %v16401_v45 = vld [vmem:[%s23298_s2 + $0xca4] ss:$16 sps:$4 sm:$0xff]  }
 0x615   :  { %8075 = vmatpush2.bf16.msra.mxu1 %v16150_v61  ;;  %v9876_v61 = vsel %vm3023_vm2, %v9867_v30, %v9875_v23  ;;  %v9981_v23 = vrot.slane %v21019_v20, 2 }
 0x616   :  { %8076 = vmatprep.subr.bf16.mxu1 %v16158_v35  ;;  %10377 = vmatpush1.bf16.msra.mxu0 %v9900_v27  ;;  %v9861_v35 = vrot.slane %v16374_v18, 2  ;;  %v21003_v27 = vld [vmem:[%s23298_s2 + $0xb00] ss:$16 sps:$4 sm:$0xff]   ;;  %v9965_v18 = vrot.slane %v16395_v56, 2 }
 0x617   :  { %10378 = vmatprep.subr.bf16.mxu0 %v9894_v58  ;;  %v9851_v21 = vrot.slane %v21003_v27, 2  ;;  %v16386_v58 = vld [vmem:[%s23298_s2 + $0xce4] ss:$16 sps:$4 sm:$0xff]   ;;  %v16415_v56 = vld [vmem:[%s23298_s2 + $0xc60] ss:$16 sps:$4 sm:$0xff]  }
 0x618   :  { %v9870_v59 = vsel %vm3023_vm2, %v9861_v35, %v9869_v37  ;;  %v9973_v54 = vrot.slane %v16386_v58, 2  ;;  %v16397_v37 = vld [vmem:[%s23298_s2 + $0xcc0] ss:$16 sps:$4 sm:$0xff]  }
 0x619   :  { %8077 = vmatpush2.bf16.msra.mxu1 %v16156_v26  ;;  %v9868_v26 = vsel %vm3023_vm2, %v9859_v63, %v9867_v30  ;;  %v16200_v30 = vld [vmem:[%s23298_s2 + $0x6e4] ss:$16 sps:$4 sm:$0xff]   ;;  %v16204_v58 = vld [vmem:[%s23298_s2 + $0x6c0] ss:$16 sps:$4 sm:$0xff]  }
 0x61a   :  { %8078 = vmatprep.subr.bf16.mxu1 %v16164_v32  ;;  %10379 = vmatpush1.bf16.msra.mxu0 %v9892_v19  ;;  %v9853_v32 = vrot.slane %v20994_v25, 2  ;;  %v9860_v19 = vsel %vm3023_vm2, %v9851_v21, %v9859_v63  ;;  %v16403_v63 = vld [vmem:[%s23298_s2 + $0xca0] ss:$16 sps:$4 sm:$0xff]  }
 0x61b   :  { %10380 = vmatprep.subr.bf16.mxu0 %v9886_v16  ;;  %v21037_v16 = vld [vmem:[%s23298_s2 + $0xd00] ss:$16 sps:$4 sm:$0xff]  }
 0x61c   :  { %v9862_v48 = vsel %vm3023_vm2, %v9853_v32, %v9861_v35  ;;  %v16686_v25 = vld [vmem:[%s23298_s2 + $0x12d0] ss:$16 sps:$4 sm:$0xff]  }
 0x61d   :  { %8079 = vmatpush2.bf16.msra.mxu1 %v16162_v50  ;;  %v16186_v50 = vld [vmem:[%s23298_s2 + $0x320] ss:$16 sps:$4 sm:$0xff]  }
 0x61e   :  { %8080 = vmatprep.subr.bf16.mxu1 %v16170_v4  ;;  %10381 = vmatpush1.bf16.msra.mxu0 %v9884_v8  ;;  %v16194_v4 = vld [vmem:[%s23298_s2 + $0x304] ss:$16 sps:$4 sm:$0xff]   ;;  %v9979_v8 = vrot.slane %v21037_v16, 2  ;;  %v16689_v27 = vld [vmem:[%s23298_s2 + $0x12b0] ss:$16 sps:$4 sm:$0xff]  }
 0x61f   :  { %10382 = vmatprep.subr.bf16.mxu0 %v9878_v31  ;;  %v16781_v16 = vld [vmem:[%s23298_s2 + $0x10dc] ss:$16 sps:$4 sm:$0xff]  }
 0x620   :  { %v9980_v31 = vsel %vm3023_vm2, %v9971_v38, %v9979_v8 }
 0x621   :  { %8081 = vmatpush2.bf16.msra.mxu1 %v16168_v22  ;;  %v9982_v22 = vsel %vm3023_vm2, %v9973_v54, %v9981_v23 }
 0x622   :  { %8082 = vmatprep.subr.bf16.mxu1 %v16176_v1  ;;  %10383 = vmatpush1.bf16.msra.mxu0 %v9876_v61  ;;  %v16192_v1 = vld [vmem:[%s23298_s2 + $0x300] ss:$16 sps:$4 sm:$0xff]   ;;  %v9974_v61 = vsel %vm3023_vm2, %v9965_v18, %v9973_v54 }
 0x623   :  { %10384 = vmatprep.subr.bf16.mxu0 %v9870_v59  ;;  %v16206_v59 = vld [vmem:[%s23298_s2 + $0x6c4] ss:$16 sps:$4 sm:$0xff]  }
 0x625   :  { %8083 = vmatpush2.bf16.msra.mxu1 %v16174_v46  ;;  %v9963_v46 = vrot.slane %v16397_v37, 2 }
 0x626   :  { %8084 = vmatprep.subr.bf16.mxu1 %v16182_v55  ;;  %10385 = vmatpush1.bf16.msra.mxu0 %v9868_v26  ;;  %v16198_v55 = vld [vmem:[%s23298_s2 + $0x6e0] ss:$16 sps:$4 sm:$0xff]   ;;  %v9955_v26 = vrot.slane %v16403_v63, 2 }
 0x627   :  { %10386 = vmatprep.subr.bf16.mxu0 %v9862_v48  ;;  %v9972_v35 = vsel %vm3023_vm2, %v9963_v46, %v9971_v38  ;;  %v16407_v48 = vld [vmem:[%s23298_s2 + $0xc84] ss:$16 sps:$4 sm:$0xff]   ;;  %v16210_v38 = vld [vmem:[%s23298_s2 + $0x6a0] ss:$16 sps:$4 sm:$0xff]  }
 0x628   :  { %v9949_v3 = vrot.slane %v16407_v48, 2 }
 0x629   :  { %8085 = vmatpush2.bf16.msra.mxu1 %v16180_v33  ;;  %v9957_v33 = vrot.slane %v16401_v45, 2  ;;  %v16216_v45 = vld [vmem:[%s23298_s2 + $0x680] ss:$16 sps:$4 sm:$0xff]  }
 0x62a   :  { %8086 = vmatprep.subr.bf16.mxu1 %v16188_v40  ;;  %10387 = vmatpush1.bf16.msra.mxu0 %v9860_v19  ;;  %v16212_v19 = vld [vmem:[%s23298_s2 + $0x6a4] ss:$16 sps:$4 sm:$0xff]  }
 0x62b   :  { %10388 = vmatprep.subr.bf16.mxu0 %v9982_v22  ;;  %v9966_v40 = vsel %vm3023_vm2, %v9957_v33, %v9965_v18  ;;  %v9958_v54 = vsel %vm3023_vm2, %v9949_v3, %v9957_v33 }
 0x62d   :  { %8087 = vmatpush2.bf16.msra.mxu1 %v16186_v50  ;;  %v9964_v50 = vsel %vm3023_vm2, %v9955_v26, %v9963_v46 }
 0x62e   :  { %8088 = vmatprep.subr.bf16.mxu1 %v16194_v4  ;;  %10389 = vmatpush2.bf16.msra.mxu0 %v9980_v31  ;;  %v9939_v31 = vrot.slane %v16415_v56, 2  ;;  %v16434_v56 = vld [vmem:[%s23298_s2 + $0x9ec] ss:$16 sps:$4 sm:$0xff]  }
 0x62f   :  { %10390 = vmatprep.subr.bf16.mxu0 %v9974_v61  ;;  %v16419_v61 = vld [vmem:[%s23298_s2 + $0xc44] ss:$16 sps:$4 sm:$0xff]  }
 0x630   :  { %v9933_v63 = vrot.slane %v16419_v61, 2 }
 0x631   :  { %8089 = vmatpush2.bf16.msra.mxu1 %v16192_v1  ;;  %v16218_v1 = vld [vmem:[%s23298_s2 + $0x684] ss:$16 sps:$4 sm:$0xff]  }
 0x632   :  { %8140 = vmatprep.subr.bf16.mxu1 %v16200_v30  ;;  %10391 = vmatpush2.bf16.msra.mxu0 %v9972_v35  ;;  %v8638_v30 = vcombine.high %v20692_v9, %v20692_v9  ;;  %v16421_v9 = vld [vmem:[%s23298_s2 + $0xc40] ss:$16 sps:$4 sm:$0xff]   ;;  %v16224_v35 = vld [vmem:[%s23298_s2 + $0x664] ss:$16 sps:$4 sm:$0xff]  }
 0x633   :  { %10392 = vmatprep.subr.bf16.mxu0 %v9966_v40  ;;  %v16222_v40 = vld [vmem:[%s23298_s2 + $0x660] ss:$16 sps:$4 sm:$0xff]  }
 0x634   :  { %8091 = vmatmul.mubr.bf16.vlgmr.msra.gmra.mxu1 %v20582_v28  ;;  %v16409_v28 = vld [vmem:[%s23298_s2 + $0xc80] ss:$16 sps:$4 sm:$0xff]   ;;  %v8661_v46 = vshrl.u32 %v8638_v30, 16  ;;  %v16244_v30 = vld [vmem:[%s23298_s2 + $0x604] ss:$16 sps:$4 sm:$0xff]  }
 0x635   :  { %8141 = vmatpush1.bf16.msra.mxu1 %v16198_v55  ;;  %14145 = vmatprep.mubr.msk.bf16.mxu1 %vm1447_vm0, %v20652_v34  ;;  %v9947_v4 = vrot.slane %v16409_v28, 2  ;;  %v16413_v34 = vld [vmem:[%s23298_s2 + $0xc64] ss:$16 sps:$4 sm:$0xff]  }
 0x636   :  { %8142 = vmatprep.subr.bf16.mxu1 %v16206_v59  ;;  %10393 = vmatpush2.bf16.msra.mxu0 %v9964_v50  ;;  %v9941_v37 = vrot.slane %v16413_v34, 2  ;;  %v9931_v59 = vrot.slane %v16421_v9, 2  ;;  %v16230_v50 = vld [vmem:[%s23298_s2 + $0x644] ss:$16 sps:$4 sm:$0xff]  }
 0x637   :  { %10394 = vmatprep.subr.bf16.mxu0 %v9958_v54  ;;  %v9956_v22 = vsel %vm3023_vm2, %v9947_v4, %v9955_v26  ;;  %v9948_v55 = vsel %vm3023_vm2, %v9939_v31, %v9947_v4  ;;  %8677 = vrot.lane.b32.xlu0 %v8661_v46, %s17076_s27  ;;  %v16425_v26 = vld [vmem:[%s23298_s2 + $0xc24] ss:$16 sps:$4 sm:$0xff]   ;;  %v16228_v4 = vld [vmem:[%s23298_s2 + $0x640] ss:$16 sps:$4 sm:$0xff]   ;;  %v21171_v46 = vld [vmem:[%s23298_s2 + $0xa08] ss:$16 sps:$4 sm:$0xff]  }
 0x638   :  { %v9950_v18 = vsel %vm3023_vm2, %v9941_v37, %v9949_v3  ;;  %v9942_v33 = vsel %vm3023_vm2, %v9933_v63, %v9941_v37  ;;  %v9940_v48 = vsel %vm3023_vm2, %v9931_v59, %v9939_v31  ;;  %v9925_v28 = vrot.slane %v16425_v26, 2  ;;  %v16235_v34 = vld [vmem:[%s23298_s2 + $0x624] ss:$16 sps:$4 sm:$0xff]   ;;  %v16233_v37 = vld [vmem:[%s23298_s2 + $0x620] ss:$16 sps:$4 sm:$0xff]  }
 0x639   :  { %8143 = vmatpush1.bf16.msra.mxu1 %v16204_v58  ;;  %v16427_v58 = vld [vmem:[%s23298_s2 + $0xc20] ss:$16 sps:$4 sm:$0xff]   ;;  %v9785_v31 = vrot.slane %v16434_v56, 2  ;;  %v14141_v26 = vcombine.high %v6803_v17, %v6803_v17 }
 0x63a   :  { %8144 = vmatprep.subr.bf16.mxu1 %v16212_v19  ;;  %10395 = vmatpush2.bf16.msra.mxu0 %v9956_v22  ;;  %v9923_v19 = vrot.slane %v16427_v58, 2  ;;  %v9934_v3 = vsel %vm3023_vm2, %v9925_v28, %v9933_v63  ;;  %v9926_v22 = vsel %vm3023_vm2, %v9917_v5, %v9925_v28  ;;  %v16438_v5 = vld [vmem:[%s23298_s2 + $0x9e8] ss:$16 sps:$4 sm:$0xff]   ;;  %v16443_v63 = vld [vmem:[%s23298_s2 + $0x9cc] ss:$16 sps:$4 sm:$0xff]  }
 0x63b   :  { %10396 = vmatprep.subr.bf16.mxu0 %v9950_v18  ;;  %v9783_v61 = vrot.slane %v16438_v5, 2  ;;  %v9777_v58 = vrot.slane %v16443_v63, 2  ;;  %v16254_v5 = vld [vmem:[%s23298_s2 + $0xe8] ss:$16 sps:$4 sm:$0xff]   ;;  %v16464_v63 = vld [vmem:[%s23298_s2 + $0x96c] ss:$16 sps:$4 sm:$0xff]  }
 0x63c   :  { %v9932_v54 = vsel %vm3023_vm2, %v9923_v19, %v9931_v59  ;;  %v9924_v51 = vsel %vm3023_vm2, %v9915_v42, %v9923_v19  ;;  %v16242_v59 = vld [vmem:[%s23298_s2 + $0x600] ss:$16 sps:$4 sm:$0xff]   ;;  %v16449_v19 = vld [vmem:[%s23298_s2 + $0x9ac] ss:$16 sps:$4 sm:$0xff]  }
 0x63d   :  { %8145 = vmatpush1.bf16.msra.mxu1 %v16210_v38  ;;  %v21142_v38 = vpop.permute.xlu1 %8675  ;;  %v9786_v28 = vsel %vm3023_vm2, %v9777_v58, %v9785_v31 }
 0x63e   :  { %8146 = vmatprep.subr.bf16.mxu1 %v16218_v1  ;;  %10397 = vmatpush2.bf16.msra.mxu0 %v9948_v55  ;;  %v21153_v1 = vld [vmem:[%s23298_s2 + $0xa0c] ss:$16 sps:$4 sm:$0xff]  }
 0x63f   :  { %10398 = vmatprep.subr.bf16.mxu0 %v9942_v33  ;;  %v9793_v18 = vrot.slane %v21153_v1, 2  ;;  %v16445_v33 = vld [vmem:[%s23298_s2 + $0x9c8] ss:$16 sps:$4 sm:$0xff]  }
 0x640   :  { %v16537_v1 = vld [vmem:[%s23298_s2 + $0xde8] ss:$16 sps:$4 sm:$0xff]  }
 0x641   :  { %8147 = vmatpush1.bf16.msra.mxu1 %v16216_v45  ;;  %v8674_v42 = vpop.permute.xlu1 %8673  ;;  %v9794_v9 = vsel %vm3023_vm2, %v9785_v31, %v9793_v18  ;;  %v16460_v31 = vld [vmem:[%s23298_s2 + $0x988] ss:$16 sps:$4 sm:$0xff]  }
 0x642   :  { %8148 = vmatprep.subr.bf16.mxu1 %v16224_v35  ;;  %10399 = vmatpush2.bf16.msra.mxu0 %v9940_v48  ;;  %v21178_v45 = vsel %vm6857_vm9, %v20859_v0, %v8674_v42  ;;  %v21182_v55 = vsel %vm6857_vm9, %v8674_v42, %v21142_v38  ;;  %v9791_v35 = vrot.slane %v21171_v46, 2  ;;  %v10039_v46 = vrot.slane %v16537_v1, 2 }
 0x643   :  { %10400 = vmatprep.subr.bf16.mxu0 %v9934_v3  ;;  %10404 = vmatprep.mubr.bf16.mxu0 %v21182_v55 }
 0x644   :  { %v9792_v48 = vsel %vm3023_vm2, %v9783_v61, %v9791_v35 }
 0x645   :  { %8149 = vmatpush1.bf16.msra.mxu1 %v16222_v40  ;;  %v14140_v40 = vcombine.low %v6803_v17, %v6803_v17  ;;  %v16262_v17 = vld [vmem:[%s23298_s2 + $0xcc] ss:$16 sps:$4 sm:$0xff]  }
 0x646   :  { %8150 = vmatprep.subr.bf16.mxu1 %v16230_v50  ;;  %10401 = vmatpush2.bf16.msra.mxu0 %v9932_v54  ;;  %v9775_v50 = vrot.slane %v16445_v33, 2 }
 0x647   :  { %10402 = vmatprep.subr.bf16.mxu0 %v9926_v22  ;;  %v8006_v54 = vsel %vm1451_vm1, %v14140_v40, 0  ;;  %v9769_v22 = vrot.slane %v16449_v19, 2  ;;  %v16268_v40 = vld [vmem:[%s23298_s2 + $0xac] ss:$16 sps:$4 sm:$0xff]  }
 0x648   :  { %v9784_v3 = vsel %vm3023_vm2, %v9775_v50, %v9783_v61  ;;  %v9759_v61 = vrot.slane %v16460_v31, 2 }
 0x649   :  { %8151 = vmatpush1.bf16.msra.mxu1 %v16228_v4  ;;  %v16451_v4 = vld [vmem:[%s23298_s2 + $0x9a8] ss:$16 sps:$4 sm:$0xff]  }
 0x64a   :  { %8152 = vmatprep.subr.bf16.mxu1 %v16235_v34  ;;  %10403 = vmatpush2.bf16.msra.mxu0 %v9924_v51  ;;  %v16256_v34 = vld [vmem:[%s23298_s2 + $0xec] ss:$16 sps:$4 sm:$0xff]   ;;  %v9767_v56 = vrot.slane %v16451_v4, 2  ;;  %v16472_v4 = vld [vmem:[%s23298_s2 + $0x948] ss:$16 sps:$4 sm:$0xff]  }
 0x64b   :  { %10495 = vmatprep.subr.bf16.mxu0 %v9794_v9  ;;  %v16458_v51 = vld [vmem:[%s23298_s2 + $0x98c] ss:$16 sps:$4 sm:$0xff]  }
 0x64c   :  { %v9761_v42 = vrot.slane %v16458_v51, 2  ;;  %v9768_v33 = vsel %vm3023_vm2, %v9759_v61, %v9767_v56  ;;  %v16476_v51 = vld [vmem:[%s23298_s2 + $0x92c] ss:$16 sps:$4 sm:$0xff]  }
 0x64d   :  { %8153 = vmatpush1.bf16.msra.mxu1 %v16233_v37  ;;  %10405 = vmatmul.mubr.bf16.vlgmr.msra.gmra.mxu0 %v21178_v45  ;;  %v9778_v37 = vsel %vm3023_vm2, %v9769_v22, %v9777_v58 }
 0x64e   :  { %8154 = vmatprep.subr.bf16.mxu1 %v16244_v30  ;;  %10496 = vmatpush1.bf16.msra.mxu0 %v9792_v48  ;;  %v9776_v30 = vsel %vm3023_vm2, %v9767_v56, %v9775_v50  ;;  %v9770_v9 = vsel %vm3023_vm2, %v9761_v42, %v9769_v22  ;;  %v9753_v48 = vrot.slane %v16464_v63, 2  ;;  %v16470_v50 = vld [vmem:[%s23298_s2 + $0x94c] ss:$16 sps:$4 sm:$0xff]   ;;  %v9743_v56 = vrot.slane %v16472_v4, 2 }
 0x64f   :  { %10497 = vmatprep.subr.bf16.mxu0 %v9786_v28  ;;  %v16266_v28 = vld [vmem:[%s23298_s2 + $0xa8] ss:$16 sps:$4 sm:$0xff]  }
 0x650   :  { %v9762_v58 = vsel %vm3023_vm2, %v9753_v48, %v9761_v42  ;;  %v16280_v42 = vld [vmem:[%s23298_s2 + $0x6c] ss:$16 sps:$4 sm:$0xff]  }
 0x651   :  { %8155 = vmatpush1.bf16.msra.mxu1 %v16242_v59  ;;  %v16260_v59 = vld [vmem:[%s23298_s2 + $0xc8] ss:$16 sps:$4 sm:$0xff]  }
 0x652   :  { %14144 = vmatprep.subr.msk.bf16.mxu1 %vm1451_vm1, %v14141_v26  ;;  %10498 = vmatpush1.bf16.msra.mxu0 %v9784_v3  ;;  %v21239_v26 = vpop.f32.mrf.mxu0 }
 0x653   :  { %10499 = vmatprep.subr.bf16.mxu0 %v9778_v37 }
 0x654   :  { %v21254_v19 = vpop.f32.mrf.mxu0 }
 0x655   :  { %8171 = vmatpush2.bf16.msra.mxu1 %v8006_v54  ;;  %v16274_v54 = vld [vmem:[%s23298_s2 + $0x8c] ss:$16 sps:$4 sm:$0xff]  }
 0x656   :  { %8181 = vmatprep.subr.bf16.mxu1 %v16256_v34  ;;  %10500 = vmatpush1.bf16.msra.mxu0 %v9776_v30  ;;  %v9745_v34 = vrot.slane %v16470_v50, 2  ;;  %v8055_v22 = vpop.f32.mrf.mxu0 }
 0x657   :  { %10501 = vmatprep.subr.bf16.mxu0 %v9770_v9  ;;  %v16284_v22 = vld [vmem:[%s23298_s2 + $0x48] ss:$16 sps:$4 sm:$0xff]  }
 0x658   :  { %8173 = vmatmul.mubr.bf16.vlgmr.msra.gmra.mxu1 %v20675_v62  ;;  %v16466_v62 = vld [vmem:[%s23298_s2 + $0x968] ss:$16 sps:$4 sm:$0xff]   ;;  %v9754_v37 = vsel %vm3023_vm2, %v9745_v34, %v9753_v48  ;;  %v8056_v30 = vpop.f32.mrf.mxu0 }
 0x659   :  { %8182 = vmatpush1.bf16.msra.mxu1 %v16254_v5  ;;  %8213 = vmatprep.mubr.bf16.mxu1 %v20318_v39  ;;  %v9751_v39 = vrot.slane %v16466_v62, 2  ;;  %v16272_v5 = vld [vmem:[%s23298_s2 + $0x88] ss:$16 sps:$4 sm:$0xff]   ;;  %v16295_v30 = vld [vmem:[%s23298_s2 + $0x2c] ss:$16 sps:$4 sm:$0xff]  }
 0x65a   :  { %8183 = vmatprep.subr.bf16.mxu1 %v16262_v17  ;;  %10502 = vmatpush1.bf16.msra.mxu0 %v9768_v33  ;;  %v16478_v17 = vld [vmem:[%s23298_s2 + $0x928] ss:$16 sps:$4 sm:$0xff]   ;;  %v21277_v9 = vpop.f32.mrf.mxu0  ;;  %v21283_v33 = vld [vmem:[%s23298_s2 + $0x90c] ss:$16 sps:$4 sm:$0xff]  }
 0x65b   :  { %10503 = vmatprep.subr.bf16.mxu0 %v9762_v58  ;;  %v9760_v3 = vsel %vm3023_vm2, %v9751_v39, %v9759_v61  ;;  %v9752_v31 = vsel %vm3023_vm2, %v9743_v56, %v9751_v39  ;;  %v9737_v61 = vrot.slane %v16476_v51, 2  ;;  %v9735_v63 = vrot.slane %v16478_v17, 2  ;;  %v16278_v62 = vld [vmem:[%s23298_s2 + $0x68] ss:$16 sps:$4 sm:$0xff]   ;;  %v16286_v58 = vld [vmem:[%s23298_s2 + $0x4c] ss:$16 sps:$4 sm:$0xff]  }
 0x65c   :  { %v21294_v39 = vld [vmem:[%s23298_s2 + $0x908] ss:$16 sps:$4 sm:$0xff]   ;;  %v9729_v50 = vrot.slane %v21283_v33, 2 }
 0x65d   :  { %8184 = vmatpush1.bf16.msra.mxu1 %v16260_v59  ;;  %v9746_v59 = vsel %vm3023_vm2, %v9737_v61, %v9745_v34  ;;  %v9744_v48 = vsel %vm3023_vm2, %v9735_v63, %v9743_v56  ;;  %v21310_v34 = vld [vmem:[%s23298_s2 + $0xb0c] ss:$16 sps:$4 sm:$0xff]   ;;  %v16492_v51 = vld [vmem:[%s23298_s2 + $0xae8] ss:$16 sps:$4 sm:$0xff]  }
 0x65e   :  { %8185 = vmatprep.subr.bf16.mxu1 %v16268_v40  ;;  %10504 = vmatpush1.bf16.msra.mxu0 %v9760_v3  ;;  %v21288_v40 = vpop.f32.mrf.mxu0  ;;  %v9727_v3 = vrot.slane %v21294_v39, 2  ;;  %v9738_v4 = vsel %vm3023_vm2, %v9729_v50, %v9737_v61  ;;  %v23319_v17 = vrot.slane %v21310_v34, 2  ;;  %v9847_v61 = vrot.slane %v16492_v51, 2  ;;  %v16836_v39 = vld [vmem:[%s23298_s2 + $0x1198] ss:$16 sps:$4 sm:$0xff]  }
 0x65f   :  { %10505 = vmatprep.subr.bf16.mxu0 %v9754_v37 }
 0x660   :  { %v9736_v37 = vsel %vm3023_vm2, %v9727_v3, %v9735_v63 }
 0x661   :  { %8186 = vmatpush1.bf16.msra.mxu1 %v16266_v28  ;;  %v8137_v28 = vpop.f32.mrf.mxu0 }
 0x662   :  { %8187 = vmatprep.subr.bf16.mxu1 %v16274_v54  ;;  %10506 = vmatpush1.bf16.msra.mxu0 %v9752_v31  ;;  %v16488_v54 = vld [vmem:[%s23298_s2 + $0xaec] ss:$16 sps:$4 sm:$0xff]  }
 0x663   :  { %10507 = vmatprep.subr.bf16.mxu0 %v9746_v59  ;;  %v8138_v56 = vpop.f32.mrf.mxu0  ;;  %v9849_v31 = vrot.slane %v16488_v54, 2  ;;  %v10648_v54 = vld [vmem:[%s23299_s0 + $0xe] sm:$0xaa] }
 0x665   :  { %8188 = vmatpush1.bf16.msra.mxu1 %v16272_v5  ;;  %v21324_v5 = vld [vmem:[%s23298_s2 + $0xb08] ss:$16 sps:$4 sm:$0xff]   ;;  %v9858_v59 = vsel %vm3023_vm2, %v9849_v31, %v23319_v17  ;;  %v16519_v17 = vld [vmem:[%s23298_s2 + $0xa4c] ss:$16 sps:$4 sm:$0xff]  }
 0x666   :  { %8189 = vmatprep.subr.bf16.mxu1 %v16280_v42  ;;  %10508 = vmatpush1.bf16.msra.mxu0 %v9744_v48  ;;  %v21330_v42 = vpop.f32.mrf.mxu0  ;;  %v23318_v63 = vrot.slane %v21324_v5, 2  ;;  %v16293_v48 = vld [vmem:[%s23298_s2 + $0x28] ss:$16 sps:$4 sm:$0xff]  }
 0x667   :  { %10509 = vmatprep.subr.bf16.mxu0 %v9738_v4  ;;  %v16499_v4 = vld [vmem:[%s23298_s2 + $0xac8] ss:$16 sps:$4 sm:$0xff]  }
 0x668   :  { %v9856_v28 = vsel %vm3023_vm2, %v9847_v61, %v23318_v63  ;;  %v16513_v63 = vld [vmem:[%s23298_s2 + $0xa6c] ss:$16 sps:$4 sm:$0xff]  }
 0x669   :  { %8190 = vmatpush1.bf16.msra.mxu1 %v16278_v62  ;;  %v16497_v62 = vld [vmem:[%s23298_s2 + $0xacc] ss:$16 sps:$4 sm:$0xff]  }
 0x66a   :  { %8191 = vmatprep.subr.bf16.mxu1 %v16286_v58  ;;  %10510 = vmatpush1.bf16.msra.mxu0 %v9736_v37  ;;  %v21342_v58 = vpop.f32.mrf.mxu0  ;;  %v9841_v56 = vrot.slane %v16497_v62, 2  ;;  %v10878_v37 = vcombine.high %v10648_v54, %v10648_v54 }
 0x66b   :  { %10511 = vmatprep.subr.bf16.mxu0 %v9858_v59  ;;  %v9839_v59 = vrot.slane %v16499_v4, 2  ;;  %v9833_v4 = vrot.slane %v16500_v57, 2 }
 0x66c   :  { %v8260_v51 = vpop.f32.mrf.mxu0  ;;  %v9850_v2 = vsel %vm3023_vm2, %v9841_v56, %v9849_v31  ;;  %v10892_v15 = vrot.slane %v10878_v37, %v17283_v49  ;;  %v16307_v31 = vld [vmem:[%s23298_s2 + $0x1ec] ss:$16 sps:$4 sm:$0xff]  }
 0x66d   :  { %8192 = vmatpush1.bf16.msra.mxu1 %v16284_v22  ;;  %v16301_v22 = vld [vmem:[%s23298_s2 + $0xc] ss:$16 sps:$4 sm:$0xff]   ;;  %v9848_v62 = vsel %vm3023_vm2, %v9839_v59, %v9847_v61  ;;  %v9842_v51 = vsel %vm3023_vm2, %v9833_v4, %v9841_v56  ;;  %v16509_v56 = vld [vmem:[%s23298_s2 + $0xa88] ss:$16 sps:$4 sm:$0xff]  }
 0x66e   :  { %8193 = vmatprep.subr.bf16.mxu1 %v16295_v30  ;;  %10512 = vmatpush2.bf16.msra.mxu0 %v9856_v28  ;;  %v16299_v30 = vld [vmem:[%s23298_s2 + $0x8] ss:$16 sps:$4 sm:$0xff]   ;;  %v8261_v36 = vpop.f32.mrf.mxu0  ;;  %v10894_v37 = vcombine.high %v10892_v15, %v10892_v15 }
 0x66f   :  { %10513 = vmatprep.subr.bf16.mxu0 %v9850_v2  ;;  %v16503_v28 = vld [vmem:[%s23298_s2 + $0xaa8] ss:$16 sps:$4 sm:$0xff]  }
 0x670   :  { %v10915_v24 = vrot.slane %v10894_v37, 1  ;;  %v21375_v36 = vld [vmem:[%s23299_s0 + $0x16] sm:$0xaa]  ;;  %v10914_v37 = vrot.slane %v10892_v15, 1 }
 0x671   :  { %8194 = vmatpush1.bf16.msra.mxu1 %v16293_v48  ;;  %v9831_v48 = vrot.slane %v16503_v28, 2  ;;  %v16305_v2 = vld [vmem:[%s23298_s2 + $0x1e8] ss:$16 sps:$4 sm:$0xff]   ;;  %v21383_v57 = vrot.slane %v21375_v36, %v17283_v49  ;;  %v9823_v28 = vrot.slane %v16509_v56, 2 }
 0x672   :  { %8195 = vmatprep.subr.bf16.mxu1 %v16301_v22  ;;  %10514 = vmatpush2.bf16.msra.mxu0 %v9848_v62  ;;  %v16507_v22 = vld [vmem:[%s23298_s2 + $0xa8c] ss:$16 sps:$4 sm:$0xff]   ;;  %v16515_v15 = vld [vmem:[%s23298_s2 + $0xa68] ss:$16 sps:$4 sm:$0xff]  }
 0x673   :  { %10515 = vmatprep.subr.bf16.mxu0 %v9842_v51  ;;  %v9840_v61 = vsel %vm3023_vm2, %v9831_v48, %v9839_v59  ;;  %10926 = vrot.lane.b32.xlu0 %v10915_v24, %s17076_s27  ;;  %v10916_v59 = vrot.slane %v21383_v57, 1  ;;  %v9825_v62 = vrot.slane %v16507_v22, 2  ;;  %v10885_v51 = vrot.slane %v10648_v54, %v17283_v49  ;;  %v16319_v54 = vld [vmem:[%s23298_s2 + $0x1ac] ss:$16 sps:$4 sm:$0xff]  }
 0x674   :  { %v9832_v22 = vsel %vm3023_vm2, %v9823_v28, %v9831_v48  ;;  %v9815_v56 = vrot.slane %v16515_v15, 2 }
 0x675   :  { %8196 = vmatpush1.bf16.msra.mxu1 %v16299_v30  ;;  %v16313_v30 = vld [vmem:[%s23298_s2 + $0x1cc] ss:$16 sps:$4 sm:$0xff]   ;;  %10928 = vrot.lane.b32.xlu1 %v10916_v59, %s17076_s27  ;;  %v9834_v24 = vsel %vm3023_vm2, %v9825_v62, %v9833_v4  ;;  %v10912_v48 = vrot.slane %v10885_v51, 1 }
 0x676   :  { %8197 = vmatprep.subr.bf16.mxu1 %v16307_v31  ;;  %10516 = vmatpush2.bf16.msra.mxu0 %v9840_v61  ;;  %v16311_v31 = vld [vmem:[%s23298_s2 + $0x1c8] ss:$16 sps:$4 sm:$0xff]   ;;  %v9817_v61 = vrot.slane %v16513_v63, 2  ;;  %v9824_v63 = vsel %vm3023_vm2, %v9815_v56, %v9823_v28  ;;  %v16525_v28 = vld [vmem:[%s23298_s2 + $0xa2c] ss:$16 sps:$4 sm:$0xff]  }
 0x677   :  { %10517 = vmatprep.subr.bf16.mxu0 %v9834_v24  ;;  %10924 = vrot.lane.b32.xlu0 %v10914_v37, %s17076_s27  ;;  %v16521_v37 = vld [vmem:[%s23298_s2 + $0xa48] ss:$16 sps:$4 sm:$0xff]  }
 0x678   :  { %v9826_v4 = vsel %vm3023_vm2, %v9817_v61, %v9825_v62  ;;  %v16325_v62 = vld [vmem:[%s23298_s2 + $0x18c] ss:$16 sps:$4 sm:$0xff]  }
 0x679   :  { %8198 = vmatpush2.bf16.msra.mxu1 %v16305_v2  ;;  %v10893_v2 = vcombine.high %v10885_v51, %v10885_v51  ;;  %v9809_v51 = vrot.slane %v16519_v17, 2  ;;  %v16527_v17 = vld [vmem:[%s23298_s2 + $0xa28] ss:$16 sps:$4 sm:$0xff]  }
 0x67a   :  { %8199 = vmatprep.subr.bf16.mxu1 %v16313_v30  ;;  %10518 = vmatpush2.bf16.msra.mxu0 %v9832_v22  ;;  %v16317_v30 = vld [vmem:[%s23298_s2 + $0x1a8] ss:$16 sps:$4 sm:$0xff]  }
 0x67b   :  { %v10913_v59 = vrot.slane %v10893_v2, 1  ;;  %10519 = vmatprep.subr.bf16.mxu0 %v9826_v4  ;;  %10920 = vrot.lane.b32.xlu0 %v10912_v48, %s17076_s27  ;;  %v9818_v24 = vsel %vm3023_vm2, %v9809_v51, %v9817_v61  ;;  %v16323_v22 = vld [vmem:[%s23298_s2 + $0x188] ss:$16 sps:$4 sm:$0xff]   ;;  %v9801_v2 = vrot.slane %v16525_v28, 2  ;;  %v9799_v61 = vrot.slane %v16527_v17, 2 }
 0x67c   :  { %v16329_v4 = vld [vmem:[%s23298_s2 + $0x168] ss:$16 sps:$4 sm:$0xff]   ;;  %v16334_v48 = vld [vmem:[%s23298_s2 + $0x14c] ss:$16 sps:$4 sm:$0xff]   ;;  %v21475_v28 = vsel %vm6857_vm9, %v20849_v11, %v20859_v0  ;;  %v21485_v17 = vsel %vm6857_vm9, %v20861_v13, %v20849_v11 }
 0x67d   :  { %8200 = vmatpush2.bf16.msra.mxu1 %v16311_v31  ;;  %10922 = vrot.lane.b32.xlu1 %v10913_v59, %s17076_s27  ;;  %v9807_v31 = vrot.slane %v16521_v37, 2  ;;  %v9810_v59 = vsel %vm3023_vm2, %v9801_v2, %v9809_v51  ;;  %v16534_v37 = vld [vmem:[%s23298_s2 + $0xdec] ss:$16 sps:$4 sm:$0xff]   ;;  %v16332_v51 = vld [vmem:[%s23298_s2 + $0x148] ss:$16 sps:$4 sm:$0xff]  }
 0x67e   :  { %8201 = vmatprep.subr.bf16.mxu1 %v16319_v54  ;;  %10520 = vmatpush2.bf16.msra.mxu0 %v9824_v63  ;;  %v16331_v54 = vld [vmem:[%s23298_s2 + $0x16c] ss:$16 sps:$4 sm:$0xff]   ;;  %v9802_v63 = vsel %vm3023_vm2, %v9793_v18, %v9801_v2  ;;  %v16341_v2 = vld [vmem:[%s23298_s2 + $0x128] ss:$16 sps:$4 sm:$0xff]  }
 0x67f   :  { %10521 = vmatprep.subr.bf16.mxu0 %v9818_v24  ;;  %v9816_v15 = vsel %vm3023_vm2, %v9807_v31, %v9815_v56  ;;  %v9808_v56 = vsel %vm3023_vm2, %v9799_v61, %v9807_v31  ;;  %v9800_v31 = vsel %vm3023_vm2, %v9791_v35, %v9799_v61  ;;  %v16343_v24 = vld [vmem:[%s23298_s2 + $0x12c] ss:$16 sps:$4 sm:$0xff]   ;;  %10527 = vmatprep.mubr.bf16.mxu0 %v21475_v28  ;;  %v16544_v11 = vld [vmem:[%s23298_s2 + $0xdc8] ss:$16 sps:$4 sm:$0xff]  }
 0x680   :  { %v16542_v0 = vld [vmem:[%s23298_s2 + $0xdcc] ss:$16 sps:$4 sm:$0xff]  }
 0x681   :  { %8202 = vmatpush2.bf16.msra.mxu1 %v16317_v30  ;;  %v8602_v30 = vld [vmem:[%s23298_s2 + $0xe08] sm:$0xff] }
 0x682   :  { %8203 = vmatprep.subr.bf16.mxu1 %v16325_v62  ;;  %10522 = vmatpush2.bf16.msra.mxu0 %v9816_v15  ;;  %v14375_v62 = vcombine.high %v8602_v30, %v8602_v30  ;;  %v14374_v18 = vcombine.low %v8602_v30, %v8602_v30  ;;  %v16349_v13 = vld [vmem:[%s23298_s2 + $0x10c] ss:$16 sps:$4 sm:$0xff]   ;;  %v16347_v30 = vld [vmem:[%s23298_s2 + $0x108] ss:$16 sps:$4 sm:$0xff]  }
 0x683   :  { %10523 = vmatprep.subr.bf16.mxu0 %v9810_v59  ;;  %v10033_v59 = vrot.slane %v16542_v0, 2 }
 0x684   :  { %v21477_v15 = vrot.slane %v14375_v62, 2  ;;  %v21480_v35 = vrot.slane %v14374_v18, 2  ;;  %v16547_v62 = vld [vmem:[%s23298_s2 + $0xda8] ss:$16 sps:$4 sm:$0xff]  }
 0x685   :  { %8204 = vmatpush2.bf16.msra.mxu1 %v16323_v22  ;;  %v10041_v22 = vrot.slane %v16534_v37, 2  ;;  %v21512_v37 = vpop.f32.mrf.mxu0  ;;  %v10023_v18 = vrot.slane %v16547_v62, 2 }
 0x686   :  { %8205 = vmatprep.subr.bf16.mxu1 %v16331_v54  ;;  %10524 = vmatpush2.bf16.msra.mxu0 %v9808_v56  ;;  %v10048_v61 = vsel %vm3023_vm2, %v10039_v46, %v21480_v35 }
 0x687   :  { %10525 = vmatprep.subr.bf16.mxu0 %v9802_v63  ;;  %v10050_v54 = vsel %vm3023_vm2, %v10041_v22, %v21477_v15  ;;  %v10042_v56 = vsel %vm3023_vm2, %v10033_v59, %v10041_v22  ;;  %v21520_v1 = vpop.f32.mrf.mxu0  ;;  %v16553_v22 = vld [vmem:[%s23298_s2 + $0xd8c] ss:$16 sps:$4 sm:$0xff]  }
 0x689   :  { %8206 = vmatpush2.bf16.msra.mxu1 %v16329_v4  ;;  %v10031_v4 = vrot.slane %v16544_v11, 2  ;;  %v8342_v0 = vpop.f32.mrf.mxu0  ;;  %v10017_v11 = vrot.slane %v16553_v22, 2  ;;  %v16567_v22 = vld [vmem:[%s23298_s2 + $0xd48] ss:$16 sps:$4 sm:$0xff]  }
 0x68a   :  { %8207 = vmatprep.subr.bf16.mxu1 %v16334_v48  ;;  %10526 = vmatpush2.bf16.msra.mxu0 %v9800_v31  ;;  %v16545_v48 = vld [vmem:[%s23298_s2 + $0xdac] ss:$16 sps:$4 sm:$0xff]   ;;  %v9999_v0 = vrot.slane %v16567_v22, 2  ;;  %v16383_v22 = vld [vmem:[%s23298_s2 + $0x448] ss:$16 sps:$4 sm:$0xff]  }
 0x68b   :  { %10577 = vmatprep.subr.bf16.mxu0 %v10050_v54  ;;  %v10040_v63 = vsel %vm3023_vm2, %v10031_v4, %v10039_v46  ;;  %v10025_v31 = vrot.slane %v16545_v48, 2  ;;  %v16353_v46 = vld [vmem:[%s23298_s2 + $0x4e8] ss:$16 sps:$4 sm:$0xff]   ;;  %v10032_v54 = vsel %vm3023_vm2, %v10023_v18, %v10031_v4  ;;  %v16559_v4 = vld [vmem:[%s23298_s2 + $0xd6c] ss:$16 sps:$4 sm:$0xff]  }
 0x68c   :  { %v16359_v48 = vld [vmem:[%s23298_s2 + $0x4c8] ss:$16 sps:$4 sm:$0xff]   ;;  %v10009_v62 = vrot.slane %v16559_v4, 2 }
 0x68d   :  { %8208 = vmatpush2.bf16.msra.mxu1 %v16332_v51  ;;  %10528 = vmatmul.mubr.bf16.vlgmr.msra.gmra.mxu0 %v21485_v17  ;;  %v16355_v51 = vld [vmem:[%s23298_s2 + $0x4ec] ss:$16 sps:$4 sm:$0xff]  }
 0x68e   :  { %8209 = vmatprep.subr.bf16.mxu1 %v16343_v24  ;;  %10578 = vmatpush1.bf16.msra.mxu0 %v10048_v61  ;;  %v10034_v24 = vsel %vm3023_vm2, %v10025_v31, %v10033_v59  ;;  %v16361_v61 = vld [vmem:[%s23298_s2 + $0x4cc] ss:$16 sps:$4 sm:$0xff]  }
 0x68f   :  { %10579 = vmatprep.subr.bf16.mxu0 %v10042_v56  ;;  %v10026_v56 = vsel %vm3023_vm2, %v10017_v11, %v10025_v31  ;;  %v16565_v31 = vld [vmem:[%s23298_s2 + $0xd4c] ss:$16 sps:$4 sm:$0xff]  }
 0x691   :  { %8210 = vmatpush2.bf16.msra.mxu1 %v16341_v2  ;;  %v16555_v2 = vld [vmem:[%s23298_s2 + $0xd88] ss:$16 sps:$4 sm:$0xff]  }
 0x692   :  { %8211 = vmatprep.subr.bf16.mxu1 %v16349_v13  ;;  %10580 = vmatpush1.bf16.msra.mxu0 %v10040_v63  ;;  %v8343_v13 = vpop.f32.mrf.mxu0  ;;  %v10015_v59 = vrot.slane %v16555_v2, 2  ;;  %v16367_v63 = vld [vmem:[%s23298_s2 + $0x4ac] ss:$16 sps:$4 sm:$0xff]  }
 0x693   :  { %10581 = vmatprep.subr.bf16.mxu0 %v10034_v24 }
 0x695   :  { %8212 = vmatpush2.bf16.msra.mxu1 %v16347_v30  ;;  %v10024_v30 = vsel %vm3023_vm2, %v10015_v59, %v10023_v18  ;;  %v16365_v18 = vld [vmem:[%s23298_s2 + $0x4a8] ss:$16 sps:$4 sm:$0xff]  }
 0x696   :  { %8263 = vmatprep.subr.bf16.mxu1 %v16355_v51  ;;  %10582 = vmatpush1.bf16.msra.mxu0 %v10032_v54  ;;  %v10001_v54 = vrot.slane %v16565_v31, 2 }
 0x697   :  { %10583 = vmatprep.subr.bf16.mxu0 %v10026_v56  ;;  %v16379_v56 = vld [vmem:[%s23298_s2 + $0x46c] ss:$16 sps:$4 sm:$0xff]  }
 0x698   :  { %8214 = vmatmul.mubr.bf16.vlgmr.msra.gmra.mxu1 %v20328_v47  ;;  %v16561_v47 = vld [vmem:[%s23298_s2 + $0xd68] ss:$16 sps:$4 sm:$0xff]   ;;  %v10010_v2 = vsel %vm3023_vm2, %v10001_v54, %v10009_v62 }
 0x699   :  { %8264 = vmatpush1.bf16.msra.mxu1 %v16353_v46  ;;  %8295 = vmatprep.mubr.bf16.mxu1 %v20443_v52  ;;  %v10007_v51 = vrot.slane %v16561_v47, 2  ;;  %v10018_v52 = vsel %vm3023_vm2, %v10009_v62, %v10017_v11  ;;  %v16373_v46 = vld [vmem:[%s23298_s2 + $0x48c] ss:$16 sps:$4 sm:$0xff]   ;;  %v16371_v11 = vld [vmem:[%s23298_s2 + $0x488] ss:$16 sps:$4 sm:$0xff]  }
 0x69a   :  { %8265 = vmatprep.subr.bf16.mxu1 %v16361_v61  ;;  %10584 = vmatpush1.bf16.msra.mxu0 %v10024_v30  ;;  %v16571_v61 = vld [vmem:[%s23298_s2 + $0xd2c] ss:$16 sps:$4 sm:$0xff]  }
 0x69b   :  { %10585 = vmatprep.subr.bf16.mxu0 %v10018_v52  ;;  %v10016_v24 = vsel %vm3023_vm2, %v10007_v51, %v10015_v59  ;;  %v10008_v13 = vsel %vm3023_vm2, %v9999_v0, %v10007_v51  ;;  %v16573_v59 = vld [vmem:[%s23298_s2 + $0xd28] ss:$16 sps:$4 sm:$0xff]   ;;  %v9993_v4 = vrot.slane %v16571_v61, 2  ;;  %v21584_v47 = vld [vmem:[%s23298_s2 + $0xd0c] ss:$16 sps:$4 sm:$0xff]  }
 0x69c   :  { %v21593_v51 = vld [vmem:[%s23298_s2 + $0xd08] ss:$16 sps:$4 sm:$0xff]   ;;  %v16385_v52 = vld [vmem:[%s23298_s2 + $0x44c] ss:$16 sps:$4 sm:$0xff]   ;;  %v9985_v31 = vrot.slane %v21584_v47, 2 }
 0x69d   :  { %8266 = vmatpush1.bf16.msra.mxu1 %v16359_v48  ;;  %v9991_v48 = vrot.slane %v16573_v59, 2  ;;  %v10002_v30 = vsel %vm3023_vm2, %v9993_v4, %v10001_v54  ;;  %v16394_v54 = vld [vmem:[%s23298_s2 + $0x42c] ss:$16 sps:$4 sm:$0xff]   ;;  %v16586_v59 = vld [vmem:[%s23298_s2 + $0xef0] ss:$16 sps:$4 sm:$0xff]  }
 0x69e   :  { %8267 = vmatprep.subr.bf16.mxu1 %v16367_v63  ;;  %10586 = vmatpush1.bf16.msra.mxu0 %v10016_v24  ;;  %v16377_v63 = vld [vmem:[%s23298_s2 + $0x468] ss:$16 sps:$4 sm:$0xff]   ;;  %v9994_v24 = vsel %vm3023_vm2, %v9985_v31, %v9993_v4  ;;  %v16400_v61 = vld [vmem:[%s23298_s2 + $0x40c] ss:$16 sps:$4 sm:$0xff]  }
 0x69f   :  { %10587 = vmatprep.subr.bf16.mxu0 %v10010_v2  ;;  %v10000_v62 = vsel %vm3023_vm2, %v9991_v48, %v9999_v0  ;;  %v16392_v0 = vld [vmem:[%s23298_s2 + $0x428] ss:$16 sps:$4 sm:$0xff]   ;;  %v10285_v2 = vsel %vm1451_vm1, %v21480_v35, 0  ;;  %v16406_v4 = vld [vmem:[%s23298_s2 + $0x5ec] ss:$16 sps:$4 sm:$0xff]  }
 0x6a1   :  { %8268 = vmatpush1.bf16.msra.mxu1 %v16365_v18  ;;  %v9983_v18 = vrot.slane %v21593_v51, 2  ;;  %v16758_v51 = vld [vmem:[%s23298_s2 + $0xc8c] ss:$16 sps:$4 sm:$0xff]  }
 0x6a2   :  { %8269 = vmatprep.subr.bf16.mxu1 %v16373_v46  ;;  %10588 = vmatpush1.bf16.msra.mxu0 %v10008_v13 }
 0x6a3   :  { %10589 = vmatprep.subr.bf16.mxu0 %v10002_v30  ;;  %v9992_v46 = vsel %vm3023_vm2, %v9983_v18, %v9991_v48  ;;  %v16591_v48 = vld [vmem:[%s23298_s2 + $0xed4] ss:$16 sps:$4 sm:$0xff]  }
 0x6a5   :  { %8270 = vmatpush1.bf16.msra.mxu1 %v16371_v11  ;;  %v16588_v11 = vld [vmem:[%s23298_s2 + $0xef4] ss:$16 sps:$4 sm:$0xff]  }
 0x6a6   :  { %8271 = vmatprep.subr.bf16.mxu1 %v16379_v56  ;;  %10590 = vmatpush1.bf16.msra.mxu0 %v10000_v62  ;;  %v6490_v56 = vld [vmem:[%s23310_s12] sm:$0x1] }
 0x6a7   :  { %10591 = vmatprep.subr.bf16.mxu0 %v9994_v24 }
 0x6a9   :  { %8272 = vmatpush1.bf16.msra.mxu1 %v16377_v63  ;;  %v21625_v13 = vpop.permute.xlu0 %8677  ;;  %v16589_v63 = vld [vmem:[%s23298_s2 + $0xed0] ss:$16 sps:$4 sm:$0xff]  }
 0x6aa   :  { %8273 = vmatprep.subr.bf16.mxu1 %v16385_v52  ;;  %10592 = vmatpush1.bf16.msra.mxu0 %v9992_v46  ;;  %v21638_v35 = vsel %vm6857_vm9, %v21142_v38, %v21625_v13  ;;  %v10895_v38 = vcombine.high %v21375_v36, %v21375_v36  ;;  %v16404_v52 = vld [vmem:[%s23298_s2 + $0x5e8] ss:$16 sps:$4 sm:$0xff]   ;;  %v16412_v36 = vld [vmem:[%s23298_s2 + $0x5cc] ss:$16 sps:$4 sm:$0xff]  }
 0x6ab   :  { %14378 = vmatprep.subr.msk.bf16.mxu0 %vm1451_vm1, %v21477_v15  ;;  %v16398_v15 = vld [vmem:[%s23298_s2 + $0x408] ss:$16 sps:$4 sm:$0xff]   ;;  %14379 = vmatprep.mubr.msk.bf16.mxu0 %vm1447_vm0, %v21625_v13 }
 0x6ac   :  { %v21659_v24 = vrot.slane %v10895_v38, %v17283_v49  ;;  %v16593_v49 = vld [vmem:[%s23298_s2 + $0xeb0] ss:$16 sps:$4 sm:$0xff]   ;;  %v16610_v38 = vld [vmem:[%s23298_s2 + $0xe74] ss:$16 sps:$4 sm:$0xff]  }
 0x6ad   :  { %8274 = vmatpush1.bf16.msra.mxu1 %v16383_v22 }
 0x6ae   :  { %8275 = vmatprep.subr.bf16.mxu1 %v16394_v54  ;;  %10608 = vmatpush2.bf16.msra.mxu0 %v10285_v2  ;;  %v10918_v46 = vrot.slane %v21659_v24, 1  ;;  %v16595_v54 = vld [vmem:[%s23298_s2 + $0xeb4] ss:$16 sps:$4 sm:$0xff]   ;;  %v16410_v2 = vld [vmem:[%s23298_s2 + $0x5c8] ss:$16 sps:$4 sm:$0xff]  }
 0x6af   :  { %12095 = vmatprep.subr.bf16.mxu0 %v16588_v11 }
 0x6b0   :  { %10932 = vrot.lane.b32.xlu1 %v10918_v46, %s17076_s27  ;;  %v16433_v46 = vld [vmem:[%s23298_s2 + $0x54c] ss:$16 sps:$4 sm:$0xff]  }
 0x6b1   :  { %8276 = vmatpush1.bf16.msra.mxu1 %v16392_v0  ;;  %10610 = vmatmul.mubr.bf16.vlgmr.msra.gmra.mxu0 %v21638_v35 }
 0x6b2   :  { %8277 = vmatprep.subr.bf16.mxu1 %v16400_v61  ;;  %12096 = vmatpush1.bf16.msra.mxu0 %v16586_v59  ;;  %v10910_v61 = vcombine.high %v21383_v57, %v21383_v57  ;;  %v16418_v59 = vld [vmem:[%s23298_s2 + $0x5ac] ss:$16 sps:$4 sm:$0xff]   ;;  %v16416_v57 = vld [vmem:[%s23298_s2 + $0x5a8] ss:$16 sps:$4 sm:$0xff]  }
 0x6b3   :  { %12097 = vmatprep.subr.bf16.mxu0 %v16591_v48  ;;  %v16424_v48 = vld [vmem:[%s23298_s2 + $0x58c] ss:$16 sps:$4 sm:$0xff]  }
 0x6b4   :  { %v6568_v30 = vpop.f32.mrf.mxu1 }
 0x6b5   :  { %v6569_v62 = vadd.f32 %v6568_v30, %v6490_v56  ;;  %8278 = vmatpush1.bf16.msra.mxu1 %v16398_v15  ;;  %v10917_v15 = vrot.slane %v10910_v61, 1  ;;  %v16604_v56 = vld [vmem:[%s23298_s2 + $0xe94] ss:$16 sps:$4 sm:$0xff]   ;;  %v16608_v30 = vld [vmem:[%s23298_s2 + $0xe70] ss:$16 sps:$4 sm:$0xff]  }
 0x6b6   :  { %v14854_v22 = vpop.f32.mrf.mxu1  ;;  %8279 = vmatprep.subr.bf16.mxu1 %v16406_v4  ;;  %12098 = vmatpush1.bf16.msra.mxu0 %v16589_v63  ;;  %v16602_v4 = vld [vmem:[%s23298_s2 + $0xe90] ss:$16 sps:$4 sm:$0xff]   ;;  %v16422_v63 = vld [vmem:[%s23298_s2 + $0x588] ss:$16 sps:$4 sm:$0xff]   ;;  %v16452_v61 = vld [vmem:[%s23298_s2 + $0x9e4] ss:$16 sps:$4 sm:$0xff]  }
 0x6b7   :  { %6575 = vst.msk [vmem:[%s23311_s13] sm:$0x1] %vm6574_vm13, %v6569_v62  ;;  %12099 = vmatprep.subr.bf16.mxu0 %v16595_v54  ;;  %10930 = vrot.lane.b32.xlu1 %v10917_v15, %s17076_s27  ;;  %v16430_v62 = vld [vmem:[%s23298_s2 + $0x56c] ss:$16 sps:$4 sm:$0xff]   ;;  %v16614_v22 = vld [vmem:[%s23298_s2 + $0xe50] ss:$16 sps:$4 sm:$0xff]  }
 0x6b8   :  { %v6571_v0 = vpop.f32.mrf.mxu1  ;;  %v16622_v54 = vld [vmem:[%s23298_s2 + $0xe34] ss:$16 sps:$4 sm:$0xff]   ;;  %v16626_v15 = vld [vmem:[%s23298_s2 + $0xe10] ss:$16 sps:$4 sm:$0xff]  }
 0x6b9   :  { %8280 = vmatpush2.bf16.msra.mxu1 %v16404_v52  ;;  %v16616_v52 = vld [vmem:[%s23298_s2 + $0xe54] ss:$16 sps:$4 sm:$0xff]   ;;  %v16620_v0 = vld [vmem:[%s23298_s2 + $0xe30] ss:$16 sps:$4 sm:$0xff]  }
 0x6ba   :  { %v14855_v11 = vpop.f32.mrf.mxu1  ;;  %8281 = vmatprep.subr.bf16.mxu1 %v16412_v36  ;;  %12100 = vmatpush1.bf16.msra.mxu0 %v16593_v49  ;;  %v16428_v36 = vld [vmem:[%s23298_s2 + $0x568] ss:$16 sps:$4 sm:$0xff]  }
 0x6bb   :  { %12101 = vmatprep.subr.bf16.mxu0 %v16604_v56  ;;  %v16431_v49 = vld [vmem:[%s23298_s2 + $0x548] ss:$16 sps:$4 sm:$0xff]   ;;  %v21739_v11 = vld [vmem:[%s23298_s2 + $0xa04] ss:$16 sps:$4 sm:$0xff]  }
 0x6bc   :  { %v16440_v56 = vld [vmem:[%s23298_s2 + $0x528] ss:$16 sps:$4 sm:$0xff]  }
 0x6bd   :  { %8282 = vmatpush2.bf16.msra.mxu1 %v16410_v2  ;;  %v16442_v2 = vld [vmem:[%s23298_s2 + $0x52c] ss:$16 sps:$4 sm:$0xff]  }
 0x6be   :  { %8283 = vmatprep.subr.bf16.mxu1 %v16418_v59  ;;  %12102 = vmatpush1.bf16.msra.mxu0 %v16602_v4  ;;  %v16628_v59 = vld [vmem:[%s23298_s2 + $0xe14] ss:$16 sps:$4 sm:$0xff]   ;;  %v16448_v4 = vld [vmem:[%s23298_s2 + $0x50c] ss:$16 sps:$4 sm:$0xff]  }
 0x6bf   :  { %12103 = vmatprep.subr.bf16.mxu0 %v16610_v38  ;;  %v9781_v38 = vrot.slane %v16452_v61, 2  ;;  %v16640_v61 = vld [vmem:[%s23298_s2 + $0xfd4] ss:$16 sps:$4 sm:$0xff]  }
 0x6c1   :  { %8284 = vmatpush2.bf16.msra.mxu1 %v16416_v57  ;;  %v16456_v57 = vld [vmem:[%s23298_s2 + $0x9e0] ss:$16 sps:$4 sm:$0xff]  }
 0x6c2   :  { %8285 = vmatprep.subr.bf16.mxu1 %v16424_v48  ;;  %12104 = vmatpush1.bf16.msra.mxu0 %v16608_v30  ;;  %v21759_v48 = vld [vmem:[%s23298_s2 + $0xa00] ss:$16 sps:$4 sm:$0xff]   ;;  %v9789_v30 = vrot.slane %v21739_v11, 2 }
 0x6c3   :  { %12105 = vmatprep.subr.bf16.mxu0 %v16616_v52  ;;  %v16632_v52 = vld [vmem:[%s23298_s2 + $0xff0] ss:$16 sps:$4 sm:$0xff]  }
 0x6c5   :  { %8286 = vmatpush2.bf16.msra.mxu1 %v16422_v63  ;;  %v16461_v63 = vld [vmem:[%s23298_s2 + $0x9c4] ss:$16 sps:$4 sm:$0xff]  }
 0x6c6   :  { %8287 = vmatprep.subr.bf16.mxu1 %v16430_v62  ;;  %12106 = vmatpush1.bf16.msra.mxu0 %v16614_v22  ;;  %v16634_v62 = vld [vmem:[%s23298_s2 + $0xff4] ss:$16 sps:$4 sm:$0xff]   ;;  %v16446_v22 = vld [vmem:[%s23298_s2 + $0x508] ss:$16 sps:$4 sm:$0xff]  }
 0x6c7   :  { %12107 = vmatprep.subr.bf16.mxu0 %v16622_v54  ;;  %v16463_v54 = vld [vmem:[%s23298_s2 + $0x9c0] ss:$16 sps:$4 sm:$0xff]  }
 0x6c9   :  { %8288 = vmatpush2.bf16.msra.mxu1 %v16428_v36  ;;  %v9779_v36 = vrot.slane %v16456_v57, 2 }
 0x6ca   :  { %8289 = vmatprep.subr.bf16.mxu1 %v16433_v46  ;;  %12108 = vmatpush1.bf16.msra.mxu0 %v16620_v0  ;;  %v9787_v46 = vrot.slane %v21759_v48, 2  ;;  %v9790_v0 = vsel %vm3023_vm2, %v9781_v38, %v9789_v30  ;;  %v16562_v48 = vld [vmem:[%s23298_s2 + $0xda4] ss:$16 sps:$4 sm:$0xff]  }
 0x6cb   :  { %12109 = vmatprep.subr.bf16.mxu0 %v16628_v59  ;;  %v16638_v59 = vld [vmem:[%s23298_s2 + $0xfd0] ss:$16 sps:$4 sm:$0xff]  }
 0x6cd   :  { %8290 = vmatpush2.bf16.msra.mxu1 %v16431_v49  ;;  %v9773_v49 = vrot.slane %v16461_v63, 2 }
 0x6ce   :  { %8291 = vmatprep.subr.bf16.mxu1 %v16442_v2  ;;  %12110 = vmatpush1.bf16.msra.mxu0 %v16626_v15  ;;  %v16467_v2 = vld [vmem:[%s23298_s2 + $0x9a4] ss:$16 sps:$4 sm:$0xff]   ;;  %v9788_v15 = vsel %vm3023_vm2, %v9779_v36, %v9787_v46 }
 0x6cf   :  { %12111 = vmatprep.subr.bf16.mxu0 %v16634_v62  ;;  %v9782_v57 = vsel %vm3023_vm2, %v9773_v49, %v9781_v38  ;;  %v9765_v63 = vrot.slane %v16467_v2, 2  ;;  %v16473_v62 = vld [vmem:[%s23298_s2 + $0x984] ss:$16 sps:$4 sm:$0xff]  }
 0x6d1   :  { %8292 = vmatpush2.bf16.msra.mxu1 %v16440_v56  ;;  %v9771_v56 = vrot.slane %v16463_v54, 2  ;;  %v9774_v2 = vsel %vm3023_vm2, %v9765_v63, %v9773_v49 }
 0x6d2   :  { %8293 = vmatprep.subr.bf16.mxu1 %v16448_v4  ;;  %12112 = vmatpush2.bf16.msra.mxu0 %v16632_v52  ;;  %v16469_v4 = vld [vmem:[%s23298_s2 + $0x9a0] ss:$16 sps:$4 sm:$0xff]   ;;  %v16646_v52 = vld [vmem:[%s23298_s2 + $0xfb4] ss:$16 sps:$4 sm:$0xff]  }
 0x6d3   :  { %12113 = vmatprep.subr.bf16.mxu0 %v16640_v61  ;;  %v9780_v38 = vsel %vm3023_vm2, %v9771_v56, %v9779_v36  ;;  %v9763_v54 = vrot.slane %v16469_v4, 2  ;;  %v16479_v61 = vld [vmem:[%s23298_s2 + $0x964] ss:$16 sps:$4 sm:$0xff]   ;;  %v16650_v36 = vld [vmem:[%s23298_s2 + $0xf90] ss:$16 sps:$4 sm:$0xff]  }
 0x6d5   :  { %8294 = vmatpush2.bf16.msra.mxu1 %v16446_v22  ;;  %v16644_v22 = vld [vmem:[%s23298_s2 + $0xfb0] ss:$16 sps:$4 sm:$0xff]  }
 0x6d6   :  { %10331 = vmatprep.subr.bf16.mxu1 %v9790_v0  ;;  %12114 = vmatpush2.bf16.msra.mxu0 %v16638_v59  ;;  %v16475_v0 = vld [vmem:[%s23298_s2 + $0x980] ss:$16 sps:$4 sm:$0xff]   ;;  %v9772_v59 = vsel %vm3023_vm2, %v9763_v54, %v9771_v56 }
 0x6d7   :  { %12115 = vmatprep.subr.bf16.mxu0 %v16646_v52  ;;  %v9755_v49 = vrot.slane %v16475_v0, 2  ;;  %v16658_v52 = vld [vmem:[%s23298_s2 + $0xf74] ss:$16 sps:$4 sm:$0xff]   ;;  %v16656_v56 = vld [vmem:[%s23298_s2 + $0xf70] ss:$16 sps:$4 sm:$0xff]  }
 0x6d8   :  { %8296 = vmatmul.mubr.bf16.vlgmr.msra.gmra.mxu1 %v20451_v41  ;;  %v9757_v41 = vrot.slane %v16473_v62, 2  ;;  %v16485_v62 = vld [vmem:[%s23298_s2 + $0x944] ss:$16 sps:$4 sm:$0xff]  }
 0x6d9   :  { %10332 = vmatpush1.bf16.msra.mxu1 %v9788_v15  ;;  %10363 = vmatprep.mubr.bf16.mxu1 %v21475_v28  ;;  %v16652_v28 = vld [vmem:[%s23298_s2 + $0xf94] ss:$16 sps:$4 sm:$0xff]   ;;  %v16481_v15 = vld [vmem:[%s23298_s2 + $0x960] ss:$16 sps:$4 sm:$0xff]  }
 0x6da   :  { %10333 = vmatprep.subr.bf16.mxu1 %v9782_v57  ;;  %12116 = vmatpush2.bf16.msra.mxu0 %v16644_v22  ;;  %v9766_v4 = vsel %vm3023_vm2, %v9757_v41, %v9765_v63  ;;  %v9749_v57 = vrot.slane %v16479_v61, 2  ;;  %v9764_v22 = vsel %vm3023_vm2, %v9755_v49, %v9763_v54  ;;  %v9747_v63 = vrot.slane %v16481_v15, 2  ;;  %v16494_v61 = vld [vmem:[%s23298_s2 + $0x924] ss:$16 sps:$4 sm:$0xff]   ;;  %v16662_v54 = vld [vmem:[%s23298_s2 + $0xf50] ss:$16 sps:$4 sm:$0xff]  }
 0x6db   :  { %12117 = vmatprep.subr.bf16.mxu0 %v16652_v28  ;;  %v16664_v28 = vld [vmem:[%s23298_s2 + $0xf54] ss:$16 sps:$4 sm:$0xff]  }
 0x6dc   :  { %v9758_v0 = vsel %vm3023_vm2, %v9749_v57, %v9757_v41 }
 0x6dd   :  { %10334 = vmatpush1.bf16.msra.mxu1 %v9780_v38  ;;  %v16487_v38 = vld [vmem:[%s23298_s2 + $0x940] ss:$16 sps:$4 sm:$0xff]  }
 0x6de   :  { %10335 = vmatprep.subr.bf16.mxu1 %v9774_v2  ;;  %12118 = vmatpush2.bf16.msra.mxu0 %v16650_v36  ;;  %v9741_v2 = vrot.slane %v16485_v62, 2  ;;  %v9756_v36 = vsel %vm3023_vm2, %v9747_v63, %v9755_v49  ;;  %v9739_v41 = vrot.slane %v16487_v38, 2  ;;  %v16670_v62 = vld [vmem:[%s23298_s2 + $0xf34] ss:$16 sps:$4 sm:$0xff]  }
 0x6df   :  { %12119 = vmatprep.subr.bf16.mxu0 %v16658_v52  ;;  %v16504_v38 = vld [vmem:[%s23298_s2 + $0xae4] ss:$16 sps:$4 sm:$0xff]  }
 0x6e0   :  { %v9750_v15 = vsel %vm3023_vm2, %v9741_v2, %v9749_v57  ;;  %v9748_v49 = vsel %vm3023_vm2, %v9739_v41, %v9747_v63 }
 0x6e1   :  { %10336 = vmatpush1.bf16.msra.mxu1 %v9772_v59  ;;  %v16496_v59 = vld [vmem:[%s23298_s2 + $0x920] ss:$16 sps:$4 sm:$0xff]  }
 0x6e2   :  { %10337 = vmatprep.subr.bf16.mxu1 %v9766_v4  ;;  %12120 = vmatpush2.bf16.msra.mxu0 %v16656_v56  ;;  %v9733_v4 = vrot.slane %v16494_v61, 2  ;;  %v16668_v56 = vld [vmem:[%s23298_s2 + $0xf30] ss:$16 sps:$4 sm:$0xff]   ;;  %v16676_v61 = vld [vmem:[%s23298_s2 + $0xf14] ss:$16 sps:$4 sm:$0xff]  }
 0x6e3   :  { %12121 = vmatprep.subr.bf16.mxu0 %v16664_v28  ;;  %v16674_v28 = vld [vmem:[%s23298_s2 + $0xf10] ss:$16 sps:$4 sm:$0xff]  }
 0x6e4   :  { %v9742_v57 = vsel %vm3023_vm2, %v9733_v4, %v9741_v2 }
 0x6e5   :  { %10338 = vmatpush1.bf16.msra.mxu1 %v9764_v22  ;;  %v21858_v52 = vpop.permute.xlu0 %10926  ;;  %v9731_v22 = vrot.slane %v16496_v59, 2  ;;  %v9845_v59 = vrot.slane %v16504_v38, 2 }
 0x6e6   :  { %10339 = vmatprep.subr.bf16.mxu1 %v9758_v0  ;;  %12122 = vmatpush2.bf16.msra.mxu0 %v16662_v54  ;;  %v16506_v54 = vld [vmem:[%s23298_s2 + $0xae0] ss:$16 sps:$4 sm:$0xff]  }
 0x6e7   :  { %12123 = vmatprep.subr.bf16.mxu0 %v16670_v62  ;;  %v21868_v0 = vpop.permute.xlu1 %10928  ;;  %v9740_v2 = vsel %vm3023_vm2, %v9731_v22, %v9739_v41  ;;  %v16682_v62 = vld [vmem:[%s23298_s2 + $0x12f4] ss:$16 sps:$4 sm:$0xff]   ;;  %v16680_v41 = vld [vmem:[%s23298_s2 + $0x12f0] ss:$16 sps:$4 sm:$0xff]  }
 0x6e9   :  { %10340 = vmatpush1.bf16.msra.mxu1 %v9756_v36  ;;  %v21876_v63 = vpop.permute.xlu0 %10924  ;;  %v9734_v36 = vsel %vm3023_vm2, %v9725_v29, %v9733_v4  ;;  %v9732_v29 = vsel %vm3023_vm2, %v9723_v12, %v9731_v22  ;;  %v9843_v4 = vrot.slane %v16506_v54, 2  ;;  %v16688_v12 = vld [vmem:[%s23298_s2 + $0x12d4] ss:$16 sps:$4 sm:$0xff]  }
 0x6ea   :  { %10341 = vmatprep.subr.bf16.mxu1 %v9750_v15  ;;  %12124 = vmatpush2.bf16.msra.mxu0 %v16668_v56  ;;  %v16510_v15 = vld [vmem:[%s23298_s2 + $0xac4] ss:$16 sps:$4 sm:$0xff]  }
 0x6eb   :  { %12125 = vmatprep.subr.bf16.mxu0 %v16676_v61  ;;  %v9854_v61 = vsel %vm3023_vm2, %v9845_v59, %v9853_v32 }
 0x6ed   :  { %10342 = vmatpush1.bf16.msra.mxu1 %v9748_v49  ;;  %v10921_v49 = vpop.permute.xlu0 %10920 }
 0x6ee   :  { %10343 = vmatprep.subr.bf16.mxu1 %v9742_v57  ;;  %12126 = vmatpush2.bf16.msra.mxu0 %v16674_v28  ;;  %v16512_v57 = vld [vmem:[%s23298_s2 + $0xac0] ss:$16 sps:$4 sm:$0xff]   ;;  %v9837_v28 = vrot.slane %v16510_v15, 2 }
 0x6ef   :  { %v10923_v56 = vpop.permute.xlu1 %10922  ;;  %12177 = vmatprep.subr.bf16.mxu0 %v16682_v62  ;;  %v9835_v54 = vrot.slane %v16512_v57, 2  ;;  %v9829_v62 = vrot.slane %v16516_v44, 2  ;;  %v16524_v57 = vld [vmem:[%s23298_s2 + $0xa80] ss:$16 sps:$4 sm:$0xff]  }
 0x6f0   :  { %v21896_v53 = vsel %vm6857_vm9, %v10923_v56, %v21876_v63  ;;  %v21905_v38 = vsel %vm6857_vm9, %v10921_v49, %v10923_v56  ;;  %v9846_v15 = vsel %vm3023_vm2, %v9837_v28, %v9845_v59  ;;  %v16522_v56 = vld [vmem:[%s23298_s2 + $0xa84] ss:$16 sps:$4 sm:$0xff]  }
 0x6f1   :  { %10344 = vmatpush1.bf16.msra.mxu1 %v9740_v2  ;;  %12127 = vmatprep.mubr.bf16.mxu0 %v21896_v53  ;;  %v9852_v2 = vsel %vm3023_vm2, %v9843_v4, %v9851_v21  ;;  %v9844_v59 = vsel %vm3023_vm2, %v9835_v54, %v9843_v4  ;;  %v9821_v44 = vrot.slane %v16522_v56, 2  ;;  %v16698_v4 = vld [vmem:[%s23298_s2 + $0x1290] ss:$16 sps:$4 sm:$0xff]  }
 0x6f2   :  { %10345 = vmatprep.subr.bf16.mxu1 %v9734_v36  ;;  %12128 = vmatmul.mubr.bf16.vlgmr.msra.gmra.mxu0 %v21905_v38  ;;  %v16518_v36 = vld [vmem:[%s23298_s2 + $0xaa0] ss:$16 sps:$4 sm:$0xff]  }
 0x6f3   :  { %12178 = vmatpush1.bf16.msra.mxu0 %v16680_v41  ;;  %v16691_v41 = vld [vmem:[%s23298_s2 + $0x12b4] ss:$16 sps:$4 sm:$0xff]  }
 0x6f4   :  { %v21918_v22 = vpop.f32.mrf.mxu1  ;;  %12179 = vmatprep.subr.bf16.mxu0 %v16688_v12  ;;  %v16528_v12 = vld [vmem:[%s23298_s2 + $0xa64] ss:$16 sps:$4 sm:$0xff]  }
 0x6f5   :  { %10346 = vmatpush1.bf16.msra.mxu1 %v9732_v29  ;;  %v9827_v29 = vrot.slane %v16518_v36, 2  ;;  %v16530_v36 = vld [vmem:[%s23298_s2 + $0xa60] ss:$16 sps:$4 sm:$0xff]   ;;  %v9813_v56 = vrot.slane %v16528_v12, 2  ;;  %v16712_v12 = vld [vmem:[%s23298_s2 + $0x1254] ss:$16 sps:$4 sm:$0xff]  }
 0x6f6   :  { %v21923_v32 = vpop.f32.mrf.mxu1  ;;  %10347 = vmatprep.subr.bf16.mxu1 %v9854_v61  ;;  %v9838_v61 = vsel %vm3023_vm2, %v9829_v62, %v9837_v28  ;;  %v9819_v28 = vrot.slane %v16524_v57, 2 }
 0x6f7   :  { %12180 = vmatpush1.bf16.msra.mxu0 %v16686_v25  ;;  %v16700_v25 = vld [vmem:[%s23298_s2 + $0x1294] ss:$16 sps:$4 sm:$0xff]  }
 0x6f8   :  { %v8096_v49 = vpop.f32.mrf.mxu1  ;;  %12181 = vmatprep.subr.bf16.mxu0 %v16691_v41  ;;  %v16531_v41 = vld [vmem:[%s23298_s2 + $0xa44] ss:$16 sps:$4 sm:$0xff]  }
 0x6f9   :  { %10348 = vmatpush2.bf16.msra.mxu1 %v9852_v2  ;;  %v9836_v2 = vsel %vm3023_vm2, %v9827_v29, %v9835_v54  ;;  %v16706_v49 = vld [vmem:[%s23298_s2 + $0x1274] ss:$16 sps:$4 sm:$0xff]   ;;  %v16704_v54 = vld [vmem:[%s23298_s2 + $0x1270] ss:$16 sps:$4 sm:$0xff]   ;;  %v9805_v57 = vrot.slane %v16531_v41, 2 }
 0x6fa   :  { %v8097_v21 = vpop.f32.mrf.mxu1  ;;  %10349 = vmatprep.subr.bf16.mxu1 %v9846_v15  ;;  %v9830_v15 = vsel %vm3023_vm2, %v9821_v44, %v9829_v62  ;;  %v9811_v62 = vrot.slane %v16530_v36, 2  ;;  %v8601_v41 = vld [vmem:[%s23298_s2 + $0xe00] sm:$0xff] }
 0x6fb   :  { %12182 = vmatpush1.bf16.msra.mxu0 %v16689_v27  ;;  %v9828_v27 = vsel %vm3023_vm2, %v9819_v28, %v9827_v29  ;;  %v16533_v21 = vld [vmem:[%s23298_s2 + $0xa40] ss:$16 sps:$4 sm:$0xff]  }
 0x6fc   :  { %12183 = vmatprep.subr.bf16.mxu0 %v16700_v25  ;;  %v16710_v29 = vld [vmem:[%s23298_s2 + $0x1250] ss:$16 sps:$4 sm:$0xff]   ;;  %v9820_v25 = vsel %vm3023_vm2, %v9811_v62, %v9819_v28 }
 0x6fd   :  { %10350 = vmatpush2.bf16.msra.mxu1 %v9844_v59  ;;  %v9822_v59 = vsel %vm3023_vm2, %v9813_v56, %v9821_v44  ;;  %v9803_v44 = vrot.slane %v16533_v21, 2  ;;  %v16716_v28 = vld [vmem:[%s23298_s2 + $0x1230] ss:$16 sps:$4 sm:$0xff]   ;;  %v14373_v21 = vcombine.high %v8601_v41, %v8601_v41 }
 0x6fe   :  { %10351 = vmatprep.subr.bf16.mxu1 %v9838_v61  ;;  %v16539_v61 = vld [vmem:[%s23298_s2 + $0xa24] ss:$16 sps:$4 sm:$0xff]  }
 0x6ff   :  { %12184 = vmatpush1.bf16.msra.mxu0 %v16698_v4  ;;  %v16541_v4 = vld [vmem:[%s23298_s2 + $0xa20] ss:$16 sps:$4 sm:$0xff]   ;;  %v9797_v36 = vrot.slane %v16539_v61, 2 }
 0x700   :  { %12185 = vmatprep.subr.bf16.mxu0 %v16706_v49  ;;  %v9812_v49 = vsel %vm3023_vm2, %v9803_v44, %v9811_v62  ;;  %v16722_v61 = vld [vmem:[%s23298_s2 + $0x1210] ss:$16 sps:$4 sm:$0xff]  }
 0x701   :  { %10352 = vmatpush2.bf16.msra.mxu1 %v9836_v2  ;;  %v9814_v2 = vsel %vm3023_vm2, %v9805_v57, %v9813_v56  ;;  %v9795_v56 = vrot.slane %v16541_v4, 2  ;;  %v22015_v4 = vrot.slane %v14373_v21, 2  ;;  %v16564_v21 = vld [vmem:[%s23298_s2 + $0xda0] ss:$16 sps:$4 sm:$0xff]  }
 0x702   :  { %10353 = vmatprep.subr.bf16.mxu1 %v9830_v15  ;;  %v16718_v15 = vld [vmem:[%s23298_s2 + $0x1234] ss:$16 sps:$4 sm:$0xff]  }
 0x703   :  { %12186 = vmatpush1.bf16.msra.mxu0 %v16704_v54  ;;  %v9806_v54 = vsel %vm3023_vm2, %v9797_v36, %v9805_v57  ;;  %v9804_v62 = vsel %vm3023_vm2, %v9795_v56, %v9803_v44  ;;  %v16551_v57 = vld [vmem:[%s23298_s2 + $0xde0] ss:$16 sps:$4 sm:$0xff]   ;;  %v16730_v44 = vld [vmem:[%s23298_s2 + $0x13f4] ss:$16 sps:$4 sm:$0xff]   ;;  %v9796_v11 = vsel %vm3023_vm2, %v9787_v46, %v9795_v56 }
 0x704   :  { %12187 = vmatprep.subr.bf16.mxu0 %v16712_v12  ;;  %v14372_v12 = vcombine.low %v8601_v41, %v8601_v41  ;;  %v16558_v41 = vld [vmem:[%s23298_s2 + $0xdc0] ss:$16 sps:$4 sm:$0xff]   ;;  %v16736_v46 = vld [vmem:[%s23298_s2 + $0x13d4] ss:$16 sps:$4 sm:$0xff]  }
 0x705   :  { %10354 = vmatpush2.bf16.msra.mxu1 %v9828_v27  ;;  %v16548_v27 = vld [vmem:[%s23298_s2 + $0xde4] ss:$16 sps:$4 sm:$0xff]   ;;  %v16734_v56 = vld [vmem:[%s23298_s2 + $0x13d0] ss:$16 sps:$4 sm:$0xff]  }
 0x706   :  { %10355 = vmatprep.subr.bf16.mxu1 %v9822_v59  ;;  %v16724_v59 = vld [vmem:[%s23298_s2 + $0x1214] ss:$16 sps:$4 sm:$0xff]  }
 0x707   :  { %12188 = vmatpush1.bf16.msra.mxu0 %v16710_v29  ;;  %v9798_v29 = vsel %vm3023_vm2, %v9789_v30, %v9797_v36  ;;  %v10035_v30 = vrot.slane %v16551_v57, 2  ;;  %v22029_v36 = vrot.slane %v14372_v12, 2  ;;  %v16737_v12 = vld [vmem:[%s23298_s2 + $0x13b0] ss:$16 sps:$4 sm:$0xff]  }
 0x708   :  { %12189 = vmatprep.subr.bf16.mxu0 %v16718_v15  ;;  %v16728_v15 = vld [vmem:[%s23298_s2 + $0x13f0] ss:$16 sps:$4 sm:$0xff]  }
 0x709   :  { %10356 = vmatpush2.bf16.msra.mxu1 %v9820_v25  ;;  %v10037_v25 = vrot.slane %v16548_v27, 2  ;;  %v10027_v27 = vrot.slane %v16558_v41, 2 }
 0x70a   :  { %10357 = vmatprep.subr.bf16.mxu1 %v9814_v2  ;;  %v16556_v2 = vld [vmem:[%s23298_s2 + $0xdc4] ss:$16 sps:$4 sm:$0xff]  }
 0x70b   :  { %12190 = vmatpush1.bf16.msra.mxu0 %v16716_v28  ;;  %v8093_v28 = vadd.f32 %v21918_v22, %v21239_v26  ;;  %v8095_v26 = vadd.f32 %v21923_v32, %v21254_v19  ;;  %v10044_v22 = vsel %vm3023_vm2, %v10035_v30, %v22029_v36  ;;  %v16568_v19 = vld [vmem:[%s23298_s2 + $0xd84] ss:$16 sps:$4 sm:$0xff]  }
 0x70c   :  { %12191 = vmatprep.subr.bf16.mxu0 %v16724_v59  ;;  %v16739_v32 = vld [vmem:[%s23298_s2 + $0x13b4] ss:$16 sps:$4 sm:$0xff]   ;;  %v10013_v41 = vrot.slane %v16568_v19, 2  ;;  %v16582_v19 = vld [vmem:[%s23298_s2 + $0xd40] ss:$16 sps:$4 sm:$0xff]  }
 0x70d   :  { %10358 = vmatpush2.bf16.msra.mxu1 %v9812_v49  ;;  %v10046_v49 = vsel %vm3023_vm2, %v10037_v25, %v22015_v4  ;;  %v8134_v59 = vadd.f32 %v21277_v9, %v8093_v28  ;;  %v16743_v28 = vld [vmem:[%s23298_s2 + $0x1390] ss:$16 sps:$4 sm:$0xff]  }
 0x70e   :  { %10359 = vmatprep.subr.bf16.mxu1 %v9806_v54  ;;  %v10029_v54 = vrot.slane %v16556_v2, 2  ;;  %v10036_v2 = vsel %vm3023_vm2, %v10027_v27, %v10035_v30 }
 0x70f   :  { %12192 = vmatpush1.bf16.msra.mxu0 %v16722_v61 }
 0x710   :  { %12193 = vmatprep.subr.bf16.mxu0 %v16730_v44  ;;  %v10038_v61 = vsel %vm3023_vm2, %v10029_v54, %v10037_v25  ;;  %v10019_v44 = vrot.slane %v16564_v21, 2  ;;  %v16580_v21 = vld [vmem:[%s23298_s2 + $0xd44] ss:$16 sps:$4 sm:$0xff]  }
 0x711   :  { %10360 = vmatpush2.bf16.msra.mxu1 %v9804_v62  ;;  %v10021_v62 = vrot.slane %v16562_v48, 2 }
 0x712   :  { %10361 = vmatprep.subr.bf16.mxu1 %v9798_v29  ;;  %v8136_v29 = vadd.f32 %v21288_v40, %v8095_v26  ;;  %v16574_v40 = vld [vmem:[%s23298_s2 + $0xd64] ss:$16 sps:$4 sm:$0xff]   ;;  %v10028_v48 = vsel %vm3023_vm2, %v10019_v44, %v10027_v27  ;;  %v16749_v27 = vld [vmem:[%s23298_s2 + $0x1370] ss:$16 sps:$4 sm:$0xff]  }
 0x713   :  { %12194 = vmatpush2.bf16.msra.mxu0 %v16728_v15  ;;  %v10022_v26 = vsel %vm3023_vm2, %v10013_v41, %v10021_v62 }
 0x714   :  { %12195 = vmatprep.subr.bf16.mxu0 %v16736_v46 }
 0x715   :  { %10362 = vmatpush2.bf16.msra.mxu1 %v9796_v11  ;;  %v10030_v11 = vsel %vm3023_vm2, %v10021_v62, %v10029_v54 }
 0x716   :  { %10413 = vmatprep.subr.bf16.mxu1 %v10046_v49 }
 0x717   :  { %12196 = vmatpush2.bf16.msra.mxu0 %v16734_v56  ;;  %v16576_v56 = vld [vmem:[%s23298_s2 + $0xd60] ss:$16 sps:$4 sm:$0xff]  }
 0x718   :  { %v8174_v57 = vpop.f32.mrf.mxu1  ;;  %10364 = vmatmul.mubr.bf16.vlgmr.msra.gmra.mxu1 %v21485_v17  ;;  %v16570_v17 = vld [vmem:[%s23298_s2 + $0xd80] ss:$16 sps:$4 sm:$0xff]   ;;  %12197 = vmatprep.subr.bf16.mxu0 %v16739_v32  ;;  %v10003_v62 = vrot.slane %v16576_v56, 2  ;;  %v16769_v56 = vld [vmem:[%s23298_s2 + $0x1314] ss:$16 sps:$4 sm:$0xff]  }
 0x719   :  { %v22066_v9 = vadd.f32 %v8174_v57, %v8134_v59  ;;  %10414 = vmatpush1.bf16.msra.mxu1 %v10044_v22  ;;  %14377 = vmatprep.mubr.msk.bf16.mxu1 %vm1447_vm0, %v21625_v13  ;;  %v16745_v13 = vld [vmem:[%s23298_s2 + $0x1394] ss:$16 sps:$4 sm:$0xff]   ;;  %v10011_v46 = vrot.slane %v16570_v17, 2  ;;  %v10005_v22 = vrot.slane %v16574_v40, 2  ;;  %v9997_v57 = vrot.slane %v16580_v21, 2 }
 0x71a   :  { %v8176_v25 = vpop.f32.mrf.mxu1  ;;  %10415 = vmatprep.subr.bf16.mxu1 %v10038_v61  ;;  %v16751_v59 = vld [vmem:[%s23298_s2 + $0x1374] ss:$16 sps:$4 sm:$0xff]  }
 0x71b   :  { %v22075_v15 = vadd.f32 %v8176_v25, %v8136_v29  ;;  %12198 = vmatpush2.bf16.msra.mxu0 %v16737_v12  ;;  %v10020_v61 = vsel %vm3023_vm2, %v10011_v46, %v10019_v44  ;;  %v10014_v32 = vsel %vm3023_vm2, %v10005_v22, %v10013_v41  ;;  %v16583_v12 = vld [vmem:[%s23298_s2 + $0xd24] ss:$16 sps:$4 sm:$0xff]   ;;  %v10911_v25 = vcombine.high %v21659_v24, %v21659_v24  ;;  %v16585_v41 = vld [vmem:[%s23298_s2 + $0xd20] ss:$16 sps:$4 sm:$0xff]  }
 0x71c   :  { %v8178_v30 = vpop.f32.mrf.mxu1  ;;  %12199 = vmatprep.subr.bf16.mxu0 %v16745_v13  ;;  %v16757_v29 = vld [vmem:[%s23298_s2 + $0x1354] ss:$16 sps:$4 sm:$0xff]   ;;  %v10012_v17 = vsel %vm3023_vm2, %v10003_v62, %v10011_v46  ;;  %v10006_v40 = vsel %vm3023_vm2, %v9997_v57, %v10005_v22  ;;  %v9989_v13 = vrot.slane %v16583_v12, 2  ;;  %v22177_v12 = vld [vmem:[%s23298_s2 + $0x808] ss:$16 sps:$4 sm:$0xff]  }
 0x71d   :  { %v8349_v49 = vcombine.low %v22066_v9, %v22075_v15  ;;  %10416 = vmatpush1.bf16.msra.mxu1 %v10036_v2  ;;  %v16755_v2 = vld [vmem:[%s23298_s2 + $0x1350] ss:$16 sps:$4 sm:$0xff]   ;;  %v10919_v44 = vrot.slane %v10911_v25, 1  ;;  %v16763_v24 = vld [vmem:[%s23298_s2 + $0x1334] ss:$16 sps:$4 sm:$0xff]  }
 0x71e   :  { %v8179_v54 = vpop.f32.mrf.mxu1  ;;  %10417 = vmatprep.subr.bf16.mxu1 %v10030_v11  ;;  %v9995_v11 = vrot.slane %v16582_v19, 2  ;;  %v16761_v30 = vld [vmem:[%s23298_s2 + $0x1330] ss:$16 sps:$4 sm:$0xff]   ;;  %v9990_v21 = vsel %vm3023_vm2, %v9981_v23, %v9989_v13  ;;  %v16773_v19 = vld [vmem:[%s23298_s2 + $0x10f8] ss:$16 sps:$4 sm:$0xff]  }
 0x71f   :  { %12200 = vmatpush2.bf16.msra.mxu0 %v16743_v28  ;;  %10934 = vrot.lane.b32.xlu0 %v10919_v44, %s17076_s27  ;;  %v9987_v54 = vrot.slane %v16585_v41, 2  ;;  %v10279_v44 = vsel %vm1451_vm1, %v22029_v36, 0  ;;  %v16607_v41 = vld [vmem:[%s23298_s2 + $0x7c8] ss:$16 sps:$4 sm:$0xff]   ;;  %v16770_v15 = vld [vmem:[%s23298_s2 + $0xc4c] ss:$16 sps:$4 sm:$0xff]  }
 0x720   :  { %12201 = vmatprep.subr.bf16.mxu0 %v16751_v59  ;;  %v10004_v28 = vsel %vm3023_vm2, %v9995_v11, %v10003_v62  ;;  %v16596_v59 = vld [vmem:[%s23298_s2 + $0x7ec] ss:$16 sps:$4 sm:$0xff]   ;;  %v16782_v36 = vld [vmem:[%s23298_s2 + $0x10b8] ss:$16 sps:$4 sm:$0xff]  }
 0x721   :  { %10418 = vmatpush1.bf16.msra.mxu1 %v10028_v48  ;;  %v9998_v48 = vsel %vm3023_vm2, %v9989_v13, %v9997_v57  ;;  %v9996_v22 = vsel %vm3023_vm2, %v9987_v54, %v9995_v11  ;;  %v16775_v62 = vld [vmem:[%s23298_s2 + $0x10fc] ss:$16 sps:$4 sm:$0xff]   ;;  %v16600_v57 = vld [vmem:[%s23298_s2 + $0x7e8] ss:$16 sps:$4 sm:$0xff]   ;;  %v9663_v11 = vrot.slane %v22177_v12, 2 }
 0x722   :  { %10419 = vmatprep.subr.bf16.mxu1 %v10022_v26  ;;  %v22133_v46 = vpop.permute.xlu1 %10932  ;;  %v16767_v26 = vld [vmem:[%s23298_s2 + $0x1310] ss:$16 sps:$4 sm:$0xff]  }
 0x723   :  { %12202 = vmatpush2.bf16.msra.mxu0 %v16749_v27  ;;  %v22151_v27 = vld [vmem:[%s23298_s2 + $0x80c] ss:$16 sps:$4 sm:$0xff]  }
 0x724   :  { %12203 = vmatprep.subr.bf16.mxu0 %v16757_v29  ;;  %v9657_v29 = vrot.slane %v16596_v59, 2  ;;  %v9665_v25 = vrot.slane %v22151_v27, 2  ;;  %v16788_v59 = vld [vmem:[%s23298_s2 + $0x1098] ss:$16 sps:$4 sm:$0xff]   ;;  %v16871_v27 = vld [vmem:[%s23298_s2 + $0x14fc] ss:$16 sps:$4 sm:$0xff]  }
 0x725   :  { %10420 = vmatpush1.bf16.msra.mxu1 %v10020_v61 }
 0x726   :  { %10421 = vmatprep.subr.bf16.mxu1 %v10014_v32  ;;  %v9988_v32 = vsel %vm3023_vm2, %v9979_v8, %v9987_v54  ;;  %v16779_v8 = vld [vmem:[%s23298_s2 + $0x10d8] ss:$16 sps:$4 sm:$0xff]  }
 0x727   :  { %12204 = vmatpush2.bf16.msra.mxu0 %v16755_v2  ;;  %v16605_v2 = vld [vmem:[%s23298_s2 + $0x7cc] ss:$16 sps:$4 sm:$0xff]   ;;  %v16613_v54 = vld [vmem:[%s23298_s2 + $0x7a8] ss:$16 sps:$4 sm:$0xff]  }
 0x728   :  { %12205 = vmatprep.subr.bf16.mxu0 %v16763_v24  ;;  %v9649_v13 = vrot.slane %v16605_v2, 2  ;;  %v16611_v24 = vld [vmem:[%s23298_s2 + $0x7ac] ss:$16 sps:$4 sm:$0xff]  }
 0x729   :  { %10422 = vmatpush1.bf16.msra.mxu1 %v10012_v17  ;;  %v10931_v61 = vpop.permute.xlu1 %10930  ;;  %v9655_v17 = vrot.slane %v16600_v57, 2 }
 0x72a   :  { %10423 = vmatprep.subr.bf16.mxu1 %v10006_v40  ;;  %v22158_v20 = vsel %vm6857_vm9, %v21868_v0, %v10931_v61  ;;  %v22162_v23 = vsel %vm6857_vm9, %v10931_v61, %v22133_v46  ;;  %v9666_v40 = vsel %vm3023_vm2, %v9657_v29, %v9665_v25 }
 0x72b   :  { %12206 = vmatpush2.bf16.msra.mxu0 %v16761_v30  ;;  %12209 = vmatprep.mubr.bf16.mxu0 %v22162_v23  ;;  %v9664_v30 = vsel %vm3023_vm2, %v9655_v17, %v9663_v11 }
 0x72c   :  { %12207 = vmatprep.subr.bf16.mxu0 %v16769_v56  ;;  %v9641_v56 = vrot.slane %v16611_v24, 2  ;;  %v16629_v24 = vld [vmem:[%s23298_s2 + $0x74c] ss:$16 sps:$4 sm:$0xff]  }
 0x72d   :  { %10424 = vmatpush1.bf16.msra.mxu1 %v10004_v28  ;;  %v9647_v28 = vrot.slane %v16607_v41, 2 }
 0x72e   :  { %10425 = vmatprep.subr.bf16.mxu1 %v9998_v48  ;;  %v9658_v48 = vsel %vm3023_vm2, %v9649_v13, %v9657_v29  ;;  %v16623_v29 = vld [vmem:[%s23298_s2 + $0x76c] ss:$16 sps:$4 sm:$0xff]  }
 0x72f   :  { %12208 = vmatpush2.bf16.msra.mxu0 %v16767_v26  ;;  %v16617_v26 = vld [vmem:[%s23298_s2 + $0x78c] ss:$16 sps:$4 sm:$0xff]   ;;  %v9656_v61 = vsel %vm3023_vm2, %v9647_v28, %v9655_v17  ;;  %v16625_v17 = vld [vmem:[%s23298_s2 + $0x768] ss:$16 sps:$4 sm:$0xff]  }
 0x730   :  { %12300 = vmatprep.subr.bf16.mxu0 %v16775_v62  ;;  %v9639_v62 = vrot.slane %v16613_v54, 2  ;;  %v9633_v57 = vrot.slane %v16617_v26, 2  ;;  %v9623_v54 = vrot.slane %v16625_v17, 2  ;;  %v16814_v17 = vld [vmem:[%s23298_s2 + $0x101c] ss:$16 sps:$4 sm:$0xff]  }
 0x731   :  { %10426 = vmatpush1.bf16.msra.mxu1 %v9996_v22  ;;  %v16790_v22 = vld [vmem:[%s23298_s2 + $0x109c] ss:$16 sps:$4 sm:$0xff]  }
 0x732   :  { %10427 = vmatprep.subr.bf16.mxu1 %v9990_v21  ;;  %12210 = vmatmul.mubr.bf16.vlgmr.msra.gmra.mxu0 %v22158_v20  ;;  %v22224_v21 = vpop.f32.mrf.mxu0 }
 0x733   :  { %12301 = vmatpush1.bf16.msra.mxu0 %v16773_v19  ;;  %v16619_v19 = vld [vmem:[%s23298_s2 + $0x788] ss:$16 sps:$4 sm:$0xff]  }
 0x734   :  { %12302 = vmatprep.subr.bf16.mxu0 %v16781_v16  ;;  %v16794_v16 = vld [vmem:[%s23298_s2 + $0x1078] ss:$16 sps:$4 sm:$0xff]  }
 0x735   :  { %10428 = vmatpush1.bf16.msra.mxu1 %v9988_v32  ;;  %v9650_v32 = vsel %vm3023_vm2, %v9641_v56, %v9649_v13  ;;  %v9625_v13 = vrot.slane %v16623_v29, 2  ;;  %v16637_v29 = vld [vmem:[%s23298_s2 + $0x728] ss:$16 sps:$4 sm:$0xff]  }
 0x736   :  { %14376 = vmatprep.subr.msk.bf16.mxu1 %vm1451_vm1, %v22015_v4  ;;  %v16784_v4 = vld [vmem:[%s23298_s2 + $0x10bc] ss:$16 sps:$4 sm:$0xff]  }
 0x737   :  { %12303 = vmatpush1.bf16.msra.mxu0 %v16779_v8  ;;  %v9648_v8 = vsel %vm3023_vm2, %v9639_v62, %v9647_v28  ;;  %v9634_v26 = vsel %vm3023_vm2, %v9625_v13, %v9633_v57 }
 0x738   :  { %12304 = vmatprep.subr.bf16.mxu0 %v16784_v4  ;;  %v16802_v4 = vld [vmem:[%s23298_s2 + $0x105c] ss:$16 sps:$4 sm:$0xff]  }
 0x739   :  { %10444 = vmatpush2.bf16.msra.mxu1 %v10279_v44  ;;  %v9631_v44 = vrot.slane %v16619_v19, 2  ;;  %v16806_v19 = vld [vmem:[%s23298_s2 + $0x1038] ss:$16 sps:$4 sm:$0xff]  }
 0x73a   :  { %10454 = vmatprep.subr.bf16.mxu1 %v9666_v40  ;;  %v9642_v40 = vsel %vm3023_vm2, %v9633_v57, %v9641_v56 }
 0x73b   :  { %12305 = vmatpush1.bf16.msra.mxu0 %v16782_v36  ;;  %v9640_v28 = vsel %vm3023_vm2, %v9631_v44, %v9639_v62 }
 0x73c   :  { %10446 = vmatmul.mubr.bf16.vlgmr.msra.gmra.mxu1 %v21638_v35  ;;  %12306 = vmatprep.subr.bf16.mxu0 %v16790_v22  ;;  %v22234_v35 = vpop.f32.mrf.mxu0  ;;  %v9617_v22 = vrot.slane %v16629_v24, 2 }
 0x73d   :  { %10455 = vmatpush1.bf16.msra.mxu1 %v9664_v30  ;;  %10486 = vmatprep.mubr.bf16.mxu1 %v20894_v10  ;;  %v16796_v10 = vld [vmem:[%s23298_s2 + $0x107c] ss:$16 sps:$4 sm:$0xff]   ;;  %v16800_v30 = vld [vmem:[%s23298_s2 + $0x1058] ss:$16 sps:$4 sm:$0xff]  }
 0x73e   :  { %10456 = vmatprep.subr.bf16.mxu1 %v9658_v48  ;;  %v10328_v2 = vpop.f32.mrf.mxu0  ;;  %v16631_v48 = vld [vmem:[%s23298_s2 + $0x748] ss:$16 sps:$4 sm:$0xff]  }
 0x73f   :  { %12307 = vmatpush1.bf16.msra.mxu0 %v16788_v59  ;;  %v16635_v59 = vld [vmem:[%s23298_s2 + $0x72c] ss:$16 sps:$4 sm:$0xff]   ;;  %v9615_v57 = vrot.slane %v16631_v48, 2  ;;  %v9626_v2 = vsel %vm3023_vm2, %v9617_v22, %v9625_v13  ;;  %v16643_v13 = vld [vmem:[%s23298_s2 + $0x708] ss:$16 sps:$4 sm:$0xfc]  }
 0x740   :  { %12308 = vmatprep.subr.bf16.mxu0 %v16796_v10  ;;  %v10329_v41 = vpop.f32.mrf.mxu0  ;;  %v16820_v48 = vld [vmem:[%s23298_s2 + $0x11fc] ss:$16 sps:$4 sm:$0xff]  }
 0x741   :  { %10457 = vmatpush1.bf16.msra.mxu1 %v9656_v61  ;;  %v16808_v61 = vld [vmem:[%s23298_s2 + $0x103c] ss:$16 sps:$4 sm:$0xff]   ;;  %v9624_v41 = vsel %vm3023_vm2, %v9615_v57, %v9623_v54 }
 0x742   :  { %10458 = vmatprep.subr.bf16.mxu1 %v9650_v32  ;;  %v22257_v36 = vpop.f32.mrf.mxu0  ;;  %v9632_v32 = vsel %vm3023_vm2, %v9623_v54, %v9631_v44  ;;  %v16812_v44 = vld [vmem:[%s23298_s2 + $0x1018] ss:$16 sps:$4 sm:$0xff]  }
 0x743   :  { %12309 = vmatpush1.bf16.msra.mxu0 %v16794_v16  ;;  %v9609_v16 = vrot.slane %v16635_v59, 2  ;;  %v16818_v54 = vld [vmem:[%s23298_s2 + $0x11f8] ss:$16 sps:$4 sm:$0xff]   ;;  %v9605_v59 = vrot.slane %v16643_v13, 2  ;;  %v16659_v13 = vld [vmem:[%s23298_s2 + $0x8ac] ss:$16 sps:$4 sm:$0xff]  }
 0x744   :  { %12310 = vmatprep.subr.bf16.mxu0 %v16802_v4  ;;  %v22266_v56 = vpop.f32.mrf.mxu0 }
 0x745   :  { %10459 = vmatpush1.bf16.msra.mxu1 %v9648_v8  ;;  %v16641_v8 = vld [vmem:[%s23298_s2 + $0x70c] ss:$16 sps:$4 sm:$0xfc]   ;;  %v9618_v24 = vsel %vm3023_vm2, %v9609_v16, %v9617_v22 }
 0x746   :  { %10460 = vmatprep.subr.bf16.mxu1 %v9642_v40  ;;  %v10410_v62 = vpop.f32.mrf.mxu0  ;;  %v9606_v40 = vrot.slane %v16637_v29, 2  ;;  %v9608_v4 = vrot.slane %v16641_v8, 2 }
 0x747   :  { %12311 = vmatpush1.bf16.msra.mxu0 %v16800_v30  ;;  %v16647_v30 = vld [vmem:[%s23298_s2 + $0x8ec] ss:$16 sps:$4 sm:$0xff]  }
 0x748   :  { %12312 = vmatprep.subr.bf16.mxu0 %v16808_v61  ;;  %v10411_v10 = vpop.f32.mrf.mxu0  ;;  %v9616_v22 = vsel %vm3023_vm2, %v9606_v40, %v9615_v57  ;;  %v16649_v61 = vld [vmem:[%s23298_s2 + $0x8e8] ss:$16 sps:$4 sm:$0xff]   ;;  %v9610_v62 = vsel %vm3023_vm2, %v9608_v4, %v9609_v16  ;;  %v9607_v16 = vsel %vm3023_vm2, %v9605_v59, %v9606_v40  ;;  %v16665_v59 = vld [vmem:[%s23298_s2 + $0x88c] ss:$16 sps:$4 sm:$0xff]  }
 0x749   :  { %10461 = vmatpush1.bf16.msra.mxu1 %v9640_v28  ;;  %v16826_v10 = vld [vmem:[%s23298_s2 + $0x11dc] ss:$16 sps:$4 sm:$0xff]   ;;  %v16824_v57 = vld [vmem:[%s23298_s2 + $0x11d8] ss:$16 sps:$4 sm:$0xff]   ;;  %v9719_v8 = vrot.slane %v16649_v61, 2 }
 0x74a   :  { %10462 = vmatprep.subr.bf16.mxu1 %v9634_v26  ;;  %v16830_v40 = vld [vmem:[%s23298_s2 + $0x11b8] ss:$16 sps:$4 sm:$0xff]   ;;  %v16838_v61 = vld [vmem:[%s23298_s2 + $0x119c] ss:$16 sps:$4 sm:$0xff]  }
 0x74b   :  { %12313 = vmatpush1.bf16.msra.mxu0 %v16806_v19  ;;  %v9721_v19 = vrot.slane %v16647_v30, 2 }
 0x74c   :  { %12314 = vmatprep.subr.bf16.mxu0 %v16814_v17  ;;  %v16655_v17 = vld [vmem:[%s23298_s2 + $0x8c8] ss:$16 sps:$4 sm:$0xff]  }
 0x74d   :  { %10463 = vmatpush1.bf16.msra.mxu1 %v9632_v32  ;;  %v22300_v28 = vpop.f32.mrf.mxu0  ;;  %v16653_v32 = vld [vmem:[%s23298_s2 + $0x8cc] ss:$16 sps:$4 sm:$0xff]   ;;  %v9711_v30 = vrot.slane %v16655_v17, 2 }
 0x74e   :  { %10464 = vmatprep.subr.bf16.mxu1 %v9626_v2 }
 0x74f   :  { %12315 = vmatpush1.bf16.msra.mxu0 %v16812_v44  ;;  %v22308_v26 = vpop.f32.mrf.mxu0  ;;  %v9730_v44 = vsel %vm3023_vm2, %v9721_v19, %v9729_v50  ;;  %v9728_v50 = vsel %vm3023_vm2, %v9719_v8, %v9727_v3 }
 0x750   :  { %12316 = vmatprep.subr.bf16.mxu0 %v16820_v48  ;;  %v16661_v48 = vld [vmem:[%s23298_s2 + $0x8a8] ss:$16 sps:$4 sm:$0xff]  }
 0x751   :  { %10465 = vmatpush1.bf16.msra.mxu1 %v9624_v41  ;;  %v10533_v29 = vpop.f32.mrf.mxu0  ;;  %v9713_v41 = vrot.slane %v16653_v32, 2  ;;  %v9703_v32 = vrot.slane %v16661_v48, 2 }
 0x752   :  { %10466 = vmatprep.subr.bf16.mxu1 %v9618_v24  ;;  %v16832_v24 = vld [vmem:[%s23298_s2 + $0x11bc] ss:$16 sps:$4 sm:$0xff]   ;;  %v16667_v29 = vld [vmem:[%s23298_s2 + $0x888] ss:$16 sps:$4 sm:$0xff]  }
 0x753   :  { %12317 = vmatpush2.bf16.msra.mxu0 %v16818_v54  ;;  %v10534_v2 = vpop.f32.mrf.mxu0  ;;  %v9722_v54 = vsel %vm3023_vm2, %v9713_v41, %v9721_v19  ;;  %v9720_v19 = vsel %vm3023_vm2, %v9711_v30, %v9719_v8  ;;  %v16842_v8 = vld [vmem:[%s23298_s2 + $0x1178] ss:$16 sps:$4 sm:$0xff]   ;;  %v9712_v17 = vsel %vm3023_vm2, %v9703_v32, %v9711_v30 }
 0x754   :  { %12318 = vmatprep.subr.bf16.mxu0 %v16826_v10  ;;  %v16671_v2 = vld [vmem:[%s23298_s2 + $0x86c] ss:$16 sps:$4 sm:$0xff]   ;;  %v16848_v30 = vld [vmem:[%s23298_s2 + $0x1158] ss:$16 sps:$4 sm:$0xff]  }
 0x755   :  { %10467 = vmatpush1.bf16.msra.mxu1 %v9616_v22  ;;  %v9705_v22 = vrot.slane %v16659_v13, 2 }
 0x756   :  { %10468 = vmatprep.subr.bf16.mxu1 %v9610_v62 }
 0x757   :  { %12319 = vmatpush2.bf16.msra.mxu0 %v16824_v57  ;;  %v9714_v10 = vsel %vm3023_vm2, %v9705_v22, %v9713_v41  ;;  %v9697_v57 = vrot.slane %v16665_v59, 2  ;;  %v16673_v41 = vld [vmem:[%s23298_s2 + $0x868] ss:$16 sps:$4 sm:$0xff]  }
 0x758   :  { %v22337_v4 = vpop.f32.mrf.mxu1  ;;  %12320 = vmatprep.subr.bf16.mxu0 %v16832_v24  ;;  %v9689_v24 = vrot.slane %v16671_v2, 2  ;;  %v16862_v2 = vld [vmem:[%s23298_s2 + $0x111c] ss:$16 sps:$4 sm:$0xff]  }
 0x759   :  { %10469 = vmatpush1.bf16.msra.mxu1 %v9607_v16  ;;  %v16844_v16 = vld [vmem:[%s23298_s2 + $0x117c] ss:$16 sps:$4 sm:$0xff]   ;;  %v9706_v13 = vsel %vm3023_vm2, %v9697_v57, %v9705_v22  ;;  %v16679_v22 = vld [vmem:[%s23298_s2 + $0x848] ss:$16 sps:$4 sm:$0xff]  }
 0x75a   :  { %v22342_v33 = vpop.f32.mrf.mxu1  ;;  %10470 = vmatprep.subr.bf16.mxu1 %v9730_v44  ;;  %v9695_v44 = vrot.slane %v16667_v29, 2  ;;  %v9698_v59 = vsel %vm3023_vm2, %v9689_v24, %v9697_v57  ;;  %v16685_v29 = vld [vmem:[%s23298_s2 + $0x828] ss:$16 sps:$4 sm:$0xff]  }
 0x75b   :  { %12321 = vmatpush2.bf16.msra.mxu0 %v16830_v40  ;;  %v16677_v40 = vld [vmem:[%s23298_s2 + $0x84c] ss:$16 sps:$4 sm:$0xff]  }
 0x75c   :  { %v8219_v62 = vpop.f32.mrf.mxu1  ;;  %12322 = vmatprep.subr.bf16.mxu0 %v16838_v61  ;;  %v9704_v48 = vsel %vm3023_vm2, %v9695_v44, %v9703_v32  ;;  %v9681_v61 = vrot.slane %v16677_v40, 2  ;;  %v9679_v32 = vrot.slane %v16679_v22, 2  ;;  %v22432_v40 = vsel %vm6857_vm9, %v21876_v63, %v21858_v52 }
 0x75d   :  { %10471 = vmatpush2.bf16.msra.mxu1 %v9728_v50  ;;  %v16850_v50 = vld [vmem:[%s23298_s2 + $0x115c] ss:$16 sps:$4 sm:$0xff]  }
 0x75e   :  { %v8220_v3 = vpop.f32.mrf.mxu1  ;;  %10472 = vmatprep.subr.bf16.mxu1 %v9722_v54  ;;  %v9687_v54 = vrot.slane %v16673_v41, 2  ;;  %v16683_v62 = vld [vmem:[%s23298_s2 + $0x82c] ss:$16 sps:$4 sm:$0xff]  }
 0x75f   :  { %12323 = vmatpush2.bf16.msra.mxu0 %v16836_v39  ;;  %v16856_v39 = vld [vmem:[%s23298_s2 + $0x113c] ss:$16 sps:$4 sm:$0xff]   ;;  %v16854_v3 = vld [vmem:[%s23298_s2 + $0x1138] ss:$16 sps:$4 sm:$0xff]   ;;  %v9673_v57 = vrot.slane %v16683_v62, 2 }
 0x760   :  { %12324 = vmatprep.subr.bf16.mxu0 %v16844_v16  ;;  %v16860_v16 = vld [vmem:[%s23298_s2 + $0x1118] ss:$16 sps:$4 sm:$0xff]  }
 0x761   :  { %10473 = vmatpush2.bf16.msra.mxu1 %v9720_v19  ;;  %v9696_v19 = vsel %vm3023_vm2, %v9687_v54, %v9695_v44  ;;  %v22417_v44 = vsel %vm6857_vm9, %v21858_v52, %v21868_v0  ;;  %v9682_v41 = vsel %vm3023_vm2, %v9673_v57, %v9681_v61 }
 0x762   :  { %10474 = vmatprep.subr.bf16.mxu1 %v9714_v10  ;;  %v9690_v10 = vsel %vm3023_vm2, %v9681_v61, %v9689_v24  ;;  %v22426_v24 = vld [vmem:[%s23298_s2 + $0xc0c] ss:$16 sps:$4 sm:$0xff]   ;;  %12332 = vmatprep.mubr.bf16.mxu0 %v22417_v44 }
 0x763   :  { %12325 = vmatpush2.bf16.msra.mxu0 %v16842_v8  ;;  %v9688_v8 = vsel %vm3023_vm2, %v9679_v32, %v9687_v54  ;;  %v9921_v63 = vrot.slane %v22426_v24, 2  ;;  %v16701_v54 = vld [vmem:[%s23298_s2 + $0xbcc] ss:$16 sps:$4 sm:$0xff]   ;;  %v16793_v24 = vld [vmem:[%s23298_s2 + $0x10d4] ss:$16 sps:$4 sm:$0xff]  }
 0x764   :  { %12326 = vmatprep.subr.bf16.mxu0 %v16850_v50  ;;  %v16696_v50 = vld [vmem:[%s23298_s2 + $0xbe8] ss:$16 sps:$4 sm:$0xff]  }
 0x765   :  { %10475 = vmatpush2.bf16.msra.mxu1 %v9712_v17  ;;  %v9671_v17 = vrot.slane %v16685_v29, 2  ;;  %v9911_v61 = vrot.slane %v16696_v50, 2  ;;  %v16875_v29 = vld [vmem:[%s23298_s2 + $0x14d8] ss:$16 sps:$4 sm:$0xff]  }
 0x766   :  { %10476 = vmatprep.subr.bf16.mxu1 %v9706_v13  ;;  %v16692_v13 = vld [vmem:[%s23298_s2 + $0xbec] ss:$16 sps:$4 sm:$0xff]  }
 0x767   :  { %12327 = vmatpush2.bf16.msra.mxu0 %v16848_v30  ;;  %v9680_v0 = vsel %vm3023_vm2, %v9671_v17, %v9679_v32  ;;  %v22441_v30 = vld [vmem:[%s23298_s2 + $0xc08] ss:$16 sps:$4 sm:$0xff]   ;;  %v9913_v52 = vrot.slane %v16692_v13, 2  ;;  %v16707_v32 = vld [vmem:[%s23298_s2 + $0xbac] ss:$16 sps:$4 sm:$0xff]  }
 0x768   :  { %12328 = vmatprep.subr.bf16.mxu0 %v16856_v39  ;;  %v9919_v62 = vrot.slane %v22441_v30, 2  ;;  %v16703_v39 = vld [vmem:[%s23298_s2 + $0xbc8] ss:$16 sps:$4 sm:$0xff]   ;;  %v16791_v30 = vld [vmem:[%s23298_s2 + $0x10d0] ss:$16 sps:$4 sm:$0xff]  }
 0x769   :  { %10477 = vmatpush2.bf16.msra.mxu1 %v9704_v48  ;;  %v9674_v48 = vsel %vm3023_vm2, %v9665_v25, %v9673_v57  ;;  %v9672_v25 = vsel %vm3023_vm2, %v9663_v11, %v9671_v17  ;;  %v9897_v17 = vrot.slane %v16707_v32, 2 }
 0x76a   :  { %10478 = vmatprep.subr.bf16.mxu1 %v9698_v59  ;;  %v16869_v59 = vld [vmem:[%s23298_s2 + $0x14f8] ss:$16 sps:$4 sm:$0xff]   ;;  %v9920_v57 = vsel %vm3023_vm2, %v9911_v61, %v9919_v62 }
 0x76b   :  { %12329 = vmatpush2.bf16.msra.mxu0 %v16854_v3  ;;  %v9922_v3 = vsel %vm3023_vm2, %v9913_v52, %v9921_v63 }
 0x76c   :  { %12330 = vmatprep.subr.bf16.mxu0 %v16862_v2  ;;  %v9903_v2 = vrot.slane %v16703_v39, 2  ;;  %v16721_v39 = vld [vmem:[%s23298_s2 + $0xb68] ss:$16 sps:$4 sm:$0xff]  }
 0x76d   :  { %10479 = vmatpush2.bf16.msra.mxu1 %v9696_v19  ;;  %v9905_v19 = vrot.slane %v16701_v54, 2 }
 0x76e   :  { %10480 = vmatprep.subr.bf16.mxu1 %v9690_v10  ;;  %v16877_v10 = vld [vmem:[%s23298_s2 + $0x14dc] ss:$16 sps:$4 sm:$0xff]   ;;  %v9912_v50 = vsel %vm3023_vm2, %v9903_v2, %v9911_v61 }
 0x76f   :  { %12331 = vmatpush2.bf16.msra.mxu0 %v16860_v16  ;;  %v16709_v16 = vld [vmem:[%s23298_s2 + $0xba8] ss:$16 sps:$4 sm:$0xff]   ;;  %v9906_v54 = vsel %vm3023_vm2, %v9897_v17, %v9905_v19 }
 0x770   :  { %12382 = vmatprep.subr.bf16.mxu0 %v16871_v27  ;;  %v16889_v27 = vld [vmem:[%s23298_s2 + $0x149c] ss:$16 sps:$4 sm:$0xff]  }
 0x771   :  { %10481 = vmatpush2.bf16.msra.mxu1 %v9688_v8  ;;  %v22451_v22 = vpop.f32.mrf.mxu0  ;;  %v9914_v8 = vsel %vm3023_vm2, %v9905_v19, %v9913_v52  ;;  %v16715_v52 = vld [vmem:[%s23298_s2 + $0xb88] ss:$16 sps:$4 sm:$0xff]  }
 0x772   :  { %10482 = vmatprep.subr.bf16.mxu1 %v9682_v41  ;;  %12333 = vmatmul.mubr.bf16.vlgmr.msra.gmra.mxu0 %v22432_v40  ;;  %v16713_v41 = vld [vmem:[%s23298_s2 + $0xb8c] ss:$16 sps:$4 sm:$0xff]   ;;  %v9887_v61 = vrot.slane %v16715_v52, 2  ;;  %v16733_v52 = vld [vmem:[%s23298_s2 + $0xb28] ss:$16 sps:$4 sm:$0xff]  }
 0x773   :  { %v22472_v12 = vpop.f32.mrf.mxu0  ;;  %12383 = vmatpush1.bf16.msra.mxu0 %v16869_v59  ;;  %v9889_v59 = vrot.slane %v16713_v41, 2  ;;  %v16731_v41 = vld [vmem:[%s23298_s2 + $0xb2c] ss:$16 sps:$4 sm:$0xff]  }
 0x774   :  { %12384 = vmatprep.subr.bf16.mxu0 %v16877_v10  ;;  %v16895_v10 = vld [vmem:[%s23298_s2 + $0x147c] ss:$16 sps:$4 sm:$0xff]  }
 0x775   :  { %10483 = vmatpush2.bf16.msra.mxu1 %v9680_v0  ;;  %v10615_v11 = vpop.f32.mrf.mxu0  ;;  %v16883_v0 = vld [vmem:[%s23298_s2 + $0x14bc] ss:$16 sps:$4 sm:$0xff]   ;;  %v9898_v19 = vsel %vm3023_vm2, %v9889_v59, %v9897_v17 }
 0x776   :  { %10484 = vmatprep.subr.bf16.mxu1 %v9674_v48  ;;  %v9895_v48 = vrot.slane %v16709_v16, 2  ;;  %v16725_v11 = vld [vmem:[%s23298_s2 + $0xb4c] ss:$16 sps:$4 sm:$0xff]   ;;  %v16727_v16 = vld [vmem:[%s23298_s2 + $0xb48] ss:$16 sps:$4 sm:$0xff]  }
 0x777   :  { %v10616_v13 = vpop.f32.mrf.mxu0  ;;  %12385 = vmatpush1.bf16.msra.mxu0 %v16875_v29  ;;  %v16893_v29 = vld [vmem:[%s23298_s2 + $0x1478] ss:$16 sps:$4 sm:$0xff]   ;;  %v9873_v17 = vrot.slane %v16725_v11, 2 }
 0x778   :  { %12386 = vmatprep.subr.bf16.mxu0 %v16883_v0  ;;  %v16899_v13 = vld [vmem:[%s23298_s2 + $0x1458] ss:$16 sps:$4 sm:$0xff]   ;;  %v16901_v0 = vld [vmem:[%s23298_s2 + $0x145c] ss:$16 sps:$4 sm:$0xff]  }
 0x779   :  { %10485 = vmatpush2.bf16.msra.mxu1 %v9672_v25  ;;  %v9904_v25 = vsel %vm3023_vm2, %v9895_v48, %v9903_v2  ;;  %v9879_v2 = vrot.slane %v16721_v39, 2  ;;  %v16740_v39 = vld [vmem:[%s23298_s2 + $0xcec] ss:$16 sps:$4 sm:$0xff]   ;;  %v16742_v11 = vld [vmem:[%s23298_s2 + $0xce8] ss:$16 sps:$4 sm:$0xff]  }
 0x77a   :  { %10536 = vmatprep.subr.bf16.mxu1 %v9922_v3  ;;  %v16887_v3 = vld [vmem:[%s23298_s2 + $0x1498] ss:$16 sps:$4 sm:$0xff]  }
 0x77c   :  { %10487 = vmatmul.mubr.bf16.vlgmr.msra.gmra.mxu1 %v20907_v6  ;;  %v16881_v6 = vld [vmem:[%s23298_s2 + $0x14b8] ss:$16 sps:$4 sm:$0xff]  }
 0x77d   :  { %10537 = vmatpush1.bf16.msra.mxu1 %v9920_v57  ;;  %10568 = vmatprep.mubr.bf16.mxu1 %v21182_v55  ;;  %v16719_v55 = vld [vmem:[%s23298_s2 + $0xb6c] ss:$16 sps:$4 sm:$0xff]   ;;  %v9896_v57 = vsel %vm3023_vm2, %v9887_v61, %v9895_v48  ;;  %v9871_v48 = vrot.slane %v16727_v16, 2 }
 0x77e   :  { %10538 = vmatprep.subr.bf16.mxu1 %v9914_v8  ;;  %12387 = vmatpush1.bf16.msra.mxu0 %v16881_v6  ;;  %v9881_v32 = vrot.slane %v16719_v55, 2  ;;  %v16907_v55 = vld [vmem:[%s23298_s2 + $0x143c] ss:$16 sps:$4 sm:$0xff]  }
 0x77f   :  { %12388 = vmatprep.subr.bf16.mxu0 %v16889_v27  ;;  %v9880_v27 = vsel %vm3023_vm2, %v9871_v48, %v9879_v2  ;;  %v10875_v16 = vld [vmem:[%s23298_s2 + $0x1518] sm:$0x33] }
 0x780   :  { %v9890_v8 = vsel %vm3023_vm2, %v9881_v32, %v9889_v59  ;;  %v9882_v6 = vsel %vm3023_vm2, %v9873_v17, %v9881_v32  ;;  %v16905_v59 = vld [vmem:[%s23298_s2 + $0x1438] ss:$16 sps:$4 sm:$0xff]  }
 0x781   :  { %10539 = vmatpush1.bf16.msra.mxu1 %v9912_v50  ;;  %v9888_v50 = vsel %vm3023_vm2, %v9879_v2, %v9887_v61  ;;  %v16746_v2 = vld [vmem:[%s23298_s2 + $0xccc] ss:$16 sps:$4 sm:$0xff]  }
 0x782   :  { %10540 = vmatprep.subr.bf16.mxu1 %v9906_v54  ;;  %12389 = vmatpush1.bf16.msra.mxu0 %v16887_v3  ;;  %v9865_v54 = vrot.slane %v16731_v41, 2  ;;  %v16911_v3 = vld [vmem:[%s23298_s2 + $0x1418] ss:$16 sps:$4 sm:$0xff]   ;;  %v23321_v41 = vrot.slane %v21324_v5, 2 }
 0x783   :  { %12390 = vmatprep.subr.bf16.mxu0 %v16895_v10 }
 0x784   :  { %v9874_v61 = vsel %vm3023_vm2, %v9865_v54, %v9873_v17  ;;  %v14606_v17 = vcombine.low %v10875_v16, %v10875_v16 }
 0x785   :  { %10541 = vmatpush1.bf16.msra.mxu1 %v9904_v25  ;;  %v9863_v25 = vrot.slane %v16733_v52, 2  ;;  %v9969_v52 = vrot.slane %v16746_v2, 2 }
 0x786   :  { %10542 = vmatprep.subr.bf16.mxu1 %v9898_v19  ;;  %12391 = vmatpush1.bf16.msra.mxu0 %v16893_v29  ;;  %v16913_v19 = vld [vmem:[%s23298_s2 + $0x141c] ss:$16 sps:$4 sm:$0xff]   ;;  %v23320_v29 = vrot.slane %v21310_v34, 2  ;;  %v12090_v5 = vsel %vm1451_vm1, %v14606_v17, 0  ;;  %v16766_v17 = vld [vmem:[%s23298_s2 + $0xc68] ss:$16 sps:$4 sm:$0xff]  }
 0x787   :  { %12392 = vmatprep.subr.bf16.mxu0 %v16901_v0  ;;  %v9872_v32 = vsel %vm3023_vm2, %v9863_v25, %v9871_v48  ;;  %v9864_v34 = vsel %vm3023_vm2, %v23321_v41, %v9863_v25  ;;  %v16748_v0 = vld [vmem:[%s23298_s2 + $0xcc8] ss:$16 sps:$4 sm:$0xff]  }
 0x788   :  { %v9866_v10 = vsel %vm3023_vm2, %v23320_v29, %v9865_v54 }
 0x789   :  { %10543 = vmatpush1.bf16.msra.mxu1 %v9896_v57  ;;  %v9977_v57 = vrot.slane %v16740_v39, 2 }
 0x78a   :  { %10544 = vmatprep.subr.bf16.mxu1 %v9890_v8  ;;  %12393 = vmatpush1.bf16.msra.mxu0 %v16899_v13  ;;  %v14607_v8 = vcombine.high %v10875_v16, %v10875_v16  ;;  %v9975_v13 = vrot.slane %v16742_v11, 2  ;;  %v16760_v11 = vld [vmem:[%s23298_s2 + $0xc88] ss:$16 sps:$4 sm:$0xff]  }
 0x78b   :  { %12394 = vmatprep.subr.bf16.mxu0 %v16907_v55  ;;  %v9986_v48 = vsel %vm3023_vm2, %v9977_v57, %v9985_v31 }
 0x78c   :  { %v9984_v31 = vsel %vm3023_vm2, %v9975_v13, %v9983_v18 }
 0x78d   :  { %10545 = vmatpush1.bf16.msra.mxu1 %v9888_v50  ;;  %v8257_v50 = vadd.f32 %v21330_v42, %v22337_v4  ;;  %v9967_v4 = vrot.slane %v16748_v0, 2  ;;  %v16772_v0 = vld [vmem:[%s23298_s2 + $0xc48] ss:$16 sps:$4 sm:$0xff]  }
 0x78e   :  { %10546 = vmatprep.subr.bf16.mxu1 %v9882_v6  ;;  %12395 = vmatpush1.bf16.msra.mxu0 %v16905_v59  ;;  %v16752_v6 = vld [vmem:[%s23298_s2 + $0xcac] ss:$16 sps:$4 sm:$0xff]   ;;  %v8259_v59 = vadd.f32 %v21342_v58, %v22342_v33  ;;  %v9978_v33 = vsel %vm3023_vm2, %v9969_v52, %v9977_v57  ;;  %v9953_v57 = vrot.slane %v16758_v51, 2  ;;  %v16785_v51 = vld [vmem:[%s23298_s2 + $0x10f0] ss:$16 sps:$4 sm:$0xff]  }
 0x78f   :  { %12396 = vmatprep.subr.bf16.mxu0 %v16913_v19  ;;  %v9976_v19 = vsel %vm3023_vm2, %v9967_v4, %v9975_v13  ;;  %v9943_v13 = vrot.slane %v16766_v17, 2 }
 0x791   :  { %10547 = vmatpush1.bf16.msra.mxu1 %v9880_v27  ;;  %v22593_v42 = vpop.permute.xlu0 %10934  ;;  %v16754_v27 = vld [vmem:[%s23298_s2 + $0xca8] ss:$16 sps:$4 sm:$0xff]  }
 0x792   :  { %10548 = vmatprep.subr.bf16.mxu1 %v9874_v61  ;;  %12397 = vmatpush1.bf16.msra.mxu0 %v16911_v3  ;;  %v22604_v25 = vsel %vm6857_vm9, %v22133_v46, %v22593_v42  ;;  %v9961_v61 = vrot.slane %v16752_v6, 2 }
 0x793   :  { %14610 = vmatprep.subr.msk.bf16.mxu0 %vm1451_vm1, %v14607_v8  ;;  %14611 = vmatprep.mubr.msk.bf16.mxu0 %vm1447_vm0, %v22593_v42  ;;  %v9951_v8 = vrot.slane %v16760_v11, 2  ;;  %v16829_v11 = vld [vmem:[%s23298_s2 + $0x1014] ss:$16 sps:$4 sm:$0xff]  }
 0x795   :  { %10549 = vmatpush1.bf16.msra.mxu1 %v9872_v32  ;;  %v9959_v32 = vrot.slane %v16754_v27, 2  ;;  %v9952_v6 = vsel %vm3023_vm2, %v9943_v13, %v9951_v8 }
 0x796   :  { %10550 = vmatprep.subr.bf16.mxu1 %v9866_v10  ;;  %12413 = vmatpush2.bf16.msra.mxu0 %v12090_v5  ;;  %v9970_v10 = vsel %vm3023_vm2, %v9961_v61, %v9969_v52  ;;  %v16776_v52 = vld [vmem:[%s23298_s2 + $0xc2c] ss:$16 sps:$4 sm:$0xff]   ;;  %v9935_v5 = vrot.slane %v16772_v0, 2  ;;  %v16851_v0 = vld [vmem:[%s23298_s2 + $0x1190] ss:$16 sps:$4 sm:$0xff]  }
 0x797   :  { %v9968_v16 = vsel %vm3023_vm2, %v9959_v32, %v9967_v4 }
 0x798   :  { %v8297_v54 = vpop.f32.mrf.mxu1 }
 0x799   :  { %v8298_v55 = vadd.f32 %v8297_v54, %v8257_v50  ;;  %10551 = vmatpush1.bf16.msra.mxu1 %v9864_v34  ;;  %12415 = vmatmul.mubr.bf16.vlgmr.msra.gmra.mxu0 %v22604_v25  ;;  %v9962_v34 = vsel %vm3023_vm2, %v9953_v57, %v9961_v61  ;;  %v16778_v54 = vld [vmem:[%s23298_s2 + $0xc28] ss:$16 sps:$4 sm:$0xff]   ;;  %v16787_v61 = vld [vmem:[%s23298_s2 + $0x10f4] ss:$16 sps:$4 sm:$0xff]  }
 0x79a   :  { %v8299_v47 = vpop.f32.mrf.mxu1  ;;  %10552 = vmatprep.subr.bf16.mxu1 %v9986_v48  ;;  %v9937_v48 = vrot.slane %v16770_v15, 2  ;;  %v16847_v15 = vld [vmem:[%s23298_s2 + $0x11b4] ss:$16 sps:$4 sm:$0xff]  }
 0x79b   :  { %v8300_v58 = vadd.f32 %v8299_v47, %v8259_v59  ;;  %v8339_v39 = vadd.f32 %v21512_v37, %v8298_v55  ;;  %v16764_v37 = vld [vmem:[%s23298_s2 + $0xc6c] ss:$16 sps:$4 sm:$0xff]   ;;  %v9929_v55 = vrot.slane %v16776_v52, 2  ;;  %v9944_v47 = vsel %vm3023_vm2, %v9935_v5, %v9943_v13  ;;  %v16853_v13 = vld [vmem:[%s23298_s2 + $0x1194] ss:$16 sps:$4 sm:$0xff]  }
 0x79c   :  { %v8301_v18 = vpop.f32.mrf.mxu1  ;;  %v9945_v9 = vrot.slane %v16764_v37, 2  ;;  %v16833_v37 = vld [vmem:[%s23298_s2 + $0x11f0] ss:$16 sps:$4 sm:$0xff]   ;;  %v16865_v52 = vld [vmem:[%s23298_s2 + $0x1154] ss:$16 sps:$4 sm:$0xff]  }
 0x79d   :  { %v8341_v3 = vadd.f32 %v21520_v1, %v8300_v58  ;;  %10553 = vmatpush2.bf16.msra.mxu1 %v9984_v31  ;;  %v22627_v1 = vrot.slane %v8349_v49, %v19117_v14  ;;  %v9960_v49 = vsel %vm3023_vm2, %v9951_v8, %v9959_v32  ;;  %v9927_v31 = vrot.slane %v16778_v54, 2  ;;  %v16811_v18 = vld [vmem:[%s23298_s2 + $0x1074] ss:$16 sps:$4 sm:$0xff]   ;;  %v16821_v32 = vld [vmem:[%s23298_s2 + $0x1030] ss:$16 sps:$4 sm:$0xff]  }
 0x79e   :  { %v8302_v46 = vpop.f32.mrf.mxu1  ;;  %10554 = vmatprep.subr.bf16.mxu1 %v9978_v33  ;;  %v9954_v50 = vsel %vm3023_vm2, %v9945_v9, %v9953_v57  ;;  %v9946_v59 = vsel %vm3023_vm2, %v9937_v48, %v9945_v9  ;;  %v9938_v4 = vsel %vm3023_vm2, %v9929_v55, %v9937_v48  ;;  %v9930_v58 = vsel %vm3023_vm2, %v9921_v63, %v9929_v55  ;;  %v16799_v63 = vld [vmem:[%s23298_s2 + $0x10b4] ss:$16 sps:$4 sm:$0xff]   ;;  %v16857_v48 = vld [vmem:[%s23298_s2 + $0x1170] ss:$16 sps:$4 sm:$0xff]  }
 0x79f   :  { %v8350_v29 = vcombine.low %v8339_v39, %v8341_v3  ;;  %v9936_v27 = vsel %vm3023_vm2, %v9927_v31, %v9935_v5  ;;  %v9928_v33 = vsel %vm3023_vm2, %v9919_v62, %v9927_v31  ;;  %v16797_v62 = vld [vmem:[%s23298_s2 + $0x10b0] ss:$16 sps:$4 sm:$0xff]   ;;  %v16817_v3 = vld [vmem:[%s23298_s2 + $0x1054] ss:$16 sps:$4 sm:$0xff]  }
 0x7a0   :  { %v16809_v39 = vld [vmem:[%s23298_s2 + $0x1070] ss:$16 sps:$4 sm:$0xff]   ;;  %v16841_v8 = vld [vmem:[%s23298_s2 + $0x11d4] ss:$16 sps:$4 sm:$0xff]  }
 0x7a1   :  { %v22630_v2 = vrot.slane %v8350_v29, %v19117_v14  ;;  %10555 = vmatpush2.bf16.msra.mxu1 %v9976_v19  ;;  %v16815_v46 = vld [vmem:[%s23298_s2 + $0x1050] ss:$16 sps:$4 sm:$0xff]   ;;  %v16823_v19 = vld [vmem:[%s23298_s2 + $0x1034] ss:$16 sps:$4 sm:$0xff]  }
 0x7a2   :  { %10556 = vmatprep.subr.bf16.mxu1 %v9970_v10  ;;  %v16827_v29 = vld [vmem:[%s23298_s2 + $0x1010] ss:$16 sps:$4 sm:$0xff]   ;;  %v16835_v10 = vld [vmem:[%s23298_s2 + $0x11f4] ss:$16 sps:$4 sm:$0xff]  }
 0x7a3   :  { %v8365_v41 = vcombine.low %v22627_v1, %v22630_v2  ;;  %v16868_v5 = vld [vmem:[%s23298_s2 + $0x1134] ss:$16 sps:$4 sm:$0xff]   ;;  %v16866_v54 = vld [vmem:[%s23298_s2 + $0x1130] ss:$16 sps:$4 sm:$0xff]   ;;  %v17007_v1 = vld [vmem:[%s23298_s2 + $0x139c] ss:$16 sps:$4 sm:$0xff]  }
 0x7a4   :  { %v16872_v55 = vld [vmem:[%s23298_s2 + $0x1110] ss:$16 sps:$4 sm:$0xff]  }
 0x7a5   :  { %10557 = vmatpush2.bf16.msra.mxu1 %v9968_v16 }
 0x7a6   :  { %10558 = vmatprep.subr.bf16.mxu1 %v9962_v34  ;;  %v16839_v34 = vld [vmem:[%s23298_s2 + $0x11d0] ss:$16 sps:$4 sm:$0xff]  }
 0x7a9   :  { %10559 = vmatpush2.bf16.msra.mxu1 %v9960_v49  ;;  %v16845_v49 = vld [vmem:[%s23298_s2 + $0x11b0] ss:$16 sps:$4 sm:$0xff]  }
 0x7aa   :  { %10560 = vmatprep.subr.bf16.mxu1 %v9954_v50  ;;  %v16859_v50 = vld [vmem:[%s23298_s2 + $0x1174] ss:$16 sps:$4 sm:$0xff]  }
 0x7ad   :  { %10561 = vmatpush2.bf16.msra.mxu1 %v9952_v6  ;;  %v16863_v6 = vld [vmem:[%s23298_s2 + $0x1150] ss:$16 sps:$4 sm:$0xff]  }
 0x7ae   :  { %10562 = vmatprep.subr.bf16.mxu1 %v9946_v59  ;;  %v16874_v59 = vld [vmem:[%s23298_s2 + $0x1114] ss:$16 sps:$4 sm:$0xff]  }
 0x7b1   :  { %10563 = vmatpush2.bf16.msra.mxu1 %v9944_v47  ;;  %v16880_v47 = vld [vmem:[%s23298_s2 + $0x14f4] ss:$16 sps:$4 sm:$0xff]  }
 0x7b2   :  { %10564 = vmatprep.subr.bf16.mxu1 %v9938_v4 }
 0x7b5   :  { %10565 = vmatpush2.bf16.msra.mxu1 %v9936_v27  ;;  %v16878_v27 = vld [vmem:[%s23298_s2 + $0x14f0] ss:$16 sps:$4 sm:$0xff]  }
 0x7b6   :  { %10566 = vmatprep.subr.bf16.mxu1 %v9930_v58  ;;  %v16886_v58 = vld [vmem:[%s23298_s2 + $0x14d4] ss:$16 sps:$4 sm:$0xff]  }
 0x7b9   :  { %10567 = vmatpush2.bf16.msra.mxu1 %v9928_v33 }
 0x7ba   :  { %12136 = vmatprep.subr.bf16.mxu1 %v16787_v61 }
 0x7bc   :  { %10569 = vmatmul.mubr.bf16.vlgmr.msra.gmra.mxu1 %v21178_v45  ;;  %v16805_v45 = vld [vmem:[%s23298_s2 + $0x1094] ss:$16 sps:$4 sm:$0xff]  }
 0x7bd   :  { %12137 = vmatpush1.bf16.msra.mxu1 %v16785_v51  ;;  %12168 = vmatprep.mubr.bf16.mxu1 %v22417_v44  ;;  %v16803_v44 = vld [vmem:[%s23298_s2 + $0x1090] ss:$16 sps:$4 sm:$0xff]  }
 0x7be   :  { %12138 = vmatprep.subr.bf16.mxu1 %v16793_v24 }
 0x7c1   :  { %12139 = vmatpush1.bf16.msra.mxu1 %v16791_v30 }
 0x7c2   :  { %12140 = vmatprep.subr.bf16.mxu1 %v16799_v63 }
 0x7c5   :  { %12141 = vmatpush1.bf16.msra.mxu1 %v16797_v62 }
 0x7c6   :  { %12142 = vmatprep.subr.bf16.mxu1 %v16805_v45  ;;  %v16896_v45 = vld [vmem:[%s23298_s2 + $0x1490] ss:$16 sps:$4 sm:$0xff]  }
 0x7c9   :  { %12143 = vmatpush1.bf16.msra.mxu1 %v16803_v44  ;;  %v16904_v44 = vld [vmem:[%s23298_s2 + $0x1474] ss:$16 sps:$4 sm:$0xff]  }
 0x7ca   :  { %12144 = vmatprep.subr.bf16.mxu1 %v16811_v18  ;;  %v16902_v18 = vld [vmem:[%s23298_s2 + $0x1470] ss:$16 sps:$4 sm:$0xff]  }
 0x7cd   :  { %12145 = vmatpush1.bf16.msra.mxu1 %v16809_v39  ;;  %v16910_v39 = vld [vmem:[%s23298_s2 + $0x1454] ss:$16 sps:$4 sm:$0xff]  }
 0x7ce   :  { %12146 = vmatprep.subr.bf16.mxu1 %v16817_v3  ;;  %v16908_v3 = vld [vmem:[%s23298_s2 + $0x1450] ss:$16 sps:$4 sm:$0xff]  }
 0x7d1   :  { %12147 = vmatpush1.bf16.msra.mxu1 %v16815_v46  ;;  %v16916_v46 = vld [vmem:[%s23298_s2 + $0x1434] ss:$16 sps:$4 sm:$0xff]  }
 0x7d2   :  { %12148 = vmatprep.subr.bf16.mxu1 %v16823_v19  ;;  %v16914_v19 = vld [vmem:[%s23298_s2 + $0x1430] ss:$16 sps:$4 sm:$0xff]  }
 0x7d5   :  { %12149 = vmatpush1.bf16.msra.mxu1 %v16821_v32  ;;  %v16920_v32 = vld [vmem:[%s23298_s2 + $0x1414] ss:$16 sps:$4 sm:$0xff]  }
 0x7d6   :  { %12150 = vmatprep.subr.bf16.mxu1 %v16829_v11  ;;  %v10874_v11 = vld [vmem:[%s23298_s2 + $0x1510] sm:$0x33] }
 0x7d8   :  { %v10365_v57 = vpop.f32.mrf.mxu1 }
 0x7d9   :  { %12151 = vmatpush1.bf16.msra.mxu1 %v16827_v29  ;;  %v10366_v31 = vadd.f32 %v10365_v57, %v22224_v21  ;;  %v16918_v29 = vld [vmem:[%s23298_s2 + $0x1410] ss:$16 sps:$4 sm:$0xff]   ;;  %v14604_v57 = vcombine.low %v10874_v11, %v10874_v11 }
 0x7da   :  { %v10367_v16 = vpop.f32.mrf.mxu1  ;;  %12152 = vmatprep.subr.bf16.mxu1 %v16835_v10  ;;  %v14605_v10 = vcombine.high %v10874_v11, %v10874_v11  ;;  %v16965_v11 = vld [vmem:[%s23298_s2 + $0xf5c] ss:$16 sps:$4 sm:$0xff]  }
 0x7db   :  { %v10368_v4 = vadd.f32 %v10367_v16, %v22234_v35  ;;  %v10407_v33 = vadd.f32 %v22257_v36, %v10366_v31  ;;  %v16884_v35 = vld [vmem:[%s23298_s2 + $0x14d0] ss:$16 sps:$4 sm:$0xff]   ;;  %v16892_v36 = vld [vmem:[%s23298_s2 + $0x14b4] ss:$16 sps:$4 sm:$0xff]   ;;  %v16926_v16 = vld [vmem:[%s23298_s2 + $0xefc] ss:$16 sps:$4 sm:$0xff]  }
 0x7dc   :  { %v10369_v17 = vpop.f32.mrf.mxu1  ;;  %v16944_v31 = vld [vmem:[%s23298_s2 + $0xe3c] ss:$16 sps:$4 sm:$0xff]  }
 0x7dd   :  { %12153 = vmatpush2.bf16.msra.mxu1 %v16833_v37  ;;  %v10409_v21 = vadd.f32 %v22266_v56, %v10368_v4  ;;  %v16890_v56 = vld [vmem:[%s23298_s2 + $0x14b0] ss:$16 sps:$4 sm:$0xff]   ;;  %v12084_v37 = vsel %vm1451_vm1, %v14604_v57, 0  ;;  %v16929_v17 = vld [vmem:[%s23298_s2 + $0xedc] ss:$16 sps:$4 sm:$0xff]  }
 0x7de   :  { %v10370_v9 = vpop.f32.mrf.mxu1  ;;  %12154 = vmatprep.subr.bf16.mxu1 %v16841_v8  ;;  %v16924_v8 = vld [vmem:[%s23298_s2 + $0xef8] ss:$16 sps:$4 sm:$0xff]  }
 0x7df   :  { %v16927_v9 = vld [vmem:[%s23298_s2 + $0xed8] ss:$16 sps:$4 sm:$0xff]  }
 0x7e0   :  { %v16966_v57 = vld [vmem:[%s23298_s2 + $0xf38] ss:$16 sps:$4 sm:$0xff]  }
 0x7e1   :  { %12155 = vmatpush2.bf16.msra.mxu1 %v16839_v34  ;;  %v22838_v34 = vpop.f32.mrf.mxu0 }
 0x7e2   :  { %12156 = vmatprep.subr.bf16.mxu1 %v16847_v15  ;;  %v16932_v15 = vld [vmem:[%s23298_s2 + $0xebc] ss:$16 sps:$4 sm:$0xff]  }
 0x7e5   :  { %12157 = vmatpush2.bf16.msra.mxu1 %v16845_v49  ;;  %v22847_v49 = vpop.f32.mrf.mxu0 }
 0x7e6   :  { %12158 = vmatprep.subr.bf16.mxu1 %v16853_v13 }
 0x7e7   :  { %v12133_v13 = vpop.f32.mrf.mxu0 }
 0x7e8   :  { %v16977_v13 = vld [vmem:[%s23298_s2 + $0x12dc] ss:$16 sps:$4 sm:$0xff]  }
 0x7e9   :  { %12159 = vmatpush2.bf16.msra.mxu1 %v16851_v0  ;;  %v12134_v0 = vpop.f32.mrf.mxu0 }
 0x7ea   :  { %12160 = vmatprep.subr.bf16.mxu1 %v16859_v50 }
 0x7ed   :  { %12161 = vmatpush2.bf16.msra.mxu1 %v16857_v48  ;;  %v16933_v48 = vld [vmem:[%s23298_s2 + $0xe98] ss:$16 sps:$4 sm:$0xff]  }
 0x7ee   :  { %12162 = vmatprep.subr.bf16.mxu1 %v16865_v52  ;;  %v16938_v52 = vld [vmem:[%s23298_s2 + $0xe7c] ss:$16 sps:$4 sm:$0xff]  }
 0x7f1   :  { %12163 = vmatpush2.bf16.msra.mxu1 %v16863_v6 }
 0x7f2   :  { %12164 = vmatprep.subr.bf16.mxu1 %v16868_v5  ;;  %v22855_v50 = vpop.f32.mrf.mxu0 }
 0x7f4   :  { %v22863_v6 = vpop.f32.mrf.mxu0 }
 0x7f5   :  { %12165 = vmatpush2.bf16.msra.mxu1 %v16866_v54  ;;  %v16936_v54 = vld [vmem:[%s23298_s2 + $0xe78] ss:$16 sps:$4 sm:$0xff]  }
 0x7f6   :  { %12166 = vmatprep.subr.bf16.mxu1 %v16874_v59  ;;  %v12215_v5 = vpop.f32.mrf.mxu0  ;;  %v16941_v59 = vld [vmem:[%s23298_s2 + $0xe5c] ss:$16 sps:$4 sm:$0xff]  }
 0x7f7   :  { %v16986_v5 = vld [vmem:[%s23298_s2 + $0x127c] ss:$16 sps:$4 sm:$0xff]  }
 0x7f9   :  { %12167 = vmatpush2.bf16.msra.mxu1 %v16872_v55  ;;  %v12216_v55 = vpop.f32.mrf.mxu0 }
 0x7fa   :  { %12218 = vmatprep.subr.bf16.mxu1 %v16880_v47  ;;  %v16939_v47 = vld [vmem:[%s23298_s2 + $0xe58] ss:$16 sps:$4 sm:$0xff]  }
 0x7fb   :  { %v16987_v55 = vld [vmem:[%s23298_s2 + $0x1258] ss:$16 sps:$4 sm:$0xff]  }
 0x7fc   :  { %v10447_v61 = vpop.f32.mrf.mxu1  ;;  %12169 = vmatmul.mubr.bf16.vlgmr.msra.gmra.mxu1 %v22432_v40 }
 0x7fd   :  { %v22775_v51 = vadd.f32 %v10447_v61, %v10407_v33  ;;  %12219 = vmatpush1.bf16.msra.mxu1 %v16878_v27  ;;  %14609 = vmatprep.mubr.msk.bf16.mxu1 %vm1447_vm0, %v22593_v42  ;;  %v16898_v42 = vld [vmem:[%s23298_s2 + $0x1494] ss:$16 sps:$4 sm:$0xff]   ;;  %v16942_v27 = vld [vmem:[%s23298_s2 + $0xe38] ss:$16 sps:$4 sm:$0xff]   ;;  %v16947_v33 = vld [vmem:[%s23298_s2 + $0xe1c] ss:$16 sps:$4 sm:$0xff]  }
 0x7fe   :  { %v10449_v24 = vpop.f32.mrf.mxu1  ;;  %12220 = vmatprep.subr.bf16.mxu1 %v16886_v58 }
 0x7ff   :  { %v22786_v30 = vadd.f32 %v10449_v24, %v10409_v21  ;;  %v16945_v21 = vld [vmem:[%s23298_s2 + $0xe18] ss:$16 sps:$4 sm:$0xff]   ;;  %v16950_v24 = vld [vmem:[%s23298_s2 + $0xffc] ss:$16 sps:$4 sm:$0xff]  }
 0x800   :  { %v10451_v40 = vpop.f32.mrf.mxu1 }
 0x801   :  { %v10622_v63 = vcombine.low %v22775_v51, %v22786_v30  ;;  %12221 = vmatpush1.bf16.msra.mxu1 %v16884_v35  ;;  %v16948_v40 = vld [vmem:[%s23298_s2 + $0xff8] ss:$16 sps:$4 sm:$0xff]  }
 0x802   :  { %v10452_v62 = vpop.f32.mrf.mxu1  ;;  %12222 = vmatprep.subr.bf16.mxu1 %v16892_v36  ;;  %v17005_v30 = vld [vmem:[%s23298_s2 + $0x1398] ss:$16 sps:$4 sm:$0xff]  }
 0x803   :  { %v16953_v62 = vld [vmem:[%s23298_s2 + $0xfdc] ss:$16 sps:$4 sm:$0xff]  }
 0x805   :  { %12223 = vmatpush1.bf16.msra.mxu1 %v16890_v56 }
 0x806   :  { %12224 = vmatprep.subr.bf16.mxu1 %v16898_v42 }
 0x809   :  { %12225 = vmatpush1.bf16.msra.mxu1 %v16896_v45  ;;  %v16951_v45 = vld [vmem:[%s23298_s2 + $0xfd8] ss:$16 sps:$4 sm:$0xff]  }
 0x80a   :  { %12226 = vmatprep.subr.bf16.mxu1 %v16904_v44 }
 0x80d   :  { %12227 = vmatpush1.bf16.msra.mxu1 %v16902_v18  ;;  %v16956_v18 = vld [vmem:[%s23298_s2 + $0xfbc] ss:$16 sps:$4 sm:$0xff]  }
 0x80e   :  { %12228 = vmatprep.subr.bf16.mxu1 %v16910_v39  ;;  %v16954_v39 = vld [vmem:[%s23298_s2 + $0xfb8] ss:$16 sps:$4 sm:$0xff]  }
 0x811   :  { %12229 = vmatpush1.bf16.msra.mxu1 %v16908_v3  ;;  %v16959_v3 = vld [vmem:[%s23298_s2 + $0xf9c] ss:$16 sps:$4 sm:$0xff]  }
 0x812   :  { %12230 = vmatprep.subr.bf16.mxu1 %v16916_v46  ;;  %v16957_v46 = vld [vmem:[%s23298_s2 + $0xf98] ss:$16 sps:$4 sm:$0xff]  }
 0x815   :  { %12231 = vmatpush1.bf16.msra.mxu1 %v16914_v19  ;;  %v16962_v19 = vld [vmem:[%s23298_s2 + $0xf7c] ss:$16 sps:$4 sm:$0xff]  }
 0x816   :  { %12232 = vmatprep.subr.bf16.mxu1 %v16920_v32  ;;  %v16960_v32 = vld [vmem:[%s23298_s2 + $0xf78] ss:$16 sps:$4 sm:$0xff]  }
 0x819   :  { %12233 = vmatpush1.bf16.msra.mxu1 %v16918_v29  ;;  %v16963_v29 = vld [vmem:[%s23298_s2 + $0xf58] ss:$16 sps:$4 sm:$0xff]  }
 0x81a   :  { %14608 = vmatprep.subr.msk.bf16.mxu1 %vm1451_vm1, %v14605_v10  ;;  %v16968_v10 = vld [vmem:[%s23298_s2 + $0xf3c] ss:$16 sps:$4 sm:$0xff]  }
 0x81d   :  { %12249 = vmatpush2.bf16.msra.mxu1 %v12084_v37  ;;  %v16971_v37 = vld [vmem:[%s23298_s2 + $0xf1c] ss:$16 sps:$4 sm:$0xff]  }
 0x81e   :  { %12259 = vmatprep.subr.bf16.mxu1 %v16926_v16  ;;  %v16969_v16 = vld [vmem:[%s23298_s2 + $0xf18] ss:$16 sps:$4 sm:$0xff]  }
 0x820   :  { %12251 = vmatmul.mubr.bf16.vlgmr.msra.gmra.mxu1 %v22604_v25  ;;  %v16930_v25 = vld [vmem:[%s23298_s2 + $0xeb8] ss:$16 sps:$4 sm:$0xff]  }
 0x821   :  { %12260 = vmatpush1.bf16.msra.mxu1 %v16924_v8  ;;  %12291 = vmatprep.mubr.bf16.mxu1 %v21896_v53  ;;  %v16935_v53 = vld [vmem:[%s23298_s2 + $0xe9c] ss:$16 sps:$4 sm:$0xff]  }
 0x822   :  { %12261 = vmatprep.subr.bf16.mxu1 %v16929_v17  ;;  %v16974_v8 = vld [vmem:[%s23298_s2 + $0x12fc] ss:$16 sps:$4 sm:$0xff]  }
 0x825   :  { %12262 = vmatpush1.bf16.msra.mxu1 %v16927_v9  ;;  %v16972_v9 = vld [vmem:[%s23298_s2 + $0x12f8] ss:$16 sps:$4 sm:$0xff]  }
 0x826   :  { %12263 = vmatprep.subr.bf16.mxu1 %v16932_v15 }
 0x829   :  { %12264 = vmatpush1.bf16.msra.mxu1 %v16930_v25 }
 0x82a   :  { %12265 = vmatprep.subr.bf16.mxu1 %v16935_v53  ;;  %v16975_v53 = vld [vmem:[%s23298_s2 + $0x12d8] ss:$16 sps:$4 sm:$0xff]  }
 0x82d   :  { %12266 = vmatpush1.bf16.msra.mxu1 %v16933_v48  ;;  %v16980_v48 = vld [vmem:[%s23298_s2 + $0x12bc] ss:$16 sps:$4 sm:$0xff]  }
 0x82e   :  { %12267 = vmatprep.subr.bf16.mxu1 %v16938_v52  ;;  %v16978_v52 = vld [vmem:[%s23298_s2 + $0x12b8] ss:$16 sps:$4 sm:$0xff]  }
 0x831   :  { %12268 = vmatpush1.bf16.msra.mxu1 %v16936_v54  ;;  %v16984_v54 = vld [vmem:[%s23298_s2 + $0x1278] ss:$16 sps:$4 sm:$0xff]  }
 0x832   :  { %12269 = vmatprep.subr.bf16.mxu1 %v16941_v59  ;;  %v22877_v4 = vpop.f32.mrf.mxu0  ;;  %v16989_v59 = vld [vmem:[%s23298_s2 + $0x125c] ss:$16 sps:$4 sm:$0xff]  }
 0x834   :  { %v22882_v58 = vpop.f32.mrf.mxu0 }
 0x835   :  { %12270 = vmatpush1.bf16.msra.mxu1 %v16939_v47  ;;  %v16992_v47 = vld [vmem:[%s23298_s2 + $0x123c] ss:$16 sps:$4 sm:$0xff]  }
 0x836   :  { %12271 = vmatprep.subr.bf16.mxu1 %v16944_v31  ;;  %v12338_v61 = vpop.f32.mrf.mxu0  ;;  %v16990_v31 = vld [vmem:[%s23298_s2 + $0x1238] ss:$16 sps:$4 sm:$0xff]  }
 0x837   :  { %v16998_v61 = vld [vmem:[%s23298_s2 + $0x13fc] ss:$16 sps:$4 sm:$0xff]  }
 0x838   :  { %v12339_v35 = vpop.f32.mrf.mxu0 }
 0x839   :  { %12272 = vmatpush1.bf16.msra.mxu1 %v16942_v27  ;;  %v16995_v27 = vld [vmem:[%s23298_s2 + $0x121c] ss:$16 sps:$4 sm:$0xff]  }
 0x83a   :  { %12273 = vmatprep.subr.bf16.mxu1 %v16947_v33  ;;  %v16993_v33 = vld [vmem:[%s23298_s2 + $0x1218] ss:$16 sps:$4 sm:$0xff]  }
 0x83c   :  { %v22893_v36 = vpop.f32.mrf.mxu1 }
 0x83d   :  { %12274 = vmatpush1.bf16.msra.mxu1 %v16945_v21  ;;  %v10530_v21 = vadd.f32 %v22300_v28, %v22893_v36 }
 0x83e   :  { %v22898_v56 = vpop.f32.mrf.mxu1  ;;  %12275 = vmatprep.subr.bf16.mxu1 %v16950_v24 }
 0x83f   :  { %v10532_v24 = vadd.f32 %v22308_v26, %v22898_v56  ;;  %v16999_v26 = vld [vmem:[%s23298_s2 + $0x13d8] ss:$16 sps:$4 sm:$0xff]  }
 0x840   :  { %v10492_v42 = vpop.f32.mrf.mxu1 }
 0x841   :  { %12276 = vmatpush2.bf16.msra.mxu1 %v16948_v40 }
 0x842   :  { %v10493_v44 = vpop.f32.mrf.mxu1  ;;  %12277 = vmatprep.subr.bf16.mxu1 %v16953_v62  ;;  %v16996_v62 = vld [vmem:[%s23298_s2 + $0x13f8] ss:$16 sps:$4 sm:$0xff]  }
 0x845   :  { %12278 = vmatpush2.bf16.msra.mxu1 %v16951_v45  ;;  %v17001_v45 = vld [vmem:[%s23298_s2 + $0x13dc] ss:$16 sps:$4 sm:$0xff]  }
 0x846   :  { %12279 = vmatprep.subr.bf16.mxu1 %v16956_v18 }
 0x849   :  { %12280 = vmatpush2.bf16.msra.mxu1 %v16954_v39  ;;  %v17004_v39 = vld [vmem:[%s23298_s2 + $0x13bc] ss:$16 sps:$4 sm:$0xff]  }
 0x84a   :  { %12281 = vmatprep.subr.bf16.mxu1 %v16959_v3 }
 0x84d   :  { %12282 = vmatpush2.bf16.msra.mxu1 %v16957_v46  ;;  %v8372_v46 = vrot.slane %v8365_v41, %v19117_v14 }
 0x84e   :  { %12283 = vmatprep.subr.bf16.mxu1 %v16962_v19  ;;  %v17002_v19 = vld [vmem:[%s23298_s2 + $0x13b8] ss:$16 sps:$4 sm:$0xff]  }
 0x851   :  { %12284 = vmatpush2.bf16.msra.mxu1 %v16960_v32  ;;  %v6576_v32 = vld [vmem:[%s23300_s3] sm:$0xf] }
 0x852   :  { %12285 = vmatprep.subr.bf16.mxu1 %v16965_v11  ;;  %v8374_v41 = vadd.f32 %v8372_v46, %v6576_v32  ;;  %v17041_v46 = vld [vmem:[%s23301_s4 + $0xd0] sm:$0xff]   ;;  %v17045_v32 = vld [vmem:[%s23301_s4 + $0xc8] sm:$0xff]  }
 0x855   :  { %12286 = vmatpush2.bf16.msra.mxu1 %v16963_v29  ;;  %v17008_v29 = vld [vmem:[%s23298_s2 + $0x1378] ss:$16 sps:$4 sm:$0xff]  }
 0x856   :  { %12287 = vmatprep.subr.bf16.mxu1 %v16968_v10  ;;  %v17013_v10 = vld [vmem:[%s23298_s2 + $0x135c] ss:$16 sps:$4 sm:$0xff]  }
 0x859   :  { %12288 = vmatpush2.bf16.msra.mxu1 %v16966_v57  ;;  %v22945_v17 = vpop.f32.mrf.mxu0  ;;  %v17011_v57 = vld [vmem:[%s23298_s2 + $0x1358] ss:$16 sps:$4 sm:$0xff]  }
 0x85a   :  { %12289 = vmatprep.subr.bf16.mxu1 %v16971_v37  ;;  %v17016_v37 = vld [vmem:[%s23298_s2 + $0x133c] ss:$16 sps:$4 sm:$0xff]  }
 0x85b   :  { %v22950_v15 = vpop.f32.mrf.mxu0 }
 0x85d   :  { %12290 = vmatpush2.bf16.msra.mxu1 %v16969_v16  ;;  %v12420_v25 = vpop.f32.mrf.mxu0  ;;  %v17014_v16 = vld [vmem:[%s23298_s2 + $0x1338] ss:$16 sps:$4 sm:$0xff]  }
 0x85e   :  { %12341 = vmatprep.subr.bf16.mxu1 %v16974_v8  ;;  %v17019_v8 = vld [vmem:[%s23298_s2 + $0x131c] ss:$16 sps:$4 sm:$0xff]  }
 0x85f   :  { %v12421_v0 = vpop.f32.mrf.mxu0  ;;  %v17021_v25 = vld [vmem:[%s23301_s4 + $0xf8] sm:$0x3f]  }
 0x860   :  { %12292 = vmatmul.mubr.bf16.vlgmr.msra.gmra.mxu1 %v21905_v38  ;;  %v16983_v38 = vld [vmem:[%s23298_s2 + $0x129c] ss:$16 sps:$4 sm:$0xff]  }
 0x861   :  { %12342 = vmatpush1.bf16.msra.mxu1 %v16972_v9  ;;  %12373 = vmatprep.mubr.bf16.mxu1 %v22162_v23  ;;  %v16981_v23 = vld [vmem:[%s23298_s2 + $0x1298] ss:$16 sps:$4 sm:$0xff]  }
 0x862   :  { %12343 = vmatprep.subr.bf16.mxu1 %v16977_v13  ;;  %v17017_v9 = vld [vmem:[%s23298_s2 + $0x1318] ss:$16 sps:$4 sm:$0xff]  }
 0x863   :  { %v17020_v13 = vld [vmem:[%s23301_s4 + $0x78] sm:$0xff]  }
 0x864   :  { %v17023_v0 = vld [vmem:[%s23301_s4 + $0xb8] sm:$0xff]   ;;  %14735 = vmatprep.subr.bf16.mxu0 %v17020_v13 }
 0x865   :  { %12344 = vmatpush1.bf16.msra.mxu1 %v16975_v53  ;;  %v17022_v53 = vld [vmem:[%s23301_s4 + $0x38] sm:$0xff]  }
 0x866   :  { %12345 = vmatprep.subr.bf16.mxu1 %v16980_v48  ;;  %v12739_v48 = vand.u32 %v17021_v25, %v20009_v60  ;;  %14736 = vmatpush3.bf16.msra.mxu0 %v17022_v53 }
 0x869   :  { %12346 = vmatpush1.bf16.msra.mxu1 %v16978_v52  ;;  %v17025_v52 = vld [vmem:[%s23301_s4 + $0xf0] sm:$0xff]  }
 0x86a   :  { %12347 = vmatprep.subr.bf16.mxu1 %v16983_v38  ;;  %v17026_v38 = vld [vmem:[%s23301_s4 + $0x30] sm:$0xff]  }
 0x86d   :  { %12348 = vmatpush1.bf16.msra.mxu1 %v16981_v23  ;;  %v17027_v23 = vld [vmem:[%s23301_s4 + $0xb0] sm:$0xff]  }
 0x86e   :  { %12349 = vmatprep.subr.bf16.mxu1 %v16986_v5 }
 0x871   :  { %12350 = vmatpush1.bf16.msra.mxu1 %v16984_v54 }
 0x872   :  { %12351 = vmatprep.subr.bf16.mxu1 %v16989_v59 }
 0x875   :  { %12352 = vmatpush1.bf16.msra.mxu1 %v16987_v55 }
 0x876   :  { %12353 = vmatprep.subr.bf16.mxu1 %v16992_v47 }
 0x879   :  { %12354 = vmatpush1.bf16.msra.mxu1 %v16990_v31 }
 0x87a   :  { %12355 = vmatprep.subr.bf16.mxu1 %v16995_v27  ;;  %v17028_v27 = vld [vmem:[%s23301_s4 + $0x68] sm:$0xff]  }
 0x87c   :  { %v10570_v35 = vpop.f32.mrf.mxu1 }
 0x87d   :  { %v10571_v40 = vadd.f32 %v10570_v35, %v10530_v21  ;;  %12356 = vmatpush1.bf16.msra.mxu1 %v16993_v33  ;;  %v17029_v33 = vld [vmem:[%s23301_s4 + $0xe8] sm:$0xff]  }
 0x87e   :  { %v10572_v42 = vpop.f32.mrf.mxu1  ;;  %12357 = vmatprep.subr.bf16.mxu1 %v16998_v61  ;;  %v17030_v21 = vld [vmem:[%s23301_s4 + $0x28] sm:$0xff]  }
 0x87f   :  { %v10573_v44 = vadd.f32 %v10572_v42, %v10532_v24  ;;  %v10612_v28 = vadd.f32 %v22451_v22, %v10571_v40  ;;  %v10630_v22 = vrot.slane %v10622_v63, %v19117_v14  ;;  %v17010_v63 = vld [vmem:[%s23298_s2 + $0x137c] ss:$16 sps:$4 sm:$0xff]  }
 0x880   :  { %v10574_v18 = vpop.f32.mrf.mxu1 }
 0x881   :  { %v10614_v36 = vadd.f32 %v22472_v12, %v10573_v44  ;;  %12358 = vmatpush2.bf16.msra.mxu1 %v16996_v62  ;;  %v17033_v62 = vld [vmem:[%s23301_s4 + $0xe0] sm:$0xff]  }
 0x882   :  { %v10575_v56 = vpop.f32.mrf.mxu1  ;;  %12359 = vmatprep.subr.bf16.mxu1 %v17001_v45  ;;  %v17034_v45 = vld [vmem:[%s23301_s4 + $0x20] sm:$0xff]  }
 0x883   :  { %v10623_v3 = vcombine.low %v10612_v28, %v10614_v36  ;;  %v17036_v36 = vld [vmem:[%s23301_s4 + $0x58] sm:$0xff]  }
 0x884   :  { %v17038_v56 = vld [vmem:[%s23301_s4 + $0x18] sm:$0xff]  }
 0x885   :  { %v10637_v12 = vrot.slane %v10623_v3, %v19117_v14  ;;  %12360 = vmatpush2.bf16.msra.mxu1 %v16999_v26  ;;  %v17037_v26 = vld [vmem:[%s23301_s4 + $0xd8] sm:$0xff]   ;;  %v17040_v3 = vld [vmem:[%s23301_s4 + $0x50] sm:$0xff]  }
 0x886   :  { %12361 = vmatprep.subr.bf16.mxu1 %v17004_v39  ;;  %v17039_v39 = vld [vmem:[%s23301_s4 + $0x98] sm:$0xff]  }
 0x887   :  { %v10638_v2 = vcombine.low %v10630_v22, %v10637_v12  ;;  %v17042_v22 = vld [vmem:[%s23301_s4 + $0x10] sm:$0xff]  }
 0x888   :  { %v17043_v12 = vld [vmem:[%s23301_s4 + $0x90] sm:$0xff]  }
 0x889   :  { %v10645_v51 = vrot.slane %v10638_v2, %v19117_v14  ;;  %12362 = vmatpush2.bf16.msra.mxu1 %v17002_v19  ;;  %v17044_v19 = vld [vmem:[%s23301_s4 + $0x48] sm:$0xff]  }
 0x88a   :  { %12363 = vmatprep.subr.bf16.mxu1 %v17007_v1  ;;  %v17046_v1 = vld [vmem:[%s23301_s4 + $0x8] sm:$0xff]  }
 0x88b   :  { %v23042_v11 = vadd.f32 %v10645_v51, %v8374_v41  ;;  %v17047_v2 = vld [vmem:[%s23301_s4 + $0x88] sm:$0xff]   ;;  %v17048_v41 = vld [vmem:[%s23301_s4 + $0x40] sm:$0xff]  }
 0x88c   :  { %v17049_v51 = vld [vmem:[%s23301_s4 + $0xc0] sm:$0xff]  }
 0x88d   :  { %12364 = vmatpush2.bf16.msra.mxu1 %v17005_v30  ;;  %v17050_v30 = vld [vmem:[%s23301_s4] sm:$0xff]  }
 0x88e   :  { %12365 = vmatprep.subr.bf16.mxu1 %v17010_v63  ;;  %v17051_v63 = vld [vmem:[%s23301_s4 + $0x80] sm:$0xff]  }
 0x891   :  { %12366 = vmatpush2.bf16.msra.mxu1 %v17008_v29  ;;  %v23322_v29 = vmov 0.0  }
 0x892   :  { %12367 = vmatprep.subr.bf16.mxu1 %v17013_v10 }
 0x895   :  { %12368 = vmatpush2.bf16.msra.mxu1 %v17011_v57 }
 0x896   :  { %12369 = vmatprep.subr.bf16.mxu1 %v17016_v37 }
 0x899   :  { %12370 = vmatpush2.bf16.msra.mxu1 %v17014_v16 }
 0x89a   :  { %12371 = vmatprep.subr.bf16.mxu1 %v17019_v8 }
 0x89d   :  { %12372 = vmatpush2.bf16.msra.mxu1 %v17017_v9 }
 0x89e   :  { %14757 = vmatprep.subr.bf16.mxu1 %v12739_v48 }
 0x8a0   :  { %12374 = vmatmul.mubr.bf16.vlgmr.msra.gmra.mxu1 %v22158_v20  ;;  %v17024_v20 = vld [vmem:[%s23301_s4 + $0x70] sm:$0xff]  }
 0x8a1   :  { %14737 = vmatprep.subr.bf16.mxu0 %v17024_v20  ;;  %14758 = vmatpush3.bf16.msra.mxu1 %v17023_v0 }
 0x8a2   :  { %14759 = vmatprep.subr.bf16.mxu1 %v17025_v52  ;;  %14738 = vmatpush3.bf16.msra.mxu0 %v17026_v38 }
 0x8a3   :  { %14739 = vmatprep.subr.bf16.mxu0 %v17028_v27 }
 0x8a5   :  { %14760 = vmatpush3.bf16.msra.mxu1 %v17027_v23 }
 0x8a6   :  { %14761 = vmatprep.subr.bf16.mxu1 %v17029_v33  ;;  %14740 = vmatpush3.bf16.msra.mxu0 %v17030_v21  ;;  %v23325_v33 = vsub.s32 0, %v17265_v43  ;;  %v23326_v21 = vsub.s32 2, %v17265_v43 }
 0x8bc   :  { %v12170_v5 = vpop.f32.mrf.mxu1 }
 0x8bd   :  { %v12171_v47 = vadd.f32 %v12170_v5, %v22838_v34  ;;  %v17031_v34 = vld [vmem:[%s23301_s4 + $0xa8] sm:$0xff]  }
 0x8be   :  { %v12172_v54 = vpop.f32.mrf.mxu1  ;;  %14762 = vmatpush3.bf16.msra.mxu1 %v17031_v34 }
 0x8bf   :  { %v12173_v31 = vadd.f32 %v12172_v54, %v22847_v49  ;;  %v12212_v61 = vadd.f32 %v22855_v50, %v12171_v47  ;;  %v17032_v50 = vld [vmem:[%s23301_s4 + $0x60] sm:$0xff]   ;;  %14763 = vmatprep.subr.bf16.mxu1 %v17033_v62  ;;  %v17052_v47 = vld [vmem:[%s23302_s6 + $0x30] sm:$0x3f]  }
 0x8c0   :  { %v12174_v59 = vpop.f32.mrf.mxu1  ;;  %14741 = vmatprep.subr.bf16.mxu0 %v17032_v50  ;;  %v17055_v50 = vld [vmem:[%s23302_s6 + $0x18] sm:$0xff]   ;;  %v17056_v62 = vld [vmem:[%s23302_s6 + $0x10] sm:$0xff]  }
 0x8c1   :  { %v12214_v24 = vadd.f32 %v22863_v6, %v12173_v31  ;;  %v17035_v6 = vld [vmem:[%s23301_s4 + $0xa0] sm:$0xff]   ;;  %14742 = vmatpush3.bf16.msra.mxu0 %v17034_v45 }
 0x8c2   :  { %v12175_v55 = vpop.f32.mrf.mxu1  ;;  %14764 = vmatpush3.bf16.msra.mxu1 %v17035_v6  ;;  %14743 = vmatprep.subr.bf16.mxu0 %v17036_v36  ;;  %v17058_v45 = vld [vmem:[%s23302_s6] sm:$0xff]   ;;  %v17063_v6 = vld [vmem:[%s23303_s9 + $0x8] sm:$0x3f]  }
 0x8c3   :  { %14765 = vmatprep.subr.bf16.mxu1 %v17037_v26  ;;  %v12543_v36 = vld [vmem:[%s23304_s5] sm:$0x1] }
 0x8c5   :  { %14744 = vmatpush3.bf16.msra.mxu0 %v17038_v56 }
 0x8c6   :  { %14766 = vmatpush3.bf16.msra.mxu1 %v17039_v39  ;;  %14745 = vmatprep.subr.bf16.mxu0 %v17040_v3 }
 0x8c7   :  { %14767 = vmatprep.subr.bf16.mxu1 %v17041_v46 }
 0x8c9   :  { %14746 = vmatpush3.bf16.msra.mxu0 %v17042_v22 }
 0x8ca   :  { %14768 = vmatpush3.bf16.msra.mxu1 %v17043_v12  ;;  %14747 = vmatprep.subr.bf16.mxu0 %v17044_v19 }
 0x8cb   :  { %14769 = vmatprep.subr.bf16.mxu1 %v17045_v32 }
 0x8cd   :  { %14748 = vmatpush3.bf16.msra.mxu0 %v17046_v1 }
 0x8ce   :  { %14770 = vmatpush3.bf16.msra.mxu1 %v17047_v2  ;;  %14749 = vmatprep.subr.bf16.mxu0 %v17048_v41 }
 0x8cf   :  { %14771 = vmatprep.subr.bf16.mxu1 %v17049_v51 }
 0x8d1   :  { %14750 = vmatpush3.bf16.msra.mxu0 %v17050_v30  ;;  %v17060_v30 = vld [vmem:[%s23305_s8 + $0x10] sm:$0xff]  }
 0x8d2   :  { %14772 = vmatpush3.bf16.msra.mxu1 %v17051_v63  ;;  %14856 = vmatprep.subr.bf16.mxu0 %v23322_v29  ;;  %v17061_v63 = vld [vmem:[%s23305_s8 + $0x8] sm:$0xff]  }
 0x8d3   :  { %14874 = vmatprep.subr.bf16.mxu1 %v23322_v29 }
 0x8e0   :  { %v12252_v35 = vpop.f32.mrf.mxu1 }
 0x8e1   :  { %v23106_v49 = vadd.f32 %v12252_v35, %v12212_v61 }
 0x8e2   :  { %v12254_v40 = vpop.f32.mrf.mxu1 }
 0x8e3   :  { %v12255_v42 = vadd.f32 %v12254_v40, %v12214_v24  ;;  %v12883_v24 = vsel %vm3023_vm2, %v17052_v47, 0  ;;  %v17053_v40 = vld [vmem:[%s23302_s6 + $0x28] sm:$0xff]   ;;  %v17070_v47 = vld [vmem:[%s23308_s11] sm:$0xff]  }
 0x8e4   :  { %v12256_v44 = vpop.f32.mrf.mxu1 }
 0x8e5   :  { %v12427_v18 = vcombine.low %v23106_v49, %v12255_v42  ;;  %v17057_v42 = vld [vmem:[%s23302_s6 + $0x8] sm:$0xff]   ;;  %v12955_v44 = vand.u32 %v17063_v6, %v20009_v60  ;;  %v17059_v60 = vld [vmem:[%s23305_s8 + $0x18] ss:$0 sps:$4 sm:$0x77]  }
 0x8e6   :  { %v12257_v28 = vpop.f32.mrf.mxu1  ;;  %v13022_v51 = vsel %vm6431_vm7, %v17059_v60, 0 }
 0x8e7   :  { %v12435_v5 = vrot.slane %v12427_v18, %v19117_v14 }
 0x920   :  { %v12293_v10 = vpop.f32.mrf.mxu1 }
 0x921   :  { %v12335_v8 = vadd.f32 %v22877_v4, %v12293_v10  ;;  %v12927_v10 = vld [vmem:[%s23307_s1 + $0x1] sm:$0x1] }
 0x922   :  { %v12295_v57 = vpop.f32.mrf.mxu1 }
 0x923   :  { %v12337_v13 = vadd.f32 %v22882_v58, %v12295_v57  ;;  %v17062_v57 = vld [vmem:[%s23305_s8] sm:$0xff]  }
 0x924   :  { %v12297_v37 = vpop.f32.mrf.mxu1 }
 0x925   :  { %v12928_v37 = vpack.c.bf16 %v12927_v10, %v12927_v10 }
 0x926   :  { %v12298_v16 = vpop.f32.mrf.mxu1 }
 0x927   :  { %v17064_v16 = vld [vmem:[%s23303_s9] sm:$0xff]  }
 0x960   :  { %v12375_v9 = vpop.f32.mrf.mxu1 }
 0x961   :  { %v12376_v25 = vadd.f32 %v12375_v9, %v12335_v8  ;;  %v12837_v8 = vld [vmem:[%s23306_s7] sm:$0x1] }
 0x962   :  { %v12377_v53 = vpop.f32.mrf.mxu1 }
 0x963   :  { %v12378_v0 = vadd.f32 %v12377_v53, %v12337_v13  ;;  %v12417_v48 = vadd.f32 %v22945_v17, %v12376_v25  ;;  %v23323_v17 = vsub.s32 1, %v17265_v43  ;;  %v17065_v13 = vld [vmem:[%s23308_s11 + $0x28] ss:$0 sps:$4 sm:$0x11]  }
 0x964   :  { %v12379_v20 = vpop.f32.mrf.mxu1 }
 0x965   :  { %v12419_v52 = vadd.f32 %v22950_v15, %v12378_v0  ;;  %v23324_v15 = vsub.s32 3, %v17265_v43  ;;  %v17054_v43 = vld [vmem:[%s23302_s6 + $0x20] sm:$0xff]  }
 0x966   :  { %v12380_v38 = vpop.f32.mrf.mxu1 }
 0x967   :  { %v12428_v23 = vcombine.low %v12417_v48, %v12419_v52  ;;  %v13117_v48 = vand.u32 %v17065_v13, %v20407_v7 }
 0x969   :  { %v12442_v54 = vrot.slane %v12428_v23, %v19117_v14  ;;  %v17066_v23 = vld [vmem:[%s23308_s11 + $0x20] sm:$0xff]  }
 0x96b   :  { %v12443_v59 = vcombine.low %v12435_v5, %v12442_v54  ;;  %v17067_v5 = vld [vmem:[%s23308_s11 + $0x18] sm:$0xff]   ;;  %v17068_v54 = vld [vmem:[%s23308_s11 + $0x10] sm:$0xff]  }
 0x96d   :  { %v12450_v4 = vrot.slane %v12443_v59, %v19117_v14 }
 0x96f   :  { %v12452_v55 = vadd.f32 %v12450_v4, %v23042_v11 }
 0x971   :  { %v12453_v58 = vmax.f32 %v12452_v55, 0.0 }
 0x973   :  { %v12462_v31 = vrot.slane %v12453_v58, %v23323_v17  ;;  %v12470_v27 = vrot.slane %v12453_v58, %v23324_v15  ;;  %v12458_v61 = vrot.slane %v12453_v58, %v23325_v33  ;;  %v12466_v34 = vrot.slane %v12453_v58, %v23326_v21  ;;  %v17069_v58 = vld [vmem:[%s23308_s11 + $0x8] sm:$0xff]  }
 0x975   :  { %v12476_v14 = vpack.c.bf16 %v12462_v31, %v12462_v31  ;;  %v12478_v35 = vpack.c.bf16 %v12470_v27, %v12470_v27  ;;  %v12475_v11 = vpack.c.bf16 %v12458_v61, %v12458_v61  ;;  %v12477_v49 = vpack.c.bf16 %v12466_v34, %v12466_v34  ;;  %v13064_v31 = vld [vmem:[%s23309_s10] sm:$0x1] }
 0x977   :  { %12773 = vmatprep.mubr.bf16.mxu0 %v12476_v14  ;;  %14644 = vmatprep.mubr.msk.bf16.mxu1 %vm6137_vm4, %v12478_v35 }
 0x978   :  { %12774 = vmatmul.mubr.bf16.vlgmr.msra.gmra.mxu0 %v12475_v11  ;;  %12814 = vmatmul.mubr.bf16.vlgmr.msra.gmra.mxu1 %v12477_v49 }
 0x979   :  { %14857 = vmatpush3.bf16.msra.mxu0 %v12883_v24  ;;  %14870 = vmatprep.mubr.msk.bf16.mxu0 %vm17075_vm5, %v23322_v29 }
 0x97a   :  { %14858 = vmatprep.subr.bf16.mxu0 %v23322_v29  ;;  %14878 = vmatprep.mubr.msk.bf16.mxu1 %vm17075_vm5, %v23322_v29 }
 0x97b   :  { %14875 = vmatpush3.bf16.msra.mxu1 %v12955_v44 }
 0x97c   :  { %14876 = vmatprep.subr.bf16.mxu1 %v23322_v29 }
 0x97d   :  { %14859 = vmatpush3.bf16.msra.mxu0 %v17053_v40 }
 0x97e   :  { %14860 = vmatprep.subr.bf16.mxu0 %v23322_v29 }
 0x97f   :  { %14877 = vmatpush3.bf16.msra.mxu1 %v17064_v16 }
 0x980   :  { %14894 = vmatprep.subr.bf16.mxu1 %v23322_v29 }
 0x981   :  { %14861 = vmatpush3.bf16.msra.mxu0 %v17054_v43 }
 0x982   :  { %14862 = vmatprep.subr.bf16.mxu0 %v23322_v29 }
 0x985   :  { %14863 = vmatpush3.bf16.msra.mxu0 %v17055_v50 }
 0x986   :  { %14864 = vmatprep.subr.bf16.mxu0 %v23322_v29 }
 0x989   :  { %14865 = vmatpush3.bf16.msra.mxu0 %v17056_v62 }
 0x98a   :  { %14866 = vmatprep.subr.bf16.mxu0 %v23322_v29 }
 0x98d   :  { %14867 = vmatpush3.bf16.msra.mxu0 %v17057_v42 }
 0x98e   :  { %14868 = vmatprep.subr.bf16.mxu0 %v23322_v29 }
 0x991   :  { %14869 = vmatpush3.bf16.msra.mxu0 %v17058_v45 }
 0x992   :  { %14882 = vmatprep.subr.bf16.mxu0 %v23322_v29 }
 0xa38   :  { %v14751_v18 = vpop.f32.mrf.mxu0  ;;  %v14773_v28 = vpop.f32.mrf.mxu1 }
 0xa3a   :  { %v14752_v26 = vpop.f32.mrf.mxu0  ;;  %v14774_v56 = vpop.f32.mrf.mxu1 }
 0xa3b   :  { %v14753_v39 = vadd.f32 %v14752_v26, %v14751_v18  ;;  %v14775_v12 = vadd.f32 %v14774_v56, %v14773_v28 }
 0xa3c   :  { %v14754_v3 = vpop.f32.mrf.mxu0  ;;  %v14776_v46 = vpop.f32.mrf.mxu1 }
 0xa3d   :  { %v12776_v22 = vadd.f32 %v14753_v39, %v12543_v36 }
 0xa3e   :  { %v14755_v19 = vpop.f32.mrf.mxu0  ;;  %v14777_v32 = vpop.f32.mrf.mxu1 }
 0xa3f   :  { %v12816_v1 = vadd.f32 %v14775_v12, %v12776_v22 }
 0xa41   :  { %v12821_v2 = vmax.f32 %v12816_v1, 0.0 }
 0xa43   :  { %v12822_v41 = vpack.c.bf16 %v12821_v2, %v12821_v2 }
 0xa45   :  { %14871 = vmatmul.mubr.msk.bf16.vlgmr.msra.gmra.mxu0 %vm6286_vm6, %v12822_v41 }
 0xa46   :  { %14883 = vmatpush3.bf16.msra.mxu0 %v13022_v51  ;;  %14890 = vmatprep.mubr.msk.bf16.mxu0 %vm17075_vm5, %v23322_v29 }
 0xa47   :  { %14884 = vmatprep.subr.bf16.mxu0 %v23322_v29 }
 0xa4a   :  { %14885 = vmatpush3.bf16.msra.mxu0 %v17060_v30 }
 0xa4b   :  { %14886 = vmatprep.subr.bf16.mxu0 %v23322_v29 }
 0xa4e   :  { %14887 = vmatpush3.bf16.msra.mxu0 %v17061_v63 }
 0xa4f   :  { %14888 = vmatprep.subr.bf16.mxu0 %v23322_v29 }
 0xa52   :  { %14889 = vmatpush3.bf16.msra.mxu0 %v17062_v57 }
 0xa55   :  { %14891 = vmatmul.mubr.msk.bf16.vlgmr.msra.gmra.mxu0 %vm6427_vm10, %v12928_v37 }
 0xb05   :  { %v12919_v9 = vpop.f32.mrf.mxu0 }
 0xb06   :  { %v12920_v25 = vadd.f32 %v12919_v9, %v12837_v8 }
 0xb07   :  { %v14872_v53 = vpop.f32.mrf.mxu0 }
 0xb08   :  { %v12925_v0 = vmax.f32 %v12920_v25, 0.0 }
 0xb09   :  { %v12922_v20 = vpop.f32.mrf.mxu0 }
 0xb0a   :  { %v12926_v52 = vpack.c.bf16 %v12925_v0, %v12925_v0 }
 0xb0b   :  { %v14873_v38 = vpop.f32.mrf.mxu0 }
 0xb0c   :  { %14879 = vmatmul.mubr.msk.bf16.vlgmr.msra.gmra.mxu1 %vm6359_vm8, %v12926_v52 }
 0xb0d   :  { %14895 = vmatpush3.bf16.msra.mxu1 %v13117_v48  ;;  %14906 = vmatprep.mubr.msk.bf16.mxu1 %vm17075_vm5, %v23322_v29 }
 0xb0e   :  { %14896 = vmatprep.subr.bf16.mxu1 %v23322_v29 }
 0xb11   :  { %14897 = vmatpush3.bf16.msra.mxu1 %v17066_v23 }
 0xb12   :  { %14898 = vmatprep.subr.bf16.mxu1 %v23322_v29 }
 0xb15   :  { %v13058_v7 = vpop.f32.mrf.mxu0  ;;  %14899 = vmatpush3.bf16.msra.mxu1 %v17067_v5 }
 0xb16   :  { %14900 = vmatprep.subr.bf16.mxu1 %v23322_v29 }
 0xb17   :  { %v14892_v59 = vpop.f32.mrf.mxu0 }
 0xb19   :  { %v13061_v4 = vpop.f32.mrf.mxu0  ;;  %14901 = vmatpush3.bf16.msra.mxu1 %v17068_v54 }
 0xb1a   :  { %14902 = vmatprep.subr.bf16.mxu1 %v23322_v29 }
 0xb1b   :  { %v14893_v55 = vpop.f32.mrf.mxu0 }
 0xb1d   :  { %14903 = vmatpush3.bf16.msra.mxu1 %v17069_v58 }
 0xb1e   :  { %14904 = vmatprep.subr.bf16.mxu1 %v23322_v29  ;;  %v13079_v29 = vld [vmem:[%s23310_s12] sm:$0x1] }
 0xb21   :  { %14905 = vmatpush3.bf16.msra.mxu1 %v17070_v47 }
 0xbcc   :  { %v12991_v17 = vpop.f32.mrf.mxu1 }
 0xbcd   :  { %v13059_v15 = vadd.f32 %v13058_v7, %v12991_v17 }
 0xbce   :  { %v14880_v27 = vpop.f32.mrf.mxu1 }
 0xbcf   :  { %v13065_v33 = vadd.f32 %v13064_v31, %v13059_v15 }
 0xbd0   :  { %v12994_v61 = vpop.f32.mrf.mxu1 }
 0xbd1   :  { %v13066_v21 = vmax.f32 %v13065_v33, 0.0 }
 0xbd2   :  { %v14881_v34 = vpop.f32.mrf.mxu1 }
 0xbd3   :  { %v13067_v14 = vpack.c.bf16 %v13066_v21, %v13066_v21 }
 0xbd5   :  { %14907 = vmatmul.mubr.msk.bf16.vlgmr.msra.gmra.mxu1 %vm6524_vm12, %v13067_v14 }
 0xc95   :  { %v13153_v35 = vpop.f32.mrf.mxu1 }
 0xc96   :  { %v13154_v11 = vadd.f32 %v13153_v35, %v13079_v29 }
 0xc97   :  { %v14908_v49 = vpop.f32.mrf.mxu1 }
 0xc98   :  { %13159 = vst.msk [vmem:[%s23311_s13 + $0x1] sm:$0x1] %vm6574_vm13, %v13154_v11 }
 0xc99   :  { %v13156_v24 = vpop.f32.mrf.mxu1 }
 0xc9b   :  { %v14909_v40 = vpop.f32.mrf.mxu1 }

</bundles_post_ra>
